<compile_context>
chip_gen: v7x
topology: tpu7x:2x2x1
jax: 0.10.0
libtpu: 0.0.40
codegen_flags: <defaults>
</compile_context>

<pallas_src>
import jax
import jax.numpy as jnp
import numpy as np
from jax import lax
from jax.experimental import pallas as pl
from jax.experimental.pallas import tpu as pltpu


# -----------------------------------------------------------------------------
# Static geometry (28x28 single-channel input is forced by fc1 = 64*14*14)
# -----------------------------------------------------------------------------
H = W = 28
WP = 32                    # padded row pitch (1 zero col left, 3 right) -> pow2
HPAD = 2 * WP              # 64 zero rows above and below the image rows
NP = H * WP                # 896 conv-output rows per image (padded-flat layout)
TOT = NP + 2 * HPAD        # 1024 rows of the padded conv2-input scratch
C1, C2 = 32, 64            # conv channel counts
PO = 14 * 14               # pooled spatial size
LM = 2 * WP * 13 + 2 * 13 + 2   # 860 rows of the 4-way pool max that are needed
CHUNK = 128                # conv2 row-chunk for vreg-resident accumulation
NCHUNK = NP // CHUNK       # 7


def _build_pool_select():
    """0/1 selection matrices turning the 4-way shifted max into the 2x2 pool.

    m[r] = max(y2[r], y2[r+1], y2[r+WP], y2[r+WP+1]); pooled pixel j=(ho,wo) is at
    r = 2*WP*ho + 2*wo + 1.  S_even / S_odd pick pooled pixels 2*j2 / 2*j2+1 so the
    kernel packs two pooled pixels (2*64 channels) per 128-lane output row.
    """
    S = np.zeros((PO, LM), np.float32)
    for j in range(PO):
        ho, wo = divmod(j, 14)
        S[j, 2 * WP * ho + 2 * wo + 1] = 1.0
    return (jnp.asarray(S[0::2], dtype=jnp.bfloat16),
            jnp.asarray(S[1::2], dtype=jnp.bfloat16))


_S_EVEN, _S_ODD = _build_pool_select()      # each [98, 860]


# -----------------------------------------------------------------------------
# Kernel 1: fused conv1 + ReLU -> conv2 + ReLU -> 2x2 maxpool (per image)
# -----------------------------------------------------------------------------
def _conv_pool_kernel(p_ref, w1_ref, b1_ref, w2_ref, b2_ref, se_ref, so_ref,
                      o_ref, y1pad_ref, y2_ref):
    # ---- conv1 (+bias+ReLU) on the MXU ---------------------------------------
    y1 = jnp.dot(p_ref[0], w1_ref[...], preferred_element_type=jnp.float32)
    y1 = jnp.maximum(y1 + b1_ref[...], 0.0)                        # [NP, 32] f32
    # zero the W-pad columns (w_pad in {0, 29, 30, 31}) so they serve as conv2's
    # zero padding
    wcol = lax.broadcasted_iota(jnp.int32, (NP, C1), 0) % WP
    y1 = jnp.where((wcol >= 1) & (wcol <= W), y1, 0.0)

    # write into the zero-padded conv2 input scratch (aligned stores only).
    # Pad-row zeroing is kept unconditional: on v7x the batch axis may be
    # core-parallel and each TensorCore owns its own scratch, so a pid==0 gate
    # would leave one core's pad rows uninitialized.
    zpad = jnp.zeros((HPAD, C1), jnp.float32)
    y1pad_ref[0:HPAD, :] = zpad
    y1pad_ref[HPAD:HPAD + NP, :] = y1
    y1pad_ref[HPAD + NP:TOT, :] = zpad

    # ---- conv2: in-VMEM im2col = 9 shifted contiguous-slice matmuls ----------
    # bf16 operands, f32 accumulation; chunked over rows so the 9-tap accumulate
    # lives in vregs and y2_ref is written exactly once per chunk.
    w2s = [w2_ref[t] for t in range(9)]                             # 9 x [32,64] bf16
    bias2 = b2_ref[...]                                             # [1, 64] f32
    for c in range(NCHUNK):
        r0 = c * CHUNK
        acc = None
        for t in range(9):
            kh, kw = divmod(t, 3)
            d = (kh - 1) * WP + (kw - 1)
            lo = HPAD + d + r0
            tap = y1pad_ref[lo:lo + CHUNK, :].astype(jnp.bfloat16)  # [CHUNK, 32]
            contrib = jnp.dot(tap, w2s[t], preferred_element_type=jnp.float32)
            acc = contrib if acc is None else acc + contrib
        # bias + ReLU, single store per chunk
        y2_ref[r0:r0 + CHUNK, :] = jnp.maximum(acc + bias2, 0.0)    # [CHUNK, 64]

    # ---- fused 2x2 maxpool ----------------------------------------------------
    m = jnp.maximum(
        jnp.maximum(y2_ref[0:LM, :], y2_ref[1:1 + LM, :]),
        jnp.maximum(y2_ref[WP:WP + LM, :], y2_ref[WP + 1:WP + 1 + LM, :]),
    ).astype(jnp.bfloat16)                                         # [LM, 64]
    # row selection via 0/1 matmuls; pack 2 pooled pixels per 128-lane output row
    pe = jnp.dot(se_ref[...], m, preferred_element_type=jnp.float32)   # [98, 64]
    po = jnp.dot(so_ref[...], m, preferred_element_type=jnp.float32)   # [98, 64]
    o_ref[0] = jnp.concatenate([pe, po], axis=-1).astype(o_ref.dtype)  # [98, 128]


def conv_pool(patches, w1, b1, w2, b2):
    """patches: [B, NP, 9] bf16 -> pooled activations [B, 98, 128] bf16
    (already flattened in (h, w, c) order when reshaped to [B, 12544])."""
    B = patches.shape[0]
    return pl.pallas_call(
        _conv_pool_kernel,
        out_shape=jax.ShapeDtypeStruct((B, PO // 2, 2 * C2), jnp.bfloat16),
        grid_spec=pltpu.PrefetchScalarGridSpec(
            num_scalar_prefetch=0,
            grid=(B,),
            in_specs=[
                pl.BlockSpec((1, NP, 9), lambda b: (b, 0, 0)),
                pl.BlockSpec((9, C1), lambda b: (0, 0)),
                pl.BlockSpec((1, C1), lambda b: (0, 0)),
                pl.BlockSpec((9, C1, C2), lambda b: (0, 0, 0)),
                pl.BlockSpec((1, C2), lambda b: (0, 0)),
                pl.BlockSpec((PO // 2, LM), lambda b: (0, 0)),
                pl.BlockSpec((PO // 2, LM), lambda b: (0, 0)),
            ],
            out_specs=pl.BlockSpec((1, PO // 2, 2 * C2), lambda b: (b, 0, 0)),
            scratch_shapes=[
                pltpu.VMEM((TOT, C1), jnp.float32),   # zero-padded conv2 input
                pltpu.VMEM((NP, C2), jnp.float32),    # conv2 output (post-ReLU)
            ],
        ),
        compiler_params=pltpu.CompilerParams(
            dimension_semantics=("parallel",)),
    )(patches, w1, b1, w2, b2, _S_EVEN, _S_ODD)


# -----------------------------------------------------------------------------
# Kernel 2: fused fc1 + ReLU + fc2 head (K-tiled, bf16 in, f32 accumulate)
# -----------------------------------------------------------------------------
def _mlp_kernel(x_ref, w1_ref, b1_ref, w2_ref, b2_ref, o_ref, acc_ref):
    k = pl.program_id(0)

    @pl.when(k == 0)
    def _():
        acc_ref[...] = jnp.zeros_like(acc_ref)

    acc_ref[...] += jnp.dot(x_ref[...], w1_ref[...],
                            preferred_element_type=jnp.float32)

    @pl.when(k == pl.num_programs(0) - 1)
    def _():
        h = jnp.maximum(acc_ref[...] + b1_ref[...], 0.0).astype(jnp.bfloat16)
        o_ref[...] = (jnp.dot(h, w2_ref[...],
                              preferred_element_type=jnp.float32)
                      + b2_ref[...]).astype(o_ref.dtype)


def mlp_head(x, w1, b1, w2, b2, *, tk):
    M, K = x.shape
    Hd = w1.shape[1]
    N = w2.shape[1]
    assert K % tk == 0 and tk % 128 == 0
    return pl.pallas_call(
        _mlp_kernel,
        out_shape=jax.ShapeDtypeStruct((M, N), jnp.float32),
        grid_spec=pltpu.PrefetchScalarGridSpec(
            num_scalar_prefetch=0,
            grid=(K // tk,),
            in_specs=[
                pl.BlockSpec((M, tk), lambda k: (0, k)),
                pl.BlockSpec((tk, Hd), lambda k: (k, 0)),
                pl.BlockSpec((1, Hd), lambda k: (0, 0)),
                pl.BlockSpec((Hd, N), lambda k: (0, 0)),
                pl.BlockSpec((1, N), lambda k: (0, 0)),
            ],
            out_specs=pl.BlockSpec((M, N), lambda k: (0, 0)),
            scratch_shapes=[pltpu.VMEM((M, Hd), jnp.float32)],
        ),
        compiler_params=pltpu.CompilerParams(
            dimension_semantics=("arbitrary",)),
    )(x, w1, b1, w2, b2)


# -----------------------------------------------------------------------------
# Forward pass (wrapper only does tiny layout plumbing; no activation transposes)
# -----------------------------------------------------------------------------
def cnn_forward(x, params):
    """x: [B, 1, 28, 28] (NCHW, as in the PyTorch module) -> logits [B, 10]."""
    B = x.shape[0]

    # conv1 patches on the padded-flat layout (tiny: 9 columns, bf16)
    # TODO(synk): patch DMA is lane-padded ([.,896,9]); a [.,9,896] layout +
    # in-kernel transpose would be lane-dense but is a sub-microsecond win.
    xp = jnp.pad(x.reshape(B, H, W).astype(jnp.float32),
                 ((0, 0), (2, 2), (1, WP - W - 1)))          # [B, 32, 32]
    xf = xp.reshape(B, TOT)                                  # [B, 1024]
    taps = []
    for kh in range(3):
        for kw in range(3):
            d = (kh - 1) * WP + (kw - 1)
            taps.append(xf[:, HPAD + d:HPAD + d + NP])
    patches = jnp.stack(taps, axis=-1).astype(jnp.bfloat16)  # [B, 896, 9]

    # conv weights in kernel-friendly layouts (conv2 weight stays bf16 for MXU)
    w1 = params["conv1_w"].reshape(C1, 9).T.astype(jnp.bfloat16)        # [9, 32]
    b1 = params["conv1_b"].reshape(1, C1).astype(jnp.float32)
    w2 = jnp.transpose(params["conv2_w"], (2, 3, 1, 0)).reshape(9, C1, C2)
    w2 = w2.astype(jnp.bfloat16)                                        # [9,32,64]
    b2 = params["conv2_b"].reshape(1, C2).astype(jnp.float32)

    # fused conv1+conv2+pool; output already in (h, w, c) flatten order
    pooled = conv_pool(patches, w1, b1, w2, b2)              # [B, 98, 128] bf16
    flat = pooled.reshape(B, PO * C2)                        # [B, 12544]

    # fc1 weight permuted once to the (h, w, c) order (PyTorch flatten is (c,h,w))
    wf1 = (params["fc1_w"].reshape(128, C2, 14, 14)
           .transpose(0, 2, 3, 1).reshape(128, PO * C2).T
           .astype(jnp.bfloat16))                            # [12544, 128]
    bf1 = params["fc1_b"].reshape(1, 128).astype(jnp.float32)
    wf2 = params["fc2_w"].T.astype(jnp.bfloat16)             # [128, 10]
    bf2 = params["fc2_b"].reshape(1, 10).astype(jnp.float32)

    # fused fc1+ReLU+fc2 head (batch padded to 8 rows for tiling).
    # tk must be 128 * (divisor of 98); 6272 -> 2 K-steps (weight-DMA bound).
    Mpad = 8
    xfc = jnp.zeros((Mpad, flat.shape[1]), jnp.bfloat16).at[:B].set(flat)
    out = mlp_head(xfc, wf1, bf1, wf2, bf2, tk=6272)
    return out[:B]                                           # [B, 10] f32


# -----------------------------------------------------------------------------
# Pure-XLA reference (PyTorch semantics, f32) for a loose correctness check
# -----------------------------------------------------------------------------
def cnn_reference(x, params):
    B = x.shape[0]
    y = lax.conv_general_dilated(x.astype(jnp.float32), params["conv1_w"],
                                 (1, 1), "SAME",
                                 dimension_numbers=("NCHW", "OIHW", "NCHW"))
    y = jax.nn.relu(y + params["conv1_b"].reshape(1, C1, 1, 1))
    y = lax.conv_general_dilated(y, params["conv2_w"], (1, 1), "SAME",
                                 dimension_numbers=("NCHW", "OIHW", "NCHW"))
    y = jax.nn.relu(y + params["conv2_b"].reshape(1, C2, 1, 1))
    y = lax.reduce_window(y, -jnp.inf, lax.max, (1, 1, 2, 2), (1, 1, 2, 2),
                          "VALID")
    flat = y.reshape(B, -1)                                  # (c, h, w) order
    h = jax.nn.relu(flat @ params["fc1_w"].T + params["fc1_b"])
    return h @ params["fc2_w"].T + params["fc2_b"]


def init_params(key):
    ks = jax.random.split(key, 8)

    def nrm(k, shape, scale):
        return scale * jax.random.normal(k, shape, jnp.float32)

    return {
        "conv1_w": nrm(ks[0], (32, 1, 3, 3), 0.10),          # OIHW like PyTorch
        "conv1_b": nrm(ks[1], (32,), 0.10),
        "conv2_w": nrm(ks[2], (64, 32, 3, 3), 0.05),
        "conv2_b": nrm(ks[3], (64,), 0.05),
        "fc1_w": nrm(ks[4], (128, 64 * 14 * 14), 0.01),      # [out, in]
        "fc1_b": nrm(ks[5], (128,), 0.01),
        "fc2_w": nrm(ks[6], (10, 128), 0.05),
        "fc2_b": nrm(ks[7], (10,), 0.05),
    }


if __name__ == "__main__":
    key = jax.random.PRNGKey(0)
    kx, kp = jax.random.split(key)
    # batch=2, single-channel 28x28 images (required by fc1 = 64*14*14)
    x = jax.random.normal(kx, (2, 1, 28, 28), jnp.float32)
    params = init_params(kp)

    fwd = jax.jit(cnn_forward)
    out = jax.block_until_ready(fwd(x, params))

    assert out.shape == (2, 10), out.shape
    assert bool(jnp.all(jnp.isfinite(out)))

    # loose check vs. the f32 XLA reference (kernel path uses bf16 operands)
    ref = jax.block_until_ready(jax.jit(cnn_reference)(x, params))
    assert bool(jnp.allclose(out, ref, rtol=1e-1, atol=3e-2)), (out, ref)

    print("KERNEL_OK")
</pallas_src>

<mosaic_0001>
module attributes {stable_mosaic.version = 11 : i64} {
  func.func @_conv_pool_kernel(%arg0: i32, %arg1: memref<1x896x9xbf16, #tpu.memory_space<vmem>>, %arg2: memref<9x32xbf16, #tpu.memory_space<vmem>>, %arg3: memref<1x32xf32, #tpu.memory_space<vmem>>, %arg4: memref<9x32x64xbf16, #tpu.memory_space<vmem>>, %arg5: memref<1x64xf32, #tpu.memory_space<vmem>>, %arg6: memref<98x860xbf16, #tpu.memory_space<vmem>>, %arg7: memref<98x860xbf16, #tpu.memory_space<vmem>>, %arg8: memref<1x98x128xbf16, #tpu.memory_space<vmem>>, %arg9: memref<1024x32xf32, #tpu.memory_space<vmem>>, %arg10: memref<896x64xf32, #tpu.memory_space<vmem>>) attributes {dimension_semantics = [#tpu.dimension_semantics<parallel>], iteration_bounds = array<i64: 2>, scalar_prefetch = 0 : i64, scratch_operands = 2 : i64, tpu.core_type = #tpu.core_type<tc>, window_params = [{transform_indices = @transform_0, window_bounds = array<i64: 1, 896, 9>}, {pipeline_mode = #tpu.pipeline_mode<synchronous>, transform_indices = @transform_1, window_bounds = array<i64: 9, 32>}, {pipeline_mode = #tpu.pipeline_mode<synchronous>, transform_indices = @transform_2, window_bounds = array<i64: 1, 32>}, {pipeline_mode = #tpu.pipeline_mode<synchronous>, transform_indices = @transform_3, window_bounds = array<i64: 9, 32, 64>}, {pipeline_mode = #tpu.pipeline_mode<synchronous>, transform_indices = @transform_4, window_bounds = array<i64: 1, 64>}, {pipeline_mode = #tpu.pipeline_mode<synchronous>, transform_indices = @transform_5, window_bounds = array<i64: 98, 860>}, {pipeline_mode = #tpu.pipeline_mode<synchronous>, transform_indices = @transform_6, window_bounds = array<i64: 98, 860>}, {transform_indices = @transform_7, window_bounds = array<i64: 1, 98, 128>}]} {
    %c0 = arith.constant 0 : index
    %c0_0 = arith.constant 0 : index
    %c0_1 = arith.constant 0 : index
    %0 = vector.load %arg1[%c0, %c0_0, %c0_1] : memref<1x896x9xbf16, #tpu.memory_space<vmem>>, vector<1x896x9xbf16>
    %1 = vector.shape_cast %0 : vector<1x896x9xbf16> to vector<896x9xbf16>
    %c0_2 = arith.constant 0 : index
    %c0_3 = arith.constant 0 : index
    %2 = vector.load %arg2[%c0_2, %c0_3] : memref<9x32xbf16, #tpu.memory_space<vmem>>, vector<9x32xbf16>
    %cst = arith.constant dense<0.000000e+00> : vector<896x32xf32>
    %3 = tpu.matmul %1, %2, %cst {dimension_numbers = #tpu.dot_dimension_numbers<[1], [0], [0], [1], [0, 0, 1, 1], [], []>} : vector<896x9xbf16>, vector<9x32xbf16>, vector<896x32xf32> -> vector<896x32xf32>
    %c0_4 = arith.constant 0 : index
    %c0_5 = arith.constant 0 : index
    %4 = vector.load %arg3[%c0_4, %c0_5] : memref<1x32xf32, #tpu.memory_space<vmem>>, vector<1x32xf32>
    %5 = vector.broadcast %4 : vector<1x32xf32> to vector<896x32xf32>
    %6 = arith.addf %3, %5 : vector<896x32xf32>
    %cst_6 = arith.constant 0.000000e+00 : f32
    %7 = vector.broadcast %cst_6 : f32 to vector<896x32xf32>
    %8 = arith.maximumf %6, %7 : vector<896x32xf32>
    %9 = tpu.iota {dimensions = array<i32: 0>} : vector<896x32xi32>
    %c32_i32 = arith.constant 32 : i32
    %c0_i32 = arith.constant 0 : i32
    %10 = arith.cmpi eq, %c32_i32, %c0_i32 : i32
    %c1_i32 = arith.constant 1 : i32
    %11 = arith.select %10, %c1_i32, %c32_i32 : i32
    %12 = vector.broadcast %11 : i32 to vector<896x32xi32>
    %13 = arith.remsi %9, %12 : vector<896x32xi32>
    %c0_i32_7 = arith.constant 0 : i32
    %14 = vector.broadcast %c0_i32_7 : i32 to vector<896x32xi32>
    %15 = arith.cmpi ne, %13, %14 : vector<896x32xi32>
    %c0_i32_8 = arith.constant 0 : i32
    %16 = vector.broadcast %c0_i32_8 : i32 to vector<896x32xi32>
    %17 = arith.cmpi slt, %13, %16 : vector<896x32xi32>
    %c0_i32_9 = arith.constant 0 : i32
    %18 = arith.cmpi slt, %11, %c0_i32_9 : i32
    %19 = vector.broadcast %18 : i1 to vector<896x32xi1>
    %20 = vector.broadcast %19 : vector<896x32xi1> to vector<896x32xi1>
    %21 = arith.xori %17, %20 : vector<896x32xi1>
    %22 = arith.andi %21, %15 : vector<896x32xi1>
    %23 = vector.broadcast %11 : i32 to vector<896x32xi32>
    %24 = arith.addi %13, %23 : vector<896x32xi32>
    %25 = arith.select %22, %24, %13 : vector<896x32xi1>, vector<896x32xi32>
    %c1_i32_10 = arith.constant 1 : i32
    %26 = vector.broadcast %c1_i32_10 : i32 to vector<896x32xi32>
    %27 = arith.cmpi sge, %25, %26 : vector<896x32xi32>
    %c28_i32 = arith.constant 28 : i32
    %28 = vector.broadcast %c28_i32 : i32 to vector<896x32xi32>
    %29 = arith.cmpi sle, %25, %28 : vector<896x32xi32>
    %30 = arith.andi %27, %29 : vector<896x32xi1>
    %cst_11 = arith.constant 0.000000e+00 : f32
    %31 = vector.broadcast %cst_11 : f32 to vector<896x32xf32>
    %32 = arith.select %30, %8, %31 : vector<896x32xi1>, vector<896x32xf32>
    %cst_12 = arith.constant 0.000000e+00 : f32
    %33 = vector.broadcast %cst_12 : f32 to vector<64x32xf32>
    %c0_13 = arith.constant 0 : index
    %c0_14 = arith.constant 0 : index
    %34 = vector.load %arg9[%c0_13, %c0_14] : memref<1024x32xf32, #tpu.memory_space<vmem>>, vector<64x32xf32>
    tpu.vector_store %arg9[%c0_13, %c0_14], %33 {strides = array<i32>} : memref<1024x32xf32, #tpu.memory_space<vmem>>, vector<64x32xf32>,
    %c64 = arith.constant 64 : index
    %c0_15 = arith.constant 0 : index
    %35 = vector.load %arg9[%c64, %c0_15] : memref<1024x32xf32, #tpu.memory_space<vmem>>, vector<896x32xf32>
    tpu.vector_store %arg9[%c64, %c0_15], %32 {strides = array<i32>} : memref<1024x32xf32, #tpu.memory_space<vmem>>, vector<896x32xf32>,
    %c960 = arith.constant 960 : index
    %c0_16 = arith.constant 0 : index
    %36 = vector.load %arg9[%c960, %c0_16] : memref<1024x32xf32, #tpu.memory_space<vmem>>, vector<64x32xf32>
    tpu.vector_store %arg9[%c960, %c0_16], %33 {strides = array<i32>} : memref<1024x32xf32, #tpu.memory_space<vmem>>, vector<64x32xf32>,
    %c0_17 = arith.constant 0 : index
    %c0_18 = arith.constant 0 : index
    %c0_19 = arith.constant 0 : index
    %37 = vector.load %arg4[%c0_17, %c0_18, %c0_19] : memref<9x32x64xbf16, #tpu.memory_space<vmem>>, vector<1x32x64xbf16>
    %38 = vector.shape_cast %37 : vector<1x32x64xbf16> to vector<32x64xbf16>
    %c1 = arith.constant 1 : index
    %c0_20 = arith.constant 0 : index
    %c0_21 = arith.constant 0 : index
    %39 = vector.load %arg4[%c1, %c0_20, %c0_21] : memref<9x32x64xbf16, #tpu.memory_space<vmem>>, vector<1x32x64xbf16>
    %40 = vector.shape_cast %39 : vector<1x32x64xbf16> to vector<32x64xbf16>
    %c2 = arith.constant 2 : index
    %c0_22 = arith.constant 0 : index
    %c0_23 = arith.constant 0 : index
    %41 = vector.load %arg4[%c2, %c0_22, %c0_23] : memref<9x32x64xbf16, #tpu.memory_space<vmem>>, vector<1x32x64xbf16>
    %42 = vector.shape_cast %41 : vector<1x32x64xbf16> to vector<32x64xbf16>
    %c3 = arith.constant 3 : index
    %c0_24 = arith.constant 0 : index
    %c0_25 = arith.constant 0 : index
    %43 = vector.load %arg4[%c3, %c0_24, %c0_25] : memref<9x32x64xbf16, #tpu.memory_space<vmem>>, vector<1x32x64xbf16>
    %44 = vector.shape_cast %43 : vector<1x32x64xbf16> to vector<32x64xbf16>
    %c4 = arith.constant 4 : index
    %c0_26 = arith.constant 0 : index
    %c0_27 = arith.constant 0 : index
    %45 = vector.load %arg4[%c4, %c0_26, %c0_27] : memref<9x32x64xbf16, #tpu.memory_space<vmem>>, vector<1x32x64xbf16>
    %46 = vector.shape_cast %45 : vector<1x32x64xbf16> to vector<32x64xbf16>
    %c5 = arith.constant 5 : index
    %c0_28 = arith.constant 0 : index
    %c0_29 = arith.constant 0 : index
    %47 = vector.load %arg4[%c5, %c0_28, %c0_29] : memref<9x32x64xbf16, #tpu.memory_space<vmem>>, vector<1x32x64xbf16>
    %48 = vector.shape_cast %47 : vector<1x32x64xbf16> to vector<32x64xbf16>
    %c6 = arith.constant 6 : index
    %c0_30 = arith.constant 0 : index
    %c0_31 = arith.constant 0 : index
    %49 = vector.load %arg4[%c6, %c0_30, %c0_31] : memref<9x32x64xbf16, #tpu.memory_space<vmem>>, vector<1x32x64xbf16>
    %50 = vector.shape_cast %49 : vector<1x32x64xbf16> to vector<32x64xbf16>
    %c7 = arith.constant 7 : index
    %c0_32 = arith.constant 0 : index
    %c0_33 = arith.constant 0 : index
    %51 = vector.load %arg4[%c7, %c0_32, %c0_33] : memref<9x32x64xbf16, #tpu.memory_space<vmem>>, vector<1x32x64xbf16>
    %52 = vector.shape_cast %51 : vector<1x32x64xbf16> to vector<32x64xbf16>
    %c8 = arith.constant 8 : index
    %c0_34 = arith.constant 0 : index
    %c0_35 = arith.constant 0 : index
    %53 = vector.load %arg4[%c8, %c0_34, %c0_35] : memref<9x32x64xbf16, #tpu.memory_space<vmem>>, vector<1x32x64xbf16>
    %54 = vector.shape_cast %53 : vector<1x32x64xbf16> to vector<32x64xbf16>
    %c0_36 = arith.constant 0 : index
    %c0_37 = arith.constant 0 : index
    %55 = vector.load %arg5[%c0_36, %c0_37] : memref<1x64xf32, #tpu.memory_space<vmem>>, vector<1x64xf32>
    %c31 = arith.constant 31 : index
    %c0_38 = arith.constant 0 : index
    %56 = vector.load %arg9[%c31, %c0_38] : memref<1024x32xf32, #tpu.memory_space<vmem>>, vector<128x32xf32>
    %57 = arith.truncf %56 : vector<128x32xf32> to vector<128x32xbf16>
    %cst_39 = arith.constant dense<0.000000e+00> : vector<128x64xf32>
    %58 = tpu.matmul %57, %38, %cst_39 {dimension_numbers = #tpu.dot_dimension_numbers<[1], [0], [0], [1], [0, 0, 1, 1], [], []>} : vector<128x32xbf16>, vector<32x64xbf16>, vector<128x64xf32> -> vector<128x64xf32>
    %c32 = arith.constant 32 : index
    %c0_40 = arith.constant 0 : index
    %59 = vector.load %arg9[%c32, %c0_40] : memref<1024x32xf32, #tpu.memory_space<vmem>>, vector<128x32xf32>
    %60 = arith.truncf %59 : vector<128x32xf32> to vector<128x32xbf16>
    %cst_41 = arith.constant dense<0.000000e+00> : vector<128x64xf32>
    %61 = tpu.matmul %60, %40, %cst_41 {dimension_numbers = #tpu.dot_dimension_numbers<[1], [0], [0], [1], [0, 0, 1, 1], [], []>} : vector<128x32xbf16>, vector<32x64xbf16>, vector<128x64xf32> -> vector<128x64xf32>
    %62 = arith.addf %58, %61 : vector<128x64xf32>
    %c33 = arith.constant 33 : index
    %c0_42 = arith.constant 0 : index
    %63 = vector.load %arg9[%c33, %c0_42] : memref<1024x32xf32, #tpu.memory_space<vmem>>, vector<128x32xf32>
    %64 = arith.truncf %63 : vector<128x32xf32> to vector<128x32xbf16>
    %cst_43 = arith.constant dense<0.000000e+00> : vector<128x64xf32>
    %65 = tpu.matmul %64, %42, %cst_43 {dimension_numbers = #tpu.dot_dimension_numbers<[1], [0], [0], [1], [0, 0, 1, 1], [], []>} : vector<128x32xbf16>, vector<32x64xbf16>, vector<128x64xf32> -> vector<128x64xf32>
    %66 = arith.addf %62, %65 : vector<128x64xf32>
    %c63 = arith.constant 63 : index
    %c0_44 = arith.constant 0 : index
    %67 = vector.load %arg9[%c63, %c0_44] : memref<1024x32xf32, #tpu.memory_space<vmem>>, vector<128x32xf32>
    %68 = arith.truncf %67 : vector<128x32xf32> to vector<128x32xbf16>
    %cst_45 = arith.constant dense<0.000000e+00> : vector<128x64xf32>
    %69 = tpu.matmul %68, %44, %cst_45 {dimension_numbers = #tpu.dot_dimension_numbers<[1], [0], [0], [1], [0, 0, 1, 1], [], []>} : vector<128x32xbf16>, vector<32x64xbf16>, vector<128x64xf32> -> vector<128x64xf32>
    %70 = arith.addf %66, %69 : vector<128x64xf32>
    %c64_46 = arith.constant 64 : index
    %c0_47 = arith.constant 0 : index
    %71 = vector.load %arg9[%c64_46, %c0_47] : memref<1024x32xf32, #tpu.memory_space<vmem>>, vector<128x32xf32>
    %72 = arith.truncf %71 : vector<128x32xf32> to vector<128x32xbf16>
    %cst_48 = arith.constant dense<0.000000e+00> : vector<128x64xf32>
    %73 = tpu.matmul %72, %46, %cst_48 {dimension_numbers = #tpu.dot_dimension_numbers<[1], [0], [0], [1], [0, 0, 1, 1], [], []>} : vector<128x32xbf16>, vector<32x64xbf16>, vector<128x64xf32> -> vector<128x64xf32>
    %74 = arith.addf %70, %73 : vector<128x64xf32>
    %c65 = arith.constant 65 : index
    %c0_49 = arith.constant 0 : index
    %75 = vector.load %arg9[%c65, %c0_49] : memref<1024x32xf32, #tpu.memory_space<vmem>>, vector<128x32xf32>
    %76 = arith.truncf %75 : vector<128x32xf32> to vector<128x32xbf16>
    %cst_50 = arith.constant dense<0.000000e+00> : vector<128x64xf32>
    %77 = tpu.matmul %76, %48, %cst_50 {dimension_numbers = #tpu.dot_dimension_numbers<[1], [0], [0], [1], [0, 0, 1, 1], [], []>} : vector<128x32xbf16>, vector<32x64xbf16>, vector<128x64xf32> -> vector<128x64xf32>
    %78 = arith.addf %74, %77 : vector<128x64xf32>
    %c95 = arith.constant 95 : index
    %c0_51 = arith.constant 0 : index
    %79 = vector.load %arg9[%c95, %c0_51] : memref<1024x32xf32, #tpu.memory_space<vmem>>, vector<128x32xf32>
    %80 = arith.truncf %79 : vector<128x32xf32> to vector<128x32xbf16>
    %cst_52 = arith.constant dense<0.000000e+00> : vector<128x64xf32>
    %81 = tpu.matmul %80, %50, %cst_52 {dimension_numbers = #tpu.dot_dimension_numbers<[1], [0], [0], [1], [0, 0, 1, 1], [], []>} : vector<128x32xbf16>, vector<32x64xbf16>, vector<128x64xf32> -> vector<128x64xf32>
    %82 = arith.addf %78, %81 : vector<128x64xf32>
    %c96 = arith.constant 96 : index
    %c0_53 = arith.constant 0 : index
    %83 = vector.load %arg9[%c96, %c0_53] : memref<1024x32xf32, #tpu.memory_space<vmem>>, vector<128x32xf32>
    %84 = arith.truncf %83 : vector<128x32xf32> to vector<128x32xbf16>
    %cst_54 = arith.constant dense<0.000000e+00> : vector<128x64xf32>
    %85 = tpu.matmul %84, %52, %cst_54 {dimension_numbers = #tpu.dot_dimension_numbers<[1], [0], [0], [1], [0, 0, 1, 1], [], []>} : vector<128x32xbf16>, vector<32x64xbf16>, vector<128x64xf32> -> vector<128x64xf32>
    %86 = arith.addf %82, %85 : vector<128x64xf32>
    %c97 = arith.constant 97 : index
    %c0_55 = arith.constant 0 : index
    %87 = vector.load %arg9[%c97, %c0_55] : memref<1024x32xf32, #tpu.memory_space<vmem>>, vector<128x32xf32>
    %88 = arith.truncf %87 : vector<128x32xf32> to vector<128x32xbf16>
    %cst_56 = arith.constant dense<0.000000e+00> : vector<128x64xf32>
    %89 = tpu.matmul %88, %54, %cst_56 {dimension_numbers = #tpu.dot_dimension_numbers<[1], [0], [0], [1], [0, 0, 1, 1], [], []>} : vector<128x32xbf16>, vector<32x64xbf16>, vector<128x64xf32> -> vector<128x64xf32>
    %90 = arith.addf %86, %89 : vector<128x64xf32>
    %91 = vector.broadcast %55 : vector<1x64xf32> to vector<128x64xf32>
    %92 = arith.addf %90, %91 : vector<128x64xf32>
    %cst_57 = arith.constant 0.000000e+00 : f32
    %93 = vector.broadcast %cst_57 : f32 to vector<128x64xf32>
    %94 = arith.maximumf %92, %93 : vector<128x64xf32>
    %c0_58 = arith.constant 0 : index
    %c0_59 = arith.constant 0 : index
    %95 = vector.load %arg10[%c0_58, %c0_59] : memref<896x64xf32, #tpu.memory_space<vmem>>, vector<128x64xf32>
    tpu.vector_store %arg10[%c0_58, %c0_59], %94 {strides = array<i32>} : memref<896x64xf32, #tpu.memory_space<vmem>>, vector<128x64xf32>,
    %c159 = arith.constant 159 : index
    %c0_60 = arith.constant 0 : index
    %96 = vector.load %arg9[%c159, %c0_60] : memref<1024x32xf32, #tpu.memory_space<vmem>>, vector<128x32xf32>
    %97 = arith.truncf %96 : vector<128x32xf32> to vector<128x32xbf16>
    %cst_61 = arith.constant dense<0.000000e+00> : vector<128x64xf32>
    %98 = tpu.matmul %97, %38, %cst_61 {dimension_numbers = #tpu.dot_dimension_numbers<[1], [0], [0], [1], [0, 0, 1, 1], [], []>} : vector<128x32xbf16>, vector<32x64xbf16>, vector<128x64xf32> -> vector<128x64xf32>
    %c160 = arith.constant 160 : index
    %c0_62 = arith.constant 0 : index
    %99 = vector.load %arg9[%c160, %c0_62] : memref<1024x32xf32, #tpu.memory_space<vmem>>, vector<128x32xf32>
    %100 = arith.truncf %99 : vector<128x32xf32> to vector<128x32xbf16>
    %cst_63 = arith.constant dense<0.000000e+00> : vector<128x64xf32>
    %101 = tpu.matmul %100, %40, %cst_63 {dimension_numbers = #tpu.dot_dimension_numbers<[1], [0], [0], [1], [0, 0, 1, 1], [], []>} : vector<128x32xbf16>, vector<32x64xbf16>, vector<128x64xf32> -> vector<128x64xf32>
    %102 = arith.addf %98, %101 : vector<128x64xf32>
    %c161 = arith.constant 161 : index
    %c0_64 = arith.constant 0 : index
    %103 = vector.load %arg9[%c161, %c0_64] : memref<1024x32xf32, #tpu.memory_space<vmem>>, vector<128x32xf32>
    %104 = arith.truncf %103 : vector<128x32xf32> to vector<128x32xbf16>
    %cst_65 = arith.constant dense<0.000000e+00> : vector<128x64xf32>
    %105 = tpu.matmul %104, %42, %cst_65 {dimension_numbers = #tpu.dot_dimension_numbers<[1], [0], [0], [1], [0, 0, 1, 1], [], []>} : vector<128x32xbf16>, vector<32x64xbf16>, vector<128x64xf32> -> vector<128x64xf32>
    %106 = arith.addf %102, %105 : vector<128x64xf32>
    %c191 = arith.constant 191 : index
    %c0_66 = arith.constant 0 : index
    %107 = vector.load %arg9[%c191, %c0_66] : memref<1024x32xf32, #tpu.memory_space<vmem>>, vector<128x32xf32>
    %108 = arith.truncf %107 : vector<128x32xf32> to vector<128x32xbf16>
    %cst_67 = arith.constant dense<0.000000e+00> : vector<128x64xf32>
    %109 = tpu.matmul %108, %44, %cst_67 {dimension_numbers = #tpu.dot_dimension_numbers<[1], [0], [0], [1], [0, 0, 1, 1], [], []>} : vector<128x32xbf16>, vector<32x64xbf16>, vector<128x64xf32> -> vector<128x64xf32>
    %110 = arith.addf %106, %109 : vector<128x64xf32>
    %c192 = arith.constant 192 : index
    %c0_68 = arith.constant 0 : index
    %111 = vector.load %arg9[%c192, %c0_68] : memref<1024x32xf32, #tpu.memory_space<vmem>>, vector<128x32xf32>
    %112 = arith.truncf %111 : vector<128x32xf32> to vector<128x32xbf16>
    %cst_69 = arith.constant dense<0.000000e+00> : vector<128x64xf32>
    %113 = tpu.matmul %112, %46, %cst_69 {dimension_numbers = #tpu.dot_dimension_numbers<[1], [0], [0], [1], [0, 0, 1, 1], [], []>} : vector<128x32xbf16>, vector<32x64xbf16>, vector<128x64xf32> -> vector<128x64xf32>
    %114 = arith.addf %110, %113 : vector<128x64xf32>
    %c193 = arith.constant 193 : index
    %c0_70 = arith.constant 0 : index
    %115 = vector.load %arg9[%c193, %c0_70] : memref<1024x32xf32, #tpu.memory_space<vmem>>, vector<128x32xf32>
    %116 = arith.truncf %115 : vector<128x32xf32> to vector<128x32xbf16>
    %cst_71 = arith.constant dense<0.000000e+00> : vector<128x64xf32>
    %117 = tpu.matmul %116, %48, %cst_71 {dimension_numbers = #tpu.dot_dimension_numbers<[1], [0], [0], [1], [0, 0, 1, 1], [], []>} : vector<128x32xbf16>, vector<32x64xbf16>, vector<128x64xf32> -> vector<128x64xf32>
    %118 = arith.addf %114, %117 : vector<128x64xf32>
    %c223 = arith.constant 223 : index
    %c0_72 = arith.constant 0 : index
    %119 = vector.load %arg9[%c223, %c0_72] : memref<1024x32xf32, #tpu.memory_space<vmem>>, vector<128x32xf32>
    %120 = arith.truncf %119 : vector<128x32xf32> to vector<128x32xbf16>
    %cst_73 = arith.constant dense<0.000000e+00> : vector<128x64xf32>
    %121 = tpu.matmul %120, %50, %cst_73 {dimension_numbers = #tpu.dot_dimension_numbers<[1], [0], [0], [1], [0, 0, 1, 1], [], []>} : vector<128x32xbf16>, vector<32x64xbf16>, vector<128x64xf32> -> vector<128x64xf32>
    %122 = arith.addf %118, %121 : vector<128x64xf32>
    %c224 = arith.constant 224 : index
    %c0_74 = arith.constant 0 : index
    %123 = vector.load %arg9[%c224, %c0_74] : memref<1024x32xf32, #tpu.memory_space<vmem>>, vector<128x32xf32>
    %124 = arith.truncf %123 : vector<128x32xf32> to vector<128x32xbf16>
    %cst_75 = arith.constant dense<0.000000e+00> : vector<128x64xf32>
    %125 = tpu.matmul %124, %52, %cst_75 {dimension_numbers = #tpu.dot_dimension_numbers<[1], [0], [0], [1], [0, 0, 1, 1], [], []>} : vector<128x32xbf16>, vector<32x64xbf16>, vector<128x64xf32> -> vector<128x64xf32>
    %126 = arith.addf %122, %125 : vector<128x64xf32>
    %c225 = arith.constant 225 : index
    %c0_76 = arith.constant 0 : index
    %127 = vector.load %arg9[%c225, %c0_76] : memref<1024x32xf32, #tpu.memory_space<vmem>>, vector<128x32xf32>
    %128 = arith.truncf %127 : vector<128x32xf32> to vector<128x32xbf16>
    %cst_77 = arith.constant dense<0.000000e+00> : vector<128x64xf32>
    %129 = tpu.matmul %128, %54, %cst_77 {dimension_numbers = #tpu.dot_dimension_numbers<[1], [0], [0], [1], [0, 0, 1, 1], [], []>} : vector<128x32xbf16>, vector<32x64xbf16>, vector<128x64xf32> -> vector<128x64xf32>
    %130 = arith.addf %126, %129 : vector<128x64xf32>
    %131 = vector.broadcast %55 : vector<1x64xf32> to vector<128x64xf32>
    %132 = arith.addf %130, %131 : vector<128x64xf32>
    %cst_78 = arith.constant 0.000000e+00 : f32
    %133 = vector.broadcast %cst_78 : f32 to vector<128x64xf32>
    %134 = arith.maximumf %132, %133 : vector<128x64xf32>
    %c128 = arith.constant 128 : index
    %c0_79 = arith.constant 0 : index
    %135 = vector.load %arg10[%c128, %c0_79] : memref<896x64xf32, #tpu.memory_space<vmem>>, vector<128x64xf32>
    tpu.vector_store %arg10[%c128, %c0_79], %134 {strides = array<i32>} : memref<896x64xf32, #tpu.memory_space<vmem>>, vector<128x64xf32>,
    %c287 = arith.constant 287 : index
    %c0_80 = arith.constant 0 : index
    %136 = vector.load %arg9[%c287, %c0_80] : memref<1024x32xf32, #tpu.memory_space<vmem>>, vector<128x32xf32>
    %137 = arith.truncf %136 : vector<128x32xf32> to vector<128x32xbf16>
    %cst_81 = arith.constant dense<0.000000e+00> : vector<128x64xf32>
    %138 = tpu.matmul %137, %38, %cst_81 {dimension_numbers = #tpu.dot_dimension_numbers<[1], [0], [0], [1], [0, 0, 1, 1], [], []>} : vector<128x32xbf16>, vector<32x64xbf16>, vector<128x64xf32> -> vector<128x64xf32>
    %c288 = arith.constant 288 : index
    %c0_82 = arith.constant 0 : index
    %139 = vector.load %arg9[%c288, %c0_82] : memref<1024x32xf32, #tpu.memory_space<vmem>>, vector<128x32xf32>
    %140 = arith.truncf %139 : vector<128x32xf32> to vector<128x32xbf16>
    %cst_83 = arith.constant dense<0.000000e+00> : vector<128x64xf32>
    %141 = tpu.matmul %140, %40, %cst_83 {dimension_numbers = #tpu.dot_dimension_numbers<[1], [0], [0], [1], [0, 0, 1, 1], [], []>} : vector<128x32xbf16>, vector<32x64xbf16>, vector<128x64xf32> -> vector<128x64xf32>
    %142 = arith.addf %138, %141 : vector<128x64xf32>
    %c289 = arith.constant 289 : index
    %c0_84 = arith.constant 0 : index
    %143 = vector.load %arg9[%c289, %c0_84] : memref<1024x32xf32, #tpu.memory_space<vmem>>, vector<128x32xf32>
    %144 = arith.truncf %143 : vector<128x32xf32> to vector<128x32xbf16>
    %cst_85 = arith.constant dense<0.000000e+00> : vector<128x64xf32>
    %145 = tpu.matmul %144, %42, %cst_85 {dimension_numbers = #tpu.dot_dimension_numbers<[1], [0], [0], [1], [0, 0, 1, 1], [], []>} : vector<128x32xbf16>, vector<32x64xbf16>, vector<128x64xf32> -> vector<128x64xf32>
    %146 = arith.addf %142, %145 : vector<128x64xf32>
    %c319 = arith.constant 319 : index
    %c0_86 = arith.constant 0 : index
    %147 = vector.load %arg9[%c319, %c0_86] : memref<1024x32xf32, #tpu.memory_space<vmem>>, vector<128x32xf32>
    %148 = arith.truncf %147 : vector<128x32xf32> to vector<128x32xbf16>
    %cst_87 = arith.constant dense<0.000000e+00> : vector<128x64xf32>
    %149 = tpu.matmul %148, %44, %cst_87 {dimension_numbers = #tpu.dot_dimension_numbers<[1], [0], [0], [1], [0, 0, 1, 1], [], []>} : vector<128x32xbf16>, vector<32x64xbf16>, vector<128x64xf32> -> vector<128x64xf32>
    %150 = arith.addf %146, %149 : vector<128x64xf32>
    %c320 = arith.constant 320 : index
    %c0_88 = arith.constant 0 : index
    %151 = vector.load %arg9[%c320, %c0_88] : memref<1024x32xf32, #tpu.memory_space<vmem>>, vector<128x32xf32>
    %152 = arith.truncf %151 : vector<128x32xf32> to vector<128x32xbf16>
    %cst_89 = arith.constant dense<0.000000e+00> : vector<128x64xf32>
    %153 = tpu.matmul %152, %46, %cst_89 {dimension_numbers = #tpu.dot_dimension_numbers<[1], [0], [0], [1], [0, 0, 1, 1], [], []>} : vector<128x32xbf16>, vector<32x64xbf16>, vector<128x64xf32> -> vector<128x64xf32>
    %154 = arith.addf %150, %153 : vector<128x64xf32>
    %c321 = arith.constant 321 : index
    %c0_90 = arith.constant 0 : index
    %155 = vector.load %arg9[%c321, %c0_90] : memref<1024x32xf32, #tpu.memory_space<vmem>>, vector<128x32xf32>
    %156 = arith.truncf %155 : vector<128x32xf32> to vector<128x32xbf16>
    %cst_91 = arith.constant dense<0.000000e+00> : vector<128x64xf32>
    %157 = tpu.matmul %156, %48, %cst_91 {dimension_numbers = #tpu.dot_dimension_numbers<[1], [0], [0], [1], [0, 0, 1, 1], [], []>} : vector<128x32xbf16>, vector<32x64xbf16>, vector<128x64xf32> -> vector<128x64xf32>
    %158 = arith.addf %154, %157 : vector<128x64xf32>
    %c351 = arith.constant 351 : index
    %c0_92 = arith.constant 0 : index
    %159 = vector.load %arg9[%c351, %c0_92] : memref<1024x32xf32, #tpu.memory_space<vmem>>, vector<128x32xf32>
    %160 = arith.truncf %159 : vector<128x32xf32> to vector<128x32xbf16>
    %cst_93 = arith.constant dense<0.000000e+00> : vector<128x64xf32>
    %161 = tpu.matmul %160, %50, %cst_93 {dimension_numbers = #tpu.dot_dimension_numbers<[1], [0], [0], [1], [0, 0, 1, 1], [], []>} : vector<128x32xbf16>, vector<32x64xbf16>, vector<128x64xf32> -> vector<128x64xf32>
    %162 = arith.addf %158, %161 : vector<128x64xf32>
    %c352 = arith.constant 352 : index
    %c0_94 = arith.constant 0 : index
    %163 = vector.load %arg9[%c352, %c0_94] : memref<1024x32xf32, #tpu.memory_space<vmem>>, vector<128x32xf32>
    %164 = arith.truncf %163 : vector<128x32xf32> to vector<128x32xbf16>
    %cst_95 = arith.constant dense<0.000000e+00> : vector<128x64xf32>
    %165 = tpu.matmul %164, %52, %cst_95 {dimension_numbers = #tpu.dot_dimension_numbers<[1], [0], [0], [1], [0, 0, 1, 1], [], []>} : vector<128x32xbf16>, vector<32x64xbf16>, vector<128x64xf32> -> vector<128x64xf32>
    %166 = arith.addf %162, %165 : vector<128x64xf32>
    %c353 = arith.constant 353 : index
    %c0_96 = arith.constant 0 : index
    %167 = vector.load %arg9[%c353, %c0_96] : memref<1024x32xf32, #tpu.memory_space<vmem>>, vector<128x32xf32>
    %168 = arith.truncf %167 : vector<128x32xf32> to vector<128x32xbf16>
    %cst_97 = arith.constant dense<0.000000e+00> : vector<128x64xf32>
    %169 = tpu.matmul %168, %54, %cst_97 {dimension_numbers = #tpu.dot_dimension_numbers<[1], [0], [0], [1], [0, 0, 1, 1], [], []>} : vector<128x32xbf16>, vector<32x64xbf16>, vector<128x64xf32> -> vector<128x64xf32>
    %170 = arith.addf %166, %169 : vector<128x64xf32>
    %171 = vector.broadcast %55 : vector<1x64xf32> to vector<128x64xf32>
    %172 = arith.addf %170, %171 : vector<128x64xf32>
    %cst_98 = arith.constant 0.000000e+00 : f32
    %173 = vector.broadcast %cst_98 : f32 to vector<128x64xf32>
    %174 = arith.maximumf %172, %173 : vector<128x64xf32>
    %c256 = arith.constant 256 : index
    %c0_99 = arith.constant 0 : index
    %175 = vector.load %arg10[%c256, %c0_99] : memref<896x64xf32, #tpu.memory_space<vmem>>, vector<128x64xf32>
    tpu.vector_store %arg10[%c256, %c0_99], %174 {strides = array<i32>} : memref<896x64xf32, #tpu.memory_space<vmem>>, vector<128x64xf32>,
    %c415 = arith.constant 415 : index
    %c0_100 = arith.constant 0 : index
    %176 = vector.load %arg9[%c415, %c0_100] : memref<1024x32xf32, #tpu.memory_space<vmem>>, vector<128x32xf32>
    %177 = arith.truncf %176 : vector<128x32xf32> to vector<128x32xbf16>
    %cst_101 = arith.constant dense<0.000000e+00> : vector<128x64xf32>
    %178 = tpu.matmul %177, %38, %cst_101 {dimension_numbers = #tpu.dot_dimension_numbers<[1], [0], [0], [1], [0, 0, 1, 1], [], []>} : vector<128x32xbf16>, vector<32x64xbf16>, vector<128x64xf32> -> vector<128x64xf32>
    %c416 = arith.constant 416 : index
    %c0_102 = arith.constant 0 : index
    %179 = vector.load %arg9[%c416, %c0_102] : memref<1024x32xf32, #tpu.memory_space<vmem>>, vector<128x32xf32>
    %180 = arith.truncf %179 : vector<128x32xf32> to vector<128x32xbf16>
    %cst_103 = arith.constant dense<0.000000e+00> : vector<128x64xf32>
    %181 = tpu.matmul %180, %40, %cst_103 {dimension_numbers = #tpu.dot_dimension_numbers<[1], [0], [0], [1], [0, 0, 1, 1], [], []>} : vector<128x32xbf16>, vector<32x64xbf16>, vector<128x64xf32> -> vector<128x64xf32>
    %182 = arith.addf %178, %181 : vector<128x64xf32>
    %c417 = arith.constant 417 : index
    %c0_104 = arith.constant 0 : index
    %183 = vector.load %arg9[%c417, %c0_104] : memref<1024x32xf32, #tpu.memory_space<vmem>>, vector<128x32xf32>
    %184 = arith.truncf %183 : vector<128x32xf32> to vector<128x32xbf16>
    %cst_105 = arith.constant dense<0.000000e+00> : vector<128x64xf32>
    %185 = tpu.matmul %184, %42, %cst_105 {dimension_numbers = #tpu.dot_dimension_numbers<[1], [0], [0], [1], [0, 0, 1, 1], [], []>} : vector<128x32xbf16>, vector<32x64xbf16>, vector<128x64xf32> -> vector<128x64xf32>
    %186 = arith.addf %182, %185 : vector<128x64xf32>
    %c447 = arith.constant 447 : index
    %c0_106 = arith.constant 0 : index
    %187 = vector.load %arg9[%c447, %c0_106] : memref<1024x32xf32, #tpu.memory_space<vmem>>, vector<128x32xf32>
    %188 = arith.truncf %187 : vector<128x32xf32> to vector<128x32xbf16>
    %cst_107 = arith.constant dense<0.000000e+00> : vector<128x64xf32>
    %189 = tpu.matmul %188, %44, %cst_107 {dimension_numbers = #tpu.dot_dimension_numbers<[1], [0], [0], [1], [0, 0, 1, 1], [], []>} : vector<128x32xbf16>, vector<32x64xbf16>, vector<128x64xf32> -> vector<128x64xf32>
    %190 = arith.addf %186, %189 : vector<128x64xf32>
    %c448 = arith.constant 448 : index
    %c0_108 = arith.constant 0 : index
    %191 = vector.load %arg9[%c448, %c0_108] : memref<1024x32xf32, #tpu.memory_space<vmem>>, vector<128x32xf32>
    %192 = arith.truncf %191 : vector<128x32xf32> to vector<128x32xbf16>
    %cst_109 = arith.constant dense<0.000000e+00> : vector<128x64xf32>
    %193 = tpu.matmul %192, %46, %cst_109 {dimension_numbers = #tpu.dot_dimension_numbers<[1], [0], [0], [1], [0, 0, 1, 1], [], []>} : vector<128x32xbf16>, vector<32x64xbf16>, vector<128x64xf32> -> vector<128x64xf32>
    %194 = arith.addf %190, %193 : vector<128x64xf32>
    %c449 = arith.constant 449 : index
    %c0_110 = arith.constant 0 : index
    %195 = vector.load %arg9[%c449, %c0_110] : memref<1024x32xf32, #tpu.memory_space<vmem>>, vector<128x32xf32>
    %196 = arith.truncf %195 : vector<128x32xf32> to vector<128x32xbf16>
    %cst_111 = arith.constant dense<0.000000e+00> : vector<128x64xf32>
    %197 = tpu.matmul %196, %48, %cst_111 {dimension_numbers = #tpu.dot_dimension_numbers<[1], [0], [0], [1], [0, 0, 1, 1], [], []>} : vector<128x32xbf16>, vector<32x64xbf16>, vector<128x64xf32> -> vector<128x64xf32>
    %198 = arith.addf %194, %197 : vector<128x64xf32>
    %c479 = arith.constant 479 : index
    %c0_112 = arith.constant 0 : index
    %199 = vector.load %arg9[%c479, %c0_112] : memref<1024x32xf32, #tpu.memory_space<vmem>>, vector<128x32xf32>
    %200 = arith.truncf %199 : vector<128x32xf32> to vector<128x32xbf16>
    %cst_113 = arith.constant dense<0.000000e+00> : vector<128x64xf32>
    %201 = tpu.matmul %200, %50, %cst_113 {dimension_numbers = #tpu.dot_dimension_numbers<[1], [0], [0], [1], [0, 0, 1, 1], [], []>} : vector<128x32xbf16>, vector<32x64xbf16>, vector<128x64xf32> -> vector<128x64xf32>
    %202 = arith.addf %198, %201 : vector<128x64xf32>
    %c480 = arith.constant 480 : index
    %c0_114 = arith.constant 0 : index
    %203 = vector.load %arg9[%c480, %c0_114] : memref<1024x32xf32, #tpu.memory_space<vmem>>, vector<128x32xf32>
    %204 = arith.truncf %203 : vector<128x32xf32> to vector<128x32xbf16>
    %cst_115 = arith.constant dense<0.000000e+00> : vector<128x64xf32>
    %205 = tpu.matmul %204, %52, %cst_115 {dimension_numbers = #tpu.dot_dimension_numbers<[1], [0], [0], [1], [0, 0, 1, 1], [], []>} : vector<128x32xbf16>, vector<32x64xbf16>, vector<128x64xf32> -> vector<128x64xf32>
    %206 = arith.addf %202, %205 : vector<128x64xf32>
    %c481 = arith.constant 481 : index
    %c0_116 = arith.constant 0 : index
    %207 = vector.load %arg9[%c481, %c0_116] : memref<1024x32xf32, #tpu.memory_space<vmem>>, vector<128x32xf32>
    %208 = arith.truncf %207 : vector<128x32xf32> to vector<128x32xbf16>
    %cst_117 = arith.constant dense<0.000000e+00> : vector<128x64xf32>
    %209 = tpu.matmul %208, %54, %cst_117 {dimension_numbers = #tpu.dot_dimension_numbers<[1], [0], [0], [1], [0, 0, 1, 1], [], []>} : vector<128x32xbf16>, vector<32x64xbf16>, vector<128x64xf32> -> vector<128x64xf32>
    %210 = arith.addf %206, %209 : vector<128x64xf32>
    %211 = vector.broadcast %55 : vector<1x64xf32> to vector<128x64xf32>
    %212 = arith.addf %210, %211 : vector<128x64xf32>
    %cst_118 = arith.constant 0.000000e+00 : f32
    %213 = vector.broadcast %cst_118 : f32 to vector<128x64xf32>
    %214 = arith.maximumf %212, %213 : vector<128x64xf32>
    %c384 = arith.constant 384 : index
    %c0_119 = arith.constant 0 : index
    %215 = vector.load %arg10[%c384, %c0_119] : memref<896x64xf32, #tpu.memory_space<vmem>>, vector<128x64xf32>
    tpu.vector_store %arg10[%c384, %c0_119], %214 {strides = array<i32>} : memref<896x64xf32, #tpu.memory_space<vmem>>, vector<128x64xf32>,
    %c543 = arith.constant 543 : index
    %c0_120 = arith.constant 0 : index
    %216 = vector.load %arg9[%c543, %c0_120] : memref<1024x32xf32, #tpu.memory_space<vmem>>, vector<128x32xf32>
    %217 = arith.truncf %216 : vector<128x32xf32> to vector<128x32xbf16>
    %cst_121 = arith.constant dense<0.000000e+00> : vector<128x64xf32>
    %218 = tpu.matmul %217, %38, %cst_121 {dimension_numbers = #tpu.dot_dimension_numbers<[1], [0], [0], [1], [0, 0, 1, 1], [], []>} : vector<128x32xbf16>, vector<32x64xbf16>, vector<128x64xf32> -> vector<128x64xf32>
    %c544 = arith.constant 544 : index
    %c0_122 = arith.constant 0 : index
    %219 = vector.load %arg9[%c544, %c0_122] : memref<1024x32xf32, #tpu.memory_space<vmem>>, vector<128x32xf32>
    %220 = arith.truncf %219 : vector<128x32xf32> to vector<128x32xbf16>
    %cst_123 = arith.constant dense<0.000000e+00> : vector<128x64xf32>
    %221 = tpu.matmul %220, %40, %cst_123 {dimension_numbers = #tpu.dot_dimension_numbers<[1], [0], [0], [1], [0, 0, 1, 1], [], []>} : vector<128x32xbf16>, vector<32x64xbf16>, vector<128x64xf32> -> vector<128x64xf32>
    %222 = arith.addf %218, %221 : vector<128x64xf32>
    %c545 = arith.constant 545 : index
    %c0_124 = arith.constant 0 : index
    %223 = vector.load %arg9[%c545, %c0_124] : memref<1024x32xf32, #tpu.memory_space<vmem>>, vector<128x32xf32>
    %224 = arith.truncf %223 : vector<128x32xf32> to vector<128x32xbf16>
    %cst_125 = arith.constant dense<0.000000e+00> : vector<128x64xf32>
    %225 = tpu.matmul %224, %42, %cst_125 {dimension_numbers = #tpu.dot_dimension_numbers<[1], [0], [0], [1], [0, 0, 1, 1], [], []>} : vector<128x32xbf16>, vector<32x64xbf16>, vector<128x64xf32> -> vector<128x64xf32>
    %226 = arith.addf %222, %225 : vector<128x64xf32>
    %c575 = arith.constant 575 : index
    %c0_126 = arith.constant 0 : index
    %227 = vector.load %arg9[%c575, %c0_126] : memref<1024x32xf32, #tpu.memory_space<vmem>>, vector<128x32xf32>
    %228 = arith.truncf %227 : vector<128x32xf32> to vector<128x32xbf16>
    %cst_127 = arith.constant dense<0.000000e+00> : vector<128x64xf32>
    %229 = tpu.matmul %228, %44, %cst_127 {dimension_numbers = #tpu.dot_dimension_numbers<[1], [0], [0], [1], [0, 0, 1, 1], [], []>} : vector<128x32xbf16>, vector<32x64xbf16>, vector<128x64xf32> -> vector<128x64xf32>
    %230 = arith.addf %226, %229 : vector<128x64xf32>
    %c576 = arith.constant 576 : index
    %c0_128 = arith.constant 0 : index
    %231 = vector.load %arg9[%c576, %c0_128] : memref<1024x32xf32, #tpu.memory_space<vmem>>, vector<128x32xf32>
    %232 = arith.truncf %231 : vector<128x32xf32> to vector<128x32xbf16>
    %cst_129 = arith.constant dense<0.000000e+00> : vector<128x64xf32>
    %233 = tpu.matmul %232, %46, %cst_129 {dimension_numbers = #tpu.dot_dimension_numbers<[1], [0], [0], [1], [0, 0, 1, 1], [], []>} : vector<128x32xbf16>, vector<32x64xbf16>, vector<128x64xf32> -> vector<128x64xf32>
    %234 = arith.addf %230, %233 : vector<128x64xf32>
    %c577 = arith.constant 577 : index
    %c0_130 = arith.constant 0 : index
    %235 = vector.load %arg9[%c577, %c0_130] : memref<1024x32xf32, #tpu.memory_space<vmem>>, vector<128x32xf32>
    %236 = arith.truncf %235 : vector<128x32xf32> to vector<128x32xbf16>
    %cst_131 = arith.constant dense<0.000000e+00> : vector<128x64xf32>
    %237 = tpu.matmul %236, %48, %cst_131 {dimension_numbers = #tpu.dot_dimension_numbers<[1], [0], [0], [1], [0, 0, 1, 1], [], []>} : vector<128x32xbf16>, vector<32x64xbf16>, vector<128x64xf32> -> vector<128x64xf32>
    %238 = arith.addf %234, %237 : vector<128x64xf32>
    %c607 = arith.constant 607 : index
    %c0_132 = arith.constant 0 : index
    %239 = vector.load %arg9[%c607, %c0_132] : memref<1024x32xf32, #tpu.memory_space<vmem>>, vector<128x32xf32>
    %240 = arith.truncf %239 : vector<128x32xf32> to vector<128x32xbf16>
    %cst_133 = arith.constant dense<0.000000e+00> : vector<128x64xf32>
    %241 = tpu.matmul %240, %50, %cst_133 {dimension_numbers = #tpu.dot_dimension_numbers<[1], [0], [0], [1], [0, 0, 1, 1], [], []>} : vector<128x32xbf16>, vector<32x64xbf16>, vector<128x64xf32> -> vector<128x64xf32>
    %242 = arith.addf %238, %241 : vector<128x64xf32>
    %c608 = arith.constant 608 : index
    %c0_134 = arith.constant 0 : index
    %243 = vector.load %arg9[%c608, %c0_134] : memref<1024x32xf32, #tpu.memory_space<vmem>>, vector<128x32xf32>
    %244 = arith.truncf %243 : vector<128x32xf32> to vector<128x32xbf16>
    %cst_135 = arith.constant dense<0.000000e+00> : vector<128x64xf32>
    %245 = tpu.matmul %244, %52, %cst_135 {dimension_numbers = #tpu.dot_dimension_numbers<[1], [0], [0], [1], [0, 0, 1, 1], [], []>} : vector<128x32xbf16>, vector<32x64xbf16>, vector<128x64xf32> -> vector<128x64xf32>
    %246 = arith.addf %242, %245 : vector<128x64xf32>
    %c609 = arith.constant 609 : index
    %c0_136 = arith.constant 0 : index
    %247 = vector.load %arg9[%c609, %c0_136] : memref<1024x32xf32, #tpu.memory_space<vmem>>, vector<128x32xf32>
    %248 = arith.truncf %247 : vector<128x32xf32> to vector<128x32xbf16>
    %cst_137 = arith.constant dense<0.000000e+00> : vector<128x64xf32>
    %249 = tpu.matmul %248, %54, %cst_137 {dimension_numbers = #tpu.dot_dimension_numbers<[1], [0], [0], [1], [0, 0, 1, 1], [], []>} : vector<128x32xbf16>, vector<32x64xbf16>, vector<128x64xf32> -> vector<128x64xf32>
    %250 = arith.addf %246, %249 : vector<128x64xf32>
    %251 = vector.broadcast %55 : vector<1x64xf32> to vector<128x64xf32>
    %252 = arith.addf %250, %251 : vector<128x64xf32>
    %cst_138 = arith.constant 0.000000e+00 : f32
    %253 = vector.broadcast %cst_138 : f32 to vector<128x64xf32>
    %254 = arith.maximumf %252, %253 : vector<128x64xf32>
    %c512 = arith.constant 512 : index
    %c0_139 = arith.constant 0 : index
    %255 = vector.load %arg10[%c512, %c0_139] : memref<896x64xf32, #tpu.memory_space<vmem>>, vector<128x64xf32>
    tpu.vector_store %arg10[%c512, %c0_139], %254 {strides = array<i32>} : memref<896x64xf32, #tpu.memory_space<vmem>>, vector<128x64xf32>,
    %c671 = arith.constant 671 : index
    %c0_140 = arith.constant 0 : index
    %256 = vector.load %arg9[%c671, %c0_140] : memref<1024x32xf32, #tpu.memory_space<vmem>>, vector<128x32xf32>
    %257 = arith.truncf %256 : vector<128x32xf32> to vector<128x32xbf16>
    %cst_141 = arith.constant dense<0.000000e+00> : vector<128x64xf32>
    %258 = tpu.matmul %257, %38, %cst_141 {dimension_numbers = #tpu.dot_dimension_numbers<[1], [0], [0], [1], [0, 0, 1, 1], [], []>} : vector<128x32xbf16>, vector<32x64xbf16>, vector<128x64xf32> -> vector<128x64xf32>
    %c672 = arith.constant 672 : index
    %c0_142 = arith.constant 0 : index
    %259 = vector.load %arg9[%c672, %c0_142] : memref<1024x32xf32, #tpu.memory_space<vmem>>, vector<128x32xf32>
    %260 = arith.truncf %259 : vector<128x32xf32> to vector<128x32xbf16>
    %cst_143 = arith.constant dense<0.000000e+00> : vector<128x64xf32>
    %261 = tpu.matmul %260, %40, %cst_143 {dimension_numbers = #tpu.dot_dimension_numbers<[1], [0], [0], [1], [0, 0, 1, 1], [], []>} : vector<128x32xbf16>, vector<32x64xbf16>, vector<128x64xf32> -> vector<128x64xf32>
    %262 = arith.addf %258, %261 : vector<128x64xf32>
    %c673 = arith.constant 673 : index
    %c0_144 = arith.constant 0 : index
    %263 = vector.load %arg9[%c673, %c0_144] : memref<1024x32xf32, #tpu.memory_space<vmem>>, vector<128x32xf32>
    %264 = arith.truncf %263 : vector<128x32xf32> to vector<128x32xbf16>
    %cst_145 = arith.constant dense<0.000000e+00> : vector<128x64xf32>
    %265 = tpu.matmul %264, %42, %cst_145 {dimension_numbers = #tpu.dot_dimension_numbers<[1], [0], [0], [1], [0, 0, 1, 1], [], []>} : vector<128x32xbf16>, vector<32x64xbf16>, vector<128x64xf32> -> vector<128x64xf32>
    %266 = arith.addf %262, %265 : vector<128x64xf32>
    %c703 = arith.constant 703 : index
    %c0_146 = arith.constant 0 : index
    %267 = vector.load %arg9[%c703, %c0_146] : memref<1024x32xf32, #tpu.memory_space<vmem>>, vector<128x32xf32>
    %268 = arith.truncf %267 : vector<128x32xf32> to vector<128x32xbf16>
    %cst_147 = arith.constant dense<0.000000e+00> : vector<128x64xf32>
    %269 = tpu.matmul %268, %44, %cst_147 {dimension_numbers = #tpu.dot_dimension_numbers<[1], [0], [0], [1], [0, 0, 1, 1], [], []>} : vector<128x32xbf16>, vector<32x64xbf16>, vector<128x64xf32> -> vector<128x64xf32>
    %270 = arith.addf %266, %269 : vector<128x64xf32>
    %c704 = arith.constant 704 : index
    %c0_148 = arith.constant 0 : index
    %271 = vector.load %arg9[%c704, %c0_148] : memref<1024x32xf32, #tpu.memory_space<vmem>>, vector<128x32xf32>
    %272 = arith.truncf %271 : vector<128x32xf32> to vector<128x32xbf16>
    %cst_149 = arith.constant dense<0.000000e+00> : vector<128x64xf32>
    %273 = tpu.matmul %272, %46, %cst_149 {dimension_numbers = #tpu.dot_dimension_numbers<[1], [0], [0], [1], [0, 0, 1, 1], [], []>} : vector<128x32xbf16>, vector<32x64xbf16>, vector<128x64xf32> -> vector<128x64xf32>
    %274 = arith.addf %270, %273 : vector<128x64xf32>
    %c705 = arith.constant 705 : index
    %c0_150 = arith.constant 0 : index
    %275 = vector.load %arg9[%c705, %c0_150] : memref<1024x32xf32, #tpu.memory_space<vmem>>, vector<128x32xf32>
    %276 = arith.truncf %275 : vector<128x32xf32> to vector<128x32xbf16>
    %cst_151 = arith.constant dense<0.000000e+00> : vector<128x64xf32>
    %277 = tpu.matmul %276, %48, %cst_151 {dimension_numbers = #tpu.dot_dimension_numbers<[1], [0], [0], [1], [0, 0, 1, 1], [], []>} : vector<128x32xbf16>, vector<32x64xbf16>, vector<128x64xf32> -> vector<128x64xf32>
    %278 = arith.addf %274, %277 : vector<128x64xf32>
    %c735 = arith.constant 735 : index
    %c0_152 = arith.constant 0 : index
    %279 = vector.load %arg9[%c735, %c0_152] : memref<1024x32xf32, #tpu.memory_space<vmem>>, vector<128x32xf32>
    %280 = arith.truncf %279 : vector<128x32xf32> to vector<128x32xbf16>
    %cst_153 = arith.constant dense<0.000000e+00> : vector<128x64xf32>
    %281 = tpu.matmul %280, %50, %cst_153 {dimension_numbers = #tpu.dot_dimension_numbers<[1], [0], [0], [1], [0, 0, 1, 1], [], []>} : vector<128x32xbf16>, vector<32x64xbf16>, vector<128x64xf32> -> vector<128x64xf32>
    %282 = arith.addf %278, %281 : vector<128x64xf32>
    %c736 = arith.constant 736 : index
    %c0_154 = arith.constant 0 : index
    %283 = vector.load %arg9[%c736, %c0_154] : memref<1024x32xf32, #tpu.memory_space<vmem>>, vector<128x32xf32>
    %284 = arith.truncf %283 : vector<128x32xf32> to vector<128x32xbf16>
    %cst_155 = arith.constant dense<0.000000e+00> : vector<128x64xf32>
    %285 = tpu.matmul %284, %52, %cst_155 {dimension_numbers = #tpu.dot_dimension_numbers<[1], [0], [0], [1], [0, 0, 1, 1], [], []>} : vector<128x32xbf16>, vector<32x64xbf16>, vector<128x64xf32> -> vector<128x64xf32>
    %286 = arith.addf %282, %285 : vector<128x64xf32>
    %c737 = arith.constant 737 : index
    %c0_156 = arith.constant 0 : index
    %287 = vector.load %arg9[%c737, %c0_156] : memref<1024x32xf32, #tpu.memory_space<vmem>>, vector<128x32xf32>
    %288 = arith.truncf %287 : vector<128x32xf32> to vector<128x32xbf16>
    %cst_157 = arith.constant dense<0.000000e+00> : vector<128x64xf32>
    %289 = tpu.matmul %288, %54, %cst_157 {dimension_numbers = #tpu.dot_dimension_numbers<[1], [0], [0], [1], [0, 0, 1, 1], [], []>} : vector<128x32xbf16>, vector<32x64xbf16>, vector<128x64xf32> -> vector<128x64xf32>
    %290 = arith.addf %286, %289 : vector<128x64xf32>
    %291 = vector.broadcast %55 : vector<1x64xf32> to vector<128x64xf32>
    %292 = arith.addf %290, %291 : vector<128x64xf32>
    %cst_158 = arith.constant 0.000000e+00 : f32
    %293 = vector.broadcast %cst_158 : f32 to vector<128x64xf32>
    %294 = arith.maximumf %292, %293 : vector<128x64xf32>
    %c640 = arith.constant 640 : index
    %c0_159 = arith.constant 0 : index
    %295 = vector.load %arg10[%c640, %c0_159] : memref<896x64xf32, #tpu.memory_space<vmem>>, vector<128x64xf32>
    tpu.vector_store %arg10[%c640, %c0_159], %294 {strides = array<i32>} : memref<896x64xf32, #tpu.memory_space<vmem>>, vector<128x64xf32>,
    %c799 = arith.constant 799 : index
    %c0_160 = arith.constant 0 : index
    %296 = vector.load %arg9[%c799, %c0_160] : memref<1024x32xf32, #tpu.memory_space<vmem>>, vector<128x32xf32>
    %297 = arith.truncf %296 : vector<128x32xf32> to vector<128x32xbf16>
    %cst_161 = arith.constant dense<0.000000e+00> : vector<128x64xf32>
    %298 = tpu.matmul %297, %38, %cst_161 {dimension_numbers = #tpu.dot_dimension_numbers<[1], [0], [0], [1], [0, 0, 1, 1], [], []>} : vector<128x32xbf16>, vector<32x64xbf16>, vector<128x64xf32> -> vector<128x64xf32>
    %c800 = arith.constant 800 : index
    %c0_162 = arith.constant 0 : index
    %299 = vector.load %arg9[%c800, %c0_162] : memref<1024x32xf32, #tpu.memory_space<vmem>>, vector<128x32xf32>
    %300 = arith.truncf %299 : vector<128x32xf32> to vector<128x32xbf16>
    %cst_163 = arith.constant dense<0.000000e+00> : vector<128x64xf32>
    %301 = tpu.matmul %300, %40, %cst_163 {dimension_numbers = #tpu.dot_dimension_numbers<[1], [0], [0], [1], [0, 0, 1, 1], [], []>} : vector<128x32xbf16>, vector<32x64xbf16>, vector<128x64xf32> -> vector<128x64xf32>
    %302 = arith.addf %298, %301 : vector<128x64xf32>
    %c801 = arith.constant 801 : index
    %c0_164 = arith.constant 0 : index
    %303 = vector.load %arg9[%c801, %c0_164] : memref<1024x32xf32, #tpu.memory_space<vmem>>, vector<128x32xf32>
    %304 = arith.truncf %303 : vector<128x32xf32> to vector<128x32xbf16>
    %cst_165 = arith.constant dense<0.000000e+00> : vector<128x64xf32>
    %305 = tpu.matmul %304, %42, %cst_165 {dimension_numbers = #tpu.dot_dimension_numbers<[1], [0], [0], [1], [0, 0, 1, 1], [], []>} : vector<128x32xbf16>, vector<32x64xbf16>, vector<128x64xf32> -> vector<128x64xf32>
    %306 = arith.addf %302, %305 : vector<128x64xf32>
    %c831 = arith.constant 831 : index
    %c0_166 = arith.constant 0 : index
    %307 = vector.load %arg9[%c831, %c0_166] : memref<1024x32xf32, #tpu.memory_space<vmem>>, vector<128x32xf32>
    %308 = arith.truncf %307 : vector<128x32xf32> to vector<128x32xbf16>
    %cst_167 = arith.constant dense<0.000000e+00> : vector<128x64xf32>
    %309 = tpu.matmul %308, %44, %cst_167 {dimension_numbers = #tpu.dot_dimension_numbers<[1], [0], [0], [1], [0, 0, 1, 1], [], []>} : vector<128x32xbf16>, vector<32x64xbf16>, vector<128x64xf32> -> vector<128x64xf32>
    %310 = arith.addf %306, %309 : vector<128x64xf32>
    %c832 = arith.constant 832 : index
    %c0_168 = arith.constant 0 : index
    %311 = vector.load %arg9[%c832, %c0_168] : memref<1024x32xf32, #tpu.memory_space<vmem>>, vector<128x32xf32>
    %312 = arith.truncf %311 : vector<128x32xf32> to vector<128x32xbf16>
    %cst_169 = arith.constant dense<0.000000e+00> : vector<128x64xf32>
    %313 = tpu.matmul %312, %46, %cst_169 {dimension_numbers = #tpu.dot_dimension_numbers<[1], [0], [0], [1], [0, 0, 1, 1], [], []>} : vector<128x32xbf16>, vector<32x64xbf16>, vector<128x64xf32> -> vector<128x64xf32>
    %314 = arith.addf %310, %313 : vector<128x64xf32>
    %c833 = arith.constant 833 : index
    %c0_170 = arith.constant 0 : index
    %315 = vector.load %arg9[%c833, %c0_170] : memref<1024x32xf32, #tpu.memory_space<vmem>>, vector<128x32xf32>
    %316 = arith.truncf %315 : vector<128x32xf32> to vector<128x32xbf16>
    %cst_171 = arith.constant dense<0.000000e+00> : vector<128x64xf32>
    %317 = tpu.matmul %316, %48, %cst_171 {dimension_numbers = #tpu.dot_dimension_numbers<[1], [0], [0], [1], [0, 0, 1, 1], [], []>} : vector<128x32xbf16>, vector<32x64xbf16>, vector<128x64xf32> -> vector<128x64xf32>
    %318 = arith.addf %314, %317 : vector<128x64xf32>
    %c863 = arith.constant 863 : index
    %c0_172 = arith.constant 0 : index
    %319 = vector.load %arg9[%c863, %c0_172] : memref<1024x32xf32, #tpu.memory_space<vmem>>, vector<128x32xf32>
    %320 = arith.truncf %319 : vector<128x32xf32> to vector<128x32xbf16>
    %cst_173 = arith.constant dense<0.000000e+00> : vector<128x64xf32>
    %321 = tpu.matmul %320, %50, %cst_173 {dimension_numbers = #tpu.dot_dimension_numbers<[1], [0], [0], [1], [0, 0, 1, 1], [], []>} : vector<128x32xbf16>, vector<32x64xbf16>, vector<128x64xf32> -> vector<128x64xf32>
    %322 = arith.addf %318, %321 : vector<128x64xf32>
    %c864 = arith.constant 864 : index
    %c0_174 = arith.constant 0 : index
    %323 = vector.load %arg9[%c864, %c0_174] : memref<1024x32xf32, #tpu.memory_space<vmem>>, vector<128x32xf32>
    %324 = arith.truncf %323 : vector<128x32xf32> to vector<128x32xbf16>
    %cst_175 = arith.constant dense<0.000000e+00> : vector<128x64xf32>
    %325 = tpu.matmul %324, %52, %cst_175 {dimension_numbers = #tpu.dot_dimension_numbers<[1], [0], [0], [1], [0, 0, 1, 1], [], []>} : vector<128x32xbf16>, vector<32x64xbf16>, vector<128x64xf32> -> vector<128x64xf32>
    %326 = arith.addf %322, %325 : vector<128x64xf32>
    %c865 = arith.constant 865 : index
    %c0_176 = arith.constant 0 : index
    %327 = vector.load %arg9[%c865, %c0_176] : memref<1024x32xf32, #tpu.memory_space<vmem>>, vector<128x32xf32>
    %328 = arith.truncf %327 : vector<128x32xf32> to vector<128x32xbf16>
    %cst_177 = arith.constant dense<0.000000e+00> : vector<128x64xf32>
    %329 = tpu.matmul %328, %54, %cst_177 {dimension_numbers = #tpu.dot_dimension_numbers<[1], [0], [0], [1], [0, 0, 1, 1], [], []>} : vector<128x32xbf16>, vector<32x64xbf16>, vector<128x64xf32> -> vector<128x64xf32>
    %330 = arith.addf %326, %329 : vector<128x64xf32>
    %331 = vector.broadcast %55 : vector<1x64xf32> to vector<128x64xf32>
    %332 = arith.addf %330, %331 : vector<128x64xf32>
    %cst_178 = arith.constant 0.000000e+00 : f32
    %333 = vector.broadcast %cst_178 : f32 to vector<128x64xf32>
    %334 = arith.maximumf %332, %333 : vector<128x64xf32>
    %c768 = arith.constant 768 : index
    %c0_179 = arith.constant 0 : index
    %335 = vector.load %arg10[%c768, %c0_179] : memref<896x64xf32, #tpu.memory_space<vmem>>, vector<128x64xf32>
    tpu.vector_store %arg10[%c768, %c0_179], %334 {strides = array<i32>} : memref<896x64xf32, #tpu.memory_space<vmem>>, vector<128x64xf32>,
    %c0_180 = arith.constant 0 : index
    %c0_181 = arith.constant 0 : index
    %336 = vector.load %arg10[%c0_180, %c0_181] : memref<896x64xf32, #tpu.memory_space<vmem>>, vector<860x64xf32>
    %c1_182 = arith.constant 1 : index
    %c0_183 = arith.constant 0 : index
    %337 = vector.load %arg10[%c1_182, %c0_183] : memref<896x64xf32, #tpu.memory_space<vmem>>, vector<860x64xf32>
    %338 = arith.maximumf %336, %337 : vector<860x64xf32>
    %c32_184 = arith.constant 32 : index
    %c0_185 = arith.constant 0 : index
    %339 = vector.load %arg10[%c32_184, %c0_185] : memref<896x64xf32, #tpu.memory_space<vmem>>, vector<860x64xf32>
    %c33_186 = arith.constant 33 : index
    %c0_187 = arith.constant 0 : index
    %340 = vector.load %arg10[%c33_186, %c0_187] : memref<896x64xf32, #tpu.memory_space<vmem>>, vector<860x64xf32>
    %341 = arith.maximumf %339, %340 : vector<860x64xf32>
    %342 = arith.maximumf %338, %341 : vector<860x64xf32>
    %343 = arith.truncf %342 : vector<860x64xf32> to vector<860x64xbf16>
    %c0_188 = arith.constant 0 : index
    %c0_189 = arith.constant 0 : index
    %344 = vector.load %arg6[%c0_188, %c0_189] : memref<98x860xbf16, #tpu.memory_space<vmem>>, vector<98x860xbf16>
    %cst_190 = arith.constant dense<0.000000e+00> : vector<98x64xf32>
    %345 = tpu.matmul %344, %343, %cst_190 {dimension_numbers = #tpu.dot_dimension_numbers<[1], [0], [0], [1], [0, 0, 1, 1], [], []>} : vector<98x860xbf16>, vector<860x64xbf16>, vector<98x64xf32> -> vector<98x64xf32>
    %c0_191 = arith.constant 0 : index
    %c0_192 = arith.constant 0 : index
    %346 = vector.load %arg7[%c0_191, %c0_192] : memref<98x860xbf16, #tpu.memory_space<vmem>>, vector<98x860xbf16>
    %cst_193 = arith.constant dense<0.000000e+00> : vector<98x64xf32>
    %347 = tpu.matmul %346, %343, %cst_193 {dimension_numbers = #tpu.dot_dimension_numbers<[1], [0], [0], [1], [0, 0, 1, 1], [], []>} : vector<98x860xbf16>, vector<860x64xbf16>, vector<98x64xf32> -> vector<98x64xf32>
    %348 = tpu.concatenate %345, %347 in 1 : vector<98x64xf32>, vector<98x64xf32> -> vector<98x128xf32>
    %349 = arith.truncf %348 : vector<98x128xf32> to vector<98x128xbf16>
    %c0_194 = arith.constant 0 : index
    %c0_195 = arith.constant 0 : index
    %c0_196 = arith.constant 0 : index
    %350 = vector.load %arg8[%c0_194, %c0_195, %c0_196] : memref<1x98x128xbf16, #tpu.memory_space<vmem>>, vector<1x98x128xbf16>
    %351 = vector.shape_cast %350 : vector<1x98x128xbf16> to vector<98x128xbf16>
    %352 = vector.shape_cast %349 : vector<98x128xbf16> to vector<1x98x128xbf16>
    tpu.vector_store %arg8[%c0_194, %c0_195, %c0_196], %352 {strides = array<i32>} : memref<1x98x128xbf16, #tpu.memory_space<vmem>>, vector<1x98x128xbf16>,
    return
  }
  func.func @transform_0(%arg0: i32) -> (i32, i32, i32) {
    %c0_i32 = arith.constant 0 : i32
    %c0_i32_0 = arith.constant 0 : i32
    %c0_i32_1 = arith.constant 0 : i32
    return %arg0, %c0_i32, %c0_i32_0 : i32, i32, i32
  }
  func.func @transform_1(%arg0: i32) -> (i32, i32) {
    %c0_i32 = arith.constant 0 : i32
    %c0_i32_0 = arith.constant 0 : i32
    %c0_i32_1 = arith.constant 0 : i32
    return %c0_i32, %c0_i32_0 : i32, i32
  }
  func.func @transform_2(%arg0: i32) -> (i32, i32) {
    %c0_i32 = arith.constant 0 : i32
    %c0_i32_0 = arith.constant 0 : i32
    %c0_i32_1 = arith.constant 0 : i32
    return %c0_i32, %c0_i32_0 : i32, i32
  }
  func.func @transform_3(%arg0: i32) -> (i32, i32, i32) {
    %c0_i32 = arith.constant 0 : i32
    %c0_i32_0 = arith.constant 0 : i32
    %c0_i32_1 = arith.constant 0 : i32
    %c0_i32_2 = arith.constant 0 : i32
    return %c0_i32, %c0_i32_0, %c0_i32_1 : i32, i32, i32
  }
  func.func @transform_4(%arg0: i32) -> (i32, i32) {
    %c0_i32 = arith.constant 0 : i32
    %c0_i32_0 = arith.constant 0 : i32
    %c0_i32_1 = arith.constant 0 : i32
    return %c0_i32, %c0_i32_0 : i32, i32
  }
  func.func @transform_5(%arg0: i32) -> (i32, i32) {
    %c0_i32 = arith.constant 0 : i32
    %c0_i32_0 = arith.constant 0 : i32
    %c0_i32_1 = arith.constant 0 : i32
    return %c0_i32, %c0_i32_0 : i32, i32
  }
  func.func @transform_6(%arg0: i32) -> (i32, i32) {
    %c0_i32 = arith.constant 0 : i32
    %c0_i32_0 = arith.constant 0 : i32
    %c0_i32_1 = arith.constant 0 : i32
    return %c0_i32, %c0_i32_0 : i32, i32
  }
  func.func @transform_7(%arg0: i32) -> (i32, i32, i32) {
    %c0_i32 = arith.constant 0 : i32
    %c0_i32_0 = arith.constant 0 : i32
    %c0_i32_1 = arith.constant 0 : i32
    return %arg0, %c0_i32, %c0_i32_0 : i32, i32, i32
  }
}

module attributes {stable_mosaic.version = 11 : i64} {
  func.func @_mlp_kernel(%arg0: i32, %arg1: memref<8x6272xbf16, #tpu.memory_space<vmem>>, %arg2: memref<6272x128xbf16, #tpu.memory_space<vmem>>, %arg3: memref<1x128xf32, #tpu.memory_space<vmem>>, %arg4: memref<128x10xbf16, #tpu.memory_space<vmem>>, %arg5: memref<1x10xf32, #tpu.memory_space<vmem>>, %arg6: memref<8x10xf32, #tpu.memory_space<vmem>>, %arg7: memref<8x128xf32, #tpu.memory_space<vmem>>) attributes {dimension_semantics = [#tpu.dimension_semantics<arbitrary>], iteration_bounds = array<i64: 2>, scalar_prefetch = 0 : i64, scratch_operands = 1 : i64, tpu.core_type = #tpu.core_type<tc>, window_params = [{transform_indices = @transform_0, window_bounds = array<i64: 8, 6272>}, {transform_indices = @transform_1, window_bounds = array<i64: 6272, 128>}, {pipeline_mode = #tpu.pipeline_mode<synchronous>, transform_indices = @transform_2, window_bounds = array<i64: 1, 128>}, {pipeline_mode = #tpu.pipeline_mode<synchronous>, transform_indices = @transform_3, window_bounds = array<i64: 128, 10>}, {pipeline_mode = #tpu.pipeline_mode<synchronous>, transform_indices = @transform_4, window_bounds = array<i64: 1, 10>}, {pipeline_mode = #tpu.pipeline_mode<synchronous>, transform_indices = @transform_5, window_bounds = array<i64: 8, 10>}]} {
    %c0_i32 = arith.constant 0 : i32
    %0 = arith.cmpi eq, %arg0, %c0_i32 : i32
    %1 = arith.extui %0 : i1 to i32
    %c0_i32_0 = arith.constant 0 : i32
    %2 = arith.cmpi ne, %1, %c0_i32_0 : i32
    scf.if %2 {
      %cst_9 = arith.constant 0.000000e+00 : f32
      %12 = vector.broadcast %cst_9 : f32 to vector<8x128xf32>
      %c0_10 = arith.constant 0 : index
      %c0_11 = arith.constant 0 : index
      %13 = vector.load %arg7[%c0_10, %c0_11] : memref<8x128xf32, #tpu.memory_space<vmem>>, vector<8x128xf32>
      tpu.vector_store %arg7[%c0_10, %c0_11], %12 {strides = array<i32>} : memref<8x128xf32, #tpu.memory_space<vmem>>, vector<8x128xf32>,
    } else {
    }
    %c0 = arith.constant 0 : index
    %c0_1 = arith.constant 0 : index
    %3 = vector.load %arg7[%c0, %c0_1] : memref<8x128xf32, #tpu.memory_space<vmem>>, vector<8x128xf32>
    %c0_2 = arith.constant 0 : index
    %c0_3 = arith.constant 0 : index
    %4 = vector.load %arg1[%c0_2, %c0_3] : memref<8x6272xbf16, #tpu.memory_space<vmem>>, vector<8x6272xbf16>
    %c0_4 = arith.constant 0 : index
    %c0_5 = arith.constant 0 : index
    %5 = vector.load %arg2[%c0_4, %c0_5] : memref<6272x128xbf16, #tpu.memory_space<vmem>>, vector<6272x128xbf16>
    %cst = arith.constant dense<0.000000e+00> : vector<8x128xf32>
    %6 = tpu.matmul %4, %5, %cst {dimension_numbers = #tpu.dot_dimension_numbers<[1], [0], [0], [1], [0, 0, 1, 1], [], []>} : vector<8x6272xbf16>, vector<6272x128xbf16>, vector<8x128xf32> -> vector<8x128xf32>
    %7 = arith.addf %3, %6 : vector<8x128xf32>
    %c0_6 = arith.constant 0 : index
    %c0_7 = arith.constant 0 : index
    %8 = vector.load %arg7[%c0_6, %c0_7] : memref<8x128xf32, #tpu.memory_space<vmem>>, vector<8x128xf32>
    tpu.vector_store %arg7[%c0_6, %c0_7], %7 {strides = array<i32>} : memref<8x128xf32, #tpu.memory_space<vmem>>, vector<8x128xf32>,
    %c1_i32 = arith.constant 1 : i32
    %9 = arith.cmpi eq, %arg0, %c1_i32 : i32
    %10 = arith.extui %9 : i1 to i32
    %c0_i32_8 = arith.constant 0 : i32
    %11 = arith.cmpi ne, %10, %c0_i32_8 : i32
    scf.if %11 {
      %c0_9 = arith.constant 0 : index
      %c0_10 = arith.constant 0 : index
      %12 = vector.load %arg7[%c0_9, %c0_10] : memref<8x128xf32, #tpu.memory_space<vmem>>, vector<8x128xf32>
      %c0_11 = arith.constant 0 : index
      %c0_12 = arith.constant 0 : index
      %13 = vector.load %arg3[%c0_11, %c0_12] : memref<1x128xf32, #tpu.memory_space<vmem>>, vector<1x128xf32>
      %14 = vector.broadcast %13 : vector<1x128xf32> to vector<8x128xf32>
      %15 = arith.addf %12, %14 : vector<8x128xf32>
      %cst_13 = arith.constant 0.000000e+00 : f32
      %16 = vector.broadcast %cst_13 : f32 to vector<8x128xf32>
      %17 = arith.maximumf %15, %16 : vector<8x128xf32>
      %18 = arith.truncf %17 : vector<8x128xf32> to vector<8x128xbf16>
      %c0_14 = arith.constant 0 : index
      %c0_15 = arith.constant 0 : index
      %19 = vector.load %arg4[%c0_14, %c0_15] : memref<128x10xbf16, #tpu.memory_space<vmem>>, vector<128x10xbf16>
      %cst_16 = arith.constant dense<0.000000e+00> : vector<8x10xf32>
      %20 = tpu.matmul %18, %19, %cst_16 {dimension_numbers = #tpu.dot_dimension_numbers<[1], [0], [0], [1], [0, 0, 1, 1], [], []>} : vector<8x128xbf16>, vector<128x10xbf16>, vector<8x10xf32> -> vector<8x10xf32>
      %c0_17 = arith.constant 0 : index
      %c0_18 = arith.constant 0 : index
      %21 = vector.load %arg5[%c0_17, %c0_18] : memref<1x10xf32, #tpu.memory_space<vmem>>, vector<1x10xf32>
      %22 = vector.broadcast %21 : vector<1x10xf32> to vector<8x10xf32>
      %23 = arith.addf %20, %22 : vector<8x10xf32>
      %c0_19 = arith.constant 0 : index
      %c0_20 = arith.constant 0 : index
      %24 = vector.load %arg6[%c0_19, %c0_20] : memref<8x10xf32, #tpu.memory_space<vmem>>, vector<8x10xf32>
      tpu.vector_store %arg6[%c0_19, %c0_20], %23 {strides = array<i32>} : memref<8x10xf32, #tpu.memory_space<vmem>>, vector<8x10xf32>,
    } else {
    }
    return
  }
  func.func @transform_0(%arg0: i32) -> (i32, i32) {
    %c0_i32 = arith.constant 0 : i32
    %c0_i32_0 = arith.constant 0 : i32
    return %c0_i32, %arg0 : i32, i32
  }
  func.func @transform_1(%arg0: i32) -> (i32, i32) {
    %c0_i32 = arith.constant 0 : i32
    %c0_i32_0 = arith.constant 0 : i32
    return %arg0, %c0_i32 : i32, i32
  }
  func.func @transform_2(%arg0: i32) -> (i32, i32) {
    %c0_i32 = arith.constant 0 : i32
    %c0_i32_0 = arith.constant 0 : i32
    %c0_i32_1 = arith.constant 0 : i32
    return %c0_i32, %c0_i32_0 : i32, i32
  }
  func.func @transform_3(%arg0: i32) -> (i32, i32) {
    %c0_i32 = arith.constant 0 : i32
    %c0_i32_0 = arith.constant 0 : i32
    %c0_i32_1 = arith.constant 0 : i32
    return %c0_i32, %c0_i32_0 : i32, i32
  }
  func.func @transform_4(%arg0: i32) -> (i32, i32) {
    %c0_i32 = arith.constant 0 : i32
    %c0_i32_0 = arith.constant 0 : i32
    %c0_i32_1 = arith.constant 0 : i32
    return %c0_i32, %c0_i32_0 : i32, i32
  }
  func.func @transform_5(%arg0: i32) -> (i32, i32) {
    %c0_i32 = arith.constant 0 : i32
    %c0_i32_0 = arith.constant 0 : i32
    %c0_i32_1 = arith.constant 0 : i32
    return %c0_i32, %c0_i32_0 : i32, i32
  }
}

</mosaic_0001>

<bundles_post_ra>
// kernel: cnn_forward.2
= control target key start
LH: loop header
LB: loop body
LE: loop exit
PB: predicated region body
PF: predicated region fallthrough
CT: control target
= control target key end

     0   :  { %12 = vsyncpa [#allocation5], 0  ;;  %s24248_s0 = inlined_call_operand.vmem [shape: bf16[2,896,9], index: 0, kind: input, shape index: {}]   ;;  %s24249_s1 = inlined_call_operand.vmem [shape: bf16[9,32], index: 1, kind: input, shape index: {}]   ;;  %s24250_s2 = inlined_call_operand.hbm [shape: f32[1,32], index: 2, kind: input, shape index: {}]   ;;  %s24251_s3 = inlined_call_operand.vmem [shape: bf16[9,32,64], index: 3, kind: input, shape index: {}]   ;;  %s24252_s4 = inlined_call_operand.hbm [shape: f32[1,64], index: 4, kind: input, shape index: {}]   ;;  %s24253_s5 = inlined_call_operand.hbm [shape: bf16[98,860], index: 5, kind: input, shape index: {}]   ;;  %s24254_s6 = inlined_call_operand.hbm [shape: bf16[98,860], index: 6, kind: input, shape index: {}]   ;;  %s24255_s7 = inlined_call_operand.vmem [shape: bf16[2,98,128], index: 7, kind: output, shape index: {}]  }
   0x1   :  { %13 = vsyncpa [#allocation7], 0 }
   0x2   :  { %14 = vsyncpa [#allocation10], 0  ;;  %s20816_s24 = smov 0  }
   0x3 LB: > { %s20766_s25 = smov [#allocation6]   ;;  %s20822_s27 = sadd.s32 4294967295, %s20764_s24   ;;  %s20764_s24 = sphi %s20816_s24, %s20_s24  }
   0x4   : > { %s233_s26 = sshll.u32 %s20766_s25, 4  ;;  %p16012_p0 = scmp.ge.s32.totalorder %s20764_s24, 1  ;;  %s20827_s26 = int_to_ptr.vmem [resolvable:$true] %s233_s26 }
   0x5   : > { %p203_p1 = scmp.lt.s32.totalorder %s20764_s24, 3  ;;  %p24256_p2 = scmp.eq.s32.totalorder %s20822_s27, 0 }
   0x6   : > { %s20767_s29 = smov [#allocation4]   ;;  %s20768_s8 = smov [#allocation8]  }
   0x7   : > { %p20829_p3 = pnand %p16012_p0, %p203_p1  ;;  %s219_s30 = sshll.u32 %s20767_s29, 4  ;;  %s20835_s30 = int_to_ptr.vmem [resolvable:$true] %s219_s30 }
   0x8   : > { %s243_s9 = sshll.u32 %s20768_s8, 4  ;;  %s20769_s11 = smov [#allocation9]   ;;  %s20843_s9 = int_to_ptr.vmem [resolvable:$true] %s243_s9 }
   0x9   : > { %s24279_s28 = scalar_select %p20829_p3, 1, 0 }
   0xa   : > { %p20300_p4 = pneg %p20829_p3  ;;  %s20845_s12 = sshll.u32 %s20769_s11, 4  ;;  %s257_s12 = int_to_ptr.vmem [resolvable:$true] %s20845_s12 }
   0xb   : > { %s20634_s15 = scalar_lea.hbm %s24252_s4, 16 }
   0xc   : > { %p20839_p5 = pnand %p24256_p2, %p20300_p4  ;;  %p20635_p6 = scmp.ne.s32.totalorder %s24252_s4, %s20634_s15 }
   0xd   : > { %p20641_p10 = scmp.lt.u32.totalorder %s20634_s15, %s24252_s4 }
   0xe   : > { %p20855_p7 = pneg %p20839_p5 }
  0x10   : > { %p20637_p8 = pnand %p20855_p7, %p20635_p6 }
  0x12   : > { %p20638_p9 = pneg %p20637_p8 }
  0x14   : > { %p20643_p11 = pnand %p20641_p10, %p20638_p9 }
  0x16   : > { %20646 = shalt.err (!%p20643_p11)
}
  0x17   : > { %s20647_s21 = scalar_lea.vmem %s20827_s26, 16  ;;  %s20654_s22 = scalar_lea.vmem %s20827_s26, 32 }
  0x18   : > { %p20648_p12 = scmp.ne.s32.totalorder %s20827_s26, %s20647_s21  ;;  %p20655_p1 = scmp.lt.s32.totalorder %s20827_s26, %s20827_s26 }
  0x19   : > { %p20656_p4 = scmp.lt.s32.totalorder %s20654_s22, %s20647_s21 }
  0x1a   : > { %p20650_p13 = pnand %p20648_p12, %p20855_p7 }
  0x1b   : > { %p20657_p6 = por %p20656_p4, %p20655_p1 }
  0x1c   : > { %p20651_p0 = pneg %p20650_p13 }
  0x1e   : > { %p20658_p8 = pnand %p20657_p6, %p20651_p0 }
  0x20   : > { %20661 = shalt.err (!%p20658_p8)
}
  0x21   : > { %20306 = dma.hbm_to_vmem [thread:$0]  (!%p20839_p5), %s24252_s4, 16, %s20827_s26, [#allocation7]  }
  0x22   : > { %s20662_s11 = scalar_lea.hbm %s24250_s2, 16 }
  0x23   : > { %p20663_p9 = scmp.ne.s32.totalorder %s24250_s2, %s20662_s11  ;;  %p20669_p12 = scmp.lt.u32.totalorder %s20662_s11, %s24250_s2 }
  0x25   : > { %p20665_p10 = pnand %p20663_p9, %p20855_p7 }
  0x27   : > { %p20666_p11 = pneg %p20665_p10 }
  0x29   : > { %p20671_p13 = pnand %p20669_p12, %p20666_p11 }
  0x2b   : > { %20674 = shalt.err (!%p20671_p13)
}
  0x2c   : > { %s20675_s26 = scalar_lea.vmem %s20835_s30, 16  ;;  %s20682_s17 = scalar_lea.vmem %s20835_s30, 32 }
  0x2d   : > { %p20676_p0 = scmp.ne.s32.totalorder %s20835_s30, %s20675_s26  ;;  %p20683_p6 = scmp.lt.s32.totalorder %s20835_s30, %s20835_s30 }
  0x2e   : > { %p20684_p8 = scmp.lt.s32.totalorder %s20682_s17, %s20675_s26 }
  0x2f   : > { %p20678_p1 = pnand %p20676_p0, %p20855_p7 }
  0x30   : > { %p20685_p9 = por %p20684_p8, %p20683_p6 }
  0x31   : > { %p20679_p4 = pneg %p20678_p1 }
  0x33   : > { %p20686_p10 = pnand %p20685_p9, %p20679_p4 }
  0x35   : > { %20689 = shalt.err (!%p20686_p10)
}
  0x36   : > { %20303 = dma.hbm_to_vmem [thread:$0]  (!%p20839_p5), %s24250_s2, 16, %s20835_s30, [#allocation5]  }
  0x37   : > { %s20690_s23 = scalar_lea.hbm %s24253_s5, 5824 }
  0x38   : > { %p20691_p11 = scmp.ne.s32.totalorder %s24253_s5, %s20690_s23  ;;  %p20697_p0 = scmp.lt.u32.totalorder %s20690_s23, %s24253_s5 }
  0x3a   : > { %p20693_p12 = pnand %p20691_p11, %p20855_p7 }
  0x3c   : > { %p20694_p13 = pneg %p20693_p12 }
  0x3e   : > { %p20699_p1 = pnand %p20697_p0, %p20694_p13 }
  0x40   : > { %20702 = shalt.err (!%p20699_p1)
}
  0x41   : > { %s20703_s30 = scalar_lea.vmem %s20843_s9, 5824  ;;  %p20711_p9 = scmp.lt.s32.totalorder %s20843_s9, %s20843_s9 }
  0x42   : > { %p20704_p4 = scmp.ne.s32.totalorder %s20843_s9, %s20703_s30  ;;  %p20712_p10 = scmp.lt.s32.totalorder %s20703_s30, %s20703_s30 }
  0x44   : > { %p20706_p6 = pnand %p20704_p4, %p20855_p7  ;;  %p20713_p11 = por %p20712_p10, %p20711_p9 }
  0x46   : > { %p20707_p8 = pneg %p20706_p6 }
  0x48   : > { %p20714_p12 = pnand %p20713_p11, %p20707_p8 }
  0x4a   : > { %20717 = shalt.err (!%p20714_p12)
}
  0x4b   : > { %s20770_s13 = smov 448   ;;  %s20771_s14 = smov 28  }
  0x4c   : > { %20309 = dma.hbm_to_vmem [thread:$0]  (!%p20839_p5), %s24253_s5, 5824, %s20843_s9, [#allocation7], %s20770_s13, %s20770_s13, %s20771_s14  }
  0x4d   : > { %s20718_s19 = scalar_lea.hbm %s24254_s6, 5824 }
  0x4e   : > { %p20719_p13 = scmp.ne.s32.totalorder %s24254_s6, %s20718_s19  ;;  %p20725_p4 = scmp.lt.u32.totalorder %s20718_s19, %s24254_s6 }
  0x50   : > { %p20721_p0 = pnand %p20719_p13, %p20855_p7 }
  0x52   : > { %p20722_p1 = pneg %p20721_p0 }
  0x54   : > { %p20727_p6 = pnand %p20725_p4, %p20722_p1 }
  0x56   : > { %20730 = shalt.err (!%p20727_p6)
}
  0x57   : > { %s20731_s25 = scalar_lea.vmem %s257_s12, 5824  ;;  %p20739_p11 = scmp.lt.s32.totalorder %s257_s12, %s257_s12 }
  0x58   : > { %p20732_p8 = scmp.ne.s32.totalorder %s257_s12, %s20731_s25  ;;  %p20740_p12 = scmp.lt.s32.totalorder %s20731_s25, %s20731_s25 }
  0x5a   : > { %p20734_p9 = pnand %p20732_p8, %p20855_p7  ;;  %p20741_p2 = por %p20740_p12, %p20739_p11 }
  0x5c   : > { %p20735_p10 = pneg %p20734_p9 }
  0x5e   : > { %p20742_p3 = pnand %p20741_p2, %p20735_p10 }
  0x60   : > { %20745 = shalt.err (!%p20742_p3)
}
  0x61   : > { %20312 = dma.hbm_to_vmem [thread:$0]  (!%p20839_p5), %s24254_s6, 5824, %s257_s12, [#allocation10], %s20770_s13, %s20770_s13, %s20771_s14  }
  0x62   : > { %p24282_p13 = scmp.ne.s32.totalorder %s24279_s28, 0 }
  0x64   : > { %280 = sbr.rel (%p24282_p13) target bundleno = 2227 (0x8b3), region = 48 }
  0x6b   : > { %p24283_p0 = scmp.eq.s32.totalorder %s20822_s27, 0 }
  0x6d   : > { %20751 = dma.done.wait (%p24283_p0), [#allocation5], 16   ;;  %p24284_p7 = pmov %p24283_p0 }
  0x6e   : > { %p24285_p1 = pmov %p24283_p0 }
  0x6f   : > { %20753 = vsyncadd (%p24284_p7), [#allocation5], 4294967280 }
  0x70   : > { %20755 = dma.done.wait (%p24285_p1), [#allocation7], 5840   ;;  %p24286_p2 = pmov %p24283_p0 }
  0x71   : > { %p24287_p3 = pmov %p24283_p0 }
  0x72   : > { %20757 = vsyncadd (%p24286_p2), [#allocation7], 4294961456 }
  0x73   : > { %20759 = dma.done.wait (%p24287_p3), [#allocation10], 5824   ;;  %p24288_p5 = pmov %p24283_p0 }
  0x74   : > { %vm3415_vm0 = vcmask 261120   ;;  %vm910_vm1 = vcmask 1043456   ;;  %v24258_v0 = vmov 0.0   ;;  %p324_p4 = scmp.lt.s32.totalorder %s20822_s27, 1  ;;  %vm911_vm2 = vcmask 1044480   ;;  %v20426_v37 = vld [vmem:[%s24251_s3 + $0x10] sm:$0xff]  }
  0x75   : > { %20761 = vsyncadd (%p24288_p5), [#allocation10], 4294961472  ;;  %3419 = vst.msk [vmem:[#allocation2 + $0x18] sm:$0xff] %vm3415_vm0, %v24258_v0  ;;  %v20773_v1 = vmov 65535   ;;  %vm741_vm3 = vcmask 72704   ;;  %v20427_v38 = vld [vmem:[%s24251_s3 + $0x18] sm:$0xff]  }
  0x76   : > { %3420 = vst.msk [vmem:[#allocation2 + $0x20] sm:$0xff] %vm3415_vm0, %v24258_v0  ;;  %3421 = vst.msk [vmem:[#allocation2 + $0x28] sm:$0xff] %vm3415_vm0, %v24258_v0  ;;  %v912_v2 = vsel %vm910_vm1, 4294967295, %v20773_v1  ;;  %s24373_s27 = smov (!%p324_p4, %s20822_s27), 1  ;;  %v20369_v4 = vld [vmem:[%s24249_s1] sm:$0x1f]  }
  0x77   : > { %3422 = vst.msk [vmem:[#allocation2 + $0x30] sm:$0xff] %vm3415_vm0, %v24258_v0  ;;  %3423 = vst.msk [vmem:[#allocation2 + $0x38] sm:$0xff] %vm3415_vm0, %v24258_v0  ;;  %s20282_s28 = smul.u32 448, %s24373_s27  ;;  %v913_v3 = vsel %vm911_vm2, %v912_v2, 0  ;;  %v21076_v52 = vld [vmem:[%s24251_s3] sm:$0xff]   ;;  %v21086_v54 = vld [vmem:[%s24251_s3 + $0x8] sm:$0xff]  }
  0x78   : > { %3536 = vst.msk [vmem:[#allocation2 + $0x3c0] sm:$0xff] %vm3415_vm0, %v24258_v0  ;;  %3537 = vst.msk [vmem:[#allocation2 + $0x3c8] sm:$0xff] %vm3415_vm0, %v24258_v0  ;;  %v915_v6 = vand.u32 %v20369_v4, %v913_v3  ;;  %v21108_v63 = vld [vmem:[%s24251_s3 + $0x20] sm:$0xff]   ;;  %s20775_s18 = smov 64   ;;  %s20283_s8 = smul.u32 52, %s24373_s27 }
  0x79   : > { %3538 = vst.msk [vmem:[#allocation2 + $0x3d0] sm:$0xff] %vm3415_vm0, %v24258_v0  ;;  %3539 = vst.msk [vmem:[#allocation2 + $0x3d8] sm:$0xff] %vm3415_vm0, %v24258_v0  ;;  %s20988_s11 = scalar_lea.vmem %s24248_s0, %s20282_s28 }
  0x7a   : > { %3540 = vst.msk [vmem:[#allocation2 + $0x3e0] sm:$0xff] %vm3415_vm0, %v24258_v0  ;;  %v20370_v5 = vld [vmem:[%s20988_s11] sm:$0xff]   ;;  %17930 = vmatprep.subr.bf16.mxu0 %v915_v6  ;;  %v20371_v7 = vld [vmem:[%s20988_s11 + $0x8] sm:$0xff]   ;;  %19384 = vmatprep.subr.bf16.mxu1 %v915_v6  ;;  %v20372_v8 = vld [vmem:[%s20988_s11 + $0x10] sm:$0xff]   ;;  %s24210_s13 = scalar_lea.vmem %s24255_s7, %s20283_s8 }
  0x7b   : > { %17932 = vmatprep.mubr.msk.bf16.mxu0 %vm741_vm3, %v20370_v5  ;;  %17931 = vmatpush3.bf16.msra.mxu0 %v915_v6  ;;  %v20373_v9 = vld [vmem:[%s20988_s11 + $0x18] sm:$0xff]   ;;  %v20374_v10 = vld [vmem:[%s20988_s11 + $0x20] sm:$0xff]   ;;  %v20375_v11 = vld [vmem:[%s20988_s11 + $0x28] sm:$0xff]  }
  0x7c   : > { %19385 = vmatpush3.bf16.msra.mxu1 %v915_v6  ;;  %v20376_v12 = vld [vmem:[%s20988_s11 + $0x30] sm:$0xff]   ;;  %v20377_v13 = vld [vmem:[%s20988_s11 + $0x38] sm:$0xff]   ;;  %v20378_v14 = vld [vmem:[%s20988_s11 + $0x40] sm:$0xff]   ;;  %18224 = vmatprep.subr.bf16.mxu0 %v20426_v37 }
  0x7d   : > { %v20379_v15 = vld [vmem:[%s20988_s11 + $0x48] sm:$0xff]   ;;  %v20380_v16 = vld [vmem:[%s20988_s11 + $0x50] sm:$0xff]   ;;  %v20381_v17 = vld [vmem:[%s20988_s11 + $0x58] sm:$0xff]   ;;  %18044 = vmatprep.subr.bf16.mxu1 %v20426_v37 }
  0x7e   : > { %17933 = vmatmul.mubr.msk.bf16.vlgmr.msra.gmra.mrb[0].mxu0 %vm741_vm3, %v20371_v7  ;;  %v20382_v18 = vld [vmem:[%s20988_s11 + $0x60] sm:$0xff]   ;;  %v20383_v19 = vld [vmem:[%s20988_s11 + $0x68] sm:$0xff]   ;;  %v20384_v20 = vld [vmem:[%s20988_s11 + $0x70] sm:$0xff]  }
  0x7f   : > { %17936 = vmatprep.mubr.msk.bf16.mxu0 %vm741_vm3, %v20372_v8  ;;  %v20385_v21 = vld [vmem:[%s20988_s11 + $0x78] sm:$0xff]   ;;  %v20386_v22 = vld [vmem:[%s20988_s11 + $0x80] sm:$0xff]   ;;  %v20418_v23 = vld [vmem:[%s20988_s11 + $0x190] sm:$0xff]   ;;  %18225 = vmatpush3.bf16.msra.mxu0 %v20426_v37 }
  0x80   : > { %v20419_v24 = vld [vmem:[%s20988_s11 + $0x198] sm:$0xff]   ;;  %v20387_v25 = vld [vmem:[%s20988_s11 + $0x88] sm:$0xff]   ;;  %18032 = vmatprep.mubr.msk.bf16.mxu1 %vm741_vm3, %v20418_v23  ;;  %v20388_v26 = vld [vmem:[%s20988_s11 + $0x90] sm:$0xff]   ;;  %18226 = vmatprep.subr.bf16.mxu0 %v20427_v38 }
  0x81   : > { %18033 = vmatmul.mubr.msk.bf16.vlgmr.msra.gmra.mrb[0].mxu1 %vm741_vm3, %v20419_v24  ;;  %v20422_v27 = vld [vmem:[%s20988_s11 + $0x1a0] sm:$0xff]   ;;  %v20423_v28 = vld [vmem:[%s20988_s11 + $0x1a8] sm:$0xff]   ;;  %v20424_v29 = vld [vmem:[%s20988_s11 + $0x1b0] sm:$0xff]  }
  0x82   : > { %v20389_v30 = vld [vmem:[%s20988_s11 + $0x98] sm:$0xff]   ;;  %18036 = vmatprep.mubr.msk.bf16.mxu1 %vm741_vm3, %v20422_v27  ;;  %v20390_v31 = vld [vmem:[%s20988_s11 + $0xa0] sm:$0xff]   ;;  %v20391_v33 = vld [vmem:[%s20988_s11 + $0xa8] sm:$0xff]   ;;  %18045 = vmatpush3.bf16.msra.mxu1 %v20426_v37 }
  0x83   : > { %v20425_v32 = vld [vmem:[%s20988_s11 + $0x1b8] sm:$0xff]   ;;  %v20392_v34 = vld [vmem:[%s20988_s11 + $0xb0] sm:$0xff]   ;;  %v20394_v36 = vld [vmem:[%s20988_s11 + $0xc0] sm:$0xff]   ;;  %18046 = vmatprep.subr.bf16.mxu1 %v20427_v38  ;;  %18227 = vmatpush3.bf16.msra.mxu0 %v20427_v38 }
  0x84   : > { %v20393_v35 = vld [vmem:[%s20988_s11 + $0xb8] sm:$0xff]   ;;  %v3613_v39 = vld [vmem:[#allocation2 + $0x20] sm:$0xff]  ;;  %v3614_v40 = vld [vmem:[#allocation2 + $0x28] sm:$0xff]  ;;  %18244 = vmatprep.subr.bf16.mxu0 %v21076_v52 }
  0x85   : > { %v3629_v41 = vpack.c.bf16 %v3614_v40, %v3613_v39  ;;  %v3615_v42 = vld [vmem:[#allocation2 + $0x30] sm:$0xff]  ;;  %v3616_v43 = vld [vmem:[#allocation2 + $0x38] sm:$0xff]  ;;  %v20395_v44 = vld [vmem:[%s20988_s11 + $0xc8] sm:$0xff]  }
  0x86   : > { %17937 = vmatmul.mubr.msk.bf16.gmra.mrb[4].mxu0 %vm741_vm3, %v20373_v9  ;;  %18047 = vmatpush3.bf16.msra.mxu1 %v20427_v38  ;;  %v3630_v45 = vpack.c.bf16 %v3616_v43, %v3615_v42  ;;  %v20396_v46 = vld [vmem:[%s20988_s11 + $0xd0] sm:$0xff]   ;;  %v20397_v47 = vld [vmem:[%s20988_s11 + $0xd8] sm:$0xff]   ;;  %v20398_v48 = vld [vmem:[%s20988_s11 + $0xe0] sm:$0xff]  }
  0x87   : > { %17940 = vmatprep.mubr.msk.bf16.mxu0 %vm741_vm3, %v20374_v10  ;;  %v20399_v49 = vld [vmem:[%s20988_s11 + $0xe8] sm:$0xff]   ;;  %v20400_v50 = vld [vmem:[%s20988_s11 + $0xf0] sm:$0xff]   ;;  %v20401_v51 = vld [vmem:[%s20988_s11 + $0xf8] sm:$0xff]   ;;  %18064 = vmatprep.subr.bf16.mxu1 %v21076_v52  ;;  %v1510_v10 = vlaneseq }
  0x88   : > { %v20402_v53 = vld [vmem:[%s20988_s11 + $0x100] sm:$0xff]   ;;  %v20403_v55 = vld [vmem:[%s20988_s11 + $0x108] sm:$0xff]   ;;  %v20404_v56 = vld [vmem:[%s20988_s11 + $0x110] sm:$0xff]  }
  0x89   : > { %18037 = vmatmul.mubr.msk.bf16.gmra.mrb[4].mxu1 %vm741_vm3, %v20423_v28  ;;  %v20405_v57 = vld [vmem:[%s20988_s11 + $0x118] sm:$0xff]   ;;  %v20406_v58 = vld [vmem:[%s20988_s11 + $0x120] sm:$0xff]   ;;  %v20407_v59 = vld [vmem:[%s20988_s11 + $0x128] sm:$0xff]  }
  0x8a   : > { %18040 = vmatprep.mubr.msk.bf16.mxu1 %vm741_vm3, %v20424_v29  ;;  %v20408_v60 = vld [vmem:[%s20988_s11 + $0x130] sm:$0xff]   ;;  %v20409_v61 = vld [vmem:[%s20988_s11 + $0x138] sm:$0xff]   ;;  %v20410_v62 = vld [vmem:[%s20988_s11 + $0x140] sm:$0xff]  }
  0x8b   : > { %v20411_v1 = vld [vmem:[%s20988_s11 + $0x148] sm:$0xff]   ;;  %v20412_v2 = vld [vmem:[%s20988_s11 + $0x150] sm:$0xff]   ;;  %v20413_v3 = vld [vmem:[%s20988_s11 + $0x158] sm:$0xff]  }
  0x8c   : > { %v20414_v4 = vld [vmem:[%s20988_s11 + $0x160] sm:$0xff]   ;;  %v20415_v5 = vld [vmem:[%s20988_s11 + $0x168] sm:$0xff]   ;;  %v20416_v6 = vld [vmem:[%s20988_s11 + $0x170] sm:$0xff]  }
  0x8d   : > { %v20417_v7 = vld [vmem:[%s20988_s11 + $0x178] sm:$0xff]   ;;  %v20420_v8 = vld [vmem:[%s20988_s11 + $0x180] sm:$0xff]   ;;  %v20421_v9 = vld [vmem:[%s20988_s11 + $0x188] sm:$0xff]  }
  0x8e   : > { %17941 = vmatmul.mubr.msk.bf16.gmra.mrb[8].mxu0 %vm741_vm3, %v20375_v11  ;;  %v21131_v11 = vshrl.u32 %v1510_v10, 7 }
  0x8f   : > { %17944 = vmatprep.mubr.msk.bf16.mxu0 %vm741_vm3, %v20376_v12 }
  0x90   : > { %v1514_v12 = vadd.s32 24, %v21131_v11  ;;  %v1515_v24 = vadd.s32 32, %v21131_v11  ;;  %v1518_v27 = vadd.s32 56, %v21131_v11  ;;  %v1519_v42 = vadd.s32 64, %v21131_v11 }
  0x91   : > { %18041 = vmatmul.mubr.msk.bf16.gmra.mrb[8].mxu1 %vm741_vm3, %v20425_v32 }
  0x92   : > { %18048 = vmatprep.mubr.msk.bf16.mxu1 %vm3415_vm0, %v3629_v41  ;;  %v1655_v32 = vand.u32 31, %v1515_v24 }
  0x94   : > { %vm2971_vm6 = vcmp.ge.s32.totalorder %v1655_v32, 1  ;;  %v1527_v32 = vadd.s32 128, %v21131_v11 }
  0x96   : > { %17945 = vmatmul.mubr.msk.bf16.gmra.mrb[12].mxu0 %vm741_vm3, %v20377_v13  ;;  %v21134_v13 = vld [vmem:[#allocation4] ss:$0 sm:$0xff] }
  0x97   : > { %17948 = vmatprep.mubr.msk.bf16.mxu0 %vm741_vm3, %v20378_v14  ;;  %v1627_v14 = vand.u32 31, %v21131_v11 }
  0x99   : > { %18049 = vmatmul.mubr.msk.bf16.vlgmr.msra.gmra.mrb[12].mxu1 %vm3415_vm0, %v3630_v45  ;;  %vm2967_vm4 = vcmp.ge.s32.totalorder %v1627_v14, 1  ;;  %v1522_v45 = vadd.s32 88, %v21131_v11 }
  0x9a   : > { %18065 = vmatpush3.bf16.msra.mxu1 %v21076_v52 }
  0x9b   : > { %18066 = vmatprep.subr.bf16.mxu1 %v21086_v54 }
  0x9e   : > { %17949 = vmatmul.mubr.msk.bf16.gmra.mrb[16].mxu0 %vm741_vm3, %v20379_v15  ;;  %18067 = vmatpush3.bf16.msra.mxu1 %v21086_v54 }
  0x9f   : > { %17952 = vmatprep.mubr.msk.bf16.mxu0 %vm741_vm3, %v20380_v16  ;;  %18084 = vmatprep.subr.bf16.mxu1 %v21108_v63  ;;  %v1648_v16 = vand.u32 31, %v1514_v12 }
  0xa1   : > { %vm3082_vm5 = vcmp.le.s32.totalorder %v1648_v16, 28 }
  0xa6   : > { %17953 = vmatmul.mubr.msk.bf16.gmra.mrb[20].mxu0 %vm741_vm3, %v20381_v17 }
  0xa7   : > { %17956 = vmatprep.mubr.msk.bf16.mxu0 %vm741_vm3, %v20382_v18 }
  0xae   : > { %17957 = vmatmul.mubr.msk.bf16.gmra.mrb[24].mxu0 %vm741_vm3, %v20383_v19 }
  0xaf   : > { %17960 = vmatprep.mubr.msk.bf16.mxu0 %vm741_vm3, %v20384_v20 }
  0xb6   : > { %17961 = vmatmul.mubr.msk.bf16.gmra.mrb[28].mxu0 %vm741_vm3, %v20385_v21 }
  0xb7   : > { %17964 = vmatprep.mubr.msk.bf16.mxu0 %vm741_vm3, %v20386_v22 }
  0xbe   : > { %17965 = vmatmul.mubr.msk.bf16.gmra.mrb[32].mxu0 %vm741_vm3, %v20387_v25 }
  0xbf   : > { %17968 = vmatprep.mubr.msk.bf16.mxu0 %vm741_vm3, %v20388_v26 }
  0xc6   : > { %17969 = vmatmul.mubr.msk.bf16.gmra.mrb[36].mxu0 %vm741_vm3, %v20389_v30 }
  0xc7   : > { %17972 = vmatprep.mubr.msk.bf16.mxu0 %vm741_vm3, %v20390_v31 }
  0xce   : > { %17973 = vmatmul.mubr.msk.bf16.gmra.mrb[40].mxu0 %vm741_vm3, %v20391_v33 }
  0xcf   : > { %17976 = vmatprep.mubr.msk.bf16.mxu0 %vm741_vm3, %v20392_v34  ;;  %v1676_v34 = vand.u32 31, %v1518_v27 }
  0xd1   : > { %vm3086_vm7 = vcmp.le.s32.totalorder %v1676_v34, 28 }
  0xd6   : > { %17977 = vmatmul.mubr.msk.bf16.gmra.mrb[44].mxu0 %vm741_vm3, %v20393_v35 }
  0xd7   : > { %17980 = vmatprep.mubr.msk.bf16.mxu0 %vm741_vm3, %v20394_v36 }
  0xde   : > { %17981 = vmatmul.mubr.msk.bf16.gmra.mrb[48].mxu0 %vm741_vm3, %v20395_v44 }
  0xdf   : > { %17984 = vmatprep.mubr.msk.bf16.mxu0 %vm741_vm3, %v20396_v46 }
  0xe6   : > { %17985 = vmatmul.mubr.msk.bf16.gmra.mrb[52].mxu0 %vm741_vm3, %v20397_v47 }
  0xe7   : > { %17988 = vmatprep.mubr.msk.bf16.mxu0 %vm741_vm3, %v20398_v48 }
  0xee   : > { %17989 = vmatmul.mubr.msk.bf16.gmra.mrb[56].mxu0 %vm741_vm3, %v20399_v49 }
  0xef   : > { %17992 = vmatprep.mubr.msk.bf16.mxu0 %vm741_vm3, %v20400_v50 }
  0xf6   : > { %17993 = vmatmul.mubr.msk.bf16.gmra.mrb[60].mxu0 %vm741_vm3, %v20401_v51  ;;  %v1683_v51 = vand.u32 31, %v1519_v42 }
  0xf7   : > { %17996 = vmatprep.mubr.msk.bf16.mxu0 %vm741_vm3, %v20402_v53 }
  0xf8   : > { %vm2975_vm8 = vcmp.ge.s32.totalorder %v1683_v51, 1 }
  0xfe   : > { %17997 = vmatmul.mubr.msk.bf16.gmra.mrb[64].mxu0 %vm741_vm3, %v20403_v55 }
  0xff   : > { %18000 = vmatprep.mubr.msk.bf16.mxu0 %vm741_vm3, %v20404_v56 }
 0x106   : > { %18001 = vmatmul.mubr.msk.bf16.gmra.mrb[68].mxu0 %vm741_vm3, %v20405_v57 }
 0x107   : > { %18004 = vmatprep.mubr.msk.bf16.mxu0 %vm741_vm3, %v20406_v58  ;;  %v1704_v58 = vand.u32 31, %v1522_v45 }
 0x109   : > { %vm3090_vm9 = vcmp.le.s32.totalorder %v1704_v58, 28 }
 0x10e   : > { %18005 = vmatmul.mubr.msk.bf16.gmra.mrb[72].mxu0 %vm741_vm3, %v20407_v59 }
 0x10f   : > { %18008 = vmatprep.mubr.msk.bf16.mxu0 %vm741_vm3, %v20408_v60 }
 0x116   : > { %18009 = vmatmul.mubr.msk.bf16.gmra.mrb[76].mxu0 %vm741_vm3, %v20409_v61 }
 0x117   : > { %18012 = vmatprep.mubr.msk.bf16.mxu0 %vm741_vm3, %v20410_v62 }
 0x11e   : > { %18013 = vmatmul.mubr.msk.bf16.gmra.mrb[80].mxu0 %vm741_vm3, %v20411_v1 }
 0x11f   : > { %18016 = vmatprep.mubr.msk.bf16.mxu0 %vm741_vm3, %v20412_v2 }
 0x126   : > { %18017 = vmatmul.mubr.msk.bf16.gmra.mrb[84].mxu0 %vm741_vm3, %v20413_v3 }
 0x127   : > { %18020 = vmatprep.mubr.msk.bf16.mxu0 %vm741_vm3, %v20414_v4 }
 0x12e   : > { %18021 = vmatmul.mubr.msk.bf16.gmra.mrb[88].mxu0 %vm741_vm3, %v20415_v5 }
 0x12f   : > { %18024 = vmatprep.mubr.msk.bf16.mxu0 %vm741_vm3, %v20416_v6  ;;  %v1523_v6 = vadd.s32 96, %v21131_v11 }
 0x136   : > { %18025 = vmatmul.mubr.msk.bf16.gmra.mrb[92].mxu0 %vm741_vm3, %v20417_v7 }
 0x137   : > { %18028 = vmatprep.mubr.msk.bf16.mxu0 %vm741_vm3, %v20420_v8 }
 0x13e   : > { %18029 = vmatmul.mubr.msk.bf16.gmra.mrb[96].mxu0 %vm741_vm3, %v20421_v9  ;;  %v1526_v9 = vadd.s32 120, %v21131_v11 }
 0x151   : > { %v17934_v15 = vpop.f32.mrb[0].mxu0 }
 0x152   : > { %v960_v17 = vadd.f32 %v17934_v15, %v21134_v13  ;;  %v951_v18 = vpop.f32.mrb[1].mxu0 }
 0x153   : > { %v952_v19 = vadd.f32 %v21134_v13, %v951_v18  ;;  %v17935_v20 = vpop.f32.mrb[2].mxu0 }
 0x154   : > { %v1400_v21 = vmax.f32 %v960_v17, 0.0  ;;  %v963_v22 = vadd.f32 %v17935_v20, %v21134_v13  ;;  %v954_v23 = vpop.f32.mrb[3].mxu0  ;;  %v1711_v17 = vand.u32 31, %v1523_v6  ;;  %v3592_v6 = vld [vmem:[#allocation2 + $0x37] sm:$0xff] }
 0x155   : > { %v1398_v25 = vmax.f32 %v952_v19, 0.0  ;;  %v955_v26 = vadd.f32 %v21134_v13, %v954_v23 }
 0x156   : > { %3426 = vst.msk [vmem:[#allocation2 + $0x50] sm:$0xff] %vm3415_vm0, %v1400_v21  ;;  %v1401_v28 = vmax.f32 %v963_v22, 0.0  ;;  %v1732_v22 = vand.u32 31, %v1526_v9  ;;  %vm2979_vm10 = vcmp.ge.s32.totalorder %v1711_v17, 1 }
 0x157   : > { %v3303_v29 = vsel %vm2967_vm4, %v1398_v25, 0.0  ;;  %v1399_v30 = vmax.f32 %v955_v26, 0.0 }
 0x158   : > { %3424 = vst.msk [vmem:[#allocation2 + $0x40] sm:$0xff] %vm3415_vm0, %v3303_v29  ;;  %v3306_v31 = vsel %vm3082_vm5, %v1401_v28, 0.0  ;;  %vm3094_vm11 = vcmp.le.s32.totalorder %v1732_v22, 28 }
 0x159   : > { %3427 = vst.msk [vmem:[#allocation2 + $0x58] sm:$0xff] %vm3415_vm0, %v3306_v31  ;;  %3425 = vst.msk [vmem:[#allocation2 + $0x48] sm:$0xff] %vm3415_vm0, %v1399_v30  ;;  %v17938_v33 = vpop.f32.mrb[4].mxu0 }
 0x15a   : > { %v976_v35 = vadd.f32 %v17938_v33, %v21134_v13  ;;  %v967_v36 = vpop.f32.mrb[5].mxu0 }
 0x15b   : > { %v968_v37 = vadd.f32 %v21134_v13, %v967_v36  ;;  %v17939_v38 = vpop.f32.mrb[6].mxu0 }
 0x15c   : > { %v1404_v39 = vmax.f32 %v976_v35, 0.0  ;;  %v979_v40 = vadd.f32 %v17939_v38, %v21134_v13  ;;  %v970_v41 = vpop.f32.mrb[7].mxu0  ;;  %v1530_v35 = vadd.s32 152, %v21131_v11  ;;  %v3590_v38 = vld [vmem:[#allocation2 + $0x27] sm:$0xff] }
 0x15d   : > { %v1402_v43 = vmax.f32 %v968_v37, 0.0  ;;  %v971_v44 = vadd.f32 %v21134_v13, %v970_v41  ;;  %v3619_v55 = vld [vmem:[#allocation2 + $0x50] sm:$0xff]  ;;  %v3589_v37 = vld [vmem:[#allocation2 + $0x1f] sm:$0xff] }
 0x15e   : > { %3430 = vst.msk [vmem:[#allocation2 + $0x70] sm:$0xff] %vm3415_vm0, %v1404_v39  ;;  %v1405_v46 = vmax.f32 %v979_v40, 0.0  ;;  %v3605_v51 = vpack.c.bf16 %v3590_v38, %v3589_v37  ;;  %v1535_v37 = vadd.s32 192, %v21131_v11 }
 0x15f   : > { %v3307_v47 = vsel %vm2971_vm6, %v1402_v43, 0.0  ;;  %v1403_v48 = vmax.f32 %v971_v44, 0.0  ;;  %v3617_v49 = vld [vmem:[#allocation2 + $0x40] sm:$0xff]  ;;  %v1739_v43 = vand.u32 31, %v1527_v32 }
 0x160   : > { %3428 = vst.msk [vmem:[#allocation2 + $0x60] sm:$0xff] %vm3415_vm0, %v3307_v47  ;;  %v3310_v50 = vsel %vm3086_vm7, %v1405_v46, 0.0  ;;  %v3618_v53 = vld [vmem:[#allocation2 + $0x48] sm:$0xff]  ;;  %v3620_v56 = vld [vmem:[#allocation2 + $0x58] sm:$0xff] }
 0x161   : > { %3431 = vst.msk [vmem:[#allocation2 + $0x78] sm:$0xff] %vm3415_vm0, %v3310_v50  ;;  %3429 = vst.msk [vmem:[#allocation2 + $0x68] sm:$0xff] %vm3415_vm0, %v1403_v48  ;;  %v17942_v57 = vpop.f32.mrb[8].mxu0  ;;  %v21157_v59 = vpack.c.bf16 %v3618_v53, %v3617_v49  ;;  %v21159_v60 = vpack.c.bf16 %v3620_v56, %v3619_v55  ;;  %v1760_v48 = vand.u32 31, %v1530_v35  ;;  %vm2983_vm12 = vcmp.ge.s32.totalorder %v1739_v43, 1  ;;  %v3595_v43 = vld [vmem:[#allocation2 + $0x4f] sm:$0xff] }
 0x162   : > { %v992_v61 = vadd.f32 %v17942_v57, %v21134_v13  ;;  %v983_v62 = vpop.f32.mrb[9].mxu0 }
 0x163   : > { %v984_v1 = vadd.f32 %v21134_v13, %v983_v62  ;;  %v17943_v2 = vpop.f32.mrb[10].mxu0  ;;  %18052 = vmatprep.mubr.msk.bf16.mxu1 %vm3415_vm0, %v21157_v59  ;;  %vm3098_vm13 = vcmp.le.s32.totalorder %v1760_v48, 28 }
 0x164   : > { %v1408_v3 = vmax.f32 %v992_v61, 0.0  ;;  %v995_v4 = vadd.f32 %v17943_v2, %v21134_v13  ;;  %v986_v5 = vpop.f32.mrb[11].mxu0  ;;  %18053 = vmatmul.mubr.msk.bf16.gmra.mrb[16].mxu1 %vm3415_vm0, %v21159_v60 }
 0x165   : > { %v1406_v7 = vmax.f32 %v984_v1, 0.0  ;;  %v987_v8 = vadd.f32 %v21134_v13, %v986_v5  ;;  %v3623_v19 = vld [vmem:[#allocation2 + $0x70] sm:$0xff]  ;;  %v1531_v1 = vadd.s32 160, %v21131_v11 }
 0x166   : > { %3434 = vst.msk [vmem:[#allocation2 + $0x90] sm:$0xff] %vm3415_vm0, %v1408_v3  ;;  %v1409_v10 = vmax.f32 %v995_v4, 0.0  ;;  %v1534_v4 = vadd.s32 184, %v21131_v11  ;;  %v3591_v5 = vld [vmem:[#allocation2 + $0x2f] sm:$0xff] }
 0x167   : > { %v3311_v12 = vsel %vm2975_vm8, %v1406_v7, 0.0  ;;  %v1407_v14 = vmax.f32 %v987_v8, 0.0  ;;  %v3621_v15 = vld [vmem:[#allocation2 + $0x60] sm:$0xff] }
 0x168   : > { %3432 = vst.msk [vmem:[#allocation2 + $0x80] sm:$0xff] %vm3415_vm0, %v3311_v12  ;;  %v3314_v16 = vsel %vm3090_vm9, %v1409_v10, 0.0  ;;  %v3622_v18 = vld [vmem:[#allocation2 + $0x68] sm:$0xff]  ;;  %v3624_v20 = vld [vmem:[#allocation2 + $0x78] sm:$0xff]  ;;  %v1788_v22 = vand.u32 31, %v1534_v4 }
 0x169   : > { %3435 = vst.msk [vmem:[#allocation2 + $0x98] sm:$0xff] %vm3415_vm0, %v3314_v16  ;;  %3433 = vst.msk [vmem:[#allocation2 + $0x88] sm:$0xff] %vm3415_vm0, %v1407_v14  ;;  %v17946_v21 = vpop.f32.mrb[12].mxu0  ;;  %v21175_v23 = vpack.c.bf16 %v3622_v18, %v3621_v15  ;;  %v21177_v24 = vpack.c.bf16 %v3624_v20, %v3623_v19  ;;  %v3593_v14 = vld [vmem:[#allocation2 + $0x3f] sm:$0xff]  ;;  %v1767_v16 = vand.u32 31, %v1531_v1  ;;  %v3606_v18 = vpack.c.bf16 %v3592_v6, %v3591_v5  ;;  %v3594_v20 = vld [vmem:[#allocation2 + $0x47] sm:$0xff] }
 0x16a   : > { %v1008_v25 = vadd.f32 %v17946_v21, %v21134_v13  ;;  %v999_v26 = vpop.f32.mrb[13].mxu0  ;;  %v21223_v32 = vpack.c.bf16 %v3594_v20, %v3593_v14  ;;  %vm21233_vm15 = vcmp.le.s32.totalorder %v1788_v22, 28 }
 0x16b   : > { %v1000_v27 = vadd.f32 %v21134_v13, %v999_v26  ;;  %v17947_v28 = vpop.f32.mrb[14].mxu0  ;;  %18056 = vmatprep.mubr.msk.bf16.mxu1 %vm3415_vm0, %v21175_v23  ;;  %vm21225_vm14 = vcmp.ge.s32.totalorder %v1767_v16, 1  ;;  %v1542_v16 = vadd.s32 248, %v21131_v11 }
 0x16c   : > { %v1412_v29 = vmax.f32 %v1008_v25, 0.0  ;;  %v1011_v30 = vadd.f32 %v17947_v28, %v21134_v13  ;;  %v1002_v31 = vpop.f32.mrb[15].mxu0  ;;  %18057 = vmatmul.mubr.msk.bf16.gmra.mrb[20].mxu1 %vm3415_vm0, %v21177_v24 }
 0x16d   : > { %v1410_v33 = vmax.f32 %v1000_v27, 0.0  ;;  %v1003_v34 = vadd.f32 %v21134_v13, %v1002_v31  ;;  %v3627_v45 = vld [vmem:[#allocation2 + $0x90] sm:$0xff] }
 0x16e   : > { %3438 = vst.msk [vmem:[#allocation2 + $0xb0] sm:$0xff] %vm3415_vm0, %v1412_v29  ;;  %v1413_v36 = vmax.f32 %v1011_v30, 0.0  ;;  %v21218_v29 = vld [vmem:[%s24251_s3 + $0x28] sm:$0xff]  }
 0x16f   : > { %v3315_v39 = vsel %vm2979_vm10, %v1410_v33, 0.0  ;;  %v1411_v40 = vmax.f32 %v1003_v34, 0.0  ;;  %v3625_v41 = vld [vmem:[#allocation2 + $0x80] sm:$0xff] }
 0x170   : > { %3436 = vst.msk [vmem:[#allocation2 + $0xa0] sm:$0xff] %vm3415_vm0, %v3315_v39  ;;  %v3318_v42 = vsel %vm3094_vm11, %v1413_v36, 0.0  ;;  %v3626_v44 = vld [vmem:[#allocation2 + $0x88] sm:$0xff]  ;;  %v3628_v46 = vld [vmem:[#allocation2 + $0x98] sm:$0xff] }
 0x171   : > { %3439 = vst.msk [vmem:[#allocation2 + $0xb8] sm:$0xff] %vm3415_vm0, %v3318_v42  ;;  %3437 = vst.msk [vmem:[#allocation2 + $0xa8] sm:$0xff] %vm3415_vm0, %v1411_v40  ;;  %v17950_v47 = vpop.f32.mrb[16].mxu0  ;;  %v21193_v49 = vpack.c.bf16 %v3626_v44, %v3625_v41  ;;  %v21195_v50 = vpack.c.bf16 %v3628_v46, %v3627_v45  ;;  %v1538_v41 = vadd.s32 216, %v21131_v11  ;;  %v21248_v45 = vld [vmem:[%s24251_s3 + $0x30] sm:$0xff]  }
 0x172   : > { %v1024_v53 = vadd.f32 %v17950_v47, %v21134_v13  ;;  %v1015_v55 = vpop.f32.mrb[17].mxu0 }
 0x173   : > { %v1016_v56 = vadd.f32 %v21134_v13, %v1015_v55  ;;  %v17951_v57 = vpop.f32.mrb[18].mxu0  ;;  %18060 = vmatprep.mubr.msk.bf16.mxu1 %vm3415_vm0, %v21193_v49  ;;  %v1795_v55 = vand.u32 31, %v1535_v37 }
 0x174   : > { %v1416_v58 = vmax.f32 %v1024_v53, 0.0  ;;  %v1027_v61 = vadd.f32 %v17951_v57, %v21134_v13  ;;  %v1018_v62 = vpop.f32.mrb[19].mxu0  ;;  %18061 = vmatmul.mubr.msk.bf16.gmra.mrb[24].mxu1 %vm3415_vm0, %v21195_v50  ;;  %v3597_v53 = vld [vmem:[#allocation2 + $0x5f] sm:$0xff] }
 0x175   : > { %v1414_v2 = vmax.f32 %v1016_v56, 0.0  ;;  %v1019_v3 = vadd.f32 %v21134_v13, %v1018_v62  ;;  %18068 = vmatprep.mubr.msk.bf16.mxu1 %vm3415_vm0, %v3605_v51  ;;  %v5195_v8 = vld [vmem:[#allocation2 + $0xb0] sm:$0xff]  ;;  %v1816_v62 = vand.u32 31, %v1538_v41  ;;  %vm2991_vm1 = vcmp.ge.s32.totalorder %v1795_v55, 1 }
 0x176   : > { %3442 = vst.msk [vmem:[#allocation2 + $0xd0] sm:$0xff] %vm3415_vm0, %v1416_v58  ;;  %v1417_v7 = vmax.f32 %v1027_v61, 0.0  ;;  %v3596_v51 = vld [vmem:[#allocation2 + $0x57] sm:$0xff]  ;;  %v3598_v58 = vld [vmem:[#allocation2 + $0x67] sm:$0xff]  ;;  %v1547_v55 = vadd.s32 288, %v21131_v11 }
 0x177   : > { %v3319_v9 = vsel %vm2983_vm12, %v1414_v2, 0.0  ;;  %v1415_v10 = vmax.f32 %v1019_v3, 0.0  ;;  %v5193_v12 = vld [vmem:[#allocation2 + $0xa0] sm:$0xff]  ;;  %v21260_v5 = vpack.c.bf16 %v3596_v51, %v3595_v43  ;;  %vm3106_vm2 = vcmp.le.s32.totalorder %v1816_v62, 28 }
 0x178   : > { %3440 = vst.msk [vmem:[#allocation2 + $0xc0] sm:$0xff] %vm3415_vm0, %v3319_v9  ;;  %v3322_v15 = vsel %vm3098_vm13, %v1417_v7, 0.0  ;;  %v5194_v17 = vld [vmem:[#allocation2 + $0xa8] sm:$0xff]  ;;  %v5196_v19 = vld [vmem:[#allocation2 + $0xb8] sm:$0xff]  ;;  %v1546_v43 = vadd.s32 280, %v21131_v11  ;;  %v1550_v62 = vadd.s32 312, %v21131_v11 }
 0x179   : > { %3443 = vst.msk [vmem:[#allocation2 + $0xd8] sm:$0xff] %vm3415_vm0, %v3322_v15  ;;  %3441 = vst.msk [vmem:[#allocation2 + $0xc8] sm:$0xff] %vm3415_vm0, %v1415_v10  ;;  %v17954_v21 = vpop.f32.mrb[20].mxu0  ;;  %v21212_v25 = vpack.c.bf16 %v5194_v17, %v5193_v12  ;;  %v5210_v26 = vpack.c.bf16 %v5196_v19, %v5195_v8  ;;  %v21266_v8 = vpack.c.bf16 %v3598_v58, %v3597_v53  ;;  %v5172_v58 = vld [vmem:[#allocation2 + $0xb7] sm:$0xff] }
 0x17a   : > { %v1040_v27 = vadd.f32 %v17954_v21, %v21134_v13  ;;  %v1031_v28 = vpop.f32.mrb[21].mxu0 }
 0x17b   : > { %v1032_v30 = vadd.f32 %v21134_v13, %v1031_v28  ;;  %v17955_v31 = vpop.f32.mrb[22].mxu0  ;;  %18228 = vmatprep.mubr.msk.bf16.mxu0 %vm3415_vm0, %v21212_v25 }
 0x17c   : > { %v1420_v33 = vmax.f32 %v1040_v27, 0.0  ;;  %v1043_v35 = vadd.f32 %v17955_v31, %v21134_v13  ;;  %v1034_v36 = vpop.f32.mrb[23].mxu0  ;;  %18069 = vmatmul.mubr.msk.bf16.vlgmr.msra.gmra.mrb[12].mxu1 %vm3415_vm0, %v3606_v18  ;;  %18229 = vmatmul.mubr.msk.bf16.vlgmr.msra.gmra.mrb[100].mxu0 %vm3415_vm0, %v5210_v26  ;;  %v3599_v18 = vld [vmem:[#allocation2 + $0x6f] sm:$0xff]  ;;  %v3600_v26 = vld [vmem:[#allocation2 + $0x77] sm:$0xff]  ;;  %v3601_v27 = vld [vmem:[#allocation2 + $0x7f] sm:$0xff] }
 0x17d   : > { %v1418_v38 = vmax.f32 %v1032_v30, 0.0  ;;  %v1035_v40 = vadd.f32 %v21134_v13, %v1034_v36  ;;  %18072 = vmatprep.mubr.msk.bf16.mxu1 %vm3415_vm0, %v21223_v32  ;;  %18085 = vmatpush3.bf16.msra.mxu1 %v21108_v63  ;;  %v5199_v44 = vld [vmem:[#allocation2 + $0xd0] sm:$0xff]  ;;  %v21282_v39 = vpack.c.bf16 %v3600_v26, %v3599_v18 }
 0x17e   : > { %3446 = vst.msk [vmem:[#allocation2 + $0xf0] sm:$0xff] %vm3415_vm0, %v1420_v33  ;;  %v1421_v42 = vmax.f32 %v1043_v35, 0.0  ;;  %18245 = vmatpush3.bf16.msra.mxu0 %v21076_v52  ;;  %18086 = vmatprep.subr.bf16.mxu1 %v21218_v29  ;;  %v3602_v33 = vld [vmem:[#allocation2 + $0x87] sm:$0xff] }
 0x17f   : > { %v3323_v46 = vsel %vm21225_vm14, %v1418_v38, 0.0  ;;  %v1419_v47 = vmax.f32 %v1035_v40, 0.0  ;;  %v5197_v48 = vld [vmem:[#allocation2 + $0xc0] sm:$0xff]  ;;  %18246 = vmatprep.subr.bf16.mxu0 %v21086_v54  ;;  %v1844_v38 = vand.u32 31, %v1542_v16 }
 0x180   : > { %3444 = vst.msk [vmem:[#allocation2 + $0xe0] sm:$0xff] %vm3415_vm0, %v3323_v46  ;;  %v3326_v52 = vsel %vm21233_vm15, %v1421_v42, 0.0  ;;  %v5198_v56 = vld [vmem:[#allocation2 + $0xc8] sm:$0xff]  ;;  %v5200_v57 = vld [vmem:[#allocation2 + $0xd8] sm:$0xff]  ;;  %v1543_v42 = vadd.s32 256, %v21131_v11 }
 0x181   : > { %3447 = vst.msk [vmem:[#allocation2 + $0xf8] sm:$0xff] %vm3415_vm0, %v3326_v52  ;;  %3445 = vst.msk [vmem:[#allocation2 + $0xe8] sm:$0xff] %vm3415_vm0, %v1419_v47  ;;  %v17958_v61 = vpop.f32.mrb[24].mxu0  ;;  %v5211_v1 = vpack.c.bf16 %v5198_v56, %v5197_v48  ;;  %v5212_v2 = vpack.c.bf16 %v5200_v57, %v5199_v44  ;;  %18087 = vmatpush3.bf16.msra.mxu1 %v21218_v29  ;;  %v21288_v44 = vpack.c.bf16 %v3602_v33, %v3601_v27  ;;  %v3903_v56 = vld [vmem:[#allocation2 + $0x21] sm:$0xff] }
 0x182   : > { %v1056_v3 = vadd.f32 %v17958_v61, %v21134_v13  ;;  %v1047_v4 = vpop.f32.mrb[25].mxu0  ;;  %18247 = vmatpush3.bf16.msra.mxu0 %v21086_v54  ;;  %18104 = vmatprep.subr.bf16.mxu1 %v21248_v45  ;;  %v1539_v54 = vadd.s32 224, %v21131_v11  ;;  %vm21302_vm4 = vcmp.le.s32.totalorder %v1844_v38, 28 }
 0x183   : > { %v1048_v6 = vadd.f32 %v21134_v13, %v1047_v4  ;;  %v17959_v7 = vpop.f32.mrb[26].mxu0  ;;  %18232 = vmatprep.mubr.msk.bf16.mxu0 %vm3415_vm0, %v5211_v1  ;;  %18264 = vmatprep.subr.bf16.mxu0 %v21108_v63  ;;  %v3603_v1 = vld [vmem:[#allocation2 + $0x8f] sm:$0xff] }
 0x184   : > { %v1424_v9 = vmax.f32 %v1056_v3, 0.0  ;;  %v1059_v10 = vadd.f32 %v17959_v7, %v21134_v13  ;;  %v1050_v12 = vpop.f32.mrb[27].mxu0  ;;  %18073 = vmatmul.mubr.msk.bf16.gmra.mrb[16].mxu1 %vm3415_vm0, %v21260_v5  ;;  %18233 = vmatmul.mubr.msk.bf16.gmra.mrb[104].mxu0 %vm3415_vm0, %v5212_v2  ;;  %v1823_v34 = vand.u32 31, %v1539_v54  ;;  %v3904_v3 = vld [vmem:[#allocation2 + $0x29] sm:$0xff]  ;;  %v1872_v7 = vand.u32 31, %v1546_v43 }
 0x185   : > { %v1422_v14 = vmax.f32 %v1048_v6, 0.0  ;;  %v1051_v15 = vadd.f32 %v21134_v13, %v1050_v12  ;;  %18076 = vmatprep.mubr.msk.bf16.mxu1 %vm3415_vm0, %v21266_v8  ;;  %v5203_v19 = vld [vmem:[#allocation2 + $0xf0] sm:$0xff]  ;;  %v1851_v6 = vand.u32 31, %v1543_v42  ;;  %v5169_v12 = vld [vmem:[#allocation2 + $0x9f] sm:$0xff]  ;;  %v3919_v26 = vpack.c.bf16 %v3904_v3, %v3903_v56 }
 0x186   : > { %3450 = vst.msk [vmem:[#allocation2 + $0x110] sm:$0xff] %vm3415_vm0, %v1424_v9  ;;  %v1425_v17 = vmax.f32 %v1059_v10, 0.0  ;;  %vm21294_vm3 = vcmp.ge.s32.totalorder %v1823_v34, 1  ;;  %v3604_v10 = vld [vmem:[#allocation2 + $0x97] sm:$0xff]  ;;  %vm21326_vm6 = vcmp.le.s32.totalorder %v1872_v7, 28  ;;  %v5174_v7 = vld [vmem:[#allocation2 + $0xc7] sm:$0xff] }
 0x187   : > { %v3327_v20 = vsel %vm2991_vm1, %v1422_v14, 0.0  ;;  %v1423_v21 = vmax.f32 %v1051_v15, 0.0  ;;  %v5201_v22 = vld [vmem:[#allocation2 + $0xe0] sm:$0xff]  ;;  %vm21322_vm5 = vcmp.ge.s32.totalorder %v1851_v6, 1  ;;  %v3905_v56 = vld [vmem:[#allocation2 + $0x31] sm:$0xff] }
 0x188   : > { %3448 = vst.msk [vmem:[#allocation2 + $0x100] sm:$0xff] %vm3415_vm0, %v3327_v20  ;;  %v3330_v28 = vsel %vm3106_vm2, %v1425_v17, 0.0  ;;  %v5202_v30 = vld [vmem:[#allocation2 + $0xe8] sm:$0xff]  ;;  %v5204_v31 = vld [vmem:[#allocation2 + $0xf8] sm:$0xff]  ;;  %v21315_v20 = vadd.s32 320, %v21131_v11 }
 0x189   : > { %3451 = vst.msk [vmem:[#allocation2 + $0x118] sm:$0xff] %vm3415_vm0, %v3330_v28  ;;  %3449 = vst.msk [vmem:[#allocation2 + $0x108] sm:$0xff] %vm3415_vm0, %v1423_v21  ;;  %v5213_v35 = vpack.c.bf16 %v5202_v30, %v5201_v22  ;;  %v5214_v36 = vpack.c.bf16 %v5204_v31, %v5203_v19  ;;  %v17962_v37 = vpop.f32.mrb[28].mxu0  ;;  %v5170_v17 = vld [vmem:[#allocation2 + $0xa7] sm:$0xff]  ;;  %v1879_v19 = vand.u32 31, %v1547_v55  ;;  %v1900_v28 = vand.u32 31, %v1550_v62 }
 0x18a   : > { %v1072_v40 = vadd.f32 %v17962_v37, %v21134_v13  ;;  %v1063_v41 = vpop.f32.mrb[29].mxu0  ;;  %v18034_v30 = vpop.f32.mrb[0].mxu1  ;;  %v21319_v31 = vpack.c.bf16 %v3604_v10, %v3603_v1  ;;  %v21331_v37 = vpack.c.bf16 %v5170_v17, %v5169_v12  ;;  %v5173_v6 = vld [vmem:[#allocation2 + $0xbf] sm:$0xff]  ;;  %v1611_v12 = vadd.s32 800, %v21131_v11 }
 0x18b   : > { %18236 = vmatprep.mubr.msk.bf16.mxu0 %vm3415_vm0, %v5213_v35  ;;  %v1064_v46 = vadd.f32 %v21134_v13, %v1063_v41  ;;  %v17963_v47 = vpop.f32.mrb[30].mxu0  ;;  %v21335_v41 = vadd.s32 344, %v21131_v11  ;;  %v1360_v42 = vadd.f32 %v18034_v30, %v21134_v13  ;;  %v1351_v43 = vpop.f32.mrb[1].mxu1  ;;  %vm21342_vm7 = vcmp.ge.s32.totalorder %v1879_v19, 1 }
 0x18c   : > { %18077 = vmatmul.mubr.msk.bf16.gmra.mrb[20].mxu1 %vm3415_vm0, %v21282_v39  ;;  %18237 = vmatmul.mubr.msk.bf16.gmra.mrb[108].mxu0 %vm3415_vm0, %v5214_v36  ;;  %v1428_v48 = vmax.f32 %v1072_v40, 0.0  ;;  %v1075_v53 = vadd.f32 %v17963_v47, %v21134_v13  ;;  %v1066_v52 = vpop.f32.mrb[31].mxu0  ;;  %v18035_v55 = vpop.f32.mrb[2].mxu1  ;;  %vm21354_vm8 = vcmp.le.s32.totalorder %v1900_v28, 28  ;;  %v1352_v10 = vadd.f32 %v21134_v13, %v1351_v43 }
 0x18d   : > { %18080 = vmatprep.mubr.msk.bf16.mxu1 %vm3415_vm0, %v21288_v44  ;;  %v1426_v57 = vmax.f32 %v1064_v46, 0.0  ;;  %v1067_v61 = vadd.f32 %v21134_v13, %v1066_v52  ;;  %v5207_v2 = vld [vmem:[#allocation2 + $0x110] sm:$0xff]  ;;  %v21348_v52 = vadd.s32 352, %v21131_v11  ;;  %v1500_v3 = vmax.f32 %v1360_v42, 0.0 }
 0x18e   : > { %3454 = vst.msk [vmem:[#allocation2 + $0x130] sm:$0xff] %vm3415_vm0, %v1428_v48  ;;  %v1429_v4 = vmax.f32 %v1075_v53, 0.0  ;;  %v1907_v53 = vand.u32 31, %v21315_v20  ;;  %v1928_v17 = vand.u32 31, %v21335_v41  ;;  %v3907_v20 = vld [vmem:[#allocation2 + $0x41] sm:$0xff]  ;;  %v21375_v30 = vpack.c.bf16 %v5174_v7, %v5173_v6 }
 0x18f   : > { %v5205_v9 = vld [vmem:[#allocation2 + $0x100] sm:$0xff]  ;;  %v3331_v54 = vsel %vm21294_vm3, %v1426_v57, 0.0  ;;  %v1427_v14 = vmax.f32 %v1067_v61, 0.0  ;;  %v5171_v57 = vld [vmem:[#allocation2 + $0xaf] sm:$0xff]  ;;  %3526 = vst.msk [vmem:[#allocation2 + $0x370] sm:$0xff] %vm3415_vm0, %v1500_v3  ;;  %v1935_v41 = vand.u32 31, %v21348_v52 }
 0x190   : > { %v5206_v15 = vld [vmem:[#allocation2 + $0x108] sm:$0xff]  ;;  %v5208_v16 = vld [vmem:[#allocation2 + $0x118] sm:$0xff]  ;;  %3452 = vst.msk [vmem:[#allocation2 + $0x120] sm:$0xff] %vm3415_vm0, %v3331_v54  ;;  %v3334_v18 = vsel %vm21302_vm4, %v1429_v4, 0.0  ;;  %v1363_v54 = vadd.f32 %v18035_v55, %v21134_v13  ;;  %v21370_v19 = vpack.c.bf16 %v5172_v58, %v5171_v57  ;;  %vm21394_vm11 = vcmp.ge.s32.totalorder %v1907_v53, 1  ;;  %v21406_v53 = vld [vmem:[%s24251_s3 + $0x40] sm:$0xff]  }
 0x191   : > { %v5215_v21 = vpack.c.bf16 %v5206_v15, %v5205_v9  ;;  %v5216_v22 = vpack.c.bf16 %v5208_v16, %v5207_v2  ;;  %3455 = vst.msk [vmem:[#allocation2 + $0x138] sm:$0xff] %vm3415_vm0, %v3334_v18  ;;  %3453 = vst.msk [vmem:[#allocation2 + $0x128] sm:$0xff] %vm3415_vm0, %v1427_v14  ;;  %v17966_v27 = vpop.f32.mrb[32].mxu0  ;;  %v21359_v2 = vadd.s32 376, %v21131_v11  ;;  %v3906_v4 = vld [vmem:[#allocation2 + $0x39] sm:$0xff]  ;;  %v1354_v14 = vpop.f32.mrb[3].mxu1 }
 0x192   : > { %v1088_v33 = vadd.f32 %v17966_v27, %v21134_v13  ;;  %v1079_v34 = vpop.f32.mrb[33].mxu0  ;;  %v1614_v18 = vadd.s32 824, %v21131_v11  ;;  %v2327_v27 = vand.u32 31, %v1611_v12  ;;  %v3920_v28 = vpack.c.bf16 %v3906_v4, %v3905_v56  ;;  %v18038_v42 = vpop.f32.mrb[4].mxu1  ;;  %v5175_v58 = vld [vmem:[#allocation2 + $0xcf] sm:$0xff]  ;;  %v5177_v12 = vld [vmem:[#allocation2 + $0xdf] sm:$0xff] }
 0x193   : > { %18240 = vmatprep.mubr.msk.bf16.mxu0 %vm3415_vm0, %v5215_v21  ;;  %v1080_v38 = vadd.f32 %v21134_v13, %v1079_v34  ;;  %v17967_v40 = vpop.f32.mrb[34].mxu0  ;;  %v3908_v21 = vld [vmem:[#allocation2 + $0x49] sm:$0xff]  ;;  %v1501_v34 = vmax.f32 %v1363_v54, 0.0  ;;  %v1355_v36 = vadd.f32 %v21134_v13, %v1354_v14  ;;  %v1367_v57 = vpop.f32.mrb[5].mxu1  ;;  %vm21409_vm12 = vcmp.le.s32.totalorder %v1928_v17, 28  ;;  %v5181_v52 = vld [vmem:[#allocation2 + $0xff] sm:$0xff] }
 0x194   : > { %18081 = vmatmul.mubr.msk.bf16.gmra.mrb[24].mxu1 %vm3415_vm0, %v21319_v31  ;;  %18241 = vmatmul.mubr.msk.bf16.gmra.mrb[112].mxu0 %vm3415_vm0, %v5216_v22  ;;  %v1432_v46 = vmax.f32 %v1088_v33, 0.0  ;;  %v1091_v47 = vadd.f32 %v17967_v40, %v21134_v13  ;;  %v1082_v48 = vpop.f32.mrb[35].mxu0  ;;  %v2348_v35 = vand.u32 31, %v1614_v18  ;;  %vm3067_vm9 = vcmp.ge.s32.totalorder %v2327_v27, 1  ;;  %v5178_v54 = vld [vmem:[#allocation2 + $0xe7] sm:$0xff] }
 0x195   : > { %18248 = vmatprep.mubr.msk.bf16.mxu0 %vm3415_vm0, %v21331_v37  ;;  %18088 = vmatprep.mubr.msk.bf16.mxu1 %vm3415_vm0, %v3919_v26  ;;  %v1430_v61 = vmax.f32 %v1080_v38, 0.0  ;;  %v1083_v62 = vadd.f32 %v21134_v13, %v1082_v48  ;;  %v1498_v26 = vmax.f32 %v1352_v10, 0.0  ;;  %v21382_v43 = vpack.c.bf16 %v3908_v21, %v3907_v20  ;;  %v5176_v10 = vld [vmem:[#allocation2 + $0xd7] sm:$0xff] }
 0x196   : > { %3458 = vst.msk [vmem:[#allocation2 + $0x150] sm:$0xff] %vm3415_vm0, %v1432_v46  ;;  %v1433_v9 = vmax.f32 %v1091_v47, 0.0  ;;  %v3910_v46 = vld [vmem:[#allocation2 + $0x59] sm:$0xff]  ;;  %vm3182_vm10 = vcmp.le.s32.totalorder %v2348_v35, 28  ;;  %v1499_v7 = vmax.f32 %v1355_v36, 0.0  ;;  %v1376_v18 = vadd.f32 %v18038_v42, %v21134_v13  ;;  %v3909_v21 = vld [vmem:[#allocation2 + $0x51] sm:$0xff] }
 0x197   : > { %v3335_v15 = vsel %vm21322_vm5, %v1430_v61, 0.0  ;;  %v1431_v16 = vmax.f32 %v1083_v62, 0.0  ;;  %v21387_v47 = vld [vmem:[%s24251_s3 + $0x38] sm:$0xff]   ;;  %v3403_v56 = vsel %vm3067_vm9, %v1498_v26, 0.0  ;;  %v3406_v6 = vsel %vm3182_vm10, %v1501_v34, 0.0  ;;  %v3912_v26 = vld [vmem:[#allocation2 + $0x69] sm:$0xff] }
 0x198   : > { %3456 = vst.msk [vmem:[#allocation2 + $0x140] sm:$0xff] %vm3415_vm0, %v3335_v15  ;;  %v3338_v22 = vsel %vm21326_vm6, %v1433_v9, 0.0  ;;  %3524 = vst.msk [vmem:[#allocation2 + $0x360] sm:$0xff] %vm3415_vm0, %v3403_v56  ;;  %v18039_v9 = vpop.f32.mrb[6].mxu1  ;;  %v1956_v17 = vand.u32 31, %v21359_v2  ;;  %v21421_v34 = vpack.c.bf16 %v3910_v46, %v3909_v21  ;;  %v5179_v35 = vld [vmem:[#allocation2 + $0xef] sm:$0xff] }
 0x199   : > { %3459 = vst.msk [vmem:[#allocation2 + $0x158] sm:$0xff] %vm3415_vm0, %v3338_v22  ;;  %3457 = vst.msk [vmem:[#allocation2 + $0x148] sm:$0xff] %vm3415_vm0, %v1431_v16  ;;  %v17970_v33 = vpop.f32.mrb[36].mxu0  ;;  %v1370_v20 = vpop.f32.mrb[7].mxu1  ;;  %v3911_v22 = vld [vmem:[#allocation2 + $0x61] sm:$0xff]  ;;  %v1504_v36 = vmax.f32 %v1376_v18, 0.0 }
 0x19a   : > { %v1104_v38 = vadd.f32 %v17970_v33, %v21134_v13  ;;  %v1095_v40 = vpop.f32.mrb[37].mxu0  ;;  %3527 = vst.msk [vmem:[#allocation2 + $0x378] sm:$0xff] %vm3415_vm0, %v3406_v6  ;;  %3525 = vst.msk [vmem:[#allocation2 + $0x368] sm:$0xff] %vm3415_vm0, %v1499_v7  ;;  %v18042_v33 = vpop.f32.mrb[8].mxu1  ;;  %v1615_v56 = vadd.s32 832, %v21131_v11  ;;  %v21441_v1 = vpack.c.bf16 %v3912_v26, %v3911_v22  ;;  %vm21458_vm13 = vcmp.ge.s32.totalorder %v1935_v41, 1 }
 0x19b   : > { %v1096_v48 = vadd.f32 %v21134_v13, %v1095_v40  ;;  %v17971_v55 = vpop.f32.mrb[38].mxu0  ;;  %v1383_v42 = vpop.f32.mrb[9].mxu1  ;;  %3530 = vst.msk [vmem:[#allocation2 + $0x390] sm:$0xff] %vm3415_vm0, %v1504_v36  ;;  %v5182_v41 = vld [vmem:[#allocation2 + $0x107] sm:$0xff]  ;;  %v1622_v4 = vadd.s32 888, %v21131_v11  ;;  %vm21489_vm1 = vcmp.le.s32.totalorder %v1956_v17, 28 }
 0x19c   : > { %18089 = vmatmul.mubr.msk.bf16.vlgmr.msra.gmra.mrb[12].mxu1 %vm3415_vm0, %v3920_v28  ;;  %18249 = vmatmul.mubr.msk.bf16.vlgmr.msra.gmra.mrb[100].mxu0 %vm3415_vm0, %v21370_v19  ;;  %v1436_v61 = vmax.f32 %v1104_v38, 0.0  ;;  %v1107_v62 = vadd.f32 %v17971_v55, %v21134_v13  ;;  %v1098_v3 = vpop.f32.mrb[39].mxu0  ;;  %v1368_v28 = vadd.f32 %v21134_v13, %v1367_v57  ;;  %v5180_v38 = vld [vmem:[#allocation2 + $0xf7] sm:$0xff]  ;;  %v21429_v55 = vpack.c.bf16 %v5178_v54, %v5177_v12  ;;  %v18043_v57 = vpop.f32.mrb[10].mxu1 }
 0x19d   : > { %18092 = vmatprep.mubr.msk.bf16.mxu1 %vm3415_vm0, %v21382_v43  ;;  %18252 = vmatprep.mubr.msk.bf16.mxu0 %vm3415_vm0, %v21375_v30  ;;  %v1434_v14 = vmax.f32 %v1096_v48, 0.0  ;;  %v1099_v15 = vadd.f32 %v21134_v13, %v1098_v3  ;;  %v21427_v48 = vpack.c.bf16 %v5176_v10, %v5175_v58  ;;  %v1379_v58 = vadd.f32 %v18039_v9, %v21134_v13  ;;  %v1386_v6 = vpop.f32.mrb[11].mxu1 }
 0x19e   : > { %18105 = vmatpush3.bf16.msra.mxu1 %v21248_v45  ;;  %18265 = vmatpush3.bf16.msra.mxu0 %v21108_v63  ;;  %3462 = vst.msk [vmem:[#allocation2 + $0x170] sm:$0xff] %vm3415_vm0, %v1436_v61  ;;  %v1437_v27 = vmax.f32 %v1107_v62, 0.0  ;;  %v1502_v61 = vmax.f32 %v1368_v28, 0.0  ;;  %v1618_v62 = vadd.s32 856, %v21131_v11  ;;  %v1371_v3 = vadd.f32 %v21134_v13, %v1370_v20 }
 0x19f   : > { %18106 = vmatprep.subr.bf16.mxu1 %v21387_v47  ;;  %18266 = vmatprep.subr.bf16.mxu0 %v21218_v29  ;;  %v3339_v63 = vsel %vm21342_vm7, %v1434_v14, 0.0  ;;  %v1435_v40 = vmax.f32 %v1099_v15, 0.0  ;;  %v21443_v7 = vpack.c.bf16 %v5180_v38, %v5179_v35  ;;  %v2355_v54 = vand.u32 31, %v1615_v56 }
 0x1a0   : > { %3460 = vst.msk [vmem:[#allocation2 + $0x160] sm:$0xff] %vm3415_vm0, %v3339_v63  ;;  %v3342_v46 = vsel %vm21354_vm8, %v1437_v27, 0.0  ;;  %v1505_v15 = vmax.f32 %v1379_v58, 0.0  ;;  %v2376_v18 = vand.u32 31, %v1618_v62  ;;  %v1503_v20 = vmax.f32 %v1371_v3, 0.0  ;;  %v3915_v62 = vld [vmem:[#allocation2 + $0x81] sm:$0xff] }
 0x1a1   : > { %3463 = vst.msk [vmem:[#allocation2 + $0x178] sm:$0xff] %vm3415_vm0, %v3342_v46  ;;  %3461 = vst.msk [vmem:[#allocation2 + $0x168] sm:$0xff] %vm3415_vm0, %v1435_v40  ;;  %v17974_v51 = vpop.f32.mrb[40].mxu0  ;;  %vm3071_vm14 = vcmp.ge.s32.totalorder %v2355_v54, 1  ;;  %v1392_v27 = vadd.f32 %v18042_v33, %v21134_v13  ;;  %v1384_v36 = vadd.f32 %v21134_v13, %v1383_v42  ;;  %v3914_v46 = vld [vmem:[#allocation2 + $0x79] sm:$0xff]  ;;  %v1395_v58 = vadd.f32 %v18043_v57, %v21134_v13  ;;  %v3916_v3 = vld [vmem:[#allocation2 + $0x89] sm:$0xff] }
 0x1a2   : > { %18107 = vmatpush3.bf16.msra.mxu1 %v21387_v47  ;;  %18267 = vmatpush3.bf16.msra.mxu0 %v21218_v29  ;;  %v1120_v10 = vadd.f32 %v17974_v51, %v21134_v13  ;;  %v1111_v12 = vpop.f32.mrb[41].mxu0  ;;  %v3407_v38 = vsel %vm3071_vm14, %v1502_v61, 0.0  ;;  %vm3186_vm15 = vcmp.le.s32.totalorder %v2376_v18, 28  ;;  %3529 = vst.msk [vmem:[#allocation2 + $0x388] sm:$0xff] %vm3415_vm0, %v1503_v20  ;;  %v1619_v61 = vadd.s32 864, %v21131_v11  ;;  %v3913_v54 = vld [vmem:[#allocation2 + $0x71] sm:$0xff] }
 0x1a3   : > { %18124 = vmatprep.subr.bf16.mxu1 %v21406_v53  ;;  %18284 = vmatprep.subr.bf16.mxu0 %v21248_v45  ;;  %v1112_v9 = vadd.f32 %v21134_v13, %v1111_v12  ;;  %v17975_v14 = vpop.f32.mrb[42].mxu0  ;;  %3528 = vst.msk [vmem:[#allocation2 + $0x380] sm:$0xff] %vm3415_vm0, %v3407_v38  ;;  %v3410_v33 = vsel %vm3186_vm15, %v1505_v15, 0.0  ;;  %v1508_v40 = vmax.f32 %v1392_v27, 0.0  ;;  %v1506_v42 = vmax.f32 %v1384_v36, 0.0 }
 0x1a4   : > { %18093 = vmatmul.mubr.msk.bf16.gmra.mrb[16].mxu1 %vm3415_vm0, %v21421_v34  ;;  %18253 = vmatmul.mubr.msk.bf16.gmra.mrb[104].mxu0 %vm3415_vm0, %v21427_v48  ;;  %v1440_v29 = vmax.f32 %v1120_v10, 0.0  ;;  %v1123_v21 = vadd.f32 %v17975_v14, %v21134_v13  ;;  %v1114_v22 = vpop.f32.mrb[43].mxu0  ;;  %3531 = vst.msk [vmem:[#allocation2 + $0x398] sm:$0xff] %vm3415_vm0, %v3410_v33  ;;  %v1387_v12 = vadd.f32 %v21134_v13, %v1386_v6  ;;  %v2383_v14 = vand.u32 31, %v1619_v61 }
 0x1a5   : > { %18096 = vmatprep.mubr.msk.bf16.mxu1 %vm3415_vm0, %v21441_v1  ;;  %18256 = vmatprep.mubr.msk.bf16.mxu0 %vm3415_vm0, %v21429_v55  ;;  %v1438_v28 = vmax.f32 %v1112_v9, 0.0  ;;  %v1115_v35 = vadd.f32 %v21134_v13, %v1114_v22  ;;  %3534 = vst.msk [vmem:[#allocation2 + $0x3b0] sm:$0xff] %vm3415_vm0, %v1508_v40  ;;  %v21483_v9 = vpack.c.bf16 %v5182_v41, %v5181_v52  ;;  %v1509_v15 = vmax.f32 %v1395_v58, 0.0  ;;  %v5183_v41 = vld [vmem:[#allocation2 + $0x10f] sm:$0xff]  ;;  %v21504_v40 = vld [vmem:[#allocation4] ss:$0 sm:$0xff] }
 0x1a6   : > { %3466 = vst.msk [vmem:[#allocation2 + $0x190] sm:$0xff] %vm3415_vm0, %v1440_v29  ;;  %v1441_v63 = vmax.f32 %v1123_v21, 0.0  ;;  %v3924_v18 = vpack.c.bf16 %v3914_v46, %v3913_v54  ;;  %v2404_v29 = vand.u32 31, %v1622_v4  ;;  %v1507_v21 = vmax.f32 %v1387_v12, 0.0  ;;  %v3917_v12 = vld [vmem:[#allocation2 + $0x91] sm:$0xff] }
 0x1a7   : > { %v3343_v56 = vsel %vm21394_vm11, %v1438_v28, 0.0  ;;  %v1439_v51 = vmax.f32 %v1115_v35, 0.0  ;;  %v3925_v22 = vpack.c.bf16 %v3916_v3, %v3915_v62  ;;  %v1559_v35 = vadd.s32 384, %v21131_v11  ;;  %v5459_v3 = vld [vmem:[#allocation2 + $0xa1] sm:$0xff] }
 0x1a8   : > { %3464 = vst.msk [vmem:[#allocation2 + $0x180] sm:$0xff] %vm3415_vm0, %v3343_v56  ;;  %v3346_v10 = vsel %vm21409_vm12, %v1441_v63, 0.0  ;;  %vm3075_vm2 = vcmp.ge.s32.totalorder %v2383_v14, 1  ;;  %vm3190_vm3 = vcmp.le.s32.totalorder %v2404_v29, 28  ;;  %3533 = vst.msk [vmem:[#allocation2 + $0x3a8] sm:$0xff] %vm3415_vm0, %v1507_v21  ;;  %v5184_v63 = vld [vmem:[#allocation2 + $0x117] sm:$0xff] }
 0x1a9   : > { %3467 = vst.msk [vmem:[#allocation2 + $0x198] sm:$0xff] %vm3415_vm0, %v3346_v10  ;;  %3465 = vst.msk [vmem:[#allocation2 + $0x188] sm:$0xff] %vm3415_vm0, %v1439_v51  ;;  %v17978_v57 = vpop.f32.mrb[44].mxu0  ;;  %v3411_v52 = vsel %vm3075_vm2, %v1506_v42, 0.0  ;;  %v1562_v46 = vadd.s32 408, %v21131_v11  ;;  %v3918_v51 = vld [vmem:[#allocation2 + $0x99] sm:$0xff]  ;;  %v21513_v62 = vpack.c.bf16 %v5184_v63, %v5183_v41 }
 0x1aa   : > { %v1136_v20 = vadd.f32 %v17978_v57, %v21134_v13  ;;  %v1127_v6 = vpop.f32.mrb[45].mxu0  ;;  %3532 = vst.msk [vmem:[#allocation2 + $0x3a0] sm:$0xff] %vm3415_vm0, %v3411_v52  ;;  %v5460_v10 = vld [vmem:[#allocation2 + $0xa9] sm:$0xff]  ;;  %v1963_v4 = vand.u32 31, %v1559_v35  ;;  %v3926_v26 = vpack.c.bf16 %v3918_v51, %v3917_v12  ;;  %v5461_v41 = vld [vmem:[#allocation2 + $0xb1] sm:$0xff]  ;;  %v5462_v63 = vld [vmem:[#allocation2 + $0xb9] sm:$0xff] }
 0x1ab   : > { %v1128_v27 = vadd.f32 %v21134_v13, %v1127_v6  ;;  %v17979_v28 = vpop.f32.mrb[46].mxu0  ;;  %v1984_v57 = vand.u32 31, %v1562_v46  ;;  %v5467_v29 = vld [vmem:[#allocation2 + $0xe1] sm:$0xff] }
 0x1ac   : > { %18097 = vmatmul.mubr.msk.bf16.gmra.mrb[20].mxu1 %vm3415_vm0, %v3924_v18  ;;  %18257 = vmatmul.mubr.msk.bf16.gmra.mrb[108].mxu0 %vm3415_vm0, %v21443_v7  ;;  %v1444_v2 = vmax.f32 %v1136_v20, 0.0  ;;  %v1139_v17 = vadd.f32 %v17979_v28, %v21134_v13  ;;  %v1130_v38 = vpop.f32.mrb[47].mxu0  ;;  %v3414_v13 = vsel %vm3190_vm3, %v1509_v15, 0.0  ;;  %v5475_v18 = vpack.c.bf16 %v5460_v10, %v5459_v3  ;;  %v21546_v10 = vld [vmem:[%s24251_s3 + $0x48] sm:$0xff]  }
 0x1ad   : > { %18100 = vmatprep.mubr.msk.bf16.mxu1 %vm3415_vm0, %v3925_v22  ;;  %18260 = vmatprep.mubr.msk.bf16.mxu0 %vm3415_vm0, %v21483_v9  ;;  %v1442_v33 = vmax.f32 %v1128_v27, 0.0  ;;  %v1131_v36 = vadd.f32 %v21504_v40, %v1130_v38  ;;  %3535 = vst.msk [vmem:[#allocation2 + $0x3b8] sm:$0xff] %vm3415_vm0, %v3414_v13  ;;  %vm21525_vm4 = vcmp.ge.s32.totalorder %v1963_v4, 1  ;;  %v1563_v27 = vadd.s32 416, %v21131_v11  ;;  %v5464_v38 = vld [vmem:[#allocation2 + $0xc9] sm:$0xff] }
 0x1ae   : > { %3470 = vst.msk [vmem:[#allocation2 + $0x1b0] sm:$0xff] %vm3415_vm0, %v1444_v2  ;;  %v1445_v56 = vmax.f32 %v1139_v17, 0.0  ;;  %vm3130_vm5 = vcmp.le.s32.totalorder %v1984_v57, 28  ;;  %v1566_v2 = vadd.s32 440, %v21131_v11  ;;  %v5463_v17 = vld [vmem:[#allocation2 + $0xc1] sm:$0xff] }
 0x1af   : > { %v3347_v61 = vsel %vm21458_vm13, %v1442_v33, 0.0  ;;  %v1443_v58 = vmax.f32 %v1131_v36, 0.0  ;;  %v1991_v46 = vand.u32 31, %v1563_v27  ;;  %v5477_v13 = vpack.c.bf16 %v5464_v38, %v5463_v17 }
 0x1b0   : > { %3468 = vst.msk [vmem:[#allocation2 + $0x1a0] sm:$0xff] %vm3415_vm0, %v3347_v61  ;;  %v3350_v42 = vsel %vm21489_vm1, %v1445_v56, 0.0  ;;  %v2012_v51 = vand.u32 31, %v1566_v2  ;;  %v5476_v61 = vpack.c.bf16 %v5462_v63, %v5461_v41 }
 0x1b1   : > { %3471 = vst.msk [vmem:[#allocation2 + $0x1b8] sm:$0xff] %vm3415_vm0, %v3350_v42  ;;  %3469 = vst.msk [vmem:[#allocation2 + $0x1a8] sm:$0xff] %vm3415_vm0, %v1443_v58  ;;  %v17982_v54 = vpop.f32.mrb[48].mxu0  ;;  %vm21552_vm6 = vcmp.ge.s32.totalorder %v1991_v46, 1 }
 0x1b2   : > { %v1152_v14 = vadd.f32 %v21504_v40, %v17982_v54  ;;  %v1143_v15 = vpop.f32.mrb[49].mxu0  ;;  %vm21561_vm7 = vcmp.le.s32.totalorder %v2012_v51, 28  ;;  %v5469_v51 = vld [vmem:[#allocation2 + $0xf1] sm:$0xff] }
 0x1b3   : > { %v1144_v20 = vadd.f32 %v21504_v40, %v1143_v15  ;;  %v17983_v6 = vpop.f32.mrb[50].mxu0  ;;  %v5465_v15 = vld [vmem:[#allocation2 + $0xd1] sm:$0xff] }
 0x1b4   : > { %18101 = vmatmul.mubr.msk.bf16.gmra.mrb[24].mxu1 %vm3415_vm0, %v3926_v26  ;;  %18261 = vmatmul.mubr.msk.bf16.gmra.mrb[112].mxu0 %vm3415_vm0, %v21513_v62  ;;  %v1448_v16 = vmax.f32 %v1152_v14, 0.0  ;;  %v1155_v21 = vadd.f32 %v21504_v40, %v17983_v6  ;;  %v1146_v22 = vpop.f32.mrb[51].mxu0  ;;  %v1567_v14 = vadd.s32 448, %v21131_v11 }
 0x1b5   : > { %18108 = vmatprep.mubr.msk.bf16.mxu1 %vm3415_vm0, %v21223_v32  ;;  %18268 = vmatprep.mubr.msk.bf16.mxu0 %vm3415_vm0, %v5475_v18  ;;  %v1446_v28 = vmax.f32 %v1144_v20, 0.0  ;;  %v1147_v35 = vadd.f32 %v21504_v40, %v1146_v22  ;;  %v5466_v18 = vld [vmem:[#allocation2 + $0xd9] sm:$0xff] }
 0x1b6   : > { %3474 = vst.msk [vmem:[#allocation2 + $0x1d0] sm:$0xff] %vm3415_vm0, %v1448_v16  ;;  %v1449_v52 = vmax.f32 %v1155_v21, 0.0  ;;  %v1570_v16 = vadd.s32 472, %v21131_v11  ;;  %v5468_v21 = vld [vmem:[#allocation2 + $0xe9] sm:$0xff]  ;;  %v2019_v2 = vand.u32 31, %v1567_v14 }
 0x1b7   : > { %v3351_v33 = vsel %vm21525_vm4, %v1446_v28, 0.0  ;;  %v1447_v36 = vmax.f32 %v1147_v35, 0.0  ;;  %v21577_v28 = vld [vmem:[%s24251_s3 + $0x50] sm:$0xff]   ;;  %v5478_v35 = vpack.c.bf16 %v5466_v18, %v5465_v15  ;;  %v5479_v17 = vpack.c.bf16 %v5468_v21, %v5467_v29 }
 0x1b8   : > { %3472 = vst.msk [vmem:[#allocation2 + $0x1c0] sm:$0xff] %vm3415_vm0, %v3351_v33  ;;  %v3354_v32 = vsel %vm3130_vm5, %v1449_v52, 0.0  ;;  %v2040_v52 = vand.u32 31, %v1570_v16  ;;  %vm21593_vm8 = vcmp.ge.s32.totalorder %v2019_v2, 1 }
 0x1b9   : > { %3475 = vst.msk [vmem:[#allocation2 + $0x1d8] sm:$0xff] %vm3415_vm0, %v3354_v32  ;;  %3473 = vst.msk [vmem:[#allocation2 + $0x1c8] sm:$0xff] %vm3415_vm0, %v1447_v36  ;;  %v17986_v56 = vpop.f32.mrb[52].mxu0 }
 0x1ba   : > { %v1168_v58 = vadd.f32 %v21504_v40, %v17986_v56  ;;  %v1159_v3 = vpop.f32.mrb[53].mxu0  ;;  %v1571_v56 = vadd.s32 480, %v21131_v11  ;;  %vm3138_vm9 = vcmp.le.s32.totalorder %v2040_v52, 28 }
 0x1bb   : > { %v1160_v42 = vadd.f32 %v21504_v40, %v1159_v3  ;;  %v17987_v4 = vpop.f32.mrb[54].mxu0  ;;  %v1574_v3 = vadd.s32 504, %v21131_v11 }
 0x1bc   : > { %18109 = vmatmul.mubr.msk.bf16.vlgmr.msra.gmra.mrb[12].mxu1 %vm3415_vm0, %v21260_v5  ;;  %18269 = vmatmul.mubr.msk.bf16.vlgmr.msra.gmra.mrb[100].mxu0 %vm3415_vm0, %v5476_v61  ;;  %v1452_v12 = vmax.f32 %v1168_v58, 0.0  ;;  %v1171_v57 = vadd.f32 %v21504_v40, %v17987_v4  ;;  %v1162_v26 = vpop.f32.mrb[55].mxu0  ;;  %v5470_v61 = vld [vmem:[#allocation2 + $0xf9] sm:$0xff]  ;;  %v5472_v4 = vld [vmem:[#allocation2 + $0x109] sm:$0xff]  ;;  %v2047_v14 = vand.u32 31, %v1571_v56 }
 0x1bd   : > { %18112 = vmatprep.mubr.msk.bf16.mxu1 %vm3415_vm0, %v21266_v8  ;;  %18272 = vmatprep.mubr.msk.bf16.mxu0 %vm3415_vm0, %v5477_v13  ;;  %v1450_v5 = vmax.f32 %v1160_v42, 0.0  ;;  %v1163_v6 = vadd.f32 %v21504_v40, %v1162_v26  ;;  %v5471_v42 = vld [vmem:[#allocation2 + $0x101] sm:$0xff] }
 0x1be   : > { %18125 = vmatpush3.bf16.msra.mxu1 %v21406_v53  ;;  %18285 = vmatpush3.bf16.msra.mxu0 %v21248_v45  ;;  %3478 = vst.msk [vmem:[#allocation2 + $0x1f0] sm:$0xff] %vm3415_vm0, %v1452_v12  ;;  %v1453_v8 = vmax.f32 %v1171_v57, 0.0  ;;  %v5481_v15 = vpack.c.bf16 %v5472_v4, %v5471_v42  ;;  %vm3027_vm10 = vcmp.ge.s32.totalorder %v2047_v14, 1 }
 0x1bf   : > { %18126 = vmatprep.subr.bf16.mxu1 %v21546_v10  ;;  %18286 = vmatprep.subr.bf16.mxu0 %v21387_v47  ;;  %v3355_v22 = vsel %vm21552_vm6, %v1450_v5, 0.0  ;;  %v1451_v27 = vmax.f32 %v1163_v6, 0.0  ;;  %v2068_v5 = vand.u32 31, %v1574_v3 }
 0x1c0   : > { %3476 = vst.msk [vmem:[#allocation2 + $0x1e0] sm:$0xff] %vm3415_vm0, %v3355_v22  ;;  %v3358_v45 = vsel %vm21561_vm7, %v1453_v8, 0.0 }
 0x1c1   : > { %3479 = vst.msk [vmem:[#allocation2 + $0x1f8] sm:$0xff] %vm3415_vm0, %v3358_v45  ;;  %3477 = vst.msk [vmem:[#allocation2 + $0x1e8] sm:$0xff] %vm3415_vm0, %v1451_v27  ;;  %v17990_v38 = vpop.f32.mrb[56].mxu0  ;;  %v1575_v27 = vadd.s32 512, %v21131_v11  ;;  %v5474_v45 = vld [vmem:[#allocation2 + $0x119] sm:$0xff]  ;;  %vm3142_vm11 = vcmp.le.s32.totalorder %v2068_v5, 28 }
 0x1c2   : > { %18127 = vmatpush3.bf16.msra.mxu1 %v21546_v10  ;;  %18287 = vmatpush3.bf16.msra.mxu0 %v21387_v47  ;;  %v1184_v41 = vadd.f32 %v21504_v40, %v17990_v38  ;;  %v1175_v63 = vpop.f32.mrb[57].mxu0 }
 0x1c3   : > { %v1176_v33 = vadd.f32 %v21504_v40, %v1175_v63  ;;  %v17991_v36 = vpop.f32.mrb[58].mxu0  ;;  %18144 = vmatprep.subr.bf16.mxu1 %v21577_v28  ;;  %18304 = vmatprep.subr.bf16.mxu0 %v21406_v53 }
 0x1c4   : > { %18113 = vmatmul.mubr.msk.bf16.gmra.mrb[16].mxu1 %vm3415_vm0, %v21282_v39  ;;  %18273 = vmatmul.mubr.msk.bf16.gmra.mrb[104].mxu0 %vm3415_vm0, %v5478_v35  ;;  %v1456_v32 = vmax.f32 %v1184_v41, 0.0  ;;  %v1187_v47 = vadd.f32 %v21504_v40, %v17991_v36  ;;  %v1178_v13 = vpop.f32.mrb[59].mxu0  ;;  %v5473_v35 = vld [vmem:[#allocation2 + $0x111] sm:$0xff] }
 0x1c5   : > { %18116 = vmatprep.mubr.msk.bf16.mxu1 %vm3415_vm0, %v21288_v44  ;;  %18276 = vmatprep.mubr.msk.bf16.mxu0 %vm3415_vm0, %v5479_v17  ;;  %v1454_v39 = vmax.f32 %v1176_v33, 0.0  ;;  %v1179_v58 = vadd.f32 %v21504_v40, %v1178_v13  ;;  %v5480_v44 = vpack.c.bf16 %v5470_v61, %v5469_v51  ;;  %v1578_v17 = vadd.s32 536, %v21131_v11 }
 0x1c6   : > { %3482 = vst.msk [vmem:[#allocation2 + $0x210] sm:$0xff] %vm3415_vm0, %v1456_v32  ;;  %v1457_v12 = vmax.f32 %v1187_v47, 0.0  ;;  %v5482_v63 = vpack.c.bf16 %v5474_v45, %v5473_v35 }
 0x1c7   : > { %v3359_v54 = vsel %vm21593_vm8, %v1454_v39, 0.0  ;;  %v1455_v57 = vmax.f32 %v1179_v58, 0.0  ;;  %v2096_v32 = vand.u32 31, %v1578_v17  ;;  %v1579_v58 = vadd.s32 544, %v21131_v11 }
 0x1c8   : > { %3480 = vst.msk [vmem:[#allocation2 + $0x200] sm:$0xff] %vm3415_vm0, %v3359_v54  ;;  %v3362_v26 = vsel %vm3138_vm9, %v1457_v12, 0.0 }
 0x1c9   : > { %3483 = vst.msk [vmem:[#allocation2 + $0x218] sm:$0xff] %vm3415_vm0, %v3362_v26  ;;  %3481 = vst.msk [vmem:[#allocation2 + $0x208] sm:$0xff] %vm3415_vm0, %v1455_v57  ;;  %v17994_v18 = vpop.f32.mrb[60].mxu0  ;;  %vm3146_vm13 = vcmp.le.s32.totalorder %v2096_v32, 28  ;;  %v5633_v32 = vld [vmem:[#allocation2 + $0x127] sm:$0xff] }
 0x1ca   : > { %v1200_v20 = vadd.f32 %v21504_v40, %v17994_v18  ;;  %v1191_v6 = vpop.f32.mrb[61].mxu0 }
 0x1cb   : > { %v1192_v16 = vadd.f32 %v21504_v40, %v1191_v6  ;;  %v17995_v29 = vpop.f32.mrb[62].mxu0 }
 0x1cc   : > { %18117 = vmatmul.mubr.msk.bf16.gmra.mrb[20].mxu1 %vm3415_vm0, %v21319_v31  ;;  %18277 = vmatmul.mubr.msk.bf16.gmra.mrb[108].mxu0 %vm3415_vm0, %v5480_v44  ;;  %v1460_v21 = vmax.f32 %v1200_v20, 0.0  ;;  %v1203_v8 = vadd.f32 %v21504_v40, %v17995_v29  ;;  %v1194_v22 = vpop.f32.mrb[63].mxu0  ;;  %v2103_v44 = vand.u32 31, %v1579_v58 }
 0x1cd   : > { %18120 = vmatprep.mubr.msk.bf16.mxu1 %vm3415_vm0, %v21331_v37  ;;  %18280 = vmatprep.mubr.msk.bf16.mxu0 %vm3415_vm0, %v5481_v15  ;;  %v1458_v2 = vmax.f32 %v1192_v16, 0.0  ;;  %v1195_v31 = vadd.f32 %v21504_v40, %v1194_v22  ;;  %v2075_v37 = vand.u32 31, %v1575_v27  ;;  %v21647_v15 = vld [vmem:[%s24251_s3 + $0x58] sm:$0xff]   ;;  %v21676_v27 = vld [vmem:[%s24251_s3 + $0x60] sm:$0xff]  }
 0x1ce   : > { %3486 = vst.msk [vmem:[#allocation2 + $0x230] sm:$0xff] %vm3415_vm0, %v1460_v21  ;;  %v1461_v38 = vmax.f32 %v1203_v8, 0.0  ;;  %vm21654_vm14 = vcmp.ge.s32.totalorder %v2103_v44, 1  ;;  %v1583_v21 = vadd.s32 576, %v21131_v11  ;;  %v1586_v8 = vadd.s32 600, %v21131_v11  ;;  %v5635_v44 = vld [vmem:[#allocation2 + $0x137] sm:$0xff] }
 0x1cf   : > { %v3363_v52 = vsel %vm3027_vm10, %v1458_v2, 0.0  ;;  %v1459_v41 = vmax.f32 %v1195_v31, 0.0  ;;  %vm3031_vm12 = vcmp.ge.s32.totalorder %v2075_v37, 1 }
 0x1d0   : > { %3484 = vst.msk [vmem:[#allocation2 + $0x220] sm:$0xff] %vm3415_vm0, %v3363_v52  ;;  %v3366_v33 = vsel %vm3142_vm11, %v1461_v38, 0.0  ;;  %v2152_v2 = vand.u32 31, %v1586_v8 }
 0x1d1   : > { %3487 = vst.msk [vmem:[#allocation2 + $0x238] sm:$0xff] %vm3415_vm0, %v3366_v33  ;;  %3485 = vst.msk [vmem:[#allocation2 + $0x228] sm:$0xff] %vm3415_vm0, %v1459_v41  ;;  %v17998_v36 = vpop.f32.mrb[64].mxu0  ;;  %v1587_v33 = vadd.s32 608, %v21131_v11 }
 0x1d2   : > { %v1216_v46 = vadd.f32 %v21504_v40, %v17998_v36  ;;  %v1207_v47 = vpop.f32.mrb[65].mxu0  ;;  %vm3154_vm2 = vcmp.le.s32.totalorder %v2152_v2, 28  ;;  %v1590_v36 = vadd.s32 632, %v21131_v11 }
 0x1d3   : > { %v1208_v13 = vadd.f32 %v21504_v40, %v1207_v47  ;;  %v17999_v56 = vpop.f32.mrb[66].mxu0 }
 0x1d4   : > { %18121 = vmatmul.mubr.msk.bf16.gmra.mrb[24].mxu1 %vm3415_vm0, %v21370_v19  ;;  %18281 = vmatmul.mubr.msk.bf16.gmra.mrb[112].mxu0 %vm3415_vm0, %v5482_v63  ;;  %v1464_v51 = vmax.f32 %v1216_v46, 0.0  ;;  %v1219_v61 = vadd.f32 %v21504_v40, %v17999_v56  ;;  %v1210_v39 = vpop.f32.mrb[67].mxu0  ;;  %v1582_v19 = vadd.s32 568, %v21131_v11 }
 0x1d5   : > { %18128 = vmatprep.mubr.msk.bf16.mxu1 %vm3415_vm0, %v21157_v59  ;;  %18288 = vmatprep.mubr.msk.bf16.mxu0 %vm3415_vm0, %v21375_v30  ;;  %v1462_v3 = vmax.f32 %v1208_v13, 0.0  ;;  %v1211_v42 = vadd.f32 %v21504_v40, %v1210_v39 }
 0x1d6   : > { %3490 = vst.msk [vmem:[#allocation2 + $0x250] sm:$0xff] %vm3415_vm0, %v1464_v51  ;;  %v1465_v4 = vmax.f32 %v1219_v61, 0.0  ;;  %v2124_v30 = vand.u32 31, %v1582_v19  ;;  %v2180_v61 = vand.u32 31, %v1590_v36 }
 0x1d7   : > { %v3367_v12 = vsel %vm3031_vm12, %v1462_v3, 0.0  ;;  %v1463_v54 = vmax.f32 %v1211_v42, 0.0 }
 0x1d8   : > { %3488 = vst.msk [vmem:[#allocation2 + $0x240] sm:$0xff] %vm3415_vm0, %v3367_v12  ;;  %v3370_v57 = vsel %vm3146_vm13, %v1465_v4, 0.0  ;;  %vm3150_vm15 = vcmp.le.s32.totalorder %v2124_v30, 28  ;;  %vm3158_vm4 = vcmp.le.s32.totalorder %v2180_v61, 28  ;;  %v1594_v30 = vadd.s32 664, %v21131_v11 }
 0x1d9   : > { %3491 = vst.msk [vmem:[#allocation2 + $0x258] sm:$0xff] %vm3415_vm0, %v3370_v57  ;;  %3489 = vst.msk [vmem:[#allocation2 + $0x248] sm:$0xff] %vm3415_vm0, %v1463_v54  ;;  %v18002_v59 = vpop.f32.mrb[68].mxu0  ;;  %v1591_v57 = vadd.s32 640, %v21131_v11 }
 0x1da   : > { %v1232_v26 = vadd.f32 %v21504_v40, %v18002_v59  ;;  %v1223_v14 = vpop.f32.mrb[69].mxu0  ;;  %v2208_v8 = vand.u32 31, %v1594_v30 }
 0x1db   : > { %v1224_v18 = vadd.f32 %v21504_v40, %v1223_v14  ;;  %v18003_v5 = vpop.f32.mrb[70].mxu0  ;;  %v5782_v14 = vld [vmem:[#allocation2 + $0xc8] sm:$0xff] }
 0x1dc   : > { %18129 = vmatmul.mubr.msk.bf16.vlgmr.msra.gmra.mrb[12].mxu1 %vm3415_vm0, %v21159_v60  ;;  %18289 = vmatmul.mubr.msk.bf16.vlgmr.msra.gmra.mrb[100].mxu0 %vm3415_vm0, %v21427_v48  ;;  %v1468_v20 = vmax.f32 %v1232_v26, 0.0  ;;  %v1235_v16 = vadd.f32 %v21504_v40, %v18003_v5  ;;  %v1226_v29 = vpop.f32.mrb[71].mxu0  ;;  %v5781_v26 = vld [vmem:[#allocation2 + $0xc0] sm:$0xff]  ;;  %v4263_v5 = vld [vmem:[#allocation2 + $0xb0] sm:$0xff]  ;;  %vm3162_vm6 = vcmp.le.s32.totalorder %v2208_v8, 28 }
 0x1dd   : > { %18132 = vmatprep.mubr.msk.bf16.mxu1 %vm3415_vm0, %v21175_v23  ;;  %18292 = vmatprep.mubr.msk.bf16.mxu0 %vm3415_vm0, %v21429_v55  ;;  %v1466_v60 = vmax.f32 %v1224_v18, 0.0  ;;  %v1227_v48 = vadd.f32 %v21504_v40, %v1226_v29 }
 0x1de   : > { %18145 = vmatpush3.bf16.msra.mxu1 %v21577_v28  ;;  %18305 = vmatpush3.bf16.msra.mxu0 %v21406_v53  ;;  %3494 = vst.msk [vmem:[#allocation2 + $0x270] sm:$0xff] %vm3415_vm0, %v1468_v20  ;;  %v1469_v22 = vmax.f32 %v1235_v16, 0.0  ;;  %v2131_v53 = vand.u32 31, %v1583_v21  ;;  %v4264_v20 = vld [vmem:[#allocation2 + $0xb8] sm:$0xff]  ;;  %v2187_v21 = vand.u32 31, %v1591_v57 }
 0x1df   : > { %18146 = vmatprep.subr.bf16.mxu1 %v21647_v15  ;;  %18306 = vmatprep.subr.bf16.mxu0 %v21546_v10  ;;  %v3371_v23 = vsel %vm21654_vm14, %v1466_v60, 0.0  ;;  %v1467_v55 = vmax.f32 %v1227_v48, 0.0  ;;  %v21729_v60 = vpack.c.bf16 %v5782_v14, %v5781_v26  ;;  %v5788_v57 = vld [vmem:[#allocation2 + $0xf8] sm:$0xff]  ;;  %v5789_v26 = vld [vmem:[#allocation2 + $0x100] sm:$0xff]  ;;  %v5790_v14 = vld [vmem:[#allocation2 + $0x108] sm:$0xff] }
 0x1e0   : > { %3492 = vst.msk [vmem:[#allocation2 + $0x260] sm:$0xff] %vm3415_vm0, %v3371_v23  ;;  %v3374_v35 = vsel %vm3150_vm15, %v1469_v22, 0.0  ;;  %vm3039_vm1 = vcmp.ge.s32.totalorder %v2131_v53, 1  ;;  %v21733_v22 = vpack.c.bf16 %v4264_v20, %v4263_v5  ;;  %vm21741_vm5 = vcmp.ge.s32.totalorder %v2187_v21, 1  ;;  %v21800_v20 = vld [vmem:[%s24251_s3 + $0x70] sm:$0xff]  }
 0x1e1   : > { %3495 = vst.msk [vmem:[#allocation2 + $0x278] sm:$0xff] %vm3415_vm0, %v3374_v35  ;;  %3493 = vst.msk [vmem:[#allocation2 + $0x268] sm:$0xff] %vm3415_vm0, %v1467_v55  ;;  %v18006_v45 = vpop.f32.mrb[72].mxu0  ;;  %v21809_v8 = vpack.c.bf16 %v5790_v14, %v5789_v26  ;;  %vm5152_vm15 = vcmask 523264  }
 0x1e2   : > { %18147 = vmatpush3.bf16.msra.mxu1 %v21647_v15  ;;  %18307 = vmatpush3.bf16.msra.mxu0 %v21546_v10  ;;  %v1248_v31 = vadd.f32 %v21504_v40, %v18006_v45  ;;  %v1239_v17 = vpop.f32.mrb[73].mxu0 }
 0x1e3   : > { %v1240_v38 = vadd.f32 %v21504_v40, %v1239_v17  ;;  %v18007_v52 = vpop.f32.mrb[74].mxu0  ;;  %18164 = vmatprep.subr.bf16.mxu1 %v21676_v27  ;;  %18324 = vmatprep.subr.bf16.mxu0 %v21577_v28 }
 0x1e4   : > { %18133 = vmatmul.mubr.msk.bf16.gmra.mrb[16].mxu1 %vm3415_vm0, %v21177_v24  ;;  %18293 = vmatmul.mubr.msk.bf16.gmra.mrb[104].mxu0 %vm3415_vm0, %v21443_v7  ;;  %v1472_v41 = vmax.f32 %v1248_v31, 0.0  ;;  %v1251_v10 = vadd.f32 %v21504_v40, %v18007_v52  ;;  %v1242_v63 = vpop.f32.mrb[75].mxu0  ;;  %v5632_v7 = vld [vmem:[#allocation2 + $0x11f] sm:$0xff]  ;;  %v5783_v52 = vld [vmem:[#allocation2 + $0xd0] sm:$0xff] }
 0x1e5   : > { %18136 = vmatprep.mubr.msk.bf16.mxu1 %vm3415_vm0, %v21193_v49  ;;  %18296 = vmatprep.mubr.msk.bf16.mxu0 %vm3415_vm0, %v21483_v9  ;;  %v1470_v37 = vmax.f32 %v1240_v38, 0.0  ;;  %v1243_v24 = vadd.f32 %v21504_v40, %v1242_v63  ;;  %v2159_v49 = vand.u32 31, %v1587_v33  ;;  %v21701_v51 = vpack.c.bf16 %v5633_v32, %v5632_v7 }
 0x1e6   : > { %3498 = vst.msk [vmem:[#allocation2 + $0x290] sm:$0xff] %vm3415_vm0, %v1472_v41  ;;  %v1473_v46 = vmax.f32 %v1251_v10, 0.0  ;;  %v1595_v38 = vadd.s32 672, %v21131_v11  ;;  %v5784_v41 = vld [vmem:[#allocation2 + $0xd8] sm:$0xff]  ;;  %v1598_v33 = vadd.s32 696, %v21131_v11 }
 0x1e7   : > { %v3375_v47 = vsel %vm3039_vm1, %v1470_v37, 0.0  ;;  %v1471_v13 = vmax.f32 %v1243_v24, 0.0  ;;  %vm21711_vm3 = vcmp.ge.s32.totalorder %v2159_v49, 1  ;;  %v5785_v37 = vld [vmem:[#allocation2 + $0xe0] sm:$0xff]  ;;  %v5786_v24 = vld [vmem:[#allocation2 + $0xe8] sm:$0xff]  ;;  %v21756_v32 = vpack.c.bf16 %v5784_v41, %v5783_v52 }
 0x1e8   : > { %3496 = vst.msk [vmem:[#allocation2 + $0x280] sm:$0xff] %vm3415_vm0, %v3375_v47  ;;  %v3378_v56 = vsel %vm3154_vm2, %v1473_v46, 0.0  ;;  %v2215_v47 = vand.u32 31, %v1595_v38  ;;  %v2236_v49 = vand.u32 31, %v1598_v33  ;;  %v5792_v33 = vld [vmem:[#allocation2 + $0x118] sm:$0xff]  ;;  %v4596_v52 = vld [vmem:[#allocation2 + $0x67] sm:$0xff] }
 0x1e9   : > { %3499 = vst.msk [vmem:[#allocation2 + $0x298] sm:$0xff] %vm3415_vm0, %v3378_v56  ;;  %3497 = vst.msk [vmem:[#allocation2 + $0x288] sm:$0xff] %vm3415_vm0, %v1471_v13  ;;  %v18010_v9 = vpop.f32.mrb[76].mxu0  ;;  %v21759_v13 = vpack.c.bf16 %v5786_v24, %v5785_v37  ;;  %vm14768_vm1 = vcmask 1045504   ;;  %vm14746_vm2 = vcmask 752640  }
 0x1ea   : > { %v1264_v39 = vadd.f32 %v21504_v40, %v18010_v9  ;;  %v1255_v58 = vpop.f32.mrb[77].mxu0  ;;  %vm21774_vm7 = vcmp.ge.s32.totalorder %v2215_v47, 1  ;;  %vm21784_vm8 = vcmp.le.s32.totalorder %v2236_v49, 28  ;;  %v4433_v47 = vld [vmem:[#allocation2 + $0x99] sm:$0xff] }
 0x1eb   : > { %v1256_v3 = vadd.f32 %v21504_v40, %v1255_v58  ;;  %v18011_v42 = vpop.f32.mrb[78].mxu0 }
 0x1ec   : > { %18137 = vmatmul.mubr.msk.bf16.gmra.mrb[20].mxu1 %vm3415_vm0, %v21195_v50  ;;  %18297 = vmatmul.mubr.msk.bf16.gmra.mrb[108].mxu0 %vm3415_vm0, %v21513_v62  ;;  %v1476_v19 = vmax.f32 %v1264_v39, 0.0  ;;  %v1267_v12 = vadd.f32 %v21504_v40, %v18011_v42  ;;  %v1258_v54 = vpop.f32.mrb[79].mxu0  ;;  %v5634_v50 = vld [vmem:[#allocation2 + $0x12f] sm:$0xff] }
 0x1ed   : > { %18140 = vmatprep.mubr.msk.bf16.mxu1 %vm3415_vm0, %v21212_v25  ;;  %18300 = vmatprep.mubr.msk.bf16.mxu0 %vm3415_vm0, %v21701_v51  ;;  %v1474_v59 = vmax.f32 %v1256_v3, 0.0  ;;  %v1259_v62 = vadd.f32 %v21504_v40, %v1258_v54  ;;  %v21726_v16 = vpack.c.bf16 %v5635_v44, %v5634_v50  ;;  %v21768_v3 = vld [vmem:[%s24251_s3 + $0x68] sm:$0xff]   ;;  %v1599_v54 = vadd.s32 704, %v21131_v11 }
 0x1ee   : > { %3502 = vst.msk [vmem:[#allocation2 + $0x2b0] sm:$0xff] %vm3415_vm0, %v1476_v19  ;;  %v1477_v18 = vmax.f32 %v1267_v12, 0.0  ;;  %v4432_v19 = vld [vmem:[#allocation2 + $0x91] sm:$0xff] }
 0x1ef   : > { %v3379_v25 = vsel %vm21711_vm3, %v1474_v59, 0.0  ;;  %v1475_v6 = vmax.f32 %v1259_v62, 0.0  ;;  %v1602_v62 = vadd.s32 728, %v21131_v11  ;;  %v2243_v21 = vand.u32 31, %v1599_v54 }
 0x1f0   : > { %3500 = vst.msk [vmem:[#allocation2 + $0x2a0] sm:$0xff] %vm3415_vm0, %v3379_v25  ;;  %v3382_v29 = vsel %vm3158_vm4, %v1477_v18, 0.0 }
 0x1f1   : > { %3503 = vst.msk [vmem:[#allocation2 + $0x2b8] sm:$0xff] %vm3415_vm0, %v3382_v29  ;;  %3501 = vst.msk [vmem:[#allocation2 + $0x2a8] sm:$0xff] %vm3415_vm0, %v1475_v6  ;;  %v18014_v48 = vpop.f32.mrb[80].mxu0  ;;  %v4430_v6 = vld [vmem:[#allocation2 + $0x81] sm:$0xff]  ;;  %v4431_v29 = vld [vmem:[#allocation2 + $0x89] sm:$0xff]  ;;  %vm21825_vm9 = vcmp.ge.s32.totalorder %v2243_v21, 1 }
 0x1f2   : > { %v1280_v23 = vadd.f32 %v21504_v40, %v18014_v48  ;;  %v1271_v55 = vpop.f32.mrb[81].mxu0  ;;  %v4428_v48 = vld [vmem:[#allocation2 + $0x71] sm:$0xff]  ;;  %v21816_v2 = vpack.c.bf16 %v4431_v29, %v4430_v6 }
 0x1f3   : > { %v1272_v35 = vadd.f32 %v21504_v40, %v1271_v55  ;;  %v18015_v53 = vpop.f32.mrb[82].mxu0  ;;  %v2264_v55 = vand.u32 31, %v1602_v62  ;;  %v5795_v6 = vld [vmem:[#allocation2 + $0x130] sm:$0xff]  ;;  %v5796_v29 = vld [vmem:[#allocation2 + $0x138] sm:$0xff] }
 0x1f4   : > { %18141 = vmatmul.mubr.msk.bf16.gmra.mrb[24].mxu1 %vm3415_vm0, %v21733_v22  ;;  %18301 = vmatmul.mubr.msk.bf16.gmra.mrb[112].mxu0 %vm3415_vm0, %v21726_v16  ;;  %v1480_v45 = vmax.f32 %v1280_v23, 0.0  ;;  %v1283_v31 = vadd.f32 %v21504_v40, %v18015_v53  ;;  %v1274_v17 = vpop.f32.mrb[83].mxu0 }
 0x1f5   : > { %18148 = vmatprep.mubr.msk.bf16.mxu1 %vm3415_vm0, %v21382_v43  ;;  %18308 = vmatprep.mubr.msk.bf16.mxu0 %vm3415_vm0, %v21729_v60  ;;  %v1478_v10 = vmax.f32 %v1272_v35, 0.0  ;;  %v1275_v63 = vadd.f32 %v21504_v40, %v1274_v17  ;;  %vm3170_vm10 = vcmp.le.s32.totalorder %v2264_v55, 28  ;;  %v4436_v55 = vld [vmem:[#allocation2 + $0xb1] sm:$0xff] }
 0x1f6   : > { %3506 = vst.msk [vmem:[#allocation2 + $0x2d0] sm:$0xff] %vm3415_vm0, %v1480_v45  ;;  %v1481_v36 = vmax.f32 %v1283_v31, 0.0 }
 0x1f7   : > { %v3383_v7 = vsel %vm21741_vm5, %v1478_v10, 0.0  ;;  %v1479_v43 = vmax.f32 %v1275_v63, 0.0  ;;  %v1603_v10 = vadd.s32 736, %v21131_v11  ;;  %v5791_v63 = vld [vmem:[#allocation2 + $0x110] sm:$0xff] }
 0x1f8   : > { %3504 = vst.msk [vmem:[#allocation2 + $0x2c0] sm:$0xff] %vm3415_vm0, %v3383_v7  ;;  %v3386_v46 = vsel %vm3162_vm6, %v1481_v36, 0.0  ;;  %v1606_v36 = vadd.s32 760, %v21131_v11 }
 0x1f9   : > { %3507 = vst.msk [vmem:[#allocation2 + $0x2d8] sm:$0xff] %vm3415_vm0, %v3386_v46  ;;  %3505 = vst.msk [vmem:[#allocation2 + $0x2c8] sm:$0xff] %vm3415_vm0, %v1479_v43  ;;  %v18018_v56 = vpop.f32.mrb[84].mxu0  ;;  %v5793_v43 = vld [vmem:[#allocation2 + $0x120] sm:$0xff]  ;;  %v5794_v46 = vld [vmem:[#allocation2 + $0x128] sm:$0xff] }
 0x1fa   : > { %v1296_v9 = vadd.f32 %v21504_v40, %v18018_v56  ;;  %v1287_v61 = vpop.f32.mrb[85].mxu0  ;;  %v21845_v54 = vpack.c.bf16 %v5794_v46, %v5793_v43 }
 0x1fb   : > { %v1288_v39 = vadd.f32 %v21504_v40, %v1287_v61  ;;  %v18019_v58 = vpop.f32.mrb[86].mxu0  ;;  %v4434_v61 = vld [vmem:[#allocation2 + $0xa1] sm:$0xff] }
 0x1fc   : > { %18149 = vmatmul.mubr.msk.bf16.vlgmr.msra.gmra.mrb[12].mxu1 %vm3415_vm0, %v21421_v34  ;;  %18309 = vmatmul.mubr.msk.bf16.vlgmr.msra.gmra.mrb[100].mxu0 %vm3415_vm0, %v21756_v32  ;;  %v1484_v42 = vmax.f32 %v1296_v9, 0.0  ;;  %v1299_v4 = vadd.f32 %v21504_v40, %v18019_v58  ;;  %v1290_v12 = vpop.f32.mrb[87].mxu0  ;;  %v5787_v34 = vld [vmem:[#allocation2 + $0xf0] sm:$0xff]  ;;  %v21840_v9 = vpack.c.bf16 %v5792_v33, %v5791_v63 }
 0x1fd   : > { %18152 = vmatprep.mubr.msk.bf16.mxu1 %vm3415_vm0, %v21441_v1  ;;  %18312 = vmatprep.mubr.msk.bf16.mxu0 %vm3415_vm0, %v21759_v13  ;;  %v1482_v50 = vmax.f32 %v1288_v39, 0.0  ;;  %v1291_v59 = vadd.f32 %v21504_v40, %v1290_v12  ;;  %v4429_v1 = vld [vmem:[#allocation2 + $0x79] sm:$0xff]  ;;  %v21802_v25 = vpack.c.bf16 %v5788_v57, %v5787_v34  ;;  %v4435_v39 = vld [vmem:[#allocation2 + $0xa9] sm:$0xff]  ;;  %v2292_v12 = vand.u32 31, %v1606_v36 }
 0x1fe   : > { %3510 = vst.msk [vmem:[#allocation2 + $0x2f0] sm:$0xff] %vm3415_vm0, %v1484_v42  ;;  %v1485_v30 = vmax.f32 %v1299_v4, 0.0  ;;  %18165 = vmatpush3.bf16.msra.mxu1 %v21676_v27  ;;  %18325 = vmatpush3.bf16.msra.mxu0 %v21577_v28  ;;  %v21811_v35 = vpack.c.bf16 %v4429_v1, %v4428_v48  ;;  %v2271_v42 = vand.u32 31, %v1603_v10  ;;  %v21847_v34 = vpack.c.bf16 %v4433_v47, %v4432_v19  ;;  %v4598_v19 = vld [vmem:[#allocation2 + $0x77] sm:$0xff] }
 0x1ff   : > { %v3387_v18 = vsel %vm21774_vm7, %v1482_v50, 0.0  ;;  %v1483_v5 = vmax.f32 %v1291_v59, 0.0  ;;  %18166 = vmatprep.subr.bf16.mxu1 %v21768_v3  ;;  %18326 = vmatprep.subr.bf16.mxu0 %v21647_v15  ;;  %v21850_v44 = vpack.c.bf16 %v4435_v39, %v4434_v61  ;;  %v1607_v1 = vadd.s32 768, %v21131_v11  ;;  %v4597_v61 = vld [vmem:[#allocation2 + $0x6f] sm:$0xff]  ;;  %v5946_v39 = vld [vmem:[#allocation2 + $0xe1] sm:$0xff] }
 0x200   : > { %3508 = vst.msk [vmem:[#allocation2 + $0x2e0] sm:$0xff] %vm3415_vm0, %v3387_v18  ;;  %v3390_v28 = vsel %vm21784_vm8, %v1485_v30, 0.0  ;;  %vm3059_vm11 = vcmp.ge.s32.totalorder %v2271_v42, 1  ;;  %vm3174_vm12 = vcmp.le.s32.totalorder %v2292_v12, 28  ;;  %v5945_v12 = vld [vmem:[#allocation2 + $0xd9] sm:$0xff] }
 0x201   : > { %3511 = vst.msk [vmem:[#allocation2 + $0x2f8] sm:$0xff] %vm3415_vm0, %v3390_v28  ;;  %3509 = vst.msk [vmem:[#allocation2 + $0x2e8] sm:$0xff] %vm3415_vm0, %v1483_v5  ;;  %v18022_v23 = vpop.f32.mrb[88].mxu0  ;;  %v1610_v28 = vadd.s32 792, %v21131_v11 }
 0x202   : > { %v1312_v53 = vadd.f32 %v21504_v40, %v18022_v23  ;;  %v1303_v45 = vpop.f32.mrb[89].mxu0  ;;  %18167 = vmatpush3.bf16.msra.mxu1 %v21768_v3  ;;  %18327 = vmatpush3.bf16.msra.mxu0 %v21647_v15 }
 0x203   : > { %v1304_v31 = vadd.f32 %v21504_v40, %v1303_v45  ;;  %v18023_v17 = vpop.f32.mrb[90].mxu0  ;;  %18184 = vmatprep.subr.bf16.mxu1 %v21800_v20  ;;  %18344 = vmatprep.subr.bf16.mxu0 %v21676_v27  ;;  %v4595_v45 = vld [vmem:[#allocation2 + $0x5f] sm:$0xff]  ;;  %v2320_v10 = vand.u32 31, %v1610_v28  ;;  %v4602_v28 = vld [vmem:[#allocation2 + $0x97] sm:$0xff] }
 0x204   : > { %18153 = vmatmul.mubr.msk.bf16.gmra.mrb[16].mxu1 %vm3415_vm0, %v21811_v35  ;;  %18313 = vmatmul.mubr.msk.bf16.gmra.mrb[104].mxu0 %vm3415_vm0, %v21802_v25  ;;  %v1488_v38 = vmax.f32 %v1312_v53, 0.0  ;;  %v1315_v15 = vadd.f32 %v21504_v40, %v18023_v17  ;;  %v1306_v41 = vpop.f32.mrb[91].mxu0  ;;  %v4437_v53 = vld [vmem:[#allocation2 + $0xb9] sm:$0xff]  ;;  %v21867_v17 = vpack.c.bf16 %v5796_v29, %v5795_v6  ;;  %v4611_v36 = vpack.c.bf16 %v4596_v52, %v4595_v45  ;;  %v5951_v6 = vld [vmem:[#allocation2 + $0x109] sm:$0xff]  ;;  %v5954_v52 = vld [vmem:[#allocation2 + $0x121] sm:$0xff] }
 0x205   : > { %18156 = vmatprep.mubr.msk.bf16.mxu1 %vm3415_vm0, %v21816_v2  ;;  %18316 = vmatprep.mubr.msk.bf16.mxu0 %vm3415_vm0, %v21809_v8  ;;  %v1486_v37 = vmax.f32 %v1304_v31, 0.0  ;;  %v1307_v24 = vadd.f32 %v21504_v40, %v1306_v41  ;;  %v5943_v41 = vld [vmem:[#allocation2 + $0xc9] sm:$0xff]  ;;  %v21872_v33 = vpack.c.bf16 %v4437_v53, %v4436_v55  ;;  %vm3178_vm14 = vcmp.le.s32.totalorder %v2320_v10, 28  ;;  %v4607_v10 = vld [vmem:[#allocation2 + $0xbf] sm:$0xff] }
 0x206   : > { %3514 = vst.msk [vmem:[#allocation2 + $0x310] sm:$0xff] %vm3415_vm0, %v1488_v38  ;;  %v1489_v7 = vmax.f32 %v1315_v15, 0.0  ;;  %v2299_v38 = vand.u32 31, %v1607_v1  ;;  %v5942_v15 = vld [vmem:[#allocation2 + $0xc1] sm:$0xff]  ;;  %v5948_v1 = vld [vmem:[#allocation2 + $0xf1] sm:$0xff] }
 0x207   : > { %v3391_v56 = vsel %vm21825_vm9, %v1486_v37, 0.0  ;;  %v1487_v49 = vmax.f32 %v1307_v24, 0.0  ;;  %v4601_v29 = vld [vmem:[#allocation2 + $0x8f] sm:$0xff]  ;;  %v4604_v55 = vld [vmem:[#allocation2 + $0xa7] sm:$0xff] }
 0x208   : > { %3512 = vst.msk [vmem:[#allocation2 + $0x300] sm:$0xff] %vm3415_vm0, %v3391_v56  ;;  %v3394_v58 = vsel %vm3170_vm10, %v1489_v7, 0.0  ;;  %v21875_v7 = vpack.c.bf16 %v5943_v41, %v5942_v15  ;;  %vm3063_vm13 = vcmp.ge.s32.totalorder %v2299_v38, 1  ;;  %v4614_v45 = vpack.c.bf16 %v4602_v28, %v4601_v29  ;;  %v5953_v38 = vld [vmem:[#allocation2 + $0x119] sm:$0xff]  ;;  %v5955_v15 = vld [vmem:[#allocation2 + $0x129] sm:$0xff] }
 0x209   : > { %3515 = vst.msk [vmem:[#allocation2 + $0x318] sm:$0xff] %vm3415_vm0, %v3394_v58  ;;  %3513 = vst.msk [vmem:[#allocation2 + $0x308] sm:$0xff] %vm3415_vm0, %v1487_v49  ;;  %v18026_v4 = vpop.f32.mrb[92].mxu0  ;;  %v5947_v58 = vld [vmem:[#allocation2 + $0xe9] sm:$0xff]  ;;  %v4606_v41 = vld [vmem:[#allocation2 + $0xb7] sm:$0xff] }
 0x20a   : > { %v1328_v57 = vadd.f32 %v21504_v40, %v18026_v4  ;;  %v1319_v50 = vpop.f32.mrb[93].mxu0  ;;  %v5944_v4 = vld [vmem:[#allocation2 + $0xd1] sm:$0xff] }
 0x20b   : > { %v1320_v59 = vadd.f32 %v21504_v40, %v1319_v50  ;;  %v18027_v62 = vpop.f32.mrb[94].mxu0  ;;  %v4600_v50 = vld [vmem:[#allocation2 + $0x87] sm:$0xff] }
 0x20c   : > { %18157 = vmatmul.mubr.msk.bf16.gmra.mrb[20].mxu1 %vm3415_vm0, %v21847_v34  ;;  %18317 = vmatmul.mubr.msk.bf16.gmra.mrb[108].mxu0 %vm3415_vm0, %v21840_v9  ;;  %v1492_v30 = vmax.f32 %v1328_v57, 0.0  ;;  %v1331_v26 = vadd.f32 %v21504_v40, %v18027_v62  ;;  %v1322_v14 = vpop.f32.mrb[95].mxu0  ;;  %v4599_v57 = vld [vmem:[#allocation2 + $0x7f] sm:$0xff]  ;;  %v4612_v62 = vpack.c.bf16 %v4598_v19, %v4597_v61 }
 0x20d   : > { %18160 = vmatprep.mubr.msk.bf16.mxu1 %vm3415_vm0, %v21850_v44  ;;  %v1490_v18 = vmax.f32 %v1320_v59, 0.0  ;;  %v1323_v5 = vadd.f32 %v21504_v40, %v1322_v14  ;;  %18320 = vmatprep.mubr.msk.bf16.mxu0 %vm3415_vm0, %v21845_v54  ;;  %v21888_v59 = vpack.c.bf16 %v5947_v58, %v5946_v39  ;;  %v21895_v14 = vld [vmem:[%s24251_s3 + $0x78] sm:$0xff]   ;;  %v4769_v39 = vld [vmem:[#allocation2 + $0x68] sm:$0xff] }
 0x20e   : > { %3518 = vst.msk [vmem:[#allocation2 + $0x330] sm:$0xff] %vm3415_vm0, %v1492_v30  ;;  %v1493_v21 = vmax.f32 %v1331_v26, 0.0  ;;  %v21890_v30 = vpack.c.bf16 %v5945_v12, %v5944_v4  ;;  %v4613_v26 = vpack.c.bf16 %v4600_v50, %v4599_v57  ;;  %v6103_v58 = vld [vmem:[#allocation2 + $0xdf] sm:$0xff]  ;;  %v6106_v57 = vld [vmem:[#allocation2 + $0xf7] sm:$0xff] }
 0x20f   : > { %v3395_v48 = vsel %vm3059_vm11, %v1490_v18, 0.0  ;;  %v1491_v23 = vmax.f32 %v1323_v5, 0.0  ;;  %v5949_v18 = vld [vmem:[#allocation2 + $0xf9] sm:$0xff]  ;;  %v5950_v5 = vld [vmem:[#allocation2 + $0x101] sm:$0xff] }
 0x210   : > { %3516 = vst.msk [vmem:[#allocation2 + $0x320] sm:$0xff] %vm3415_vm0, %v3395_v48  ;;  %v3398_v31 = vsel %vm3174_vm12, %v1493_v21, 0.0  ;;  %v21910_v21 = vld [vmem:[%s24251_s3 + $0x80] sm:$0xff]   ;;  %v21912_v48 = vpack.c.bf16 %v5949_v18, %v5948_v1  ;;  %v21914_v53 = vpack.c.bf16 %v5951_v6, %v5950_v5  ;;  %v4773_v5 = vld [vmem:[#allocation2 + $0x88] sm:$0xff]  ;;  %v4770_v6 = vld [vmem:[#allocation2 + $0x70] sm:$0xff] }
 0x211   : > { %3519 = vst.msk [vmem:[#allocation2 + $0x338] sm:$0xff] %vm3415_vm0, %v3398_v31  ;;  %3517 = vst.msk [vmem:[#allocation2 + $0x328] sm:$0xff] %vm3415_vm0, %v1491_v23  ;;  %v18030_v11 = vpop.f32.mrb[96].mxu0  ;;  %v4603_v23 = vld [vmem:[#allocation2 + $0x9f] sm:$0xff]  ;;  %v5952_v31 = vld [vmem:[#allocation2 + $0x111] sm:$0xff] }
 0x212   : > { %v1344_v63 = vadd.f32 %v21504_v40, %v18030_v11  ;;  %v1335_v37 = vpop.f32.mrb[97].mxu0  ;;  %v21926_v11 = vpack.c.bf16 %v5953_v38, %v5952_v31  ;;  %v6107_v50 = vld [vmem:[#allocation2 + $0xff] sm:$0xff] }
 0x213   : > { %v1336_v24 = vadd.f32 %v21504_v40, %v1335_v37  ;;  %v18031_v43 = vpop.f32.mrb[98].mxu0  ;;  %v21928_v37 = vpack.c.bf16 %v5955_v15, %v5954_v52  ;;  %v4772_v18 = vld [vmem:[#allocation2 + $0x80] sm:$0xff]  ;;  %v4775_v31 = vld [vmem:[#allocation2 + $0x98] sm:$0xff]  ;;  %v4777_v15 = vld [vmem:[#allocation2 + $0xa8] sm:$0xff] }
 0x214   : > { %v1496_v46 = vmax.f32 %v1344_v63, 0.0  ;;  %18161 = vmatmul.mubr.msk.bf16.gmra.mrb[24].mxu1 %vm3415_vm0, %v21872_v33  ;;  %18321 = vmatmul.mubr.msk.bf16.gmra.mrb[112].mxu0 %vm3415_vm0, %v21867_v17  ;;  %v1347_v47 = vadd.f32 %v21504_v40, %v18031_v43  ;;  %v4608_v63 = vld [vmem:[#allocation2 + $0xc7] sm:$0xff]  ;;  %v5956_v43 = vld [vmem:[#allocation2 + $0x131] sm:$0xff] }
 0x215   : > { %v1494_v56 = vmax.f32 %v1336_v24, 0.0  ;;  %18168 = vmatprep.mubr.msk.bf16.mxu1 %vm3415_vm0, %v4611_v36  ;;  %18328 = vmatprep.mubr.msk.bf16.mxu0 %vm3415_vm0, %v21875_v7  ;;  %v4617_v36 = vpack.c.bf16 %v4608_v63, %v4607_v10  ;;  %v4776_v52 = vld [vmem:[#allocation2 + $0xa0] sm:$0xff] }
 0x216   : > { %3522 = vst.msk [vmem:[#allocation2 + $0x350] sm:$0xff] %vm3415_vm0, %v1496_v46  ;;  %v1497_v49 = vmax.f32 %v1347_v47, 0.0  ;;  %v5957_v46 = vld [vmem:[#allocation2 + $0x139] sm:$0xff]  ;;  %v4609_v47 = vld [vmem:[#allocation2 + $0xcf] sm:$0xff]  ;;  %v4788_v10 = vpack.c.bf16 %v4777_v15, %v4776_v52 }
 0x217   : > { %v3399_v42 = vsel %vm3063_vm13, %v1494_v56, 0.0  ;;  %v4610_v56 = vld [vmem:[#allocation2 + $0xd7] sm:$0xff]  ;;  %v21936_v61 = vpack.c.bf16 %v5957_v46, %v5956_v43  ;;  %v6115_v63 = vld [vmem:[#allocation2 + $0x13f] sm:$0xff]  ;;  %v6117_v43 = vld [vmem:[#allocation2 + $0x14f] sm:$0xff] }
 0x218   : > { %3520 = vst.msk [vmem:[#allocation2 + $0x340] sm:$0xff] %vm3415_vm0, %v3399_v42  ;;  %v3402_v40 = vsel %vm3178_vm14, %v1497_v49, 0.0  ;;  %v4768_v49 = vld [vmem:[#allocation2 + $0x60] sm:$0xff]  ;;  %v4618_v19 = vpack.c.bf16 %v4610_v56, %v4609_v47  ;;  %v6118_v46 = vld [vmem:[#allocation2 + $0x157] sm:$0xff]  ;;  %v4942_v56 = vld [vmem:[#allocation2 + $0x69] sm:$0xff] }
 0x219   : > { %3523 = vst.msk [vmem:[#allocation2 + $0x358] sm:$0xff] %vm3415_vm0, %v3402_v40  ;;  %v6104_v42 = vld [vmem:[#allocation2 + $0xe7] sm:$0xff]  ;;  %v4784_v4 = vpack.c.bf16 %v4769_v39, %v4768_v49  ;;  %v6105_v40 = vld [vmem:[#allocation2 + $0xef] sm:$0xff]  ;;  %v21980_v47 = vpack.c.bf16 %v6118_v46, %v6117_v43  ;;  %v8130_v15 = vld [vmem:[#allocation2 + $0x1d8] sm:$0xff] }
 0x21a   : > { %v6119_v12 = vpack.c.bf16 %v6104_v42, %v6103_v58  ;;  %v6120_v1 = vpack.c.bf16 %v6106_v57, %v6105_v40  ;;  %v6439_v58 = vld [vmem:[#allocation2 + $0x151] sm:$0xff]  ;;  %v8123_v42 = vld [vmem:[#allocation2 + $0x1a0] sm:$0xff] }
 0x21b   : > { %v6673_v40 = vld [vmem:[#allocation2 + $0x198] sm:$0xff]  ;;  %v8129_v52 = vld [vmem:[#allocation2 + $0x1d0] sm:$0xff]  ;;  %v6643_v43 = vld [vmem:[#allocation2 + $0x167] sm:$0xff] }
 0x21c   : > { %18169 = vmatmul.mubr.msk.bf16.vlgmr.msra.gmra.mrb[12].mxu1 %vm3415_vm0, %v4612_v62  ;;  %18329 = vmatmul.mubr.msk.bf16.vlgmr.msra.gmra.mrb[100].mxu0 %vm3415_vm0, %v21890_v30  ;;  %v6108_v62 = vld [vmem:[#allocation2 + $0x107] sm:$0xff]  ;;  %v6634_v57 = vld [vmem:[#allocation2 + $0x11f] sm:$0xff] }
 0x21d   : > { %18172 = vmatprep.mubr.msk.bf16.mxu1 %vm3415_vm0, %v4613_v26  ;;  %18332 = vmatprep.mubr.msk.bf16.mxu0 %vm3415_vm0, %v21888_v59  ;;  %v4771_v26 = vld [vmem:[#allocation2 + $0x78] sm:$0xff]  ;;  %v6121_v29 = vpack.c.bf16 %v6108_v62, %v6107_v50  ;;  %v6635_v50 = vld [vmem:[#allocation2 + $0x127] sm:$0xff] }
 0x21e   : > { %18185 = vmatpush3.bf16.msra.mxu1 %v21800_v20  ;;  %18345 = vmatpush3.bf16.msra.mxu0 %v21676_v27  ;;  %v4615_v27 = vpack.c.bf16 %v4604_v55, %v4603_v23  ;;  %v4785_v28 = vpack.c.bf16 %v4771_v26, %v4770_v6  ;;  %v4786_v23 = vpack.c.bf16 %v4773_v5, %v4772_v18  ;;  %v21946_v55 = vld [vmem:[%s24251_s3 + $0x88] sm:$0xff]   ;;  %v8125_v5 = vld [vmem:[#allocation2 + $0x1b0] sm:$0xff]  ;;  %v8126_v6 = vld [vmem:[#allocation2 + $0x1b8] sm:$0xff] }
 0x21f   : > { %18186 = vmatprep.subr.bf16.mxu1 %v21895_v14  ;;  %18346 = vmatprep.subr.bf16.mxu0 %v21768_v3  ;;  %v6650_v18 = vpack.c.bf16 %v6635_v50, %v6634_v57  ;;  %v8102_v57 = vld [vmem:[#allocation2 + $0x1b7] sm:$0xff]  ;;  %v8103_v50 = vld [vmem:[#allocation2 + $0x1bf] sm:$0xff] }
 0x222   : > { %18187 = vmatpush3.bf16.msra.mxu1 %v21895_v14  ;;  %18347 = vmatpush3.bf16.msra.mxu0 %v21768_v3  ;;  %v4605_v3 = vld [vmem:[#allocation2 + $0xaf] sm:$0xff] }
 0x223   : > { %18204 = vmatprep.subr.bf16.mxu1 %v21910_v21  ;;  %18364 = vmatprep.subr.bf16.mxu0 %v21800_v20  ;;  %v4616_v24 = vpack.c.bf16 %v4606_v41, %v4605_v3  ;;  %v4774_v3 = vld [vmem:[#allocation2 + $0x90] sm:$0xff] }
 0x224   : > { %18173 = vmatmul.mubr.msk.bf16.gmra.mrb[16].mxu1 %vm3415_vm0, %v4614_v45  ;;  %18333 = vmatmul.mubr.msk.bf16.gmra.mrb[104].mxu0 %vm3415_vm0, %v21912_v48  ;;  %v6109_v45 = vld [vmem:[#allocation2 + $0x10f] sm:$0xff]  ;;  %v4787_v41 = vpack.c.bf16 %v4775_v31, %v4774_v3  ;;  %v8131_v3 = vld [vmem:[#allocation2 + $0x1e0] sm:$0xff] }
 0x225   : > { %18176 = vmatprep.mubr.msk.bf16.mxu1 %vm3415_vm0, %v4615_v27  ;;  %18336 = vmatprep.mubr.msk.bf16.mxu0 %vm3415_vm0, %v21914_v53  ;;  %v6110_v27 = vld [vmem:[#allocation2 + $0x117] sm:$0xff] }
 0x226   : > { %v6122_v38 = vpack.c.bf16 %v6110_v27, %v6109_v45  ;;  %v6637_v45 = vld [vmem:[#allocation2 + $0x137] sm:$0xff]  ;;  %v22100_v27 = vpack.c.bf16 %v8126_v6, %v8125_v5 }
 0x22c   : > { %18177 = vmatmul.mubr.msk.bf16.gmra.mrb[20].mxu1 %vm3415_vm0, %v4616_v24  ;;  %18337 = vmatmul.mubr.msk.bf16.gmra.mrb[108].mxu0 %vm3415_vm0, %v21926_v11  ;;  %v6116_v24 = vld [vmem:[#allocation2 + $0x147] sm:$0xff] }
 0x22d   : > { %18180 = vmatprep.mubr.msk.bf16.mxu1 %vm3415_vm0, %v4617_v36  ;;  %18340 = vmatprep.mubr.msk.bf16.mxu0 %vm3415_vm0, %v21928_v37  ;;  %v21970_v36 = vpack.c.bf16 %v6116_v24, %v6115_v63  ;;  %v22120_v63 = vpack.c.bf16 %v8130_v15, %v8129_v52  ;;  %v6642_v24 = vld [vmem:[#allocation2 + $0x15f] sm:$0xff]  ;;  %v6933_v52 = vld [vmem:[#allocation2 + $0x169] sm:$0xff] }
 0x234   : > { %18181 = vmatmul.mubr.msk.bf16.gmra.mrb[24].mxu1 %vm3415_vm0, %v4618_v19  ;;  %18341 = vmatmul.mubr.msk.bf16.gmra.mrb[112].mxu0 %vm3415_vm0, %v21936_v61  ;;  %v8124_v19 = vld [vmem:[#allocation2 + $0x1a8] sm:$0xff] }
 0x235   : > { %18188 = vmatprep.mubr.msk.bf16.mxu1 %vm3415_vm0, %v4784_v4  ;;  %18348 = vmatprep.mubr.msk.bf16.mxu0 %vm3415_vm0, %v6119_v12  ;;  %v6440_v4 = vld [vmem:[#allocation2 + $0x159] sm:$0xff]  ;;  %v6672_v12 = vld [vmem:[#allocation2 + $0x190] sm:$0xff]  ;;  %v22087_v62 = vpack.c.bf16 %v8124_v19, %v8123_v42  ;;  %v8100_v19 = vld [vmem:[#allocation2 + $0x1a7] sm:$0xff] }
 0x236   : > { %v22089_v26 = vpack.c.bf16 %v6440_v4, %v6439_v58  ;;  %v8099_v42 = vld [vmem:[#allocation2 + $0x19f] sm:$0xff] }
 0x23c   : > { %18189 = vmatmul.mubr.msk.bf16.vlgmr.msra.gmra.mrb[12].mxu1 %vm3415_vm0, %v4785_v28  ;;  %18349 = vmatmul.mubr.msk.bf16.vlgmr.msra.gmra.mrb[100].mxu0 %vm3415_vm0, %v6120_v1  ;;  %v22091_v1 = vpack.c.bf16 %v6673_v40, %v6672_v12  ;;  %v8128_v28 = vld [vmem:[#allocation2 + $0x1c8] sm:$0xff]  ;;  %v22163_v12 = vpack.c.bf16 %v8100_v19, %v8099_v42  ;;  %v1338_v42 = vpop.f32.mrb[99].mxu0 }
 0x23d   : > { %18192 = vmatprep.mubr.msk.bf16.mxu1 %vm3415_vm0, %v4786_v23  ;;  %18352 = vmatprep.mubr.msk.bf16.mxu0 %vm3415_vm0, %v6121_v29  ;;  %v8127_v29 = vld [vmem:[#allocation2 + $0x1c0] sm:$0xff]  ;;  %v6636_v23 = vld [vmem:[#allocation2 + $0x12f] sm:$0xff] }
 0x23e   : > { %18205 = vmatpush3.bf16.msra.mxu1 %v21910_v21  ;;  %18365 = vmatpush3.bf16.msra.mxu0 %v21800_v20  ;;  %v21962_v20 = vld [vmem:[%s24251_s3 + $0x10] sm:$0xff]   ;;  %v22102_v31 = vpack.c.bf16 %v8128_v28, %v8127_v29  ;;  %v8107_v28 = vld [vmem:[#allocation2 + $0x1df] sm:$0xff] }
 0x23f   : > { %18206 = vmatprep.subr.bf16.mxu1 %v21946_v55  ;;  %18366 = vmatprep.subr.bf16.mxu0 %v21895_v14  ;;  %v8101_v40 = vld [vmem:[#allocation2 + $0x1af] sm:$0xff]  ;;  %v8106_v29 = vld [vmem:[#allocation2 + $0x1d7] sm:$0xff] }
 0x240   : > { %v22173_v5 = vpack.c.bf16 %v8102_v57, %v8101_v40  ;;  %v8389_v40 = vld [vmem:[#allocation2 + $0x1a1] sm:$0xff]  ;;  %v8390_v57 = vld [vmem:[#allocation2 + $0x1a9] sm:$0xff] }
 0x242   : > { %18207 = vmatpush3.bf16.msra.mxu1 %v21946_v55  ;;  %18367 = vmatpush3.bf16.msra.mxu0 %v21895_v14 }
 0x243   : > { %18384 = vmatprep.subr.bf16.mxu0 %v21910_v21  ;;  %18404 = vmatprep.subr.bf16.mxu1 %v21962_v20 }
 0x244   : > { %18193 = vmatmul.mubr.msk.bf16.gmra.mrb[16].mxu1 %vm3415_vm0, %v4787_v41  ;;  %18353 = vmatmul.mubr.msk.bf16.gmra.mrb[104].mxu0 %vm3415_vm0, %v6122_v38  ;;  %v6651_v38 = vpack.c.bf16 %v6637_v45, %v6636_v23  ;;  %v8132_v41 = vld [vmem:[#allocation2 + $0x1e8] sm:$0xff] }
 0x245   : > { %18196 = vmatprep.mubr.msk.bf16.mxu1 %vm3415_vm0, %v4788_v10  ;;  %18356 = vmatprep.mubr.msk.bf16.mxu0 %vm3415_vm0, %v21701_v51  ;;  %v4941_v51 = vld [vmem:[#allocation2 + $0x61] sm:$0xff]  ;;  %v22122_v46 = vpack.c.bf16 %v8132_v41, %v8131_v3  ;;  %v8109_v41 = vld [vmem:[#allocation2 + $0x1ef] sm:$0xff] }
 0x246   : > { %v4957_v49 = vpack.c.bf16 %v4942_v56, %v4941_v51  ;;  %v22116_v10 = vld [vmem:[%s24251_s3 + $0x28] sm:$0xff]   ;;  %v22126_v51 = vpack.c.bf16 %v6643_v43, %v6642_v24  ;;  %v22131_v56 = vld [vmem:[%s24251_s3 + $0x30] sm:$0xff]   ;;  %v22205_v3 = vld [vmem:[%s24251_s3 + $0x40] sm:$0xff]  }
 0x247   : > { %v8108_v23 = vld [vmem:[#allocation2 + $0x1e7] sm:$0xff]  ;;  %v8111_v24 = vld [vmem:[#allocation2 + $0x1ff] sm:$0xff] }
 0x248   : > { %v22196_v15 = vpack.c.bf16 %v8108_v23, %v8107_v28  ;;  %v8112_v43 = vld [vmem:[#allocation2 + $0x207] sm:$0xff]  ;;  %v22237_v28 = vpack.c.bf16 %v8390_v57, %v8389_v40  ;;  %v8403_v40 = vld [vmem:[#allocation2 + $0x211] sm:$0xff]  ;;  %v8404_v57 = vld [vmem:[#allocation2 + $0x219] sm:$0xff] }
 0x249   : > { %v8393_v23 = vld [vmem:[#allocation2 + $0x1c1] sm:$0xff] }
 0x24c   : > { %18197 = vmatmul.mubr.msk.bf16.gmra.mrb[20].mxu1 %vm3415_vm0, %v21733_v22  ;;  %18357 = vmatmul.mubr.msk.bf16.gmra.mrb[108].mxu0 %vm3415_vm0, %v21726_v16  ;;  %v20578_v16 = vld [vmem:[%s24251_s3 + $0x18] sm:$0xff]   ;;  %v6276_v22 = vld [vmem:[#allocation2 + $0x140] sm:$0xff] }
 0x24d   : > { %18200 = vmatprep.mubr.msk.bf16.mxu1 %vm3415_vm0, %v21729_v60  ;;  %18360 = vmatprep.mubr.msk.bf16.mxu0 %vm3415_vm0, %v21970_v36  ;;  %v22007_v60 = vld [vmem:[%s24251_s3] sm:$0xff]  }
 0x254   : > { %18201 = vmatmul.mubr.msk.bf16.gmra.mrb[24].mxu1 %vm3415_vm0, %v21756_v32  ;;  %18361 = vmatmul.mubr.msk.bf16.gmra.mrb[112].mxu0 %vm3415_vm0, %v21980_v47  ;;  %v6277_v32 = vld [vmem:[#allocation2 + $0x148] sm:$0xff] }
 0x255   : > { %18208 = vmatprep.mubr.msk.bf16.mxu1 %vm3415_vm0, %v4957_v49  ;;  %18368 = vmatprep.mubr.msk.bf16.mxu0 %vm3415_vm0, %v21759_v13  ;;  %v22019_v13 = vpack.c.bf16 %v6277_v32, %v6276_v22  ;;  %v8133_v49 = vld [vmem:[#allocation2 + $0x1f0] sm:$0xff]  ;;  %v8136_v22 = vld [vmem:[#allocation2 + $0x208] sm:$0xff] }
 0x256   : > { %v6644_v32 = vld [vmem:[#allocation2 + $0x16f] sm:$0xff] }
 0x25c   : > { %18209 = vmatmul.mubr.msk.bf16.vlgmr.msra.gmra.mrb[12].mxu1 %vm3415_vm0, %v21811_v35  ;;  %18369 = vmatmul.mubr.msk.bf16.vlgmr.msra.gmra.mrb[100].mxu0 %vm3415_vm0, %v21802_v25  ;;  %v6278_v25 = vld [vmem:[#allocation2 + $0x150] sm:$0xff] }
 0x25d   : > { %18212 = vmatprep.mubr.msk.bf16.mxu1 %vm3415_vm0, %v21816_v2  ;;  %18372 = vmatprep.mubr.msk.bf16.mxu0 %vm3415_vm0, %v21809_v8  ;;  %v6279_v8 = vld [vmem:[#allocation2 + $0x158] sm:$0xff]  ;;  %v6666_v2 = vld [vmem:[#allocation2 + $0x160] sm:$0xff] }
 0x25e   : > { %18385 = vmatpush3.bf16.msra.mxu0 %v21910_v21  ;;  %18405 = vmatpush3.bf16.msra.mxu1 %v21962_v20  ;;  %v22029_v35 = vpack.c.bf16 %v6279_v8, %v6278_v25  ;;  %v6645_v25 = vld [vmem:[#allocation2 + $0x177] sm:$0xff] }
 0x25f   : > { %18386 = vmatprep.subr.bf16.mxu0 %v21946_v55  ;;  %18406 = vmatprep.subr.bf16.mxu1 %v20578_v16 }
 0x262   : > { %18387 = vmatpush3.bf16.msra.mxu0 %v21946_v55  ;;  %18407 = vmatpush3.bf16.msra.mxu1 %v20578_v16 }
 0x263   : > { %18424 = vmatprep.subr.bf16.mxu1 %v22007_v60  ;;  %18584 = vmatprep.subr.bf16.mxu0 %v21962_v20 }
 0x264   : > { %18213 = vmatmul.mubr.msk.bf16.gmra.mrb[16].mxu1 %vm3415_vm0, %v21847_v34  ;;  %18373 = vmatmul.mubr.msk.bf16.gmra.mrb[104].mxu0 %vm3415_vm0, %v21840_v9  ;;  %v6667_v9 = vld [vmem:[#allocation2 + $0x168] sm:$0xff] }
 0x265   : > { %18216 = vmatprep.mubr.msk.bf16.mxu1 %vm3415_vm0, %v21850_v44  ;;  %18376 = vmatprep.mubr.msk.bf16.mxu0 %vm3415_vm0, %v21845_v54  ;;  %v22055_v34 = vpack.c.bf16 %v6667_v9, %v6666_v2  ;;  %v22061_v44 = vld [vmem:[%s24251_s3 + $0x20] sm:$0xff]  }
 0x266   : > { %v6646_v2 = vld [vmem:[#allocation2 + $0x17f] sm:$0xff]  ;;  %v6647_v9 = vld [vmem:[#allocation2 + $0x187] sm:$0xff] }
 0x26c   : > { %18217 = vmatmul.mubr.msk.bf16.gmra.mrb[20].mxu1 %vm3415_vm0, %v21872_v33  ;;  %18377 = vmatmul.mubr.msk.bf16.gmra.mrb[108].mxu0 %vm3415_vm0, %v21867_v17  ;;  %v6671_v33 = vld [vmem:[#allocation2 + $0x188] sm:$0xff] }
 0x26d   : > { %18220 = vmatprep.mubr.msk.bf16.mxu1 %vm3415_vm0, %v21875_v7  ;;  %18380 = vmatprep.mubr.msk.bf16.mxu0 %vm3415_vm0, %v22019_v13  ;;  %v6668_v7 = vld [vmem:[#allocation2 + $0x170] sm:$0xff] }
 0x274   : > { %18221 = vmatmul.mubr.msk.bf16.gmra.mrb[24].mxu1 %vm3415_vm0, %v21890_v30  ;;  %18381 = vmatmul.mubr.msk.bf16.gmra.mrb[112].mxu0 %vm3415_vm0, %v22029_v35  ;;  %v6437_v30 = vld [vmem:[#allocation2 + $0x141] sm:$0xff] }
 0x275   : > { %18388 = vmatprep.mubr.msk.bf16.mxu0 %vm3415_vm0, %v21888_v59  ;;  %18408 = vmatprep.mubr.msk.bf16.mxu1 %vm3415_vm0, %v21845_v54  ;;  %v22052_v54 = vld [vmem:[%s24251_s3 + $0x8] sm:$0xff]   ;;  %v6669_v59 = vld [vmem:[#allocation2 + $0x178] sm:$0xff] }
 0x276   : > { %v22075_v39 = vpack.c.bf16 %v6669_v59, %v6668_v7  ;;  %v8137_v7 = vld [vmem:[#allocation2 + $0x210] sm:$0xff]  ;;  %v8138_v59 = vld [vmem:[#allocation2 + $0x218] sm:$0xff] }
 0x277   : > { %v22159_v58 = vpack.c.bf16 %v8138_v59, %v8137_v7  ;;  %v8113_v7 = vld [vmem:[#allocation2 + $0x20f] sm:$0xff]  ;;  %v8114_v59 = vld [vmem:[#allocation2 + $0x217] sm:$0xff] }
 0x278   : > { %v22233_v19 = vpack.c.bf16 %v8114_v59, %v8113_v7  ;;  %v20588_v7 = vld [vmem:[%s24251_s3 + $0x50] sm:$0xff]   ;;  %v8401_v59 = vld [vmem:[#allocation2 + $0x201] sm:$0xff] }
 0x27c   : > { %18389 = vmatmul.mubr.msk.bf16.vlgmr.msra.gmra.mrb[100].mxu0 %vm3415_vm0, %v21912_v48  ;;  %18409 = vmatmul.mubr.msk.bf16.vlgmr.msra.gmra.mrb[28].mxu1 %vm3415_vm0, %v21867_v17  ;;  %v6670_v17 = vld [vmem:[#allocation2 + $0x180] sm:$0xff]  ;;  %v6438_v48 = vld [vmem:[#allocation2 + $0x149] sm:$0xff] }
 0x27d   : > { %18392 = vmatprep.mubr.msk.bf16.mxu0 %vm3415_vm0, %v21914_v53  ;;  %18412 = vmatprep.mubr.msk.bf16.mxu1 %vm3415_vm0, %v22019_v13  ;;  %v22073_v53 = vpack.c.bf16 %v6671_v33, %v6670_v17  ;;  %v22147_v17 = vpack.c.bf16 %v6645_v25, %v6644_v32  ;;  %v22149_v33 = vpack.c.bf16 %v6647_v9, %v6646_v2  ;;  %v6937_v32 = vld [vmem:[#allocation2 + $0x189] sm:$0xff] }
 0x27e   : > { %18425 = vmatpush3.bf16.msra.mxu1 %v22007_v60  ;;  %18585 = vmatpush3.bf16.msra.mxu0 %v21962_v20  ;;  %v22219_v25 = vpack.c.bf16 %v8112_v43, %v8111_v24  ;;  %v8396_v43 = vld [vmem:[#allocation2 + $0x1d9] sm:$0xff] }
 0x27f   : > { %18426 = vmatprep.subr.bf16.mxu1 %v22052_v54  ;;  %18586 = vmatprep.subr.bf16.mxu0 %v20578_v16 }
 0x282   : > { %18427 = vmatpush3.bf16.msra.mxu1 %v22052_v54  ;;  %18587 = vmatpush3.bf16.msra.mxu0 %v20578_v16  ;;  %v8134_v16 = vld [vmem:[#allocation2 + $0x1f8] sm:$0xff] }
 0x283   : > { %18444 = vmatprep.subr.bf16.mxu1 %v22061_v44  ;;  %18604 = vmatprep.subr.bf16.mxu0 %v22007_v60  ;;  %v22143_v8 = vpack.c.bf16 %v8134_v16, %v8133_v49  ;;  %v6934_v49 = vld [vmem:[#allocation2 + $0x171] sm:$0xff]  ;;  %v6935_v16 = vld [vmem:[#allocation2 + $0x179] sm:$0xff] }
 0x284   : > { %18393 = vmatmul.mubr.msk.bf16.gmra.mrb[104].mxu0 %vm3415_vm0, %v21926_v11  ;;  %18413 = vmatmul.mubr.msk.bf16.gmra.mrb[32].mxu1 %vm3415_vm0, %v22029_v35  ;;  %v22077_v11 = vpack.c.bf16 %v6438_v48, %v6437_v30  ;;  %v6648_v30 = vld [vmem:[#allocation2 + $0x18f] sm:$0xff]  ;;  %v6649_v48 = vld [vmem:[#allocation2 + $0x197] sm:$0xff]  ;;  %v22221_v2 = vpack.c.bf16 %v6935_v16, %v6934_v49  ;;  %v8397_v49 = vld [vmem:[#allocation2 + $0x1e1] sm:$0xff] }
 0x285   : > { %18396 = vmatprep.mubr.msk.bf16.mxu0 %vm3415_vm0, %v21928_v37  ;;  %18416 = vmatprep.mubr.msk.bf16.mxu1 %vm3415_vm0, %v22055_v34  ;;  %v22161_v4 = vpack.c.bf16 %v6649_v48, %v6648_v30  ;;  %v6938_v30 = vld [vmem:[#allocation2 + $0x191] sm:$0xff]  ;;  %v6939_v48 = vld [vmem:[#allocation2 + $0x199] sm:$0xff]  ;;  %v8398_v16 = vld [vmem:[#allocation2 + $0x1e9] sm:$0xff] }
 0x28c   : > { %18397 = vmatmul.mubr.msk.bf16.gmra.mrb[108].mxu0 %vm3415_vm0, %v21936_v61  ;;  %18417 = vmatmul.mubr.msk.bf16.gmra.mrb[36].mxu1 %vm3415_vm0, %v22075_v39 }
 0x28d   : > { %18400 = vmatprep.mubr.msk.bf16.mxu0 %vm3415_vm0, %v22077_v11  ;;  %18420 = vmatprep.mubr.msk.bf16.mxu1 %vm3415_vm0, %v22073_v53 }
 0x294   : > { %18401 = vmatmul.mubr.msk.bf16.gmra.mrb[112].mxu0 %vm3415_vm0, %v22089_v26  ;;  %18421 = vmatmul.mubr.msk.bf16.gmra.mrb[40].mxu1 %vm3415_vm0, %v22091_v1 }
 0x295   : > { %18428 = vmatprep.mubr.msk.bf16.mxu1 %vm3415_vm0, %v6650_v18  ;;  %18588 = vmatprep.mubr.msk.bf16.mxu0 %vm3415_vm0, %v22087_v62  ;;  %v8104_v18 = vld [vmem:[#allocation2 + $0x1c7] sm:$0xff] }
 0x296   : > { %v22175_v6 = vpack.c.bf16 %v8104_v18, %v8103_v50  ;;  %v20586_v50 = vld [vmem:[#allocation4] ss:$0 sm:$0xff] }
 0x297   : > { %v1339_v18 = vadd.f32 %v20586_v50, %v1338_v42  ;;  %v22295_v50 = vpack.c.bf16 %v8404_v57, %v8403_v40 }
 0x29c   : > { %18429 = vmatmul.mubr.msk.bf16.vlgmr.msra.gmra.mrb[28].mxu1 %vm3415_vm0, %v6651_v38  ;;  %18589 = vmatmul.mubr.msk.bf16.vlgmr.msra.gmra.mrb[116].mxu0 %vm3415_vm0, %v22100_v27  ;;  %v6932_v38 = vld [vmem:[#allocation2 + $0x161] sm:$0xff] }
 0x29d   : > { %18432 = vmatprep.mubr.msk.bf16.mxu1 %vm3415_vm0, %v21970_v36  ;;  %18592 = vmatprep.mubr.msk.bf16.mxu0 %vm3415_vm0, %v22102_v31 }
 0x29e   : > { %18445 = vmatpush3.bf16.msra.mxu1 %v22061_v44  ;;  %18605 = vmatpush3.bf16.msra.mxu0 %v22007_v60  ;;  %v8135_v60 = vld [vmem:[#allocation2 + $0x200] sm:$0xff] }
 0x29f   : > { %18446 = vmatprep.subr.bf16.mxu1 %v22116_v10  ;;  %18606 = vmatprep.subr.bf16.mxu0 %v22052_v54 }
 0x2a2   : > { %18447 = vmatpush3.bf16.msra.mxu1 %v22116_v10  ;;  %18607 = vmatpush3.bf16.msra.mxu0 %v22052_v54  ;;  %v22145_v54 = vpack.c.bf16 %v8136_v22, %v8135_v60  ;;  %v6936_v22 = vld [vmem:[#allocation2 + $0x181] sm:$0xff] }
 0x2a3   : > { %18464 = vmatprep.subr.bf16.mxu1 %v22131_v56  ;;  %18624 = vmatprep.subr.bf16.mxu0 %v22061_v44  ;;  %v22223_v9 = vpack.c.bf16 %v6937_v32, %v6936_v22  ;;  %v22268_v32 = vpack.c.bf16 %v8398_v16, %v8397_v49 }
 0x2a4   : > { %18433 = vmatmul.mubr.msk.bf16.gmra.mrb[32].mxu1 %vm3415_vm0, %v21980_v47  ;;  %18593 = vmatmul.mubr.msk.bf16.gmra.mrb[120].mxu0 %vm3415_vm0, %v22120_v63 }
 0x2a5   : > { %18436 = vmatprep.mubr.msk.bf16.mxu1 %vm3415_vm0, %v22126_v51  ;;  %18596 = vmatprep.mubr.msk.bf16.mxu0 %vm3415_vm0, %v22122_v46 }
 0x2ac   : > { %18437 = vmatmul.mubr.msk.bf16.gmra.mrb[36].mxu1 %vm3415_vm0, %v22147_v17  ;;  %18597 = vmatmul.mubr.msk.bf16.gmra.mrb[124].mxu0 %vm3415_vm0, %v22143_v8 }
 0x2ad   : > { %18440 = vmatprep.mubr.msk.bf16.mxu1 %vm3415_vm0, %v22149_v33  ;;  %18600 = vmatprep.mubr.msk.bf16.mxu0 %vm3415_vm0, %v22145_v54 }
 0x2b4   : > { %18441 = vmatmul.mubr.msk.bf16.gmra.mrb[40].mxu1 %vm3415_vm0, %v22161_v4  ;;  %18601 = vmatmul.mubr.msk.bf16.gmra.mrb[128].mxu0 %vm3415_vm0, %v22159_v58 }
 0x2b5   : > { %18448 = vmatprep.mubr.msk.bf16.mxu1 %vm3415_vm0, %v21928_v37  ;;  %18608 = vmatprep.mubr.msk.bf16.mxu0 %vm3415_vm0, %v22163_v12  ;;  %v8105_v37 = vld [vmem:[#allocation2 + $0x1cf] sm:$0xff] }
 0x2b6   : > { %v22194_v45 = vpack.c.bf16 %v8106_v29, %v8105_v37  ;;  %v22235_v37 = vpack.c.bf16 %v6939_v48, %v6938_v30  ;;  %v1495_v29 = vmax.f32 %v1339_v18, 0.0  ;;  %v8402_v30 = vld [vmem:[#allocation2 + $0x209] sm:$0xff] }
 0x2b7   : > { %v22285_v42 = vpack.c.bf16 %v8402_v30, %v8401_v59 }
 0x2b8   : > { %3521 = vst.msk [vmem:[#allocation2 + $0x348] sm:$0xff] %vm3415_vm0, %v1495_v29 }
 0x2bc   : > { %18449 = vmatmul.mubr.msk.bf16.vlgmr.msra.gmra.mrb[28].mxu1 %vm3415_vm0, %v21936_v61  ;;  %18609 = vmatmul.mubr.msk.bf16.vlgmr.msra.gmra.mrb[116].mxu0 %vm3415_vm0, %v22173_v5  ;;  %v22190_v61 = vld [vmem:[%s24251_s3 + $0x38] sm:$0xff]  }
 0x2bd   : > { %18452 = vmatprep.mubr.msk.bf16.mxu1 %vm3415_vm0, %v22077_v11  ;;  %18612 = vmatprep.mubr.msk.bf16.mxu0 %vm3415_vm0, %v22175_v6 }
 0x2be   : > { %18465 = vmatpush3.bf16.msra.mxu1 %v22131_v56  ;;  %18625 = vmatpush3.bf16.msra.mxu0 %v22061_v44  ;;  %v22200_v44 = vpack.c.bf16 %v6933_v52, %v6932_v38  ;;  %v8394_v38 = vld [vmem:[#allocation2 + $0x1c9] sm:$0xff]  ;;  %v8391_v52 = vld [vmem:[#allocation2 + $0x1b1] sm:$0xff] }
 0x2bf   : > { %18466 = vmatprep.subr.bf16.mxu1 %v22190_v61  ;;  %18626 = vmatprep.subr.bf16.mxu0 %v22116_v10 }
 0x2c2   : > { %18467 = vmatpush3.bf16.msra.mxu1 %v22190_v61  ;;  %18627 = vmatpush3.bf16.msra.mxu0 %v22116_v10  ;;  %v8110_v10 = vld [vmem:[#allocation2 + $0x1f7] sm:$0xff] }
 0x2c3   : > { %18484 = vmatprep.subr.bf16.mxu1 %v22205_v3  ;;  %18644 = vmatprep.subr.bf16.mxu0 %v22131_v56  ;;  %v22217_v60 = vpack.c.bf16 %v8110_v10, %v8109_v41  ;;  %v8392_v41 = vld [vmem:[#allocation2 + $0x1b9] sm:$0xff]  ;;  %v22248_v10 = vpack.c.bf16 %v8394_v38, %v8393_v23 }
 0x2c4   : > { %18453 = vmatmul.mubr.msk.bf16.gmra.mrb[32].mxu1 %vm3415_vm0, %v22089_v26  ;;  %18613 = vmatmul.mubr.msk.bf16.gmra.mrb[120].mxu0 %vm3415_vm0, %v22194_v45  ;;  %v22250_v24 = vpack.c.bf16 %v8392_v41, %v8391_v52 }
 0x2c5   : > { %18456 = vmatprep.mubr.msk.bf16.mxu1 %vm3415_vm0, %v22200_v44  ;;  %18616 = vmatprep.mubr.msk.bf16.mxu0 %vm3415_vm0, %v22196_v15 }
 0x2cc   : > { %18457 = vmatmul.mubr.msk.bf16.gmra.mrb[36].mxu1 %vm3415_vm0, %v22221_v2  ;;  %18617 = vmatmul.mubr.msk.bf16.gmra.mrb[124].mxu0 %vm3415_vm0, %v22217_v60 }
 0x2cd   : > { %18460 = vmatprep.mubr.msk.bf16.mxu1 %vm3415_vm0, %v22223_v9  ;;  %18620 = vmatprep.mubr.msk.bf16.mxu0 %vm3415_vm0, %v22219_v25 }
 0x2d4   : > { %18461 = vmatmul.mubr.msk.bf16.gmra.mrb[40].mxu1 %vm3415_vm0, %v22235_v37  ;;  %18621 = vmatmul.mubr.msk.bf16.gmra.mrb[128].mxu0 %vm3415_vm0, %v22233_v19 }
 0x2d5   : > { %18468 = vmatprep.mubr.msk.bf16.mxu1 %vm3415_vm0, %v21970_v36  ;;  %18628 = vmatprep.mubr.msk.bf16.mxu0 %vm3415_vm0, %v22237_v28  ;;  %v8395_v36 = vld [vmem:[#allocation2 + $0x1d1] sm:$0xff] }
 0x2d6   : > { %v22266_v22 = vpack.c.bf16 %v8396_v43, %v8395_v36 }
 0x2dc   : > { %18469 = vmatmul.mubr.msk.bf16.vlgmr.msra.gmra.mrb[28].mxu1 %vm3415_vm0, %v21980_v47  ;;  %18629 = vmatmul.mubr.msk.bf16.vlgmr.msra.gmra.mrb[116].mxu0 %vm3415_vm0, %v22250_v24  ;;  %v20587_v47 = vld [vmem:[%s24251_s3 + $0x48] sm:$0xff]  }
 0x2dd   : > { %18472 = vmatprep.mubr.msk.bf16.mxu1 %vm3415_vm0, %v22126_v51  ;;  %18632 = vmatprep.mubr.msk.bf16.mxu0 %vm3415_vm0, %v22248_v10 }
 0x2de   : > { %18485 = vmatpush3.bf16.msra.mxu1 %v22205_v3  ;;  %18645 = vmatpush3.bf16.msra.mxu0 %v22131_v56  ;;  %v8399_v56 = vld [vmem:[#allocation2 + $0x1f1] sm:$0xff] }
 0x2df   : > { %18486 = vmatprep.subr.bf16.mxu1 %v20587_v47  ;;  %18646 = vmatprep.subr.bf16.mxu0 %v22190_v61 }
 0x2e2   : > { %18487 = vmatpush3.bf16.msra.mxu1 %v20587_v47  ;;  %18647 = vmatpush3.bf16.msra.mxu0 %v22190_v61  ;;  %v8400_v61 = vld [vmem:[#allocation2 + $0x1f9] sm:$0xff] }
 0x2e3   : > { %18504 = vmatprep.subr.bf16.mxu1 %v20588_v7  ;;  %18664 = vmatprep.subr.bf16.mxu0 %v22205_v3  ;;  %v22283_v48 = vpack.c.bf16 %v8400_v61, %v8399_v56 }
 0x2e4   : > { %18473 = vmatmul.mubr.msk.bf16.gmra.mrb[32].mxu1 %vm3415_vm0, %v22147_v17  ;;  %18633 = vmatmul.mubr.msk.bf16.gmra.mrb[120].mxu0 %vm3415_vm0, %v22266_v22 }
 0x2e5   : > { %18476 = vmatprep.mubr.msk.bf16.mxu1 %vm3415_vm0, %v22149_v33  ;;  %18636 = vmatprep.mubr.msk.bf16.mxu0 %vm3415_vm0, %v22268_v32 }
 0x2ec   : > { %18477 = vmatmul.mubr.msk.bf16.gmra.mrb[36].mxu1 %vm3415_vm0, %v22161_v4  ;;  %18637 = vmatmul.mubr.msk.bf16.gmra.mrb[124].mxu0 %vm3415_vm0, %v22283_v48 }
 0x2ed   : > { %18480 = vmatprep.mubr.msk.bf16.mxu1 %vm3415_vm0, %v22163_v12  ;;  %18640 = vmatprep.mubr.msk.bf16.mxu0 %vm3415_vm0, %v22285_v42 }
 0x2f4   : > { %18481 = vmatmul.mubr.msk.bf16.gmra.mrb[40].mxu1 %vm3415_vm0, %v22173_v5  ;;  %18641 = vmatmul.mubr.msk.bf16.gmra.mrb[128].mxu0 %vm3415_vm0, %v22295_v50 }
 0x2f5   : > { %18488 = vmatprep.mubr.msk.bf16.mxu1 %vm3415_vm0, %v22019_v13  ;;  %18648 = vmatprep.mubr.msk.bf16.mxu0 %vm3415_vm0, %v22175_v6  ;;  %v20589_v13 = vld [vmem:[%s24251_s3 + $0x58] sm:$0xff]  }
 0x2fc   : > { %18489 = vmatmul.mubr.msk.bf16.vlgmr.msra.gmra.mrb[28].mxu1 %vm3415_vm0, %v22029_v35  ;;  %18649 = vmatmul.mubr.msk.bf16.vlgmr.msra.gmra.mrb[116].mxu0 %vm3415_vm0, %v22194_v45  ;;  %v22320_v35 = vld [vmem:[%s24251_s3 + $0x60] sm:$0xff]  }
 0x2fd   : > { %18492 = vmatprep.mubr.msk.bf16.mxu1 %vm3415_vm0, %v22055_v34  ;;  %18652 = vmatprep.mubr.msk.bf16.mxu0 %vm3415_vm0, %v22196_v15  ;;  %v8562_v34 = vld [vmem:[#allocation2 + $0x21f] sm:$0xff] }
 0x2fe   : > { %18505 = vmatpush3.bf16.msra.mxu1 %v20588_v7  ;;  %18665 = vmatpush3.bf16.msra.mxu0 %v22205_v3  ;;  %v8563_v3 = vld [vmem:[#allocation2 + $0x227] sm:$0xff] }
 0x2ff   : > { %18506 = vmatprep.subr.bf16.mxu1 %v20589_v13  ;;  %18666 = vmatprep.subr.bf16.mxu0 %v20587_v47  ;;  %v22331_v18 = vpack.c.bf16 %v8563_v3, %v8562_v34 }
 0x302   : > { %18507 = vmatpush3.bf16.msra.mxu1 %v20589_v13  ;;  %18667 = vmatpush3.bf16.msra.mxu0 %v20587_v47 }
 0x303   : > { %18524 = vmatprep.subr.bf16.mxu1 %v22320_v35  ;;  %18684 = vmatprep.subr.bf16.mxu0 %v20588_v7 }
 0x304   : > { %18493 = vmatmul.mubr.msk.bf16.gmra.mrb[32].mxu1 %vm3415_vm0, %v22075_v39  ;;  %18653 = vmatmul.mubr.msk.bf16.gmra.mrb[120].mxu0 %vm3415_vm0, %v22217_v60  ;;  %v8565_v39 = vld [vmem:[#allocation2 + $0x237] sm:$0xff] }
 0x305   : > { %18496 = vmatprep.mubr.msk.bf16.mxu1 %vm3415_vm0, %v22073_v53  ;;  %18656 = vmatprep.mubr.msk.bf16.mxu0 %vm3415_vm0, %v22219_v25  ;;  %v8564_v53 = vld [vmem:[#allocation2 + $0x22f] sm:$0xff] }
 0x306   : > { %v22341_v29 = vpack.c.bf16 %v8565_v39, %v8564_v53 }
 0x30c   : > { %18497 = vmatmul.mubr.msk.bf16.gmra.mrb[36].mxu1 %vm3415_vm0, %v22091_v1  ;;  %18657 = vmatmul.mubr.msk.bf16.gmra.mrb[124].mxu0 %vm3415_vm0, %v22233_v19  ;;  %v8724_v1 = vld [vmem:[#allocation2 + $0x228] sm:$0xff] }
 0x30d   : > { %18500 = vmatprep.mubr.msk.bf16.mxu1 %vm3415_vm0, %v22087_v62  ;;  %18660 = vmatprep.mubr.msk.bf16.mxu0 %vm3415_vm0, %v22331_v18  ;;  %v22370_v62 = vld [vmem:[%s24251_s3 + $0x70] sm:$0xff]  }
 0x314   : > { %18501 = vmatmul.mubr.msk.bf16.gmra.mrb[40].mxu1 %vm3415_vm0, %v22100_v27  ;;  %18661 = vmatmul.mubr.msk.bf16.gmra.mrb[128].mxu0 %vm3415_vm0, %v22341_v29 }
 0x315   : > { %18508 = vmatprep.mubr.msk.bf16.mxu1 %vm3415_vm0, %v22077_v11  ;;  %18668 = vmatprep.mubr.msk.bf16.mxu0 %vm3415_vm0, %v22102_v31  ;;  %v22363_v11 = vld [vmem:[%s24251_s3 + $0x68] sm:$0xff]   ;;  %v22392_v31 = vld [vmem:[#allocation6] ss:$0 sm:$0xff] }
 0x31c   : > { %18509 = vmatmul.mubr.msk.bf16.vlgmr.msra.gmra.mrb[28].mxu1 %vm3415_vm0, %v22089_v26  ;;  %18669 = vmatmul.mubr.msk.bf16.vlgmr.msra.gmra.mrb[116].mxu0 %vm3415_vm0, %v22120_v63  ;;  %v8723_v26 = vld [vmem:[#allocation2 + $0x220] sm:$0xff] }
 0x31d   : > { %18512 = vmatprep.mubr.msk.bf16.mxu1 %vm3415_vm0, %v22200_v44  ;;  %18672 = vmatprep.mubr.msk.bf16.mxu0 %vm3415_vm0, %v22122_v46  ;;  %v22382_v27 = vpack.c.bf16 %v8724_v1, %v8723_v26  ;;  %v8725_v46 = vld [vmem:[#allocation2 + $0x230] sm:$0xff] }
 0x31e   : > { %18525 = vmatpush3.bf16.msra.mxu1 %v22320_v35  ;;  %18685 = vmatpush3.bf16.msra.mxu0 %v20588_v7  ;;  %v8885_v26 = vld [vmem:[#allocation2 + $0x229] sm:$0xff] }
 0x31f   : > { %18526 = vmatprep.subr.bf16.mxu1 %v22363_v11  ;;  %18686 = vmatprep.subr.bf16.mxu0 %v20589_v13 }
 0x322   : > { %18527 = vmatpush3.bf16.msra.mxu1 %v22363_v11  ;;  %18687 = vmatpush3.bf16.msra.mxu0 %v20589_v13 }
 0x323   : > { %18544 = vmatprep.subr.bf16.mxu1 %v22370_v62  ;;  %18704 = vmatprep.subr.bf16.mxu0 %v22320_v35 }
 0x324   : > { %18513 = vmatmul.mubr.msk.bf16.gmra.mrb[32].mxu1 %vm3415_vm0, %v22221_v2  ;;  %18673 = vmatmul.mubr.msk.bf16.gmra.mrb[120].mxu0 %vm3415_vm0, %v22143_v8  ;;  %v8726_v8 = vld [vmem:[#allocation2 + $0x238] sm:$0xff] }
 0x325   : > { %18516 = vmatprep.mubr.msk.bf16.mxu1 %vm3415_vm0, %v22223_v9  ;;  %18676 = vmatprep.mubr.msk.bf16.mxu0 %vm3415_vm0, %v22145_v54 }
 0x32c   : > { %18517 = vmatmul.mubr.msk.bf16.gmra.mrb[36].mxu1 %vm3415_vm0, %v22235_v37  ;;  %18677 = vmatmul.mubr.msk.bf16.gmra.mrb[124].mxu0 %vm3415_vm0, %v22159_v58 }
 0x32d   : > { %18520 = vmatprep.mubr.msk.bf16.mxu1 %vm3415_vm0, %v22237_v28  ;;  %18680 = vmatprep.mubr.msk.bf16.mxu0 %vm3415_vm0, %v22382_v27  ;;  %v22397_v28 = vpack.c.bf16 %v8726_v8, %v8725_v46 }
 0x32f   : > { %v18210_v63 = vpop.f32.mrb[12].mxu1 }
 0x330   : > { %v5122_v54 = vadd.f32 %v18210_v63, %v22392_v31  ;;  %v5035_v44 = vpop.f32.mrb[13].mxu1 }
 0x331   : > { %v5120_v2 = vadd.f32 %v22392_v31, %v5035_v44  ;;  %v18211_v9 = vpop.f32.mrb[14].mxu1 }
 0x332   : > { %v5138_v37 = vmax.f32 %v5122_v54, 0.0  ;;  %v5123_v58 = vadd.f32 %v18211_v9, %v22392_v31  ;;  %v5038_v23 = vpop.f32.mrb[15].mxu1 }
 0x333   : > { %v5136_v38 = vmax.f32 %v5120_v2, 0.0  ;;  %v5121_v52 = vadd.f32 %v22392_v31, %v5038_v23 }
 0x334   : > { %5155 = vst.msk [vmem:[#allocation3 + $0x10] sm:$0xff] %vm5152_vm15, %v5138_v37  ;;  %v5139_v41 = vmax.f32 %v5123_v58, 0.0  ;;  %18521 = vmatmul.mubr.msk.bf16.gmra.mrb[40].mxu1 %vm3415_vm0, %v22250_v24  ;;  %18681 = vmatmul.mubr.msk.bf16.gmra.mrb[128].mxu0 %vm3415_vm0, %v22397_v28  ;;  %v8886_v37 = vld [vmem:[#allocation2 + $0x231] sm:$0xff]  ;;  %v8887_v58 = vld [vmem:[#allocation2 + $0x239] sm:$0xff] }
 0x335   : > { %5153 = vst.msk [vmem:[#allocation3] sm:$0xff] %vm5152_vm15, %v5136_v38  ;;  %v5137_v36 = vmax.f32 %v5121_v52, 0.0  ;;  %18528 = vmatprep.mubr.msk.bf16.mxu1 %vm3415_vm0, %v22126_v51  ;;  %18688 = vmatprep.mubr.msk.bf16.mxu0 %vm3415_vm0, %v22248_v10  ;;  %v7730_v38 = vld [vmem:[#allocation2 + $0x168] sm:$0xff] }
 0x336   : > { %5156 = vst.msk [vmem:[#allocation3 + $0x18] sm:$0xff] %vm5152_vm15, %v5139_v41 }
 0x337   : > { %5154 = vst.msk [vmem:[#allocation3 + $0x8] sm:$0xff] %vm5152_vm15, %v5137_v36  ;;  %v18214_v43 = vpop.f32.mrb[16].mxu1 }
 0x338   : > { %v5126_v49 = vadd.f32 %v18214_v43, %v22392_v31  ;;  %v5051_v24 = vpop.f32.mrb[17].mxu1 }
 0x339   : > { %v5124_v16 = vadd.f32 %v22392_v31, %v5051_v24  ;;  %v18215_v47 = vpop.f32.mrb[18].mxu1 }
 0x33a   : > { %v5142_v7 = vmax.f32 %v5126_v49, 0.0  ;;  %v5127_v56 = vadd.f32 %v18215_v47, %v22392_v31  ;;  %v5054_v61 = vpop.f32.mrb[19].mxu1  ;;  %v22473_v49 = vpack.c.bf16 %v8887_v58, %v8886_v37  ;;  %v7739_v37 = vld [vmem:[#allocation2 + $0x1b0] sm:$0xff]  ;;  %v7740_v58 = vld [vmem:[#allocation2 + $0x1b8] sm:$0xff] }
 0x33b   : > { %v5140_v59 = vmax.f32 %v5124_v16, 0.0  ;;  %v5125_v51 = vadd.f32 %v22392_v31, %v5054_v61 }
 0x33c   : > { %5159 = vst.msk [vmem:[#allocation3 + $0x30] sm:$0xff] %vm5152_vm15, %v5142_v7  ;;  %v5143_v10 = vmax.f32 %v5127_v56, 0.0  ;;  %18529 = vmatmul.mubr.msk.bf16.vlgmr.msra.gmra.mrb[28].mxu1 %vm3415_vm0, %v22147_v17  ;;  %18689 = vmatmul.mubr.msk.bf16.vlgmr.msra.gmra.mrb[116].mxu0 %vm3415_vm0, %v22266_v22 }
 0x33d   : > { %5157 = vst.msk [vmem:[#allocation3 + $0x20] sm:$0xff] %vm5152_vm15, %v5140_v59  ;;  %v5141_v30 = vmax.f32 %v5125_v51, 0.0  ;;  %18532 = vmatprep.mubr.msk.bf16.mxu1 %vm3415_vm0, %v22149_v33  ;;  %18692 = vmatprep.mubr.msk.bf16.mxu0 %vm3415_vm0, %v22268_v32  ;;  %v7731_v59 = vld [vmem:[#allocation2 + $0x170] sm:$0xff]  ;;  %v7732_v51 = vld [vmem:[#allocation2 + $0x178] sm:$0xff] }
 0x33e   : > { %5160 = vst.msk [vmem:[#allocation3 + $0x38] sm:$0xff] %vm5152_vm15, %v5143_v10  ;;  %18545 = vmatpush3.bf16.msra.mxu1 %v22370_v62  ;;  %18705 = vmatpush3.bf16.msra.mxu0 %v22320_v35 }
 0x33f   : > { %5158 = vst.msk [vmem:[#allocation3 + $0x28] sm:$0xff] %vm5152_vm15, %v5141_v30  ;;  %v18218_v17 = vpop.f32.mrb[20].mxu1  ;;  %18546 = vmatprep.subr.bf16.mxu1 %v21895_v14  ;;  %18706 = vmatprep.subr.bf16.mxu0 %v22363_v11  ;;  %v7733_v30 = vld [vmem:[#allocation2 + $0x180] sm:$0xff] }
 0x340   : > { %v5130_v22 = vadd.f32 %v18218_v17, %v22392_v31  ;;  %v5067_v40 = vpop.f32.mrb[21].mxu1  ;;  %v7734_v17 = vld [vmem:[#allocation2 + $0x188] sm:$0xff] }
 0x341   : > { %v5128_v33 = vadd.f32 %v22392_v31, %v5067_v40  ;;  %v18219_v57 = vpop.f32.mrb[22].mxu1 }
 0x342   : > { %v5146_v32 = vmax.f32 %v5130_v22, 0.0  ;;  %v5131_v13 = vadd.f32 %v18219_v57, %v22392_v31  ;;  %v5070_v34 = vpop.f32.mrb[23].mxu1  ;;  %18547 = vmatpush3.bf16.msra.mxu1 %v21895_v14  ;;  %18707 = vmatpush3.bf16.msra.mxu0 %v22363_v11  ;;  %v8884_v11 = vld [vmem:[#allocation2 + $0x221] sm:$0xff] }
 0x343   : > { %v5144_v35 = vmax.f32 %v5128_v33, 0.0  ;;  %v5129_v3 = vadd.f32 %v22392_v31, %v5070_v34  ;;  %18564 = vmatprep.subr.bf16.mxu1 %v21910_v21  ;;  %18724 = vmatprep.subr.bf16.mxu0 %v22370_v62  ;;  %v22456_v54 = vpack.c.bf16 %v8885_v26, %v8884_v11  ;;  %v7737_v26 = vld [vmem:[#allocation2 + $0x1a0] sm:$0xff] }
 0x344   : > { %5163 = vst.msk [vmem:[#allocation3 + $0x50] sm:$0xff] %vm5152_vm15, %v5146_v32  ;;  %v5147_v53 = vmax.f32 %v5131_v13, 0.0  ;;  %18533 = vmatmul.mubr.msk.bf16.gmra.mrb[32].mxu1 %vm3415_vm0, %v22161_v4  ;;  %18693 = vmatmul.mubr.msk.bf16.gmra.mrb[120].mxu0 %vm3415_vm0, %v22283_v48 }
 0x345   : > { %5161 = vst.msk [vmem:[#allocation3 + $0x40] sm:$0xff] %vm5152_vm15, %v5144_v35  ;;  %v5145_v14 = vmax.f32 %v5129_v3, 0.0  ;;  %18536 = vmatprep.mubr.msk.bf16.mxu1 %vm3415_vm0, %v22163_v12  ;;  %18696 = vmatprep.mubr.msk.bf16.mxu0 %vm3415_vm0, %v22285_v42  ;;  %v7747_v35 = vpack.c.bf16 %v7734_v17, %v7733_v30  ;;  %v9047_v30 = vld [vmem:[#allocation2 + $0x24f] sm:$0xff]  ;;  %v9048_v17 = vld [vmem:[#allocation2 + $0x257] sm:$0xff] }
 0x346   : > { %5164 = vst.msk [vmem:[#allocation3 + $0x58] sm:$0xff] %vm5152_vm15, %v5147_v53 }
 0x347   : > { %5162 = vst.msk [vmem:[#allocation3 + $0x48] sm:$0xff] %vm5152_vm15, %v5145_v14  ;;  %v18222_v21 = vpop.f32.mrb[24].mxu1  ;;  %v22503_v14 = vld [vmem:[%s24251_s3 + $0x80] sm:$0xff]  }
 0x348   : > { %v5134_v39 = vadd.f32 %v18222_v21, %v22392_v31  ;;  %v5083_v4 = vpop.f32.mrb[25].mxu1  ;;  %v7735_v21 = vld [vmem:[#allocation2 + $0x190] sm:$0xff] }
 0x349   : > { %v5132_v48 = vadd.f32 %v22392_v31, %v5083_v4  ;;  %v18223_v1 = vpop.f32.mrb[26].mxu1 }
 0x34a   : > { %v5150_v63 = vmax.f32 %v5134_v39, 0.0  ;;  %v5135_v46 = vadd.f32 %v18223_v1, %v22392_v31  ;;  %v5086_v12 = vpop.f32.mrb[27].mxu1  ;;  %v7736_v39 = vld [vmem:[#allocation2 + $0x198] sm:$0xff] }
 0x34b   : > { %v5148_v8 = vmax.f32 %v5132_v48, 0.0  ;;  %v5133_v42 = vadd.f32 %v22392_v31, %v5086_v12  ;;  %v7738_v48 = vld [vmem:[#allocation2 + $0x1a8] sm:$0xff] }
 0x34c   : > { %5167 = vst.msk [vmem:[#allocation3 + $0x70] sm:$0xff] %vm5152_vm15, %v5150_v63  ;;  %v5151_v44 = vmax.f32 %v5135_v46, 0.0  ;;  %18537 = vmatmul.mubr.msk.bf16.gmra.mrb[36].mxu1 %vm3415_vm0, %v22173_v5  ;;  %18697 = vmatmul.mubr.msk.bf16.gmra.mrb[124].mxu0 %vm3415_vm0, %v22295_v50  ;;  %v7729_v50 = vld [vmem:[#allocation2 + $0x160] sm:$0xff] }
 0x34d   : > { %5165 = vst.msk [vmem:[#allocation3 + $0x60] sm:$0xff] %vm5152_vm15, %v5148_v8  ;;  %v5149_v2 = vmax.f32 %v5133_v42, 0.0  ;;  %18540 = vmatprep.mubr.msk.bf16.mxu1 %vm3415_vm0, %v22175_v6  ;;  %18700 = vmatprep.mubr.msk.bf16.mxu0 %vm3415_vm0, %v22456_v54  ;;  %v7745_v47 = vpack.c.bf16 %v7730_v38, %v7729_v50  ;;  %v7748_v8 = vpack.c.bf16 %v7736_v39, %v7735_v21  ;;  %v9045_v38 = vld [vmem:[#allocation2 + $0x23f] sm:$0xff]  ;;  %v9199_v39 = vld [vmem:[#allocation2 + $0x208] sm:$0xff] }
 0x34e   : > { %5168 = vst.msk [vmem:[#allocation3 + $0x78] sm:$0xff] %vm5152_vm15, %v5151_v44  ;;  %v9198_v21 = vld [vmem:[#allocation2 + $0x200] sm:$0xff] }
 0x34f   : > { %5166 = vst.msk [vmem:[#allocation3 + $0x68] sm:$0xff] %vm5152_vm15, %v5149_v2  ;;  %v18390_v9 = vpop.f32.mrb[100].mxu0  ;;  %v7749_v2 = vpack.c.bf16 %v7738_v48, %v7737_v26  ;;  %v9212_v48 = vpack.c.bf16 %v9199_v39, %v9198_v21  ;;  %v9601_v21 = vld [vmem:[#allocation2 + $0x288] sm:$0xff] }
 0x350   : > { %v6588_v5 = vadd.f32 %v18390_v9, %v22392_v31  ;;  %v6507_v23 = vpop.f32.mrb[101].mxu0 }
 0x351   : > { %v6586_v52 = vadd.f32 %v22392_v31, %v6507_v23  ;;  %v18391_v41 = vpop.f32.mrb[102].mxu0 }
 0x352   : > { %v6604_v36 = vmax.f32 %v6588_v5, 0.0  ;;  %v6589_v6 = vadd.f32 %v18391_v41, %v22392_v31  ;;  %v6510_v43 = vpop.f32.mrb[103].mxu0  ;;  %v7741_v5 = vld [vmem:[#allocation2 + $0x1c0] sm:$0xff] }
 0x353   : > { %v6602_v24 = vmax.f32 %v6586_v52, 0.0  ;;  %v6587_v16 = vadd.f32 %v22392_v31, %v6510_v43  ;;  %v9046_v52 = vld [vmem:[#allocation2 + $0x247] sm:$0xff] }
 0x354   : > { %6620 = vst.msk [vmem:[#allocation3 + $0x90] sm:$0xff] %vm5152_vm15, %v6604_v36  ;;  %v6605_v7 = vmax.f32 %v6589_v6, 0.0  ;;  %18541 = vmatmul.mubr.msk.bf16.gmra.mrb[40].mxu1 %vm3415_vm0, %v22194_v45  ;;  %18701 = vmatmul.mubr.msk.bf16.gmra.mrb[128].mxu0 %vm3415_vm0, %v22473_v49 }
 0x355   : > { %6618 = vst.msk [vmem:[#allocation3 + $0x80] sm:$0xff] %vm5152_vm15, %v6602_v24  ;;  %v6603_v56 = vmax.f32 %v6587_v16, 0.0  ;;  %18548 = vmatprep.mubr.msk.bf16.mxu1 %vm3415_vm0, %v7745_v47  ;;  %18708 = vmatprep.mubr.msk.bf16.mxu0 %vm3415_vm0, %v22196_v15  ;;  %v7746_v15 = vpack.c.bf16 %v7732_v51, %v7731_v59  ;;  %v7750_v16 = vpack.c.bf16 %v7740_v58, %v7739_v37  ;;  %v22577_v37 = vld [vmem:[%s24251_s3] sm:$0xff]   ;;  %v7900_v58 = vld [vmem:[#allocation2 + $0x1b1] sm:$0xff] }
 0x356   : > { %6621 = vst.msk [vmem:[#allocation3 + $0x98] sm:$0xff] %vm5152_vm15, %v6605_v7 }
 0x357   : > { %6619 = vst.msk [vmem:[#allocation3 + $0x88] sm:$0xff] %vm5152_vm15, %v6603_v56  ;;  %v18394_v61 = vpop.f32.mrb[104].mxu0 }
 0x358   : > { %v6592_v45 = vadd.f32 %v18394_v61, %v22392_v31  ;;  %v6523_v10 = vpop.f32.mrb[105].mxu0  ;;  %v22537_v61 = vpack.c.bf16 %v9046_v52, %v9045_v38  ;;  %v9207_v38 = vld [vmem:[#allocation2 + $0x248] sm:$0xff] }
 0x359   : > { %v6590_v22 = vadd.f32 %v22392_v31, %v6523_v10  ;;  %v18395_v40 = vpop.f32.mrb[106].mxu0  ;;  %v7744_v10 = vld [vmem:[#allocation2 + $0x1d8] sm:$0xff] }
 0x35a   : > { %v6608_v33 = vmax.f32 %v6592_v45, 0.0  ;;  %v6593_v57 = vadd.f32 %v18395_v40, %v22392_v31  ;;  %v6526_v32 = vpop.f32.mrb[107].mxu0  ;;  %v7890_v45 = vld [vmem:[#allocation2 + $0x161] sm:$0xff] }
 0x35b   : > { %v6606_v13 = vmax.f32 %v6590_v22, 0.0  ;;  %v6591_v34 = vadd.f32 %v22392_v31, %v6526_v32  ;;  %v7891_v22 = vld [vmem:[#allocation2 + $0x169] sm:$0xff]  ;;  %v9194_v40 = vld [vmem:[#allocation2 + $0x1e0] sm:$0xff] }
 0x35c   : > { %6624 = vst.msk [vmem:[#allocation3 + $0xb0] sm:$0xff] %vm5152_vm15, %v6608_v33  ;;  %v6609_v3 = vmax.f32 %v6593_v57, 0.0  ;;  %18549 = vmatmul.mubr.msk.bf16.vlgmr.msra.gmra.mrb[28].mxu1 %vm3415_vm0, %v7746_v15  ;;  %18709 = vmatmul.mubr.msk.bf16.vlgmr.msra.gmra.mrb[116].mxu0 %vm3415_vm0, %v22217_v60  ;;  %v22549_v57 = vpack.c.bf16 %v9048_v17, %v9047_v30  ;;  %v7906_v32 = vpack.c.bf16 %v7891_v22, %v7890_v45  ;;  %v9358_v45 = vld [vmem:[#allocation2 + $0x1f9] sm:$0xff]  ;;  %v9360_v30 = vld [vmem:[#allocation2 + $0x209] sm:$0xff] }
 0x35d   : > { %6622 = vst.msk [vmem:[#allocation3 + $0xa0] sm:$0xff] %vm5152_vm15, %v6606_v13  ;;  %v6607_v53 = vmax.f32 %v6591_v34, 0.0  ;;  %18552 = vmatprep.mubr.msk.bf16.mxu1 %vm3415_vm0, %v7747_v35  ;;  %18712 = vmatprep.mubr.msk.bf16.mxu0 %vm3415_vm0, %v22219_v25  ;;  %v22512_v25 = vld [vmem:[%s24251_s3 + $0x78] sm:$0xff]   ;;  %v9196_v35 = vld [vmem:[#allocation2 + $0x1f0] sm:$0xff] }
 0x35e   : > { %6625 = vst.msk [vmem:[#allocation3 + $0xb8] sm:$0xff] %vm5152_vm15, %v6609_v3  ;;  %18565 = vmatpush3.bf16.msra.mxu1 %v22503_v14  ;;  %18725 = vmatpush3.bf16.msra.mxu0 %v22370_v62  ;;  %v7892_v13 = vld [vmem:[#allocation2 + $0x171] sm:$0xff]  ;;  %v7893_v34 = vld [vmem:[#allocation2 + $0x179] sm:$0xff] }
 0x35f   : > { %6623 = vst.msk [vmem:[#allocation3 + $0xa8] sm:$0xff] %vm5152_vm15, %v6607_v53  ;;  %v18398_v60 = vpop.f32.mrb[108].mxu0  ;;  %18566 = vmatprep.subr.bf16.mxu1 %v21946_v55  ;;  %18726 = vmatprep.subr.bf16.mxu0 %v22512_v25  ;;  %v9197_v3 = vld [vmem:[#allocation2 + $0x1f8] sm:$0xff]  ;;  %v7894_v53 = vld [vmem:[#allocation2 + $0x181] sm:$0xff] }
 0x360   : > { %v6596_v4 = vadd.f32 %v18398_v60, %v22392_v31  ;;  %v6539_v11 = vpop.f32.mrb[109].mxu0  ;;  %v7895_v60 = vld [vmem:[#allocation2 + $0x189] sm:$0xff] }
 0x361   : > { %v6594_v62 = vadd.f32 %v22392_v31, %v6539_v11  ;;  %v18399_v1 = vpop.f32.mrb[110].mxu0  ;;  %v9211_v11 = vpack.c.bf16 %v9197_v3, %v9196_v35  ;;  %v7908_v26 = vpack.c.bf16 %v7895_v60, %v7894_v53  ;;  %v9599_v35 = vld [vmem:[#allocation2 + $0x278] sm:$0xff]  ;;  %v9367_v3 = vld [vmem:[#allocation2 + $0x241] sm:$0xff]  ;;  %v9368_v53 = vld [vmem:[#allocation2 + $0x249] sm:$0xff] }
 0x362   : > { %v6612_v63 = vmax.f32 %v6596_v4, 0.0  ;;  %v6597_v46 = vadd.f32 %v18399_v1, %v22392_v31  ;;  %v6542_v12 = vpop.f32.mrb[111].mxu0  ;;  %18567 = vmatpush3.bf16.msra.mxu1 %v21946_v55  ;;  %18727 = vmatpush3.bf16.msra.mxu0 %v22512_v25  ;;  %v7907_v4 = vpack.c.bf16 %v7893_v34, %v7892_v13  ;;  %v20595_v1 = vld [vmem:[%s24251_s3 + $0x10] sm:$0xff]   ;;  %v22620_v13 = vld [vmem:[%s24251_s3 + $0x20] sm:$0xff]  }
 0x363   : > { %v6610_v42 = vmax.f32 %v6594_v62, 0.0  ;;  %v6595_v44 = vadd.f32 %v22392_v31, %v6542_v12  ;;  %18744 = vmatprep.subr.bf16.mxu0 %v22503_v14  ;;  %18764 = vmatprep.subr.bf16.mxu1 %v21962_v20  ;;  %v7896_v62 = vld [vmem:[#allocation2 + $0x191] sm:$0xff]  ;;  %v9600_v60 = vld [vmem:[#allocation2 + $0x280] sm:$0xff] }
 0x364   : > { %6628 = vst.msk [vmem:[#allocation3 + $0xd0] sm:$0xff] %vm5152_vm15, %v6612_v63  ;;  %v6613_v9 = vmax.f32 %v6597_v46, 0.0  ;;  %18553 = vmatmul.mubr.msk.bf16.gmra.mrb[32].mxu1 %vm3415_vm0, %v7748_v8  ;;  %18713 = vmatmul.mubr.msk.bf16.gmra.mrb[120].mxu0 %vm3415_vm0, %v22233_v19  ;;  %v7742_v19 = vld [vmem:[#allocation2 + $0x1c8] sm:$0xff]  ;;  %v7897_v63 = vld [vmem:[#allocation2 + $0x199] sm:$0xff]  ;;  %v9200_v46 = vld [vmem:[#allocation2 + $0x210] sm:$0xff] }
 0x365   : > { %6626 = vst.msk [vmem:[#allocation3 + $0xc0] sm:$0xff] %vm5152_vm15, %v6610_v42  ;;  %v6611_v55 = vmax.f32 %v6595_v44, 0.0  ;;  %18556 = vmatprep.mubr.msk.bf16.mxu1 %vm3415_vm0, %v7749_v2  ;;  %18716 = vmatprep.mubr.msk.bf16.mxu0 %vm3415_vm0, %v22331_v18  ;;  %v7751_v56 = vpack.c.bf16 %v7742_v19, %v7741_v5  ;;  %v9201_v12 = vld [vmem:[#allocation2 + $0x218] sm:$0xff]  ;;  %v22567_v8 = vld [vmem:[%s24251_s3 + $0x88] sm:$0xff]   ;;  %v9206_v19 = vld [vmem:[#allocation2 + $0x240] sm:$0xff] }
 0x366   : > { %6629 = vst.msk [vmem:[#allocation3 + $0xd8] sm:$0xff] %vm5152_vm15, %v6613_v9  ;;  %v20597_v42 = vld [vmem:[%s24251_s3 + $0x18] sm:$0xff]   ;;  %v7898_v44 = vld [vmem:[#allocation2 + $0x1a1] sm:$0xff]  ;;  %v7899_v2 = vld [vmem:[#allocation2 + $0x1a9] sm:$0xff]  ;;  %v7909_v9 = vpack.c.bf16 %v7897_v63, %v7896_v62 }
 0x367   : > { %6627 = vst.msk [vmem:[#allocation3 + $0xc8] sm:$0xff] %vm5152_vm15, %v6611_v55  ;;  %v18402_v20 = vpop.f32.mrb[112].mxu0  ;;  %v9213_v55 = vpack.c.bf16 %v9201_v12, %v9200_v46  ;;  %v7901_v5 = vld [vmem:[#allocation2 + $0x1b9] sm:$0xff]  ;;  %v9598_v34 = vld [vmem:[#allocation2 + $0x270] sm:$0xff]  ;;  %v11054_v46 = vld [vmem:[#allocation2 + $0x2a8] sm:$0xff] }
 0x368   : > { %v6600_v23 = vadd.f32 %v18402_v20, %v22392_v31  ;;  %v6555_v50 = vpop.f32.mrb[113].mxu0  ;;  %v7910_v20 = vpack.c.bf16 %v7899_v2, %v7898_v44  ;;  %v7911_v52 = vpack.c.bf16 %v7901_v5, %v7900_v58  ;;  %v22631_v39 = vpack.c.bf16 %v9599_v35, %v9598_v34  ;;  %v9602_v62 = vld [vmem:[#allocation2 + $0x290] sm:$0xff]  ;;  %v11053_v63 = vld [vmem:[#allocation2 + $0x2a0] sm:$0xff]  ;;  %v11058_v5 = vld [vmem:[#allocation2 + $0x2c8] sm:$0xff] }
 0x369   : > { %v6598_v41 = vadd.f32 %v22392_v31, %v6555_v50  ;;  %v18403_v36 = vpop.f32.mrb[114].mxu0  ;;  %v7903_v50 = vld [vmem:[#allocation2 + $0x1c9] sm:$0xff]  ;;  %v22649_v44 = vpack.c.bf16 %v11054_v46, %v11053_v63  ;;  %v11057_v58 = vld [vmem:[#allocation2 + $0x2c0] sm:$0xff]  ;;  %v11068_v35 = vld [vmem:[#allocation2 + $0x318] sm:$0xff] }
 0x36a   : > { %v6616_v6 = vmax.f32 %v6600_v23, 0.0  ;;  %v6601_v43 = vadd.f32 %v18403_v36, %v22392_v31  ;;  %v6558_v24 = vpop.f32.mrb[115].mxu0  ;;  %v7902_v23 = vld [vmem:[#allocation2 + $0x1c1] sm:$0xff]  ;;  %v22585_v36 = vpack.c.bf16 %v9207_v38, %v9206_v19  ;;  %v9566_v2 = vld [vmem:[#allocation2 + $0x22f] sm:$0xff]  ;;  %v22661_v19 = vpack.c.bf16 %v11058_v5, %v11057_v58  ;;  %v11060_v38 = vld [vmem:[#allocation2 + $0x2d8] sm:$0xff] }
 0x36b   : > { %v6614_v47 = vmax.f32 %v6598_v41, 0.0  ;;  %v6599_v7 = vadd.f32 %v22392_v31, %v6558_v24  ;;  %v7743_v31 = vld [vmem:[#allocation2 + $0x1d0] sm:$0xff]  ;;  %v7912_v41 = vpack.c.bf16 %v7903_v50, %v7902_v23  ;;  %v11034_v63 = vld [vmem:[#allocation2 + $0x2c7] sm:$0xff]  ;;  %v11037_v58 = vld [vmem:[#allocation2 + $0x2df] sm:$0xff] }
 0x36c   : > { %6632 = vst.msk [vmem:[#allocation3 + $0xf0] sm:$0xff] %vm5152_vm15, %v6616_v6  ;;  %v6617_v59 = vmax.f32 %v6601_v43, 0.0  ;;  %18557 = vmatmul.mubr.msk.bf16.gmra.mrb[36].mxu1 %vm3415_vm0, %v7750_v16  ;;  %18717 = vmatmul.mubr.msk.bf16.gmra.mrb[124].mxu0 %vm3415_vm0, %v22341_v29  ;;  %v9195_v29 = vld [vmem:[#allocation2 + $0x1e8] sm:$0xff]  ;;  %v7752_v33 = vpack.c.bf16 %v7744_v10, %v7743_v31  ;;  %v7904_v6 = vld [vmem:[#allocation2 + $0x1d1] sm:$0xff]  ;;  %v7905_v43 = vld [vmem:[#allocation2 + $0x1d9] sm:$0xff] }
 0x36d   : > { %6630 = vst.msk [vmem:[#allocation3 + $0xe0] sm:$0xff] %vm5152_vm15, %v6614_v47  ;;  %v6615_v51 = vmax.f32 %v6599_v7, 0.0  ;;  %18560 = vmatprep.mubr.msk.bf16.mxu1 %vm3415_vm0, %v7751_v56  ;;  %18720 = vmatprep.mubr.msk.bf16.mxu0 %vm3415_vm0, %v22537_v61  ;;  %v9210_v15 = vpack.c.bf16 %v9195_v29, %v9194_v40  ;;  %v9208_v24 = vld [vmem:[#allocation2 + $0x250] sm:$0xff]  ;;  %v9209_v16 = vld [vmem:[#allocation2 + $0x258] sm:$0xff]  ;;  %v9355_v47 = vld [vmem:[#allocation2 + $0x1e1] sm:$0xff]  ;;  %v7913_v56 = vpack.c.bf16 %v7905_v43, %v7904_v6 }
 0x36e   : > { %6633 = vst.msk [vmem:[#allocation3 + $0xf8] sm:$0xff] %vm5152_vm15, %v6617_v59  ;;  %v9356_v7 = vld [vmem:[#allocation2 + $0x1e9] sm:$0xff]  ;;  %v22593_v59 = vpack.c.bf16 %v9209_v16, %v9208_v24  ;;  %v9357_v31 = vld [vmem:[#allocation2 + $0x1f1] sm:$0xff]  ;;  %v9359_v10 = vld [vmem:[#allocation2 + $0x201] sm:$0xff] }
 0x36f   : > { %6631 = vst.msk [vmem:[#allocation3 + $0xe8] sm:$0xff] %vm5152_vm15, %v6615_v51  ;;  %v9371_v51 = vpack.c.bf16 %v9356_v7, %v9355_v47  ;;  %v9372_v17 = vpack.c.bf16 %v9358_v45, %v9357_v31  ;;  %v9373_v22 = vpack.c.bf16 %v9360_v30, %v9359_v10  ;;  %v9362_v40 = vld [vmem:[#allocation2 + $0x219] sm:$0xff]  ;;  %v22611_v29 = vld [vmem:[%s24251_s3 + $0x8] sm:$0xff]   ;;  %v22690_v7 = vld [vmem:[%s24251_s3 + $0x30] sm:$0xff]  }
 0x370   : > { %v9573_v6 = vld [vmem:[#allocation2 + $0x267] sm:$0xff]  ;;  %v11063_v31 = vld [vmem:[#allocation2 + $0x2f0] sm:$0xff]  ;;  %v11064_v45 = vld [vmem:[#allocation2 + $0x2f8] sm:$0xff] }
 0x371   : > { %v11061_v43 = vld [vmem:[#allocation2 + $0x2e0] sm:$0xff]  ;;  %v11062_v24 = vld [vmem:[#allocation2 + $0x2e8] sm:$0xff]  ;;  %v11067_v34 = vld [vmem:[#allocation2 + $0x310] sm:$0xff] }
 0x372   : > { %v22685_v47 = vpack.c.bf16 %v11062_v24, %v11061_v43  ;;  %v9576_v10 = vld [vmem:[#allocation2 + $0x27f] sm:$0xff]  ;;  %v9577_v30 = vld [vmem:[#allocation2 + $0x287] sm:$0xff]  ;;  %v11040_v43 = vld [vmem:[#allocation2 + $0x2f7] sm:$0xff] }
 0x373   : > { %v11038_v5 = vld [vmem:[#allocation2 + $0x2e7] sm:$0xff]  ;;  %v13986_v0 = vld [vmem:[#allocation3 + $0xd8] sm:$0xff] }
 0x374   : > { %18561 = vmatmul.mubr.msk.bf16.gmra.mrb[40].mxu1 %vm3415_vm0, %v7752_v33  ;;  %18721 = vmatmul.mubr.msk.bf16.gmra.mrb[128].mxu0 %vm3415_vm0, %v22549_v57  ;;  %v9596_v33 = vld [vmem:[#allocation2 + $0x260] sm:$0xff] }
 0x375   : > { %18568 = vmatprep.mubr.msk.bf16.mxu1 %vm3415_vm0, %v7906_v32  ;;  %18728 = vmatprep.mubr.msk.bf16.mxu0 %vm3415_vm0, %v9210_v15  ;;  %v9866_v24 = vld [vmem:[#allocation2 + $0x281] sm:$0xff] }
 0x37c   : > { %18569 = vmatmul.mubr.msk.bf16.vlgmr.msra.gmra.mrb[28].mxu1 %vm3415_vm0, %v7907_v4  ;;  %18729 = vmatmul.mubr.msk.bf16.vlgmr.msra.gmra.mrb[116].mxu0 %vm3415_vm0, %v9211_v11  ;;  %v22633_v4 = vpack.c.bf16 %v9368_v53, %v9367_v3  ;;  %v22635_v11 = vpack.c.bf16 %v9601_v21, %v9600_v60  ;;  %v11029_v3 = vld [vmem:[#allocation2 + $0x29f] sm:$0xff]  ;;  %v11030_v53 = vld [vmem:[#allocation2 + $0x2a7] sm:$0xff]  ;;  %v22720_v21 = vpack.c.bf16 %v11068_v35, %v11067_v34  ;;  %v11044_v34 = vld [vmem:[#allocation2 + $0x317] sm:$0xff] }
 0x37d   : > { %18572 = vmatprep.mubr.msk.bf16.mxu1 %vm3415_vm0, %v7908_v26  ;;  %18732 = vmatprep.mubr.msk.bf16.mxu0 %vm3415_vm0, %v9212_v48  ;;  %v9369_v26 = vld [vmem:[#allocation2 + $0x251] sm:$0xff]  ;;  %v9370_v48 = vld [vmem:[#allocation2 + $0x259] sm:$0xff]  ;;  %v11319_v35 = vld [vmem:[#allocation2 + $0x2a1] sm:$0xff] }
 0x37e   : > { %18745 = vmatpush3.bf16.msra.mxu0 %v22503_v14  ;;  %18765 = vmatpush3.bf16.msra.mxu1 %v20595_v1  ;;  %v22645_v12 = vpack.c.bf16 %v9370_v48, %v9369_v26  ;;  %v22722_v26 = vpack.c.bf16 %v11030_v53, %v11029_v3  ;;  %v11031_v48 = vld [vmem:[#allocation2 + $0x2af] sm:$0xff] }
 0x37f   : > { %18746 = vmatprep.subr.bf16.mxu0 %v22567_v8  ;;  %18766 = vmatprep.subr.bf16.mxu1 %v20597_v42  ;;  %v11320_v3 = vld [vmem:[#allocation2 + $0x2a9] sm:$0xff] }
 0x382   : > { %18747 = vmatpush3.bf16.msra.mxu0 %v22567_v8  ;;  %18767 = vmatpush3.bf16.msra.mxu1 %v20597_v42 }
 0x383   : > { %18784 = vmatprep.subr.bf16.mxu1 %v22577_v37  ;;  %18944 = vmatprep.subr.bf16.mxu0 %v20595_v1 }
 0x384   : > { %18573 = vmatmul.mubr.msk.bf16.gmra.mrb[32].mxu1 %vm3415_vm0, %v7909_v9  ;;  %18733 = vmatmul.mubr.msk.bf16.gmra.mrb[120].mxu0 %vm3415_vm0, %v9213_v55  ;;  %v9567_v9 = vld [vmem:[#allocation2 + $0x237] sm:$0xff] }
 0x385   : > { %18576 = vmatprep.mubr.msk.bf16.mxu1 %vm3415_vm0, %v7910_v20  ;;  %18736 = vmatprep.mubr.msk.bf16.mxu0 %vm3415_vm0, %v22382_v27  ;;  %v11055_v55 = vld [vmem:[#allocation2 + $0x2b0] sm:$0xff]  ;;  %v11056_v20 = vld [vmem:[#allocation2 + $0x2b8] sm:$0xff]  ;;  %v9581_v23 = vpack.c.bf16 %v9567_v9, %v9566_v2 }
 0x386   : > { %v22659_v50 = vpack.c.bf16 %v11056_v20, %v11055_v55  ;;  %v11036_v9 = vld [vmem:[#allocation2 + $0x2d7] sm:$0xff]  ;;  %v9862_v55 = vld [vmem:[#allocation2 + $0x261] sm:$0xff]  ;;  %v9863_v20 = vld [vmem:[#allocation2 + $0x269] sm:$0xff] }
 0x38c   : > { %18577 = vmatmul.mubr.msk.bf16.gmra.mrb[36].mxu1 %vm3415_vm0, %v7911_v52  ;;  %18737 = vmatmul.mubr.msk.bf16.gmra.mrb[124].mxu0 %vm3415_vm0, %v22397_v28  ;;  %v9572_v52 = vld [vmem:[#allocation2 + $0x25f] sm:$0xff] }
 0x38d   : > { %18580 = vmatprep.mubr.msk.bf16.mxu1 %vm3415_vm0, %v7912_v41  ;;  %18740 = vmatprep.mubr.msk.bf16.mxu0 %vm3415_vm0, %v22585_v36  ;;  %v22675_v41 = vld [vmem:[%s24251_s3 + $0x28] sm:$0xff]  }
 0x394   : > { %18581 = vmatmul.mubr.msk.bf16.gmra.mrb[40].mxu1 %vm3415_vm0, %v7913_v56  ;;  %18741 = vmatmul.mubr.msk.bf16.gmra.mrb[128].mxu0 %vm3415_vm0, %v22593_v59  ;;  %v9574_v56 = vld [vmem:[#allocation2 + $0x26f] sm:$0xff] }
 0x395   : > { %18748 = vmatprep.mubr.msk.bf16.mxu0 %vm3415_vm0, %v9371_v51  ;;  %18768 = vmatprep.mubr.msk.bf16.mxu1 %vm3415_vm0, %v22382_v27  ;;  %v9361_v27 = vld [vmem:[#allocation2 + $0x211] sm:$0xff] }
 0x396   : > { %v9374_v32 = vpack.c.bf16 %v9362_v40, %v9361_v27  ;;  %v9575_v51 = vld [vmem:[#allocation2 + $0x277] sm:$0xff]  ;;  %v22704_v40 = vpack.c.bf16 %v11064_v45, %v11063_v31  ;;  %v11042_v31 = vld [vmem:[#allocation2 + $0x307] sm:$0xff] }
 0x397   : > { %v22702_v27 = vpack.c.bf16 %v9575_v51, %v9574_v56  ;;  %v9867_v56 = vld [vmem:[#allocation2 + $0x289] sm:$0xff]  ;;  %v11041_v51 = vld [vmem:[#allocation2 + $0x2ff] sm:$0xff] }
 0x39c   : > { %18749 = vmatmul.mubr.msk.bf16.vlgmr.msra.gmra.mrb[116].mxu0 %vm3415_vm0, %v9372_v17  ;;  %18769 = vmatmul.mubr.msk.bf16.vlgmr.msra.gmra.mrb[44].mxu1 %vm3415_vm0, %v22397_v28  ;;  %v9597_v28 = vld [vmem:[#allocation2 + $0x268] sm:$0xff]  ;;  %v11065_v17 = vld [vmem:[#allocation2 + $0x300] sm:$0xff] }
 0x39d   : > { %18752 = vmatprep.mubr.msk.bf16.mxu0 %vm3415_vm0, %v9373_v22  ;;  %18772 = vmatprep.mubr.msk.bf16.mxu1 %vm3415_vm0, %v22585_v36  ;;  %v22615_v15 = vpack.c.bf16 %v9597_v28, %v9596_v33  ;;  %v11066_v22 = vld [vmem:[#allocation2 + $0x308] sm:$0xff] }
 0x39e   : > { %18785 = vmatpush3.bf16.msra.mxu1 %v22577_v37  ;;  %18945 = vmatpush3.bf16.msra.mxu0 %v20595_v1  ;;  %v9603_v1 = vld [vmem:[#allocation2 + $0x298] sm:$0xff]  ;;  %v22708_v33 = vpack.c.bf16 %v11066_v22, %v11065_v17  ;;  %v9578_v28 = vld [vmem:[#allocation2 + $0x28f] sm:$0xff]  ;;  %v22782_v17 = vpack.c.bf16 %v11042_v31, %v11041_v51 }
 0x39f   : > { %18786 = vmatprep.subr.bf16.mxu1 %v22611_v29  ;;  %18946 = vmatprep.subr.bf16.mxu0 %v20597_v42  ;;  %v9868_v22 = vld [vmem:[#allocation2 + $0x291] sm:$0xff] }
 0x3a2   : > { %18787 = vmatpush3.bf16.msra.mxu1 %v22611_v29  ;;  %18947 = vmatpush3.bf16.msra.mxu0 %v20597_v42  ;;  %v22647_v42 = vpack.c.bf16 %v9603_v1, %v9602_v62  ;;  %v11032_v62 = vld [vmem:[#allocation2 + $0x2b7] sm:$0xff]  ;;  %v11033_v1 = vld [vmem:[#allocation2 + $0x2bf] sm:$0xff] }
 0x3a3   : > { %18804 = vmatprep.subr.bf16.mxu1 %v22620_v13  ;;  %18964 = vmatprep.subr.bf16.mxu0 %v22577_v37  ;;  %v22732_v46 = vpack.c.bf16 %v11032_v62, %v11031_v48  ;;  %v22734_v2 = vpack.c.bf16 %v11034_v63, %v11033_v1  ;;  %v22796_v62 = vpack.c.bf16 %v11320_v3, %v11319_v35  ;;  %v11321_v1 = vld [vmem:[#allocation2 + $0x2b1] sm:$0xff]  ;;  %v11322_v63 = vld [vmem:[#allocation2 + $0x2b9] sm:$0xff] }
 0x3a4   : > { %18753 = vmatmul.mubr.msk.bf16.gmra.mrb[120].mxu0 %vm3415_vm0, %v9374_v32  ;;  %18773 = vmatmul.mubr.msk.bf16.gmra.mrb[48].mxu1 %vm3415_vm0, %v22593_v59  ;;  %v9579_v32 = vld [vmem:[#allocation2 + $0x297] sm:$0xff] }
 0x3a5   : > { %18756 = vmatprep.mubr.msk.bf16.mxu0 %vm3415_vm0, %v22456_v54  ;;  %18776 = vmatprep.mubr.msk.bf16.mxu1 %vm3415_vm0, %v22615_v15  ;;  %v22718_v60 = vpack.c.bf16 %v9579_v32, %v9578_v28  ;;  %v9869_v28 = vld [vmem:[#allocation2 + $0x299] sm:$0xff]  ;;  %v11043_v32 = vld [vmem:[#allocation2 + $0x30f] sm:$0xff] }
 0x3a6   : > { %v22792_v53 = vpack.c.bf16 %v9869_v28, %v9868_v22  ;;  %v22794_v48 = vpack.c.bf16 %v11044_v34, %v11043_v32  ;;  %v11333_v22 = vld [vmem:[#allocation2 + $0x311] sm:$0xff]  ;;  %v11334_v28 = vld [vmem:[#allocation2 + $0x319] sm:$0xff] }
 0x3a7   : > { %v22853_v32 = vpack.c.bf16 %v11334_v28, %v11333_v22 }
 0x3ac   : > { %18757 = vmatmul.mubr.msk.bf16.gmra.mrb[124].mxu0 %vm3415_vm0, %v22473_v49  ;;  %18777 = vmatmul.mubr.msk.bf16.gmra.mrb[52].mxu1 %vm3415_vm0, %v22631_v39 }
 0x3ad   : > { %18760 = vmatprep.mubr.msk.bf16.mxu0 %vm3415_vm0, %v22633_v4  ;;  %18780 = vmatprep.mubr.msk.bf16.mxu1 %vm3415_vm0, %v22635_v11 }
 0x3b4   : > { %18761 = vmatmul.mubr.msk.bf16.gmra.mrb[128].mxu0 %vm3415_vm0, %v22645_v12  ;;  %18781 = vmatmul.mubr.msk.bf16.gmra.mrb[56].mxu1 %vm3415_vm0, %v22647_v42 }
 0x3b5   : > { %18788 = vmatprep.mubr.msk.bf16.mxu1 %vm3415_vm0, %v22331_v18  ;;  %18948 = vmatprep.mubr.msk.bf16.mxu0 %vm3415_vm0, %v22649_v44  ;;  %v11059_v18 = vld [vmem:[#allocation2 + $0x2d0] sm:$0xff] }
 0x3b6   : > { %v22679_v16 = vpack.c.bf16 %v11060_v38, %v11059_v18  ;;  %v22759_v18 = vpack.c.bf16 %v11038_v5, %v11037_v58  ;;  %v22764_v38 = vld [vmem:[%s24251_s3 + $0x40] sm:$0xff]   ;;  %v20605_v5 = vld [vmem:[%s24251_s3 + $0x48] sm:$0xff]  }
 0x3b7   : > { %v11326_v58 = vld [vmem:[#allocation2 + $0x2d9] sm:$0xff] }
 0x3bc   : > { %18789 = vmatmul.mubr.msk.bf16.vlgmr.msra.gmra.mrb[44].mxu1 %vm3415_vm0, %v9581_v23  ;;  %18949 = vmatmul.mubr.msk.bf16.vlgmr.msra.gmra.mrb[132].mxu0 %vm3415_vm0, %v22659_v50 }
 0x3bd   : > { %18792 = vmatprep.mubr.msk.bf16.mxu1 %vm3415_vm0, %v22537_v61  ;;  %18952 = vmatprep.mubr.msk.bf16.mxu0 %vm3415_vm0, %v22661_v19 }
 0x3be   : > { %18805 = vmatpush3.bf16.msra.mxu1 %v22620_v13  ;;  %18965 = vmatpush3.bf16.msra.mxu0 %v22577_v37  ;;  %v22683_v37 = vpack.c.bf16 %v9573_v6, %v9572_v52  ;;  %v9864_v52 = vld [vmem:[#allocation2 + $0x271] sm:$0xff] }
 0x3bf   : > { %18806 = vmatprep.subr.bf16.mxu1 %v22675_v41  ;;  %18966 = vmatprep.subr.bf16.mxu0 %v22611_v29  ;;  %v11039_v6 = vld [vmem:[#allocation2 + $0x2ef] sm:$0xff] }
 0x3c2   : > { %18807 = vmatpush3.bf16.msra.mxu1 %v22675_v41  ;;  %18967 = vmatpush3.bf16.msra.mxu0 %v22611_v29  ;;  %v22706_v29 = vpack.c.bf16 %v9577_v30, %v9576_v10  ;;  %v22778_v10 = vpack.c.bf16 %v11040_v43, %v11039_v6  ;;  %v22780_v30 = vpack.c.bf16 %v9867_v56, %v9866_v24  ;;  %v11330_v43 = vld [vmem:[#allocation2 + $0x2f9] sm:$0xff]  ;;  %v11331_v24 = vld [vmem:[#allocation2 + $0x301] sm:$0xff]  ;;  %v11332_v56 = vld [vmem:[#allocation2 + $0x309] sm:$0xff] }
 0x3c3   : > { %18824 = vmatprep.subr.bf16.mxu1 %v22690_v7  ;;  %18984 = vmatprep.subr.bf16.mxu0 %v22620_v13  ;;  %v22843_v31 = vpack.c.bf16 %v11332_v56, %v11331_v24 }
 0x3c4   : > { %18793 = vmatmul.mubr.msk.bf16.gmra.mrb[48].mxu1 %vm3415_vm0, %v22549_v57  ;;  %18953 = vmatmul.mubr.msk.bf16.gmra.mrb[136].mxu0 %vm3415_vm0, %v22679_v16 }
 0x3c5   : > { %18796 = vmatprep.mubr.msk.bf16.mxu1 %vm3415_vm0, %v22683_v37  ;;  %18956 = vmatprep.mubr.msk.bf16.mxu0 %vm3415_vm0, %v22685_v47 }
 0x3cc   : > { %18797 = vmatmul.mubr.msk.bf16.gmra.mrb[52].mxu1 %vm3415_vm0, %v22702_v27  ;;  %18957 = vmatmul.mubr.msk.bf16.gmra.mrb[140].mxu0 %vm3415_vm0, %v22704_v40 }
 0x3cd   : > { %18800 = vmatprep.mubr.msk.bf16.mxu1 %vm3415_vm0, %v22706_v29  ;;  %18960 = vmatprep.mubr.msk.bf16.mxu0 %vm3415_vm0, %v22708_v33 }
 0x3d4   : > { %18801 = vmatmul.mubr.msk.bf16.gmra.mrb[56].mxu1 %vm3415_vm0, %v22718_v60  ;;  %18961 = vmatmul.mubr.msk.bf16.gmra.mrb[144].mxu0 %vm3415_vm0, %v22720_v21 }
 0x3d5   : > { %18808 = vmatprep.mubr.msk.bf16.mxu1 %vm3415_vm0, %v22456_v54  ;;  %18968 = vmatprep.mubr.msk.bf16.mxu0 %vm3415_vm0, %v22722_v26  ;;  %v11035_v54 = vld [vmem:[#allocation2 + $0x2cf] sm:$0xff] }
 0x3d6   : > { %v22753_v23 = vpack.c.bf16 %v11036_v9, %v11035_v54  ;;  %v11323_v54 = vld [vmem:[#allocation2 + $0x2c1] sm:$0xff]  ;;  %v11324_v9 = vld [vmem:[#allocation2 + $0x2c9] sm:$0xff] }
 0x3dc   : > { %18809 = vmatmul.mubr.msk.bf16.vlgmr.msra.gmra.mrb[44].mxu1 %vm3415_vm0, %v22473_v49  ;;  %18969 = vmatmul.mubr.msk.bf16.vlgmr.msra.gmra.mrb[132].mxu0 %vm3415_vm0, %v22732_v46  ;;  %v22749_v49 = vld [vmem:[%s24251_s3 + $0x38] sm:$0xff]  }
 0x3dd   : > { %18812 = vmatprep.mubr.msk.bf16.mxu1 %vm3415_vm0, %v22633_v4  ;;  %18972 = vmatprep.mubr.msk.bf16.mxu0 %vm3415_vm0, %v22734_v2 }
 0x3de   : > { %18825 = vmatpush3.bf16.msra.mxu1 %v22690_v7  ;;  %18985 = vmatpush3.bf16.msra.mxu0 %v22620_v13  ;;  %v22757_v13 = vpack.c.bf16 %v9863_v20, %v9862_v55  ;;  %v22806_v55 = vpack.c.bf16 %v11322_v63, %v11321_v1  ;;  %v22808_v20 = vpack.c.bf16 %v11324_v9, %v11323_v54 }
 0x3df   : > { %18826 = vmatprep.subr.bf16.mxu1 %v22749_v49  ;;  %18986 = vmatprep.subr.bf16.mxu0 %v22675_v41 }
 0x3e2   : > { %18827 = vmatpush3.bf16.msra.mxu1 %v22749_v49  ;;  %18987 = vmatpush3.bf16.msra.mxu0 %v22675_v41  ;;  %v9865_v41 = vld [vmem:[#allocation2 + $0x279] sm:$0xff] }
 0x3e3   : > { %18844 = vmatprep.subr.bf16.mxu1 %v22764_v38  ;;  %19004 = vmatprep.subr.bf16.mxu0 %v22690_v7  ;;  %v22776_v45 = vpack.c.bf16 %v9865_v41, %v9864_v52  ;;  %v11328_v52 = vld [vmem:[#allocation2 + $0x2e9] sm:$0xff] }
 0x3e4   : > { %18813 = vmatmul.mubr.msk.bf16.gmra.mrb[48].mxu1 %vm3415_vm0, %v22645_v12  ;;  %18973 = vmatmul.mubr.msk.bf16.gmra.mrb[136].mxu0 %vm3415_vm0, %v22753_v23 }
 0x3e5   : > { %18816 = vmatprep.mubr.msk.bf16.mxu1 %vm3415_vm0, %v22757_v13  ;;  %18976 = vmatprep.mubr.msk.bf16.mxu0 %vm3415_vm0, %v22759_v18 }
 0x3ec   : > { %18817 = vmatmul.mubr.msk.bf16.gmra.mrb[52].mxu1 %vm3415_vm0, %v22776_v45  ;;  %18977 = vmatmul.mubr.msk.bf16.gmra.mrb[140].mxu0 %vm3415_vm0, %v22778_v10 }
 0x3ed   : > { %18820 = vmatprep.mubr.msk.bf16.mxu1 %vm3415_vm0, %v22780_v30  ;;  %18980 = vmatprep.mubr.msk.bf16.mxu0 %vm3415_vm0, %v22782_v17 }
 0x3f4   : > { %18821 = vmatmul.mubr.msk.bf16.gmra.mrb[56].mxu1 %vm3415_vm0, %v22792_v53  ;;  %18981 = vmatmul.mubr.msk.bf16.gmra.mrb[144].mxu0 %vm3415_vm0, %v22794_v48 }
 0x3f5   : > { %18828 = vmatprep.mubr.msk.bf16.mxu1 %vm3415_vm0, %v22537_v61  ;;  %18988 = vmatprep.mubr.msk.bf16.mxu0 %vm3415_vm0, %v22796_v62  ;;  %v11325_v61 = vld [vmem:[#allocation2 + $0x2d1] sm:$0xff] }
 0x3f6   : > { %v22824_v41 = vpack.c.bf16 %v11326_v58, %v11325_v61 }
 0x3fc   : > { %18829 = vmatmul.mubr.msk.bf16.vlgmr.msra.gmra.mrb[44].mxu1 %vm3415_vm0, %v22549_v57  ;;  %18989 = vmatmul.mubr.msk.bf16.vlgmr.msra.gmra.mrb[132].mxu0 %vm3415_vm0, %v22806_v55  ;;  %v11327_v57 = vld [vmem:[#allocation2 + $0x2e1] sm:$0xff] }
 0x3fd   : > { %18832 = vmatprep.mubr.msk.bf16.mxu1 %vm3415_vm0, %v22683_v37  ;;  %18992 = vmatprep.mubr.msk.bf16.mxu0 %vm3415_vm0, %v22808_v20  ;;  %v22827_v6 = vpack.c.bf16 %v11328_v52, %v11327_v57 }
 0x3fe   : > { %18845 = vmatpush3.bf16.msra.mxu1 %v22764_v38  ;;  %19005 = vmatpush3.bf16.msra.mxu0 %v22690_v7  ;;  %v20606_v7 = vld [vmem:[%s24251_s3 + $0x50] sm:$0xff]  }
 0x3ff   : > { %18846 = vmatprep.subr.bf16.mxu1 %v20605_v5  ;;  %19006 = vmatprep.subr.bf16.mxu0 %v22749_v49 }
 0x402   : > { %18847 = vmatpush3.bf16.msra.mxu1 %v20605_v5  ;;  %19007 = vmatpush3.bf16.msra.mxu0 %v22749_v49  ;;  %v11329_v49 = vld [vmem:[#allocation2 + $0x2f1] sm:$0xff] }
 0x403   : > { %18864 = vmatprep.subr.bf16.mxu1 %v20606_v7  ;;  %19024 = vmatprep.subr.bf16.mxu0 %v22764_v38  ;;  %v22841_v51 = vpack.c.bf16 %v11330_v43, %v11329_v49 }
 0x404   : > { %18833 = vmatmul.mubr.msk.bf16.gmra.mrb[48].mxu1 %vm3415_vm0, %v22702_v27  ;;  %18993 = vmatmul.mubr.msk.bf16.gmra.mrb[136].mxu0 %vm3415_vm0, %v22824_v41 }
 0x405   : > { %18836 = vmatprep.mubr.msk.bf16.mxu1 %vm3415_vm0, %v22706_v29  ;;  %18996 = vmatprep.mubr.msk.bf16.mxu0 %vm3415_vm0, %v22827_v6 }
 0x40c   : > { %18837 = vmatmul.mubr.msk.bf16.gmra.mrb[52].mxu1 %vm3415_vm0, %v22718_v60  ;;  %18997 = vmatmul.mubr.msk.bf16.gmra.mrb[140].mxu0 %vm3415_vm0, %v22841_v51 }
 0x40d   : > { %18840 = vmatprep.mubr.msk.bf16.mxu1 %vm3415_vm0, %v22722_v26  ;;  %19000 = vmatprep.mubr.msk.bf16.mxu0 %vm3415_vm0, %v22843_v31 }
 0x414   : > { %18841 = vmatmul.mubr.msk.bf16.gmra.mrb[56].mxu1 %vm3415_vm0, %v22732_v46  ;;  %19001 = vmatmul.mubr.msk.bf16.gmra.mrb[144].mxu0 %vm3415_vm0, %v22853_v32 }
 0x415   : > { %18848 = vmatprep.mubr.msk.bf16.mxu1 %vm3415_vm0, %v22585_v36  ;;  %19008 = vmatprep.mubr.msk.bf16.mxu0 %vm3415_vm0, %v22734_v2  ;;  %v20607_v36 = vld [vmem:[%s24251_s3 + $0x58] sm:$0xff]  }
 0x41c   : > { %18849 = vmatmul.mubr.msk.bf16.vlgmr.msra.gmra.mrb[44].mxu1 %vm3415_vm0, %v22593_v59  ;;  %19009 = vmatmul.mubr.msk.bf16.vlgmr.msra.gmra.mrb[132].mxu0 %vm3415_vm0, %v22753_v23  ;;  %v22878_v59 = vld [vmem:[%s24251_s3 + $0x60] sm:$0xff]  }
 0x41d   : > { %18852 = vmatprep.mubr.msk.bf16.mxu1 %vm3415_vm0, %v22615_v15  ;;  %19012 = vmatprep.mubr.msk.bf16.mxu0 %vm3415_vm0, %v22759_v18  ;;  %v11492_v15 = vld [vmem:[#allocation2 + $0x31f] sm:$0xff] }
 0x41e   : > { %18865 = vmatpush3.bf16.msra.mxu1 %v20606_v7  ;;  %19025 = vmatpush3.bf16.msra.mxu0 %v22764_v38  ;;  %v11493_v38 = vld [vmem:[#allocation2 + $0x327] sm:$0xff] }
 0x41f   : > { %18866 = vmatprep.subr.bf16.mxu1 %v20607_v36  ;;  %19026 = vmatprep.subr.bf16.mxu0 %v20605_v5  ;;  %v22889_v34 = vpack.c.bf16 %v11493_v38, %v11492_v15 }
 0x422   : > { %18867 = vmatpush3.bf16.msra.mxu1 %v20607_v36  ;;  %19027 = vmatpush3.bf16.msra.mxu0 %v20605_v5 }
 0x423   : > { %18884 = vmatprep.subr.bf16.mxu1 %v22878_v59  ;;  %19044 = vmatprep.subr.bf16.mxu0 %v20606_v7 }
 0x424   : > { %18853 = vmatmul.mubr.msk.bf16.gmra.mrb[48].mxu1 %vm3415_vm0, %v22631_v39  ;;  %19013 = vmatmul.mubr.msk.bf16.gmra.mrb[136].mxu0 %vm3415_vm0, %v22778_v10  ;;  %v11494_v39 = vld [vmem:[#allocation2 + $0x32f] sm:$0xff] }
 0x425   : > { %18856 = vmatprep.mubr.msk.bf16.mxu1 %vm3415_vm0, %v22635_v11  ;;  %19016 = vmatprep.mubr.msk.bf16.mxu0 %vm3415_vm0, %v22782_v17  ;;  %v11495_v11 = vld [vmem:[#allocation2 + $0x337] sm:$0xff] }
 0x426   : > { %v22899_v35 = vpack.c.bf16 %v11495_v11, %v11494_v39  ;;  %v11814_v11 = vld [vmem:[#allocation2 + $0x321] sm:$0xff] }
 0x42c   : > { %18857 = vmatmul.mubr.msk.bf16.gmra.mrb[52].mxu1 %vm3415_vm0, %v22647_v42  ;;  %19017 = vmatmul.mubr.msk.bf16.gmra.mrb[140].mxu0 %vm3415_vm0, %v22794_v48  ;;  %v11653_v42 = vld [vmem:[#allocation2 + $0x320] sm:$0xff] }
 0x42d   : > { %18860 = vmatprep.mubr.msk.bf16.mxu1 %vm3415_vm0, %v22649_v44  ;;  %19020 = vmatprep.mubr.msk.bf16.mxu0 %vm3415_vm0, %v22889_v34  ;;  %v11654_v44 = vld [vmem:[#allocation2 + $0x328] sm:$0xff] }
 0x434   : > { %18861 = vmatmul.mubr.msk.bf16.gmra.mrb[56].mxu1 %vm3415_vm0, %v22659_v50  ;;  %19021 = vmatmul.mubr.msk.bf16.gmra.mrb[144].mxu0 %vm3415_vm0, %v22899_v35  ;;  %v22940_v50 = vpack.c.bf16 %v11654_v44, %v11653_v42 }
 0x435   : > { %18868 = vmatprep.mubr.msk.bf16.mxu1 %vm3415_vm0, %v22633_v4  ;;  %19028 = vmatprep.mubr.msk.bf16.mxu0 %vm3415_vm0, %v22661_v19  ;;  %v22921_v4 = vld [vmem:[%s24251_s3 + $0x68] sm:$0xff]  }
 0x43c   : > { %18869 = vmatmul.mubr.msk.bf16.vlgmr.msra.gmra.mrb[44].mxu1 %vm3415_vm0, %v22645_v12  ;;  %19029 = vmatmul.mubr.msk.bf16.vlgmr.msra.gmra.mrb[132].mxu0 %vm3415_vm0, %v22679_v16  ;;  %v22928_v12 = vld [vmem:[%s24251_s3 + $0x70] sm:$0xff]  }
 0x43d   : > { %18872 = vmatprep.mubr.msk.bf16.mxu1 %vm3415_vm0, %v22757_v13  ;;  %19032 = vmatprep.mubr.msk.bf16.mxu0 %vm3415_vm0, %v22685_v47  ;;  %v11655_v16 = vld [vmem:[#allocation2 + $0x330] sm:$0xff]  ;;  %v11656_v47 = vld [vmem:[#allocation2 + $0x338] sm:$0xff] }
 0x43e   : > { %18885 = vmatpush3.bf16.msra.mxu1 %v22878_v59  ;;  %19045 = vmatpush3.bf16.msra.mxu0 %v20606_v7  ;;  %v22955_v1 = vpack.c.bf16 %v11656_v47, %v11655_v16 }
 0x43f   : > { %18886 = vmatprep.subr.bf16.mxu1 %v22921_v4  ;;  %19046 = vmatprep.subr.bf16.mxu0 %v20607_v36 }
 0x442   : > { %18887 = vmatpush3.bf16.msra.mxu1 %v22921_v4  ;;  %19047 = vmatpush3.bf16.msra.mxu0 %v20607_v36 }
 0x443   : > { %18904 = vmatprep.subr.bf16.mxu1 %v22928_v12  ;;  %19064 = vmatprep.subr.bf16.mxu0 %v22878_v59 }
 0x444   : > { %18873 = vmatmul.mubr.msk.bf16.gmra.mrb[48].mxu1 %vm3415_vm0, %v22776_v45  ;;  %19033 = vmatmul.mubr.msk.bf16.gmra.mrb[136].mxu0 %vm3415_vm0, %v22704_v40  ;;  %v22950_v40 = vld [vmem:[#allocation6] ss:$0 sm:$0xff] }
 0x445   : > { %18876 = vmatprep.mubr.msk.bf16.mxu1 %vm3415_vm0, %v22780_v30  ;;  %19036 = vmatprep.mubr.msk.bf16.mxu0 %vm3415_vm0, %v22708_v33 }
 0x44c   : > { %18877 = vmatmul.mubr.msk.bf16.gmra.mrb[52].mxu1 %vm3415_vm0, %v22792_v53  ;;  %19037 = vmatmul.mubr.msk.bf16.gmra.mrb[140].mxu0 %vm3415_vm0, %v22720_v21 }
 0x44d   : > { %18880 = vmatprep.mubr.msk.bf16.mxu1 %vm3415_vm0, %v22796_v62  ;;  %19040 = vmatprep.mubr.msk.bf16.mxu0 %vm3415_vm0, %v22940_v50 }
 0x44f   : > { %v18570_v19 = vpop.f32.mrb[28].mxu1 }
 0x450   : > { %v8053_v33 = vadd.f32 %v22950_v40, %v18570_v19  ;;  %v7972_v13 = vpop.f32.mrb[29].mxu1 }
 0x451   : > { %v8051_v45 = vadd.f32 %v22950_v40, %v7972_v13  ;;  %v18571_v30 = vpop.f32.mrb[30].mxu1 }
 0x452   : > { %v8069_v3 = vmax.f32 %v8053_v33, 0.0  ;;  %v8054_v21 = vadd.f32 %v22950_v40, %v18571_v30  ;;  %v7975_v53 = vpop.f32.mrb[31].mxu1  ;;  %v11816_v30 = vld [vmem:[#allocation2 + $0x331] sm:$0xff] }
 0x453   : > { %v8067_v62 = vmax.f32 %v8051_v45, 0.0  ;;  %v8052_v63 = vadd.f32 %v22950_v40, %v7975_v53  ;;  %v10660_v53 = vld [vmem:[#allocation2 + $0x268] sm:$0xff] }
 0x454   : > { %8085 = vst.msk [vmem:[#allocation3 + $0x110] sm:$0xff] %vm5152_vm15, %v8069_v3  ;;  %v8070_v54 = vmax.f32 %v8054_v21, 0.0  ;;  %18881 = vmatmul.mubr.msk.bf16.gmra.mrb[56].mxu1 %vm3415_vm0, %v22806_v55  ;;  %19041 = vmatmul.mubr.msk.bf16.gmra.mrb[144].mxu0 %vm3415_vm0, %v22955_v1  ;;  %v11817_v3 = vld [vmem:[#allocation2 + $0x339] sm:$0xff] }
 0x455   : > { %8083 = vst.msk [vmem:[#allocation3 + $0x100] sm:$0xff] %vm5152_vm15, %v8067_v62  ;;  %v8068_v9 = vmax.f32 %v8052_v63, 0.0  ;;  %18888 = vmatprep.mubr.msk.bf16.mxu1 %vm3415_vm0, %v22683_v37  ;;  %19048 = vmatprep.mubr.msk.bf16.mxu0 %vm3415_vm0, %v22808_v20 }
 0x456   : > { %8086 = vst.msk [vmem:[#allocation3 + $0x118] sm:$0xff] %vm5152_vm15, %v8070_v54 }
 0x457   : > { %8084 = vst.msk [vmem:[#allocation3 + $0x108] sm:$0xff] %vm5152_vm15, %v8068_v9  ;;  %v18574_v61 = vpop.f32.mrb[32].mxu1 }
 0x458   : > { %v8057_v58 = vadd.f32 %v22950_v40, %v18574_v61  ;;  %v7988_v55 = vpop.f32.mrb[33].mxu1  ;;  %v23031_v61 = vpack.c.bf16 %v11817_v3, %v11816_v30 }
 0x459   : > { %v8055_v5 = vadd.f32 %v22950_v40, %v7988_v55  ;;  %v18575_v57 = vpop.f32.mrb[34].mxu1 }
 0x45a   : > { %v8073_v52 = vmax.f32 %v8057_v58, 0.0  ;;  %v8058_v7 = vadd.f32 %v22950_v40, %v18575_v57  ;;  %v7991_v49 = vpop.f32.mrb[35].mxu1 }
 0x45b   : > { %v8071_v43 = vmax.f32 %v8055_v5, 0.0  ;;  %v8056_v37 = vadd.f32 %v22950_v40, %v7991_v49  ;;  %v10661_v49 = vld [vmem:[#allocation2 + $0x270] sm:$0xff] }
 0x45c   : > { %8089 = vst.msk [vmem:[#allocation3 + $0x130] sm:$0xff] %vm5152_vm15, %v8073_v52  ;;  %v8074_v20 = vmax.f32 %v8058_v7, 0.0  ;;  %18889 = vmatmul.mubr.msk.bf16.vlgmr.msra.gmra.mrb[44].mxu1 %vm3415_vm0, %v22702_v27  ;;  %19049 = vmatmul.mubr.msk.bf16.vlgmr.msra.gmra.mrb[132].mxu0 %vm3415_vm0, %v22824_v41 }
 0x45d   : > { %8087 = vst.msk [vmem:[#allocation3 + $0x120] sm:$0xff] %vm5152_vm15, %v8071_v43  ;;  %v8072_v24 = vmax.f32 %v8056_v37, 0.0  ;;  %18892 = vmatprep.mubr.msk.bf16.mxu1 %vm3415_vm0, %v22706_v29  ;;  %19052 = vmatprep.mubr.msk.bf16.mxu0 %vm3415_vm0, %v22827_v6  ;;  %v10662_v43 = vld [vmem:[#allocation2 + $0x278] sm:$0xff] }
 0x45e   : > { %8090 = vst.msk [vmem:[#allocation3 + $0x138] sm:$0xff] %vm5152_vm15, %v8074_v20  ;;  %18905 = vmatpush3.bf16.msra.mxu1 %v22928_v12  ;;  %19065 = vmatpush3.bf16.msra.mxu0 %v22878_v59 }
 0x45f   : > { %8088 = vst.msk [vmem:[#allocation3 + $0x128] sm:$0xff] %vm5152_vm15, %v8072_v24  ;;  %v18578_v27 = vpop.f32.mrb[36].mxu1  ;;  %18906 = vmatprep.subr.bf16.mxu1 %v22512_v25  ;;  %19066 = vmatprep.subr.bf16.mxu0 %v22921_v4  ;;  %v10663_v24 = vld [vmem:[#allocation2 + $0x280] sm:$0xff] }
 0x460   : > { %v8061_v41 = vadd.f32 %v22950_v40, %v18578_v27  ;;  %v8004_v56 = vpop.f32.mrb[37].mxu1  ;;  %v10664_v27 = vld [vmem:[#allocation2 + $0x288] sm:$0xff] }
 0x461   : > { %v8059_v29 = vadd.f32 %v22950_v40, %v8004_v56  ;;  %v18579_v22 = vpop.f32.mrb[38].mxu1 }
 0x462   : > { %v8077_v6 = vmax.f32 %v8061_v41, 0.0  ;;  %v8062_v28 = vadd.f32 %v22950_v40, %v18579_v22  ;;  %v8007_v36 = vpop.f32.mrb[39].mxu1  ;;  %18907 = vmatpush3.bf16.msra.mxu1 %v22512_v25  ;;  %19067 = vmatpush3.bf16.msra.mxu0 %v22921_v4  ;;  %v11815_v4 = vld [vmem:[#allocation2 + $0x329] sm:$0xff] }
 0x463   : > { %v8075_v59 = vmax.f32 %v8059_v29, 0.0  ;;  %v8060_v15 = vadd.f32 %v22950_v40, %v8007_v36  ;;  %19084 = vmatprep.subr.bf16.mxu0 %v22928_v12  ;;  %18924 = vmatprep.subr.bf16.mxu1 %v22503_v14  ;;  %v23014_v47 = vpack.c.bf16 %v11815_v4, %v11814_v11  ;;  %v10676_v36 = vpack.c.bf16 %v10662_v43, %v10661_v49 }
 0x464   : > { %8093 = vst.msk [vmem:[#allocation3 + $0x150] sm:$0xff] %vm5152_vm15, %v8077_v6  ;;  %v8078_v38 = vmax.f32 %v8062_v28, 0.0  ;;  %18893 = vmatmul.mubr.msk.bf16.gmra.mrb[48].mxu1 %vm3415_vm0, %v22718_v60  ;;  %19053 = vmatmul.mubr.msk.bf16.gmra.mrb[136].mxu0 %vm3415_vm0, %v22841_v51 }
 0x465   : > { %8091 = vst.msk [vmem:[#allocation3 + $0x140] sm:$0xff] %vm5152_vm15, %v8075_v59  ;;  %v8076_v25 = vmax.f32 %v8060_v15, 0.0  ;;  %18896 = vmatprep.mubr.msk.bf16.mxu1 %vm3415_vm0, %v22722_v26  ;;  %19056 = vmatprep.mubr.msk.bf16.mxu0 %vm3415_vm0, %v22843_v31 }
 0x466   : > { %8094 = vst.msk [vmem:[#allocation3 + $0x158] sm:$0xff] %vm5152_vm15, %v8078_v38 }
 0x467   : > { %8092 = vst.msk [vmem:[#allocation3 + $0x148] sm:$0xff] %vm5152_vm15, %v8076_v25  ;;  %v18582_v14 = vpop.f32.mrb[40].mxu1 }
 0x468   : > { %v8065_v39 = vadd.f32 %v22950_v40, %v18582_v14  ;;  %v8020_v60 = vpop.f32.mrb[41].mxu1 }
 0x469   : > { %v8063_v51 = vadd.f32 %v22950_v40, %v8020_v60  ;;  %v18583_v42 = vpop.f32.mrb[42].mxu1 }
 0x46a   : > { %v8081_v44 = vmax.f32 %v8065_v39, 0.0  ;;  %v8066_v19 = vadd.f32 %v22950_v40, %v18583_v42  ;;  %v8023_v26 = vpop.f32.mrb[43].mxu1  ;;  %v10677_v39 = vpack.c.bf16 %v10664_v27, %v10663_v24 }
 0x46b   : > { %v8079_v16 = vmax.f32 %v8063_v51, 0.0  ;;  %v8064_v31 = vadd.f32 %v22950_v40, %v8023_v26  ;;  %v14001_v59 = vld [vmem:[#allocation3 + $0x150] sm:$0xff] }
 0x46c   : > { %8097 = vst.msk [vmem:[#allocation3 + $0x170] sm:$0xff] %vm5152_vm15, %v8081_v44  ;;  %v8082_v33 = vmax.f32 %v8066_v19, 0.0  ;;  %18897 = vmatmul.mubr.msk.bf16.gmra.mrb[52].mxu1 %vm3415_vm0, %v22732_v46  ;;  %19057 = vmatmul.mubr.msk.bf16.gmra.mrb[140].mxu0 %vm3415_vm0, %v22853_v32  ;;  %v10659_v32 = vld [vmem:[#allocation2 + $0x260] sm:$0xff] }
 0x46d   : > { %8095 = vst.msk [vmem:[#allocation3 + $0x160] sm:$0xff] %vm5152_vm15, %v8079_v16  ;;  %v8080_v13 = vmax.f32 %v8064_v31, 0.0  ;;  %18900 = vmatprep.mubr.msk.bf16.mxu1 %vm3415_vm0, %v22734_v2  ;;  %19060 = vmatprep.mubr.msk.bf16.mxu0 %vm3415_vm0, %v23014_v47  ;;  %v10675_v5 = vpack.c.bf16 %v10660_v53, %v10659_v32  ;;  %v14109_v29 = vld [vmem:[#allocation3 + $0x151] sm:$0xff] }
 0x46e   : > { %8098 = vst.msk [vmem:[#allocation3 + $0x178] sm:$0xff] %vm5152_vm15, %v8082_v33  ;;  %v14002_v42 = vld [vmem:[#allocation3 + $0x158] sm:$0xff]  ;;  %v23055_v44 = vmax.f32 %v14001_v59, %v14109_v29  ;;  %v10665_v31 = vld [vmem:[#allocation2 + $0x290] sm:$0xff] }
 0x46f   : > { %8096 = vst.msk [vmem:[#allocation3 + $0x168] sm:$0xff] %vm5152_vm15, %v8080_v13  ;;  %v18750_v45 = vpop.f32.mrb[116].mxu0 }
 0x470   : > { %v9518_v46 = vadd.f32 %v22950_v40, %v18750_v45  ;;  %v9437_v21 = vpop.f32.mrb[117].mxu0 }
 0x471   : > { %v9516_v62 = vadd.f32 %v22950_v40, %v9437_v21  ;;  %v18751_v63 = vpop.f32.mrb[118].mxu0 }
 0x472   : > { %v9534_v54 = vmax.f32 %v9518_v46, 0.0  ;;  %v9519_v2 = vadd.f32 %v22950_v40, %v18751_v63  ;;  %v9440_v9 = vpop.f32.mrb[119].mxu0  ;;  %v10667_v63 = vld [vmem:[#allocation2 + $0x2a0] sm:$0xff] }
 0x473   : > { %v9532_v58 = vmax.f32 %v9516_v62, 0.0  ;;  %v9517_v55 = vadd.f32 %v22950_v40, %v9440_v9  ;;  %v14005_v22 = vld [vmem:[#allocation3 + $0x170] sm:$0xff]  ;;  %v10666_v62 = vld [vmem:[#allocation2 + $0x298] sm:$0xff] }
 0x474   : > { %9550 = vst.msk [vmem:[#allocation3 + $0x190] sm:$0xff] %vm5152_vm15, %v9534_v54  ;;  %v9535_v57 = vmax.f32 %v9519_v2, 0.0  ;;  %18901 = vmatmul.mubr.msk.bf16.gmra.mrb[56].mxu1 %vm3415_vm0, %v22753_v23  ;;  %19061 = vmatmul.mubr.msk.bf16.gmra.mrb[144].mxu0 %vm3415_vm0, %v23031_v61  ;;  %v14110_v15 = vld [vmem:[#allocation3 + $0x159] sm:$0xff]  ;;  %v10668_v54 = vld [vmem:[#allocation2 + $0x2a8] sm:$0xff] }
 0x475   : > { %9548 = vst.msk [vmem:[#allocation3 + $0x180] sm:$0xff] %vm5152_vm15, %v9532_v58  ;;  %v9533_v52 = vmax.f32 %v9517_v55, 0.0  ;;  %18908 = vmatprep.mubr.msk.bf16.mxu1 %vm3415_vm0, %v10675_v5  ;;  %19068 = vmatprep.mubr.msk.bf16.mxu0 %vm3415_vm0, %v22759_v18  ;;  %v14113_v37 = vld [vmem:[#allocation3 + $0x171] sm:$0xff]  ;;  %v23061_v13 = vmax.f32 %v14002_v42, %v14110_v15  ;;  %v14003_v45 = vld [vmem:[#allocation3 + $0x160] sm:$0xff] }
 0x476   : > { %9551 = vst.msk [vmem:[#allocation3 + $0x198] sm:$0xff] %vm5152_vm15, %v9535_v57  ;;  %v23048_v38 = vmax.f32 %v14005_v22, %v14113_v37  ;;  %v14004_v60 = vld [vmem:[#allocation3 + $0x168] sm:$0xff]  ;;  %v14006_v19 = vld [vmem:[#allocation3 + $0x178] sm:$0xff] }
 0x477   : > { %9549 = vst.msk [vmem:[#allocation3 + $0x188] sm:$0xff] %vm5152_vm15, %v9533_v52  ;;  %v18754_v7 = vpop.f32.mrb[120].mxu0  ;;  %v14111_v11 = vld [vmem:[#allocation3 + $0x161] sm:$0xff]  ;;  %v14112_v4 = vld [vmem:[#allocation3 + $0x169] sm:$0xff]  ;;  %v20613_v2 = vld [vmem:[%s24251_s3 + $0x78] sm:$0xff]  }
 0x478   : > { %v9522_v23 = vadd.f32 %v22950_v40, %v18754_v7  ;;  %v9453_v20 = vpop.f32.mrb[121].mxu0  ;;  %v23073_v21 = vmax.f32 %v14003_v45, %v14111_v11  ;;  %v23075_v32 = vmax.f32 %v14004_v60, %v14112_v4  ;;  %v14340_v53 = vmax.f32 %v23055_v44, %v23048_v38  ;;  %v10669_v60 = vld [vmem:[#allocation2 + $0x2b0] sm:$0xff]  ;;  %v10670_v11 = vld [vmem:[#allocation2 + $0x2b8] sm:$0xff] }
 0x479   : > { %v9520_v41 = vadd.f32 %v22950_v40, %v9453_v20  ;;  %v18755_v56 = vpop.f32.mrb[122].mxu0 }
 0x47a   : > { %v9538_v6 = vmax.f32 %v9522_v23, 0.0  ;;  %v9523_v18 = vadd.f32 %v22950_v40, %v18755_v56  ;;  %v9456_v28 = vpop.f32.mrb[123].mxu0  ;;  %v10679_v56 = vpack.c.bf16 %v10668_v54, %v10667_v63 }
 0x47b   : > { %v9536_v25 = vmax.f32 %v9520_v41, 0.0  ;;  %v9521_v14 = vadd.f32 %v22950_v40, %v9456_v28  ;;  %v10678_v41 = vpack.c.bf16 %v10666_v62, %v10665_v31  ;;  %v14009_v29 = vld [vmem:[#allocation3 + $0x190] sm:$0xff] }
 0x47c   : > { %9554 = vst.msk [vmem:[#allocation3 + $0x1b0] sm:$0xff] %vm5152_vm15, %v9538_v6  ;;  %v9539_v51 = vmax.f32 %v9523_v18, 0.0  ;;  %18909 = vmatmul.mubr.msk.bf16.vlgmr.msra.gmra.mrb[44].mxu1 %vm3415_vm0, %v10676_v36  ;;  %19069 = vmatmul.mubr.msk.bf16.vlgmr.msra.gmra.mrb[132].mxu0 %vm3415_vm0, %v22778_v10  ;;  %v14114_v26 = vld [vmem:[#allocation3 + $0x179] sm:$0xff]  ;;  %v23105_v18 = vld [vmem:[%s24251_s3 + $0x10] sm:$0xff]  }
 0x47d   : > { %9552 = vst.msk [vmem:[#allocation3 + $0x1a0] sm:$0xff] %vm5152_vm15, %v9536_v25  ;;  %v9537_v16 = vmax.f32 %v9521_v14, 0.0  ;;  %18912 = vmatprep.mubr.msk.bf16.mxu1 %vm3415_vm0, %v10677_v39  ;;  %19072 = vmatprep.mubr.msk.bf16.mxu0 %vm3415_vm0, %v22782_v17  ;;  %v14007_v33 = vld [vmem:[#allocation3 + $0x180] sm:$0xff]  ;;  %v23063_v30 = vmax.f32 %v14006_v19, %v14114_v26  ;;  %v14117_v52 = vld [vmem:[#allocation3 + $0x191] sm:$0xff] }
 0x47e   : > { %9555 = vst.msk [vmem:[#allocation3 + $0x1b8] sm:$0xff] %vm5152_vm15, %v9539_v51  ;;  %19085 = vmatpush3.bf16.msra.mxu0 %v22928_v12  ;;  %v23070_v10 = vld [vmem:[%s24251_s3 + $0x80] sm:$0xff]   ;;  %v14008_v3 = vld [vmem:[#allocation3 + $0x188] sm:$0xff]  ;;  %v23108_v28 = vmax.f32 %v14009_v29, %v14117_v52  ;;  %v14010_v59 = vld [vmem:[#allocation3 + $0x198] sm:$0xff] }
 0x47f   : > { %18925 = vmatpush3.bf16.msra.mxu1 %v23070_v10  ;;  %v14115_v17 = vld [vmem:[#allocation3 + $0x181] sm:$0xff]  ;;  %v14116_v46 = vld [vmem:[#allocation3 + $0x189] sm:$0xff]  ;;  %9553 = vst.msk [vmem:[#allocation3 + $0x1a8] sm:$0xff] %vm5152_vm15, %v9537_v16  ;;  %v18758_v12 = vpop.f32.mrb[124].mxu0  ;;  %19086 = vmatprep.subr.bf16.mxu0 %v20613_v2  ;;  %v14341_v55 = vmax.f32 %v23061_v13, %v23063_v30 }
 0x480   : > { %18926 = vmatprep.subr.bf16.mxu1 %v22567_v8  ;;  %v23084_v9 = vmax.f32 %v14007_v33, %v14115_v17  ;;  %v23086_v58 = vmax.f32 %v14008_v3, %v14116_v46  ;;  %v9526_v5 = vadd.f32 %v22950_v40, %v18758_v12  ;;  %v9469_v57 = vpop.f32.mrb[125].mxu0  ;;  %v14344_v4 = vmax.f32 %v23048_v38, %v23108_v28  ;;  %v11975_v26 = vld [vmem:[#allocation2 + $0x33f] sm:$0xff]  ;;  %v11976_v16 = vld [vmem:[#allocation2 + $0x347] sm:$0xff] }
 0x481   : > { %v9524_v7 = vadd.f32 %v22950_v40, %v9469_v57  ;;  %v18759_v49 = vpop.f32.mrb[126].mxu0  ;;  %v23092_v43 = vpack.c.bf16 %v14341_v55, %v14340_v53  ;;  %v10680_v53 = vpack.c.bf16 %v10670_v11, %v10669_v60  ;;  %v23134_v62 = vpack.c.bf16 %v11976_v16, %v11975_v26  ;;  %v10674_v55 = vld [vmem:[#allocation2 + $0x2d8] sm:$0xff]  ;;  %v10821_v52 = vld [vmem:[#allocation2 + $0x269] sm:$0xff] }
 0x482   : > { %v14342_v37 = vmax.f32 %v23073_v21, %v23084_v9  ;;  %v14343_v23 = vmax.f32 %v23075_v32, %v23086_v58  ;;  %v9542_v20 = vmax.f32 %v9526_v5, 0.0  ;;  %v9527_v24 = vadd.f32 %v22950_v40, %v18759_v49  ;;  %v9472_v27 = vpop.f32.mrb[127].mxu0  ;;  %19087 = vmatpush3.bf16.msra.mxu0 %v20613_v2  ;;  %v10820_v2 = vld [vmem:[#allocation2 + $0x261] sm:$0xff]  ;;  %v11977_v5 = vld [vmem:[#allocation2 + $0x34f] sm:$0xff]  ;;  %v11978_v57 = vld [vmem:[#allocation2 + $0x357] sm:$0xff] }
 0x483   : > { %24333 = vst [vmem:[#allocation14_spill] sm:$0xff] %v23092_v43  ;;  %18927 = vmatpush3.bf16.msra.mxu1 %v22567_v8  ;;  %v9540_v22 = vmax.f32 %v9524_v7, 0.0  ;;  %v9525_v6 = vadd.f32 %v22950_v40, %v9472_v27  ;;  %19104 = vmatprep.subr.bf16.mxu0 %v23070_v10  ;;  %v12124_v7 = vld [vmem:[#allocation2 + $0x2e0] sm:$0xff]  ;;  %v14088_v29 = vld [vmem:[#allocation3 + $0xa9] sm:$0xff] }
 0x484   : > { %19124 = vmatprep.subr.bf16.mxu1 %v23105_v18  ;;  %v23110_v36 = vpack.c.bf16 %v14343_v23, %v14342_v37  ;;  %9558 = vst.msk [vmem:[#allocation3 + $0x1d0] sm:$0xff] %vm5152_vm15, %v9542_v20  ;;  %v9543_v8 = vmax.f32 %v9527_v24, 0.0  ;;  %18913 = vmatmul.mubr.msk.bf16.gmra.mrb[48].mxu1 %vm3415_vm0, %v10678_v41  ;;  %v14118_v15 = vld [vmem:[#allocation3 + $0x199] sm:$0xff]  ;;  %v23146_v37 = vpack.c.bf16 %v11978_v57, %v11977_v5  ;;  %v10822_v24 = vld [vmem:[#allocation2 + $0x271] sm:$0xff]  ;;  %v13980_v41 = vld [vmem:[#allocation3 + $0xa8] sm:$0xff] }
 0x485   : > { %19073 = vmatmul.mubr.msk.bf16.gmra.mrb[136].mxu0 %vm3415_vm0, %v22794_v48  ;;  %9556 = vst.msk [vmem:[#allocation3 + $0x1c0] sm:$0xff] %vm5152_vm15, %v9540_v22  ;;  %v9541_v25 = vmax.f32 %v9525_v6, 0.0  ;;  %18916 = vmatprep.mubr.msk.bf16.mxu1 %vm3415_vm0, %v10679_v56  ;;  %v23120_v14 = vmax.f32 %v14010_v59, %v14118_v15  ;;  %v10671_v48 = vld [vmem:[#allocation2 + $0x2c0] sm:$0xff]  ;;  %v10836_v23 = vpack.c.bf16 %v10821_v52, %v10820_v2  ;;  %v12126_v22 = vld [vmem:[#allocation2 + $0x2f0] sm:$0xff]  ;;  %v12127_v6 = vld [vmem:[#allocation2 + $0x2f8] sm:$0xff] }
 0x486   : > { %24334 = vst [vmem:[#allocation15_spill] sm:$0xff] %v23110_v36  ;;  %19076 = vmatprep.mubr.msk.bf16.mxu0 %vm3415_vm0, %v22889_v34  ;;  %9559 = vst.msk [vmem:[#allocation3 + $0x1d8] sm:$0xff] %vm5152_vm15, %v9543_v8  ;;  %v10672_v34 = vld [vmem:[#allocation2 + $0x2c8] sm:$0xff]  ;;  %v10823_v27 = vld [vmem:[#allocation2 + $0x279] sm:$0xff] }
 0x487   : > { %9557 = vst.msk [vmem:[#allocation3 + $0x1c8] sm:$0xff] %vm5152_vm15, %v9541_v25  ;;  %v18762_v39 = vpop.f32.mrb[128].mxu0  ;;  %v14345_v51 = vmax.f32 %v23063_v30, %v23120_v14  ;;  %v10681_v30 = vpack.c.bf16 %v10672_v34, %v10671_v48  ;;  %v14087_v56 = vld [vmem:[#allocation3 + $0xa1] sm:$0xff]  ;;  %v14084_v25 = vld [vmem:[#allocation3 + $0x89] sm:$0xff]  ;;  %v23155_v48 = vmax.f32 %v13980_v41, %v14088_v29  ;;  %v12141_v34 = vpack.c.bf16 %v12127_v6, %v12126_v22  ;;  %v10830_v57 = vld [vmem:[#allocation2 + $0x2b1] sm:$0xff] }
 0x488   : > { %v9530_v42 = vadd.f32 %v22950_v40, %v18762_v39  ;;  %v9485_v19 = vpop.f32.mrb[129].mxu0  ;;  %v13976_v8 = vld [vmem:[#allocation3 + $0x88] sm:$0xff]  ;;  %v13979_v59 = vld [vmem:[#allocation3 + $0xa0] sm:$0xff]  ;;  %v10834_v41 = vld [vmem:[#allocation2 + $0x2d1] sm:$0xff] }
 0x489   : > { %v9528_v31 = vadd.f32 %v22950_v40, %v9485_v19  ;;  %v18763_v33 = vpop.f32.mrb[130].mxu0  ;;  %v23130_v45 = vpack.c.bf16 %v14345_v51, %v14344_v4  ;;  %v14083_v15 = vld [vmem:[#allocation3 + $0x81] sm:$0xff]  ;;  %v10825_v60 = vld [vmem:[#allocation2 + $0x289] sm:$0xff]  ;;  %v23153_v11 = vmax.f32 %v13979_v59, %v14087_v56  ;;  %v10837_v19 = vpack.c.bf16 %v10823_v27, %v10822_v24  ;;  %v10831_v52 = vld [vmem:[#allocation2 + $0x2b9] sm:$0xff] }
 0x48a   : > { %v9546_v3 = vmax.f32 %v9530_v42, 0.0  ;;  %v9531_v17 = vadd.f32 %v22950_v40, %v18763_v33  ;;  %v9488_v46 = vpop.f32.mrb[131].mxu0  ;;  %v10824_v39 = vld [vmem:[#allocation2 + $0x281] sm:$0xff]  ;;  %v23159_v16 = vmax.f32 %v13976_v8, %v14084_v25  ;;  %v10835_v56 = vld [vmem:[#allocation2 + $0x2d9] sm:$0xff]  ;;  %v12138_v29 = vld [vmem:[#allocation2 + $0x350] sm:$0xff] }
 0x48b   : > { %24335 = vst [vmem:[#allocation16_spill] sm:$0xff] %v23130_v45  ;;  %v9544_v38 = vmax.f32 %v9528_v31, 0.0  ;;  %v9529_v12 = vadd.f32 %v22950_v40, %v9488_v46  ;;  %v10673_v40 = vld [vmem:[#allocation2 + $0x2d0] sm:$0xff]  ;;  %v12128_v4 = vld [vmem:[#allocation2 + $0x300] sm:$0xff]  ;;  %v12129_v51 = vld [vmem:[#allocation2 + $0x308] sm:$0xff]  ;;  %v10838_v31 = vpack.c.bf16 %v10825_v60, %v10824_v39 }
 0x48c   : > { %9562 = vst.msk [vmem:[#allocation3 + $0x1f0] sm:$0xff] %vm5152_vm15, %v9546_v3  ;;  %v9547_v63 = vmax.f32 %v9531_v17, 0.0  ;;  %18917 = vmatmul.mubr.msk.bf16.gmra.mrb[52].mxu1 %vm3415_vm0, %v10680_v53  ;;  %v10682_v49 = vpack.c.bf16 %v10674_v55, %v10673_v40  ;;  %v13975_v42 = vld [vmem:[#allocation3 + $0x80] sm:$0xff]  ;;  %v12142_v33 = vpack.c.bf16 %v12129_v51, %v12128_v4  ;;  %v14315_v17 = vmax.f32 %v23159_v16, %v23155_v48  ;;  %v20615_v46 = vld [vmem:[%s24251_s3 + $0x88] sm:$0xff]   ;;  %v10826_v53 = vld [vmem:[#allocation2 + $0x291] sm:$0xff] }
 0x48d   : > { %19077 = vmatmul.mubr.msk.bf16.gmra.mrb[140].mxu0 %vm3415_vm0, %v22899_v35  ;;  %9560 = vst.msk [vmem:[#allocation3 + $0x1e0] sm:$0xff] %vm5152_vm15, %v9544_v38  ;;  %v9545_v54 = vmax.f32 %v9529_v12, 0.0  ;;  %18920 = vmatprep.mubr.msk.bf16.mxu1 %vm3415_vm0, %v10681_v30  ;;  %v12125_v35 = vld [vmem:[#allocation2 + $0x2e8] sm:$0xff]  ;;  %v23157_v26 = vmax.f32 %v13975_v42, %v14083_v15  ;;  %v10827_v38 = vld [vmem:[#allocation2 + $0x299] sm:$0xff]  ;;  %v12130_v12 = vld [vmem:[#allocation2 + $0x310] sm:$0xff] }
 0x48e   : > { %19080 = vmatprep.mubr.msk.bf16.mxu0 %vm3415_vm0, %v23134_v62  ;;  %9563 = vst.msk [vmem:[#allocation3 + $0x1f8] sm:$0xff] %vm5152_vm15, %v9547_v63  ;;  %v12140_v20 = vpack.c.bf16 %v12125_v35, %v12124_v7  ;;  %v12131_v30 = vld [vmem:[#allocation2 + $0x318] sm:$0xff]  ;;  %v10829_v40 = vld [vmem:[#allocation2 + $0x2a9] sm:$0xff]  ;;  %v10839_v2 = vpack.c.bf16 %v10827_v38, %v10826_v53  ;;  %v10832_v7 = vld [vmem:[#allocation2 + $0x2c1] sm:$0xff] }
 0x48f   : > { %9561 = vst.msk [vmem:[#allocation3 + $0x1e8] sm:$0xff] %vm5152_vm15, %v9545_v54  ;;  %v14314_v3 = vmax.f32 %v23157_v26, %v23153_v11  ;;  %v10828_v54 = vld [vmem:[#allocation2 + $0x2a1] sm:$0xff]  ;;  %v12143_v55 = vpack.c.bf16 %v12131_v30, %v12130_v12  ;;  %v10833_v35 = vld [vmem:[#allocation2 + $0x2c9] sm:$0xff]  ;;  %v12139_v22 = vld [vmem:[#allocation2 + $0x358] sm:$0xff] }
 0x490   : > { %v10840_v5 = vpack.c.bf16 %v10829_v40, %v10828_v54  ;;  %v10842_v24 = vpack.c.bf16 %v10833_v35, %v10832_v7  ;;  %v12285_v6 = vld [vmem:[#allocation2 + $0x2e1] sm:$0xff]  ;;  %v14072_v15 = vld [vmem:[#allocation3 + $0x29] sm:$0xff]  ;;  %v14090_v60 = vld [vmem:[#allocation3 + $0xb9] sm:$0xff] }
 0x491   : > { %v23174_v63 = vpack.c.bf16 %v14315_v17, %v14314_v3  ;;  %v13964_v8 = vld [vmem:[#allocation3 + $0x28] sm:$0xff]  ;;  %v13963_v4 = vld [vmem:[#allocation3 + $0x20] sm:$0xff]  ;;  %v13982_v3 = vld [vmem:[#allocation3 + $0xb8] sm:$0xff] }
 0x492   : > { %v14071_v59 = vld [vmem:[#allocation3 + $0x21] sm:$0xff]  ;;  %v12286_v25 = vld [vmem:[#allocation2 + $0x2e9] sm:$0xff]  ;;  %v14086_v17 = vld [vmem:[#allocation3 + $0x99] sm:$0xff]  ;;  %v23205_v12 = vmax.f32 %v13982_v3, %v14090_v60 }
 0x493   : > { %v13960_v39 = vld [vmem:[#allocation3 + $0x8] sm:$0xff]  ;;  %v12301_v53 = vpack.c.bf16 %v12286_v25, %v12285_v6  ;;  %v13959_v38 = vld [vmem:[#allocation3] sm:$0xff]  ;;  %v13962_v6 = vld [vmem:[#allocation3 + $0x18] sm:$0xff] }
 0x494   : > { %18921 = vmatmul.mubr.msk.bf16.gmra.mrb[56].mxu1 %vm3415_vm0, %v10682_v49  ;;  %v12136_v49 = vld [vmem:[#allocation2 + $0x340] sm:$0xff]  ;;  %v14068_v42 = vld [vmem:[#allocation3 + $0x9] sm:$0xff] }
 0x495   : > { %19081 = vmatmul.mubr.msk.bf16.gmra.mrb[144].mxu0 %vm3415_vm0, %v23146_v37  ;;  %18928 = vmatprep.mubr.msk.bf16.mxu1 %vm3415_vm0, %v10836_v23  ;;  %v12137_v23 = vld [vmem:[#allocation2 + $0x348] sm:$0xff]  ;;  %v14074_v30 = vld [vmem:[#allocation3 + $0x39] sm:$0xff]  ;;  %v14176_v40 = vmax.f32 %v13960_v39, %v14068_v42  ;;  %v13965_v25 = vld [vmem:[#allocation3 + $0x30] sm:$0xff] }
 0x496   : > { %19088 = vmatprep.mubr.msk.bf16.mxu0 %vm3415_vm0, %v12140_v20  ;;  %v10841_v20 = vpack.c.bf16 %v10831_v52, %v10830_v57  ;;  %v23191_v27 = vpack.c.bf16 %v12137_v23, %v12136_v49  ;;  %v14067_v51 = vld [vmem:[#allocation3 + $0x1] sm:$0xff]  ;;  %v12287_v57 = vld [vmem:[#allocation2 + $0x2f1] sm:$0xff]  ;;  %v12288_v52 = vld [vmem:[#allocation2 + $0x2f9] sm:$0xff] }
 0x497   : > { %v14175_v54 = vmax.f32 %v13959_v38, %v14067_v51  ;;  %v12289_v7 = vld [vmem:[#allocation2 + $0x301] sm:$0xff]  ;;  %v12290_v35 = vld [vmem:[#allocation2 + $0x309] sm:$0xff]  ;;  %v14069_v39 = vld [vmem:[#allocation3 + $0x11] sm:$0xff] }
 0x498   : > { %v14075_v3 = vld [vmem:[#allocation3 + $0x41] sm:$0xff] }
 0x49c   : > { %18929 = vmatmul.mubr.msk.bf16.vlgmr.msra.gmra.mrb[44].mxu1 %vm3415_vm0, %v10837_v19  ;;  %v10843_v19 = vpack.c.bf16 %v10835_v56, %v10834_v41  ;;  %v14092_v41 = vld [vmem:[#allocation3 + $0xc9] sm:$0xff] }
 0x49d   : > { %19089 = vmatmul.mubr.msk.bf16.vlgmr.msra.gmra.mrb[132].mxu0 %vm3415_vm0, %v12141_v34  ;;  %18932 = vmatprep.mubr.msk.bf16.mxu1 %vm3415_vm0, %v10838_v31  ;;  %v23199_v34 = vpack.c.bf16 %v12139_v22, %v12138_v29  ;;  %v23201_v31 = vmax.f32 %v13963_v4, %v14071_v59  ;;  %v13977_v22 = vld [vmem:[#allocation3 + $0x90] sm:$0xff]  ;;  %v13983_v4 = vld [vmem:[#allocation3 + $0xc0] sm:$0xff] }
 0x49e   : > { %19105 = vmatpush3.bf16.msra.mxu0 %v23070_v10  ;;  %19092 = vmatprep.mubr.msk.bf16.mxu0 %vm3415_vm0, %v12142_v33  ;;  %v20616_v10 = vld [vmem:[%s24251_s3 + $0x18] sm:$0xff]   ;;  %v23203_v33 = vmax.f32 %v13964_v8, %v14072_v15 }
 0x49f   : > { %19106 = vmatprep.subr.bf16.mxu0 %v20615_v46  ;;  %19125 = vmatpush3.bf16.msra.mxu1 %v23105_v18  ;;  %v23188_v18 = vld [vmem:[%s24251_s3] sm:$0xff]   ;;  %v14298_v56 = vmax.f32 %v14175_v54, %v23201_v31  ;;  %v13966_v8 = vld [vmem:[#allocation3 + $0x38] sm:$0xff] }
 0x4a0   : > { %19126 = vmatprep.subr.bf16.mxu1 %v20616_v10  ;;  %v14299_v29 = vmax.f32 %v14176_v40, %v23203_v33  ;;  %v14073_v59 = vld [vmem:[#allocation3 + $0x31] sm:$0xff]  ;;  %v23223_v60 = vmax.f32 %v13966_v8, %v14074_v30  ;;  %v14094_v40 = vld [vmem:[#allocation3 + $0xd9] sm:$0xff]  ;;  %v12303_v30 = vpack.c.bf16 %v12290_v35, %v12289_v7 }
 0x4a1   : > { %v23231_v54 = vmax.f32 %v13965_v25, %v14073_v59  ;;  %v13985_v7 = vld [vmem:[#allocation3 + $0xd0] sm:$0xff]  ;;  %v23249_v35 = vmax.f32 %v13986_v0, %v14094_v40  ;;  %v14095_v25 = vld [vmem:[#allocation3 + $0xe1] sm:$0xff] }
 0x4a2   : > { %19107 = vmatpush3.bf16.msra.mxu0 %v20615_v46  ;;  %v14089_v46 = vld [vmem:[#allocation3 + $0xb1] sm:$0xff]  ;;  %v12527_v0 = vld [vmem:[#allocation2 + $0x368] sm:$0xff]  ;;  %v13987_v40 = vld [vmem:[#allocation3 + $0xe0] sm:$0xff] }
 0x4a3   : > { %17556 = vmatprep.subr.bf16.mxu0 %v23174_v63  ;;  %19127 = vmatpush3.bf16.msra.mxu1 %v20616_v10  ;;  %v13978_v10 = vld [vmem:[#allocation3 + $0x98] sm:$0xff] }
 0x4a4   : > { %18933 = vmatmul.mubr.msk.bf16.gmra.mrb[48].mxu1 %vm3415_vm0, %v10839_v2  ;;  %19144 = vmatprep.subr.bf16.mxu1 %v23188_v18  ;;  %v13981_v2 = vld [vmem:[#allocation3 + $0xb0] sm:$0xff]  ;;  %v23213_v49 = vmax.f32 %v13978_v10, %v14086_v17  ;;  %v12302_v10 = vpack.c.bf16 %v12288_v52, %v12287_v57 }
 0x4a5   : > { %19093 = vmatmul.mubr.msk.bf16.gmra.mrb[136].mxu0 %vm3415_vm0, %v12143_v55  ;;  %18936 = vmatprep.mubr.msk.bf16.mxu1 %vm3415_vm0, %v10840_v5  ;;  %v14085_v55 = vld [vmem:[#allocation3 + $0x91] sm:$0xff]  ;;  %v14070_v5 = vld [vmem:[#allocation3 + $0x19] sm:$0xff]  ;;  %v23215_v23 = vmax.f32 %v13981_v2, %v14089_v46  ;;  %v14076_v17 = vld [vmem:[#allocation3 + $0x49] sm:$0xff]  ;;  %v23233_v2 = vpack.c.bf16 %v14299_v29, %v14298_v56 }
 0x4a6   : > { %19096 = vmatprep.mubr.msk.bf16.mxu0 %vm3415_vm0, %v22940_v50  ;;  %v14317_v15 = vmax.f32 %v23213_v49, %v23205_v12  ;;  %v14178_v38 = vmax.f32 %v13962_v6, %v14070_v5  ;;  %v14093_v5 = vld [vmem:[#allocation3 + $0xd1] sm:$0xff]  ;;  %v14078_v6 = vld [vmem:[#allocation3 + $0x59] sm:$0xff] }
 0x4a7   : > { %v13969_v56 = vld [vmem:[#allocation3 + $0x50] sm:$0xff]  ;;  %v13970_v29 = vld [vmem:[#allocation3 + $0x58] sm:$0xff] }
 0x4ac   : > { %18937 = vmatmul.mubr.msk.bf16.gmra.mrb[52].mxu1 %vm3415_vm0, %v10841_v20  ;;  %v13984_v20 = vld [vmem:[#allocation3 + $0xc8] sm:$0xff] }
 0x4ad   : > { %19097 = vmatmul.mubr.msk.bf16.gmra.mrb[140].mxu0 %vm3415_vm0, %v22955_v1  ;;  %18940 = vmatprep.mubr.msk.bf16.mxu1 %vm3415_vm0, %v10842_v24  ;;  %v14091_v24 = vld [vmem:[#allocation3 + $0xc1] sm:$0xff]  ;;  %v23227_v42 = vmax.f32 %v13984_v20, %v14092_v41  ;;  %v14301_v41 = vmax.f32 %v14178_v38, %v23223_v60 }
 0x4ae   : > { %19100 = vmatprep.mubr.msk.bf16.mxu0 %vm3415_vm0, %v23191_v27  ;;  %v23225_v51 = vmax.f32 %v13983_v4, %v14091_v24  ;;  %v13967_v24 = vld [vmem:[#allocation3 + $0x40] sm:$0xff] }
 0x4af   : > { %v23238_v8 = vmax.f32 %v13967_v24, %v14075_v3  ;;  %v14319_v52 = vmax.f32 %v23155_v48, %v23227_v42  ;;  %v12526_v48 = vld [vmem:[#allocation2 + $0x360] sm:$0xff]  ;;  %v23261_v3 = vmax.f32 %v13970_v29, %v14078_v6  ;;  %v23274_v24 = vmax.f32 %v13987_v40, %v14095_v25  ;;  %v14097_v29 = vld [vmem:[#allocation3 + $0xf1] sm:$0xff]  ;;  %v14100_v40 = vld [vmem:[#allocation3 + $0x109] sm:$0xff] }
 0x4b0   : > { %v14318_v57 = vmax.f32 %v23153_v11, %v23225_v51  ;;  %v12291_v11 = vld [vmem:[#allocation2 + $0x311] sm:$0xff]  ;;  %v14098_v6 = vld [vmem:[#allocation3 + $0xf9] sm:$0xff] }
 0x4b4   : > { %18941 = vmatmul.mubr.msk.bf16.gmra.mrb[56].mxu1 %vm3415_vm0, %v10843_v19  ;;  %v13968_v19 = vld [vmem:[#allocation3 + $0x48] sm:$0xff] }
 0x4b5   : > { %19101 = vmatmul.mubr.msk.bf16.gmra.mrb[144].mxu0 %vm3415_vm0, %v23199_v34  ;;  %19128 = vmatprep.mubr.msk.bf16.mxu1 %vm3415_vm0, %v22940_v50  ;;  %v23219_v50 = vmax.f32 %v13977_v22, %v14085_v55  ;;  %v14077_v22 = vld [vmem:[#allocation3 + $0x51] sm:$0xff]  ;;  %v23240_v4 = vmax.f32 %v13968_v19, %v14076_v17 }
 0x4b6   : > { %19108 = vmatprep.mubr.msk.bf16.mxu0 %vm3415_vm0, %v12301_v53  ;;  %v13961_v53 = vld [vmem:[#allocation3 + $0x10] sm:$0xff]  ;;  %v23259_v19 = vmax.f32 %v13969_v56, %v14077_v22  ;;  %v13990_v56 = vld [vmem:[#allocation3 + $0xf8] sm:$0xff] }
 0x4b7   : > { %v14316_v46 = vmax.f32 %v23219_v50, %v23215_v23  ;;  %v14177_v55 = vmax.f32 %v13961_v53, %v14069_v39  ;;  %v23257_v39 = vmax.f32 %v13985_v7, %v14093_v5  ;;  %v14302_v53 = vmax.f32 %v23201_v31, %v23238_v8  ;;  %v14080_v5 = vld [vmem:[#allocation3 + $0x69] sm:$0xff]  ;;  %v13971_v7 = vld [vmem:[#allocation3 + $0x60] sm:$0xff] }
 0x4b8   : > { %v14303_v38 = vmax.f32 %v23203_v33, %v23240_v4  ;;  %v20618_v31 = vld [vmem:[%s24251_s3 + $0x8] sm:$0xff]  }
 0x4b9   : > { %v23235_v20 = vpack.c.bf16 %v14317_v15, %v14316_v46  ;;  %v14300_v59 = vmax.f32 %v14177_v55, %v23231_v54  ;;  %v13988_v15 = vld [vmem:[#allocation3 + $0xe8] sm:$0xff]  ;;  %v12292_v46 = vld [vmem:[#allocation2 + $0x319] sm:$0xff]  ;;  %v14321_v55 = vmax.f32 %v23205_v12, %v23249_v35  ;;  %v14320_v12 = vmax.f32 %v23215_v23, %v23257_v39 }
 0x4ba   : > { %v12304_v33 = vpack.c.bf16 %v12292_v46, %v12291_v11  ;;  %v13989_v11 = vld [vmem:[#allocation3 + $0xf0] sm:$0xff] }
 0x4bb   : > { %v23263_v17 = vpack.c.bf16 %v14301_v41, %v14300_v59  ;;  %v14079_v41 = vld [vmem:[#allocation3 + $0x61] sm:$0xff]  ;;  %v23291_v59 = vpack.c.bf16 %v14303_v38, %v14302_v53  ;;  %v23302_v23 = vpack.c.bf16 %v14321_v55, %v14320_v12  ;;  %v23311_v46 = vmax.f32 %v13989_v11, %v14097_v29  ;;  %v14081_v55 = vld [vmem:[#allocation3 + $0x71] sm:$0xff] }
 0x4bc   : > { %19129 = vmatmul.mubr.msk.bf16.vlgmr.msra.gmra.mrb[60].mxu1 %vm3415_vm0, %v22955_v1  ;;  %v14096_v1 = vld [vmem:[#allocation3 + $0xe9] sm:$0xff]  ;;  %v14099_v38 = vld [vmem:[#allocation3 + $0x101] sm:$0xff] }
 0x4bd   : > { %19109 = vmatmul.mubr.msk.bf16.vlgmr.msra.gmra.mrb[132].mxu0 %vm3415_vm0, %v12302_v10  ;;  %19132 = vmatprep.mubr.msk.bf16.mxu1 %vm3415_vm0, %v23191_v27  ;;  %v13972_v10 = vld [vmem:[#allocation3 + $0x68] sm:$0xff]  ;;  %v23276_v22 = vmax.f32 %v13988_v15, %v14096_v1  ;;  %v23293_v15 = vmax.f32 %v13971_v7, %v14079_v41  ;;  %v23297_v1 = vmax.f32 %v13990_v56, %v14098_v6  ;;  %v13991_v12 = vld [vmem:[#allocation3 + $0x100] sm:$0xff] }
 0x4be   : > { %17557 = vmatpush3.bf16.msra.mxu0 %v23233_v2  ;;  %19112 = vmatprep.mubr.msk.bf16.mxu0 %vm3415_vm0, %v12303_v30  ;;  %v23270_v30 = vpack.c.bf16 %v14319_v52, %v14318_v57  ;;  %v14304_v57 = vmax.f32 %v23231_v54, %v23259_v19  ;;  %v14305_v52 = vmax.f32 %v23223_v60, %v23261_v3  ;;  %v13992_v53 = vld [vmem:[#allocation3 + $0x108] sm:$0xff] }
 0x4bf   : > { %17558 = vmatprep.subr.bf16.mxu0 %v23235_v20  ;;  %19145 = vmatpush3.bf16.msra.mxu1 %v23188_v18  ;;  %v23282_v18 = vpack.c.bf16 %v12527_v0, %v12526_v48  ;;  %v23295_v25 = vmax.f32 %v13972_v10, %v14080_v5  ;;  %v14322_v60 = vmax.f32 %v23225_v51, %v23274_v24  ;;  %v14082_v48 = vld [vmem:[#allocation3 + $0x79] sm:$0xff]  ;;  %v12528_v0 = vld [vmem:[#allocation2 + $0x370] sm:$0xff]  ;;  %v12531_v6 = vld [vmem:[#allocation2 + $0x388] sm:$0xff] }
 0x4c0   : > { %19146 = vmatprep.subr.bf16.mxu1 %v20618_v31  ;;  %v14323_v54 = vmax.f32 %v23227_v42, %v23276_v22  ;;  %v23316_v51 = vpack.c.bf16 %v14305_v52, %v14304_v57  ;;  %v12529_v42 = vld [vmem:[#allocation2 + $0x378] sm:$0xff]  ;;  %v14306_v41 = vmax.f32 %v23238_v8, %v23293_v15  ;;  %v12530_v5 = vld [vmem:[#allocation2 + $0x380] sm:$0xff]  ;;  %v12298_v7 = vld [vmem:[#allocation2 + $0x349] sm:$0xff]  ;;  %v23334_v56 = vmax.f32 %v13991_v12, %v14099_v38 }
 0x4c1   : > { %v13974_v10 = vld [vmem:[#allocation3 + $0x78] sm:$0xff]  ;;  %v23329_v57 = vld [vmem:[%s24251_s3 + $0x20] sm:$0xff]   ;;  %v23336_v29 = vmax.f32 %v13992_v53, %v14100_v40 }
 0x4c2   : > { %17559 = vmatpush3.bf16.msra.mxu0 %v23263_v17  ;;  %24336 = vst [vmem:[#allocation17_spill] sm:$0xff] %v23316_v51  ;;  %v23332_v52 = vpack.c.bf16 %v14323_v54, %v14322_v60  ;;  %v12297_v8 = vld [vmem:[#allocation2 + $0x341] sm:$0xff]  ;;  %v23346_v60 = vpack.c.bf16 %v12531_v6, %v12530_v5  ;;  %v13994_v12 = vld [vmem:[#allocation3 + $0x118] sm:$0xff] }
 0x4c3   : > { %17560 = vmatprep.subr.bf16.mxu0 %v23270_v30  ;;  %19147 = vmatpush3.bf16.msra.mxu1 %v20618_v31  ;;  %v14325_v31 = vmax.f32 %v23249_v35, %v23297_v1  ;;  %v14324_v35 = vmax.f32 %v23257_v39, %v23311_v46  ;;  %v23350_v38 = vpack.c.bf16 %v12298_v7, %v12297_v8  ;;  %v14101_v39 = vld [vmem:[#allocation3 + $0x111] sm:$0xff]  ;;  %v14119_v6 = vld [vmem:[#allocation3 + $0x1a1] sm:$0xff] }
 0x4c4   : > { %19133 = vmatmul.mubr.msk.bf16.gmra.mrb[64].mxu1 %vm3415_vm0, %v23199_v34  ;;  %19164 = vmatprep.subr.bf16.mxu1 %v23329_v57  ;;  %24337 = vst [vmem:[#allocation18_spill] sm:$0xff] %v23332_v52  ;;  %v13996_v7 = vld [vmem:[#allocation3 + $0x128] sm:$0xff] }
 0x4c5   : > { %19113 = vmatmul.mubr.msk.bf16.gmra.mrb[136].mxu0 %vm3415_vm0, %v12304_v33  ;;  %19136 = vmatprep.mubr.msk.bf16.mxu1 %vm3415_vm0, %v23282_v18  ;;  %v23324_v33 = vmax.f32 %v13974_v10, %v14082_v48  ;;  %v14102_v48 = vld [vmem:[#allocation3 + $0x119] sm:$0xff]  ;;  %v23344_v10 = vpack.c.bf16 %v12529_v42, %v12528_v0  ;;  %v23352_v53 = vpack.c.bf16 %v14325_v31, %v14324_v35  ;;  %v14120_v31 = vld [vmem:[#allocation3 + $0x1a9] sm:$0xff] }
 0x4c6   : > { %17561 = vmatpush3.bf16.msra.mxu0 %v23291_v59  ;;  %19116 = vmatprep.mubr.msk.bf16.mxu0 %vm3415_vm0, %v23014_v47  ;;  %v14307_v47 = vmax.f32 %v23240_v4, %v23295_v25  ;;  %v13973_v4 = vld [vmem:[#allocation3 + $0x70] sm:$0xff]  ;;  %v14326_v0 = vmax.f32 %v23274_v24, %v23334_v56  ;;  %v14327_v42 = vmax.f32 %v23276_v22, %v23336_v29  ;;  %v12300_v22 = vld [vmem:[#allocation2 + $0x359] sm:$0xff] }
 0x4c7   : > { %17562 = vmatprep.subr.bf16.mxu0 %v23302_v23  ;;  %v23341_v11 = vmax.f32 %v13973_v4, %v14081_v55  ;;  %24339 = vst [vmem:[#allocation20_spill] sm:$0xff] %v23352_v53  ;;  %v14309_v40 = vmax.f32 %v23261_v3, %v23324_v33  ;;  %v12532_v55 = vld [vmem:[#allocation2 + $0x390] sm:$0xff]  ;;  %v23364_v5 = vmax.f32 %v13994_v12, %v14102_v48  ;;  %v14012_v3 = vld [vmem:[#allocation3 + $0x1a8] sm:$0xff]  ;;  %v14011_v48 = vld [vmem:[#allocation3 + $0x1a0] sm:$0xff] }
 0x4c8   : > { %v23348_v54 = vpack.c.bf16 %v14307_v47, %v14306_v41  ;;  %v12533_v41 = vld [vmem:[#allocation2 + $0x398] sm:$0xff]  ;;  %v13993_v47 = vld [vmem:[#allocation3 + $0x110] sm:$0xff]  ;;  %v14310_v35 = vmax.f32 %v23293_v15, %v23157_v26  ;;  %v14103_v12 = vld [vmem:[#allocation3 + $0x121] sm:$0xff] }
 0x4c9   : > { %v12299_v24 = vld [vmem:[#allocation2 + $0x351] sm:$0xff]  ;;  %v23374_v8 = vmax.f32 %v13993_v47, %v14101_v39  ;;  %v14329_v39 = vmax.f32 %v23297_v1, %v23364_v5  ;;  %v23386_v47 = vmax.f32 %v14011_v48, %v14119_v6  ;;  %v23391_v26 = vpack.c.bf16 %v12533_v41, %v12532_v55 }
 0x4ca   : > { %17563 = vmatpush3.bf16.msra.mxu0 %v23316_v51  ;;  %24338 = vst [vmem:[#allocation19_spill] sm:$0xff] %v23348_v54  ;;  %v12494_v51 = vld [vmem:[#allocation2 + $0x31f] sm:$0xff]  ;;  %v23394_v15 = vpack.c.bf16 %v12300_v22, %v12299_v24  ;;  %v14121_v6 = vld [vmem:[#allocation3 + $0x1b1] sm:$0xff]  ;;  %v14313_v55 = vmax.f32 %v23324_v33, %v23213_v49  ;;  %v14312_v49 = vmax.f32 %v23341_v11, %v23219_v50 }
 0x4cb   : > { %17564 = vmatprep.subr.bf16.mxu0 %v23332_v52  ;;  %v23382_v52 = vpack.c.bf16 %v14327_v42, %v14326_v0  ;;  %v20446_v0 = vld [vmem:[#allocation8 + $0x4] ss:$28 sps:$4 sm:$0xff]   ;;  %v12496_v33 = vld [vmem:[#allocation2 + $0x32f] sm:$0xff] }
 0x4cc   : > { %19137 = vmatmul.mubr.msk.bf16.gmra.mrb[68].mxu1 %vm3415_vm0, %v23344_v10  ;;  %v20444_v50 = vld [vmem:[#allocation8] ss:$28 sps:$4 sm:$0xff]  }
 0x4cd   : > { %19117 = vmatmul.mubr.msk.bf16.gmra.mrb[140].mxu0 %vm3415_vm0, %v23031_v61  ;;  %v14308_v61 = vmax.f32 %v23259_v19, %v23341_v11  ;;  %19140 = vmatprep.mubr.msk.bf16.mxu1 %vm3415_vm0, %v23346_v60  ;;  %v14311_v19 = vmax.f32 %v23295_v25, %v23159_v16  ;;  %v13995_v16 = vld [vmem:[#allocation3 + $0x120] sm:$0xff]  ;;  %v14328_v25 = vmax.f32 %v23311_v46, %v23374_v8 }
 0x4ce   : > { %17565 = vmatpush3.bf16.msra.mxu0 %v23348_v54  ;;  %19120 = vmatprep.mubr.msk.bf16.mxu0 %vm3415_vm0, %v23350_v38  ;;  %v14104_v54 = vld [vmem:[#allocation3 + $0x129] sm:$0xff]  ;;  %v23398_v42 = vmax.f32 %v13995_v16, %v14103_v12  ;;  %v23429_v16 = vpack.c.bf16 %v14313_v55, %v14312_v49 }
 0x4cf   : > { %17566 = vmatprep.subr.bf16.mxu0 %v23352_v53  ;;  %v23376_v4 = vpack.c.bf16 %v14309_v40, %v14308_v61  ;;  %v12495_v53 = vld [vmem:[#allocation2 + $0x327] sm:$0xff]  ;;  %v23388_v40 = vmax.f32 %v14012_v3, %v14120_v31  ;;  %v14122_v61 = vld [vmem:[#allocation3 + $0x1b9] sm:$0xff]  ;;  %v23400_v1 = vmax.f32 %v13996_v7, %v14104_v54  ;;  %v23402_v31 = vpack.c.bf16 %v14311_v19, %v14310_v35 }
 0x4d0   : > { %v14014_v3 = vld [vmem:[#allocation3 + $0x1b8] sm:$0xff]  ;;  %v12510_v48 = vpack.c.bf16 %v12495_v53, %v12494_v51  ;;  %v23412_v46 = vpack.c.bf16 %v14329_v39, %v14328_v25  ;;  %v14346_v54 = vmax.f32 %v23084_v9, %v23386_v47  ;;  %v14013_v51 = vld [vmem:[#allocation3 + $0x1b0] sm:$0xff]  ;;  %v14016_v7 = vld [vmem:[#allocation3 + $0x1c8] sm:$0xff]  ;;  %24341 = vst [vmem:[#allocation22_spill] sm:$0xff] %v23429_v16 }
 0x4d1   : > { %v23406_v41 = vmax.f32 %v14014_v3, %v14122_v61  ;;  %v14347_v24 = vmax.f32 %v23086_v58, %v23388_v40  ;;  %v14106_v53 = vld [vmem:[#allocation3 + $0x139] sm:$0xff]  ;;  %v23422_v22 = vmax.f32 %v14013_v51, %v14121_v6  ;;  %v14123_v35 = vld [vmem:[#allocation3 + $0x1c1] sm:$0xff]  ;;  %v14124_v19 = vld [vmem:[#allocation3 + $0x1c9] sm:$0xff]  ;;  %v14330_v58 = vmax.f32 %v23334_v56, %v23398_v42 }
 0x4d2   : > { %17567 = vmatpush3.bf16.msra.mxu0 %v23376_v4  ;;  %24340 = vst [vmem:[#allocation21_spill] sm:$0xff] %v23412_v46  ;;  %v12497_v9 = vld [vmem:[#allocation2 + $0x337] sm:$0xff]  ;;  %v14331_v12 = vmax.f32 %v23336_v29, %v23400_v1  ;;  %v14015_v6 = vld [vmem:[#allocation3 + $0x1c0] sm:$0xff]  ;;  %v23439_v56 = vmax.f32 %v14016_v7, %v14124_v19  ;;  %v14000_v51 = vld [vmem:[#allocation3 + $0x148] sm:$0xff] }
 0x4d3   : > { %17568 = vmatprep.subr.bf16.mxu0 %v23382_v52  ;;  %v13998_v39 = vld [vmem:[#allocation3 + $0x138] sm:$0xff]  ;;  %v14349_v11 = vmax.f32 %v23120_v14, %v23406_v41  ;;  %v13997_v25 = vld [vmem:[#allocation3 + $0x130] sm:$0xff]  ;;  %v14107_v29 = vld [vmem:[#allocation3 + $0x141] sm:$0xff]  ;;  %v14348_v55 = vmax.f32 %v23108_v28, %v23422_v22 }
 0x4d4   : > { %19141 = vmatmul.mubr.msk.bf16.gmra.mrb[72].mxu1 %vm3415_vm0, %v23391_v26  ;;  %v14105_v61 = vld [vmem:[#allocation3 + $0x131] sm:$0xff]  ;;  %v23433_v3 = vmax.f32 %v13998_v39, %v14106_v53  ;;  %v14126_v14 = vld [vmem:[#allocation3 + $0x1d9] sm:$0xff]  ;;  %v12511_v53 = vpack.c.bf16 %v12497_v9, %v12496_v33  ;;  %v23445_v39 = vpack.c.bf16 %v14331_v12, %v14330_v58  ;;  %v14351_v33 = vmax.f32 %v23388_v40, %v23439_v56  ;;  %v14127_v12 = vld [vmem:[#allocation3 + $0x1e1] sm:$0xff] }
 0x4d5   : > { %19121 = vmatmul.mubr.msk.bf16.gmra.mrb[144].mxu0 %vm3415_vm0, %v23394_v15  ;;  %19148 = vmatprep.mubr.msk.bf16.mxu1 %vm3415_vm0, %v12510_v48  ;;  %v23437_v48 = vmax.f32 %v14015_v6, %v14123_v35  ;;  %v14213_v49 = vmax.f32 %v13997_v25, %v14105_v61  ;;  %v14018_v6 = vld [vmem:[#allocation3 + $0x1d8] sm:$0xff]  ;;  %v14017_v9 = vld [vmem:[#allocation3 + $0x1d0] sm:$0xff]  ;;  %v14019_v25 = vld [vmem:[#allocation3 + $0x1e0] sm:$0xff] }
 0x4d6   : > { %17569 = vmatpush3.bf16.msra.mxu0 %v23402_v31  ;;  %14804 = vmatprep.mubr.bf16.mxu0 %v20446_v0  ;;  %v23435_v0 = vpack.c.bf16 %v14347_v24, %v14346_v54  ;;  %v13999_v54 = vld [vmem:[#allocation3 + $0x140] sm:$0xff]  ;;  %v23447_v24 = vpack.c.bf16 %v14349_v11, %v14348_v55  ;;  %v14333_v7 = vmax.f32 %v23364_v5, %v23433_v3  ;;  %v14128_v61 = vld [vmem:[#allocation3 + $0x1e9] sm:$0xff] }
 0x4d7   : > { %17570 = vmatprep.subr.bf16.mxu0 %v23412_v46  ;;  %v14108_v46 = vld [vmem:[#allocation3 + $0x149] sm:$0xff]  ;;  %v14215_v35 = vmax.f32 %v13999_v54, %v14107_v29  ;;  %v14350_v28 = vmax.f32 %v23386_v47, %v23437_v48  ;;  %v23456_v58 = vmax.f32 %v14018_v6, %v14126_v14  ;;  %v14332_v5 = vmax.f32 %v23374_v8, %v14213_v49  ;;  %v12505_v6 = vld [vmem:[#allocation2 + $0x377] sm:$0xff] }
 0x4d8   : > { %v14216_v19 = vmax.f32 %v14000_v51, %v14108_v46  ;;  %v14020_v46 = vld [vmem:[#allocation3 + $0x1e8] sm:$0xff]  ;;  %v12502_v51 = vld [vmem:[#allocation2 + $0x35f] sm:$0xff] }
 0x4d9   : > { %v23466_v47 = vpack.c.bf16 %v14333_v7, %v14332_v5  ;;  %v14334_v40 = vmax.f32 %v23398_v42, %v14215_v35  ;;  %v23473_v8 = vpack.c.bf16 %v14351_v33, %v14350_v28  ;;  %v12503_v29 = vld [vmem:[#allocation2 + $0x367] sm:$0xff]  ;;  %v23479_v55 = vmax.f32 %v14020_v46, %v14128_v61  ;;  %v12786_v61 = vld [vmem:[#allocation2 + $0x331] sm:$0xff] }
 0x4da   : > { %17571 = vmatpush3.bf16.msra.mxu0 %v23429_v16  ;;  %v14125_v16 = vld [vmem:[#allocation3 + $0x1d1] sm:$0xff]  ;;  %v14335_v11 = vmax.f32 %v23400_v1, %v14216_v19  ;;  %v23487_v14 = vpack.c.bf16 %v12503_v29, %v12502_v51  ;;  %v14338_v28 = vmax.f32 %v14215_v35, %v23073_v21  ;;  %v12784_v35 = vld [vmem:[#allocation2 + $0x321] sm:$0xff]  ;;  %v12793_v51 = vld [vmem:[#allocation2 + $0x369] sm:$0xff] }
 0x4db   : > { %17614 = vmatprep.subr.bf16.mxu0 %v23435_v0  ;;  %v14355_v7 = vmax.f32 %v23439_v56, %v23479_v55  ;;  %v12506_v56 = vld [vmem:[#allocation2 + $0x37f] sm:$0xff]  ;;  %v12508_v21 = vld [vmem:[#allocation2 + $0x38f] sm:$0xff] }
 0x4dc   : > { %19149 = vmatmul.mubr.msk.bf16.vlgmr.msra.gmra.mrb[60].mxu1 %vm3415_vm0, %v12511_v53  ;;  %v23485_v1 = vpack.c.bf16 %v14335_v11, %v14334_v40  ;;  %v14337_v53 = vmax.f32 %v23433_v3, %v23061_v13  ;;  %v14336_v13 = vmax.f32 %v14213_v49, %v23055_v44  ;;  %v12787_v40 = vld [vmem:[#allocation2 + $0x339] sm:$0xff] }
 0x4dd   : > { %14805 = vmatmul.mubr.bf16.vlgmr.msra.gmra.mrb[148].mxu0 %v20444_v50  ;;  %19152 = vmatprep.mubr.msk.bf16.mxu1 %vm3415_vm0, %v23134_v62  ;;  %v23463_v50 = vmax.f32 %v14017_v9, %v14125_v16  ;;  %v20620_v62 = vld [vmem:[%s24251_s3 + $0x28] sm:$0xff]   ;;  %v14353_v16 = vmax.f32 %v23406_v41, %v23456_v58  ;;  %v20621_v41 = vld [vmem:[%s24251_s3 + $0x30] sm:$0xff]   ;;  %v12801_v11 = vpack.c.bf16 %v12787_v40, %v12786_v61  ;;  %v20623_v29 = vld [vmem:[%s24251_s3 + $0x40] sm:$0xff]  }
 0x4de   : > { %17615 = vmatpush3.bf16.msra.mxu0 %v23445_v39  ;;  %19165 = vmatpush3.bf16.msra.mxu1 %v23329_v57  ;;  %v23477_v57 = vmax.f32 %v14019_v25, %v14127_v12  ;;  %24342 = vst [vmem:[#allocation23_spill] sm:$0xff] %v23485_v1  ;;  %v23507_v3 = vpack.c.bf16 %v14337_v53, %v14336_v13  ;;  %v12507_v9 = vld [vmem:[#allocation2 + $0x387] sm:$0xff]  ;;  %v20622_v25 = vld [vmem:[%s24251_s3 + $0x38] sm:$0xff]  }
 0x4df   : > { %17616 = vmatprep.subr.bf16.mxu0 %v23447_v24  ;;  %19166 = vmatprep.subr.bf16.mxu1 %v20620_v62  ;;  %v14352_v42 = vmax.f32 %v23422_v22, %v23463_v50  ;;  %v23519_v49 = vpack.c.bf16 %v12507_v9, %v12506_v56  ;;  %v12795_v53 = vld [vmem:[#allocation2 + $0x379] sm:$0xff]  ;;  %v12958_v40 = vld [vmem:[#allocation2 + $0x3a7] sm:$0xff] }
 0x4e0   : > { %v14354_v22 = vmax.f32 %v23437_v48, %v23477_v57  ;;  %24344 = vst [vmem:[#allocation25_spill] sm:$0xff] %v23507_v3  ;;  %v14339_v48 = vmax.f32 %v14216_v19, %v23075_v32  ;;  %v12509_v32 = vld [vmem:[#allocation2 + $0x397] sm:$0xff]  ;;  %v12785_v19 = vld [vmem:[#allocation2 + $0x329] sm:$0xff]  ;;  %v12957_v61 = vld [vmem:[#allocation2 + $0x39f] sm:$0xff] }
 0x4e1   : > { %v23496_v54 = vpack.c.bf16 %v14353_v16, %v14352_v42  ;;  %v23526_v46 = vpack.c.bf16 %v12509_v32, %v12508_v21  ;;  %v12800_v12 = vpack.c.bf16 %v12785_v19, %v12784_v35  ;;  %v12794_v42 = vld [vmem:[#allocation2 + $0x371] sm:$0xff]  ;;  %v20624_v19 = vld [vmem:[%s24251_s3 + $0x48] sm:$0xff]  }
 0x4e2   : > { %17617 = vmatpush3.bf16.msra.mxu0 %v23466_v47  ;;  %19167 = vmatpush3.bf16.msra.mxu1 %v20620_v62  ;;  %v23511_v33 = vpack.c.bf16 %v14355_v7, %v14354_v22  ;;  %v23517_v44 = vpack.c.bf16 %v14339_v48, %v14338_v28  ;;  %v12792_v62 = vld [vmem:[#allocation2 + $0x361] sm:$0xff]  ;;  %v12797_v22 = vld [vmem:[#allocation2 + $0x389] sm:$0xff]  ;;  %v23546_v7 = vpack.c.bf16 %v12795_v53, %v12794_v42  ;;  %v12948_v32 = vld [vmem:[#allocation2 + $0x357] sm:$0xff] }
 0x4e3   : > { %17618 = vmatprep.subr.bf16.mxu0 %v23473_v8  ;;  %19184 = vmatprep.subr.bf16.mxu1 %v20621_v41  ;;  %24343 = vst [vmem:[#allocation24_spill] sm:$0xff] %v23496_v54  ;;  %v23540_v16 = vpack.c.bf16 %v12793_v51, %v12792_v62  ;;  %v12945_v28 = vld [vmem:[#allocation2 + $0x33f] sm:$0xff]  ;;  %v12946_v48 = vld [vmem:[#allocation2 + $0x347] sm:$0xff]  ;;  %v12947_v21 = vld [vmem:[#allocation2 + $0x34f] sm:$0xff] }
 0x4e4   : > { %19153 = vmatmul.mubr.msk.bf16.gmra.mrb[64].mxu1 %vm3415_vm0, %v23146_v37  ;;  %v12504_v37 = vld [vmem:[#allocation2 + $0x36f] sm:$0xff]  ;;  %24345 = vst [vmem:[#allocation26_spill] sm:$0xff] %v23511_v33  ;;  %24346 = vst [vmem:[#allocation27_spill] sm:$0xff] %v23517_v44  ;;  %v12961_v9 = vpack.c.bf16 %v12946_v48, %v12945_v28  ;;  %v12962_v35 = vpack.c.bf16 %v12948_v32, %v12947_v21  ;;  %v12960_v62 = vld [vmem:[#allocation2 + $0x3b7] sm:$0xff] }
 0x4e5   : > { %19156 = vmatprep.mubr.msk.bf16.mxu1 %vm3415_vm0, %v23487_v14  ;;  %v23515_v5 = vpack.c.bf16 %v12505_v6, %v12504_v37  ;;  %v12798_v37 = vld [vmem:[#allocation2 + $0x391] sm:$0xff]  ;;  %v12799_v6 = vld [vmem:[#allocation2 + $0x399] sm:$0xff]  ;;  %v20628_v28 = vld [vmem:[%s24251_s3 + $0x68] sm:$0xff]  }
 0x4e6   : > { %17619 = vmatpush3.bf16.msra.mxu0 %v23485_v1  ;;  %v23554_v56 = vpack.c.bf16 %v12799_v6, %v12798_v37  ;;  %v20627_v42 = vld [vmem:[%s24251_s3 + $0x60] sm:$0xff]   ;;  %v13120_v53 = vld [vmem:[#allocation2 + $0x3b0] sm:$0xff]  ;;  %v20449_v37 = vld [vmem:[#allocation8 + $0x38] ss:$28 sps:$4 sm:$0xff]  }
 0x4e7   : > { %17620 = vmatprep.subr.bf16.mxu0 %v23496_v54  ;;  %v20453_v6 = vld [vmem:[#allocation8 + $0xac] ss:$28 sps:$4 sm:$0xff]   ;;  %v20456_v48 = vld [vmem:[#allocation8 + $0xe4] ss:$28 sps:$4 sm:$0xff]  }
 0x4e8   : > { %v13280_v21 = vld [vmem:[#allocation2 + $0x3a9] sm:$0xff] }
 0x4ea   : > { %17621 = vmatpush3.bf16.msra.mxu0 %v23507_v3 }
 0x4eb   : > { %17622 = vmatprep.subr.bf16.mxu0 %v23511_v33 }
 0x4ec   : > { %19157 = vmatmul.mubr.msk.bf16.gmra.mrb[68].mxu1 %vm3415_vm0, %v23515_v5 }
 0x4ed   : > { %19160 = vmatprep.mubr.msk.bf16.mxu1 %vm3415_vm0, %v23519_v49 }
 0x4ee   : > { %17623 = vmatpush3.bf16.msra.mxu0 %v23517_v44 }
 0x4f4   : > { %19161 = vmatmul.mubr.msk.bf16.gmra.mrb[72].mxu1 %vm3415_vm0, %v23526_v46 }
 0x4f5   : > { %19168 = vmatprep.mubr.msk.bf16.mxu1 %vm3415_vm0, %v12800_v12  ;;  %v20625_v12 = vld [vmem:[%s24251_s3 + $0x50] sm:$0xff]  }
 0x4fc   : > { %19169 = vmatmul.mubr.msk.bf16.vlgmr.msra.gmra.mrb[60].mxu1 %vm3415_vm0, %v12801_v11  ;;  %v23572_v11 = vpack.c.bf16 %v12958_v40, %v12957_v61  ;;  %v13281_v61 = vld [vmem:[#allocation2 + $0x3b1] sm:$0xff]  ;;  %v13282_v40 = vld [vmem:[#allocation2 + $0x3b9] sm:$0xff] }
 0x4fd   : > { %19172 = vmatprep.mubr.msk.bf16.mxu1 %vm3415_vm0, %v23350_v38  ;;  %19185 = vmatpush3.bf16.msra.mxu1 %v20621_v41  ;;  %v12796_v41 = vld [vmem:[#allocation2 + $0x381] sm:$0xff] }
 0x4fe   : > { %19186 = vmatprep.subr.bf16.mxu1 %v20622_v25  ;;  %v23548_v13 = vpack.c.bf16 %v12797_v22, %v12796_v41  ;;  %v13121_v41 = vld [vmem:[#allocation2 + $0x3b8] sm:$0xff] }
 0x4ff   : > { %v23604_v22 = vpack.c.bf16 %v13121_v41, %v13120_v53 }
 0x501   : > { %19187 = vmatpush3.bf16.msra.mxu1 %v20622_v25  ;;  %v12959_v25 = vld [vmem:[#allocation2 + $0x3af] sm:$0xff] }
 0x502   : > { %19204 = vmatprep.subr.bf16.mxu1 %v20623_v29  ;;  %v23578_v51 = vpack.c.bf16 %v12960_v62, %v12959_v25  ;;  %v23633_v25 = vld [vmem:[#allocation6] ss:$0 sm:$0xff] }
 0x504   : > { %19173 = vmatmul.mubr.msk.bf16.gmra.mrb[64].mxu1 %vm3415_vm0, %v23394_v15 }
 0x505   : > { %19176 = vmatprep.mubr.msk.bf16.mxu1 %vm3415_vm0, %v23540_v16 }
 0x50c   : > { %19177 = vmatmul.mubr.msk.bf16.gmra.mrb[68].mxu1 %vm3415_vm0, %v23546_v7 }
 0x50d   : > { %19180 = vmatprep.mubr.msk.bf16.mxu1 %vm3415_vm0, %v23548_v13 }
 0x514   : > { %19181 = vmatmul.mubr.msk.bf16.gmra.mrb[72].mxu1 %vm3415_vm0, %v23554_v56 }
 0x515   : > { %19188 = vmatprep.mubr.msk.bf16.mxu1 %vm3415_vm0, %v12961_v9  ;;  %v13279_v9 = vld [vmem:[#allocation2 + $0x3a1] sm:$0xff] }
 0x516   : > { %v23627_v32 = vpack.c.bf16 %v13280_v21, %v13279_v9 }
 0x51c   : > { %19189 = vmatmul.mubr.msk.bf16.vlgmr.msra.gmra.mrb[60].mxu1 %vm3415_vm0, %v12962_v35  ;;  %v20458_v35 = vld [vmem:[#allocation8 + $0xe0] ss:$28 sps:$4 sm:$0xff]  }
 0x51d   : > { %19192 = vmatprep.mubr.msk.bf16.mxu1 %vm3415_vm0, %v23487_v14  ;;  %19205 = vmatpush3.bf16.msra.mxu1 %v20623_v29  ;;  %v20626_v29 = vld [vmem:[%s24251_s3 + $0x58] sm:$0xff]  }
 0x51e   : > { %19206 = vmatprep.subr.bf16.mxu1 %v20624_v19 }
 0x521   : > { %19207 = vmatpush3.bf16.msra.mxu1 %v20624_v19  ;;  %v20459_v19 = vld [vmem:[#allocation8 + $0x11c] ss:$28 sps:$4 sm:$0xff]  }
 0x522   : > { %19224 = vmatprep.subr.bf16.mxu1 %v20625_v12 }
 0x524   : > { %19193 = vmatmul.mubr.msk.bf16.gmra.mrb[64].mxu1 %vm3415_vm0, %v23515_v5 }
 0x525   : > { %19196 = vmatprep.mubr.msk.bf16.mxu1 %vm3415_vm0, %v23519_v49 }
 0x52c   : > { %19197 = vmatmul.mubr.msk.bf16.gmra.mrb[68].mxu1 %vm3415_vm0, %v23526_v46 }
 0x52d   : > { %19200 = vmatprep.mubr.msk.bf16.mxu1 %vm3415_vm0, %v23572_v11 }
 0x534   : > { %19201 = vmatmul.mubr.msk.bf16.gmra.mrb[72].mxu1 %vm3415_vm0, %v23578_v51 }
 0x535   : > { %19208 = vmatprep.mubr.msk.bf16.mxu1 %vm3415_vm0, %v23191_v27  ;;  %v13118_v27 = vld [vmem:[#allocation2 + $0x3a0] sm:$0xff] }
 0x53c   : > { %19209 = vmatmul.mubr.msk.bf16.vlgmr.msra.gmra.mrb[60].mxu1 %vm3415_vm0, %v23199_v34  ;;  %v13119_v34 = vld [vmem:[#allocation2 + $0x3a8] sm:$0xff] }
 0x53d   : > { %19212 = vmatprep.mubr.msk.bf16.mxu1 %vm3415_vm0, %v23282_v18  ;;  %19225 = vmatpush3.bf16.msra.mxu1 %v20625_v12  ;;  %v23598_v18 = vpack.c.bf16 %v13119_v34, %v13118_v27  ;;  %v14508_v34 = vld [vmem:[#allocation8 + $0x150] sm:$0x11] }
 0x53e   : > { %19226 = vmatprep.subr.bf16.mxu1 %v20626_v29 }
 0x541   : > { %19227 = vmatpush3.bf16.msra.mxu1 %v20626_v29 }
 0x542   : > { %19244 = vmatprep.subr.bf16.mxu1 %v20627_v42 }
 0x544   : > { %19213 = vmatmul.mubr.msk.bf16.gmra.mrb[64].mxu1 %vm3415_vm0, %v23344_v10  ;;  %v20447_v10 = vld [vmem:[#allocation8 + $0x3c] ss:$28 sps:$4 sm:$0xff]  }
 0x545   : > { %19216 = vmatprep.mubr.msk.bf16.mxu1 %vm3415_vm0, %v23346_v60  ;;  %v20450_v60 = vld [vmem:[#allocation8 + $0x74] ss:$28 sps:$4 sm:$0xff]   ;;  %14812 = vmatprep.mubr.bf16.mxu0 %v20447_v10 }
 0x546   : > { %14813 = vmatmul.mubr.bf16.gmra.mrb[152].mxu0 %v20449_v37  ;;  %v23638_v37 = vpack.c.bf16 %v13282_v40, %v13281_v61 }
 0x547   : > { %14820 = vmatprep.mubr.bf16.mxu0 %v20450_v60 }
 0x54c   : > { %19217 = vmatmul.mubr.msk.bf16.gmra.mrb[68].mxu1 %vm3415_vm0, %v23391_v26  ;;  %v20452_v26 = vld [vmem:[#allocation8 + $0x70] ss:$28 sps:$4 sm:$0xff]  }
 0x54d   : > { %19220 = vmatprep.mubr.msk.bf16.mxu1 %vm3415_vm0, %v23598_v18 }
 0x54e   : > { %14821 = vmatmul.mubr.bf16.gmra.mrb[156].mxu0 %v20452_v26 }
 0x54f   : > { %14828 = vmatprep.mubr.bf16.mxu0 %v20453_v6  ;;  %v20461_v6 = vld [vmem:[#allocation8 + $0x118] ss:$28 sps:$4 sm:$0xff]  }
 0x554   : > { %19221 = vmatmul.mubr.msk.bf16.gmra.mrb[72].mxu1 %vm3415_vm0, %v23604_v22 }
 0x555   : > { %19228 = vmatprep.mubr.msk.bf16.mxu1 %vm3415_vm0, %v23350_v38  ;;  %v23620_v38 = vld [vmem:[%s24251_s3 + $0x70] sm:$0xff]  }
 0x55c   : > { %19229 = vmatmul.mubr.msk.bf16.vlgmr.msra.gmra.mrb[60].mxu1 %vm3415_vm0, %v23394_v15  ;;  %v20455_v15 = vld [vmem:[#allocation8 + $0xa8] ss:$28 sps:$4 sm:$0xff]  }
 0x55d   : > { %19232 = vmatprep.mubr.msk.bf16.mxu1 %vm3415_vm0, %v23540_v16  ;;  %19245 = vmatpush3.bf16.msra.mxu1 %v20627_v42 }
 0x55e   : > { %19246 = vmatprep.subr.bf16.mxu1 %v20628_v28  ;;  %14829 = vmatmul.mubr.bf16.gmra.mrb[160].mxu0 %v20455_v15  ;;  %v16737_v15 = vcombine.high %v14508_v34, %v14508_v34 }
 0x55f   : > { %14836 = vmatprep.mubr.bf16.mxu0 %v20456_v48 }
 0x561   : > { %19247 = vmatpush3.bf16.msra.mxu1 %v20628_v28 }
 0x562   : > { %19264 = vmatprep.subr.bf16.mxu1 %v23620_v38 }
 0x564   : > { %19233 = vmatmul.mubr.msk.bf16.gmra.mrb[64].mxu1 %vm3415_vm0, %v23546_v7 }
 0x565   : > { %19236 = vmatprep.mubr.msk.bf16.mxu1 %vm3415_vm0, %v23548_v13 }
 0x566   : > { %14837 = vmatmul.mubr.bf16.gmra.mrb[164].mxu0 %v20458_v35 }
 0x567   : > { %14844 = vmatprep.mubr.bf16.mxu0 %v20459_v19  ;;  %v14129_v19 = vld [vmem:[#allocation3 + $0x1f1] sm:$0xff] }
 0x56c   : > { %19237 = vmatmul.mubr.msk.bf16.gmra.mrb[68].mxu1 %vm3415_vm0, %v23554_v56 }
 0x56d   : > { %19240 = vmatprep.mubr.msk.bf16.mxu1 %vm3415_vm0, %v23627_v32 }
 0x56e   : > { %14845 = vmatmul.mubr.bf16.gmra.mrb[168].mxu0 %v20461_v6  ;;  %v20466_v6 = vld [vmem:[#allocation8 + $0xc] ss:$28 sps:$4 sm:$0xff]  }
 0x56f   : > { %v18930_v12 = vpop.f32.mrb[44].mxu1  ;;  %14852 = vmatprep.mubr.bf16.mxu0 %v16737_v15 }
 0x570   : > { %v10983_v62 = vadd.f32 %v23633_v25, %v18930_v12  ;;  %v10902_v29 = vpop.f32.mrb[45].mxu1 }
 0x571   : > { %v10981_v42 = vadd.f32 %v23633_v25, %v10902_v29  ;;  %v18931_v27 = vpop.f32.mrb[46].mxu1 }
 0x572   : > { %v10999_v53 = vmax.f32 %v10983_v62, 0.0  ;;  %v10984_v41 = vadd.f32 %v23633_v25, %v18931_v27  ;;  %v10905_v10 = vpop.f32.mrb[47].mxu1 }
 0x573   : > { %v10997_v60 = vmax.f32 %v10981_v42, 0.0  ;;  %v10982_v26 = vadd.f32 %v23633_v25, %v10905_v10  ;;  %v14021_v42 = vld [vmem:[#allocation3 + $0x1f0] sm:$0xff] }
 0x574   : > { %11015 = vst.msk [vmem:[#allocation3 + $0x210] sm:$0xff] %vm5152_vm15, %v10999_v53  ;;  %v11000_v28 = vmax.f32 %v10984_v41, 0.0  ;;  %19241 = vmatmul.mubr.msk.bf16.gmra.mrb[72].mxu1 %vm3415_vm0, %v23638_v37  ;;  %v23653_v53 = vmax.f32 %v14021_v42, %v14129_v19  ;;  %v16736_v41 = vcombine.low %v14508_v34, %v14508_v34 }
 0x575   : > { %11013 = vst.msk [vmem:[#allocation3 + $0x200] sm:$0xff] %vm5152_vm15, %v10997_v60  ;;  %v10998_v48 = vmax.f32 %v10982_v26, 0.0  ;;  %19248 = vmatprep.mubr.msk.bf16.mxu1 %vm3415_vm0, %v23487_v14  ;;  %v14022_v60 = vld [vmem:[#allocation3 + $0x1f8] sm:$0xff] }
 0x576   : > { %11016 = vst.msk [vmem:[#allocation3 + $0x218] sm:$0xff] %vm5152_vm15, %v11000_v28  ;;  %14853 = vmatmul.mubr.bf16.gmra.mrb[172].mxu0 %v16736_v41 }
 0x577   : > { %11014 = vst.msk [vmem:[#allocation3 + $0x208] sm:$0xff] %vm5152_vm15, %v10998_v48  ;;  %v18934_v9 = vpop.f32.mrb[48].mxu1  ;;  %14892 = vmatprep.mubr.bf16.mxu0 %v20466_v6 }
 0x578   : > { %v10987_v21 = vadd.f32 %v23633_v25, %v18934_v9  ;;  %v10918_v35 = vpop.f32.mrb[49].mxu1 }
 0x579   : > { %v10985_v12 = vadd.f32 %v23633_v25, %v10918_v35  ;;  %v18935_v61 = vpop.f32.mrb[50].mxu1 }
 0x57a   : > { %v11003_v40 = vmax.f32 %v10987_v21, 0.0  ;;  %v10988_v62 = vadd.f32 %v23633_v25, %v18935_v61  ;;  %v10921_v29 = vpop.f32.mrb[51].mxu1 }
 0x57b   : > { %v11001_v14 = vmax.f32 %v10985_v12, 0.0  ;;  %v10986_v27 = vadd.f32 %v23633_v25, %v10921_v29 }
 0x57c   : > { %11019 = vst.msk [vmem:[#allocation3 + $0x230] sm:$0xff] %vm5152_vm15, %v11003_v40  ;;  %v11004_v10 = vmax.f32 %v10988_v62, 0.0  ;;  %19249 = vmatmul.mubr.msk.bf16.vlgmr.msra.gmra.mrb[60].mxu1 %vm3415_vm0, %v23515_v5  ;;  %v14130_v26 = vld [vmem:[#allocation3 + $0x1f9] sm:$0xff] }
 0x57d   : > { %11017 = vst.msk [vmem:[#allocation3 + $0x220] sm:$0xff] %vm5152_vm15, %v11001_v14  ;;  %v11002_v28 = vmax.f32 %v10986_v27, 0.0  ;;  %19252 = vmatprep.mubr.msk.bf16.mxu1 %vm3415_vm0, %v23519_v49  ;;  %v14238_v15 = vmax.f32 %v14022_v60, %v14130_v26  ;;  %v14023_v48 = vld [vmem:[#allocation3 + $0x200] sm:$0xff]  ;;  %19265 = vmatpush3.bf16.msra.mxu1 %v23620_v38  ;;  %v20631_v5 = vld [vmem:[%s24251_s3 + $0x78] sm:$0xff]   ;;  %v14356_v49 = vmax.f32 %v23463_v50, %v23653_v53  ;;  %v14025_v60 = vld [vmem:[#allocation3 + $0x210] sm:$0xff] }
 0x57e   : > { %11020 = vst.msk [vmem:[#allocation3 + $0x238] sm:$0xff] %vm5152_vm15, %v11004_v10  ;;  %v14024_v34 = vld [vmem:[#allocation3 + $0x208] sm:$0xff]  ;;  %19266 = vmatprep.subr.bf16.mxu1 %v20631_v5  ;;  %v14133_v62 = vld [vmem:[#allocation3 + $0x211] sm:$0xff]  ;;  %v23686_v26 = vld [vmem:[%s24251_s3 + $0x80] sm:$0xff]  }
 0x57f   : > { %v14131_v9 = vld [vmem:[#allocation3 + $0x201] sm:$0xff]  ;;  %v14132_v21 = vld [vmem:[#allocation3 + $0x209] sm:$0xff]  ;;  %11018 = vst.msk [vmem:[#allocation3 + $0x228] sm:$0xff] %vm5152_vm15, %v11002_v28  ;;  %v18938_v35 = vpop.f32.mrb[52].mxu1  ;;  %v14357_v19 = vmax.f32 %v23456_v58, %v14238_v15 }
 0x580   : > { %v23670_v12 = vmax.f32 %v14023_v48, %v14131_v9  ;;  %v23672_v38 = vmax.f32 %v14024_v34, %v14132_v21  ;;  %v10991_v61 = vadd.f32 %v23633_v25, %v18938_v35  ;;  %v10934_v40 = vpop.f32.mrb[53].mxu1  ;;  %v14026_v34 = vld [vmem:[#allocation3 + $0x218] sm:$0xff] }
 0x581   : > { %v10989_v29 = vadd.f32 %v23633_v25, %v10934_v40  ;;  %v18939_v42 = vpop.f32.mrb[54].mxu1  ;;  %v23676_v14 = vpack.c.bf16 %v14357_v19, %v14356_v49  ;;  %19267 = vmatpush3.bf16.msra.mxu1 %v20631_v5  ;;  %v13441_v40 = vld [vmem:[#allocation2 + $0x3c7] sm:$0xff] }
 0x582   : > { %v14358_v50 = vmax.f32 %v23477_v57, %v23670_v12  ;;  %v14359_v58 = vmax.f32 %v23479_v55, %v23672_v38  ;;  %v11007_v27 = vmax.f32 %v10991_v61, 0.0  ;;  %v10992_v41 = vadd.f32 %v23633_v25, %v18939_v42  ;;  %v10937_v10 = vpop.f32.mrb[55].mxu1  ;;  %19284 = vmatprep.subr.bf16.mxu1 %v23686_v26 }
 0x583   : > { %24347 = vst [vmem:[#allocation28_spill] sm:$0xff] %v23676_v14  ;;  %v11005_v6 = vmax.f32 %v10989_v29, 0.0  ;;  %v10990_v28 = vadd.f32 %v23633_v25, %v10937_v10  ;;  %17624 = vmatprep.subr.bf16.mxu0 %v23676_v14  ;;  %v23693_v55 = vmax.f32 %v14025_v60, %v14133_v62  ;;  %v20464_v10 = vld [vmem:[#allocation8 + $0x8] ss:$28 sps:$4 sm:$0xff]  }
 0x584   : > { %v23691_v57 = vpack.c.bf16 %v14359_v58, %v14358_v50  ;;  %11023 = vst.msk [vmem:[#allocation3 + $0x250] sm:$0xff] %vm5152_vm15, %v11007_v27  ;;  %v11008_v48 = vmax.f32 %v10992_v41, 0.0  ;;  %19253 = vmatmul.mubr.msk.bf16.gmra.mrb[64].mxu1 %vm3415_vm0, %v23526_v46  ;;  %17625 = vmatpush3.bf16.msra.mxu0 %v23092_v43  ;;  %v14134_v9 = vld [vmem:[#allocation3 + $0x219] sm:$0xff] }
 0x585   : > { %11021 = vst.msk [vmem:[#allocation3 + $0x240] sm:$0xff] %vm5152_vm15, %v11005_v6  ;;  %v11006_v21 = vmax.f32 %v10990_v28, 0.0  ;;  %19256 = vmatprep.mubr.msk.bf16.mxu1 %vm3415_vm0, %v23572_v11  ;;  %v23703_v5 = vmax.f32 %v14026_v34, %v14134_v9  ;;  %v14360_v46 = vmax.f32 %v23653_v53, %v23693_v55  ;;  %v13440_v11 = vld [vmem:[#allocation2 + $0x3bf] sm:$0xff]  ;;  %v13443_v34 = vld [vmem:[#allocation2 + $0x3d7] sm:$0xff]  ;;  %v24350_v9 = vmov 0.0  }
 0x586   : > { %24348 = vst [vmem:[#allocation29_spill] sm:$0xff] %v23691_v57  ;;  %17626 = vmatprep.subr.bf16.mxu0 %v23691_v57  ;;  %11024 = vst.msk [vmem:[#allocation3 + $0x258] sm:$0xff] %vm5152_vm15, %v11008_v48  ;;  %v20467_v6 = vld [vmem:[#allocation8 + $0x44] ss:$28 sps:$4 sm:$0xff]   ;;  %v13442_v48 = vld [vmem:[#allocation2 + $0x3cf] sm:$0xff] }
 0x587   : > { %11022 = vst.msk [vmem:[#allocation3 + $0x248] sm:$0xff] %vm5152_vm15, %v11006_v21  ;;  %v18942_v35 = vpop.f32.mrb[56].mxu1  ;;  %v14361_v49 = vmax.f32 %v14238_v15, %v23703_v5  ;;  %v13450_v15 = vpack.c.bf16 %v13441_v40, %v13440_v11 }
 0x588   : > { %v10995_v19 = vadd.f32 %v23633_v25, %v18942_v35  ;;  %v10950_v61 = vpop.f32.mrb[57].mxu1  ;;  %17627 = vmatpush3.bf16.msra.mxu0 %v23110_v36 }
 0x589   : > { %v10993_v62 = vadd.f32 %v23633_v25, %v10950_v61  ;;  %v18943_v29 = vpop.f32.mrb[58].mxu1  ;;  %v23713_v42 = vpack.c.bf16 %v14361_v49, %v14360_v46  ;;  %v13451_v46 = vpack.c.bf16 %v13443_v34, %v13442_v48  ;;  %v13589_v49 = vld [vmem:[#allocation2 + $0x360] sm:$0xff] }
 0x58a   : > { %v11011_v50 = vmax.f32 %v10995_v19, 0.0  ;;  %v10996_v58 = vadd.f32 %v23633_v25, %v18943_v29  ;;  %v10953_v27 = vpop.f32.mrb[59].mxu1  ;;  %v13590_v19 = vld [vmem:[#allocation2 + $0x368] sm:$0xff] }
 0x58b   : > { %24349 = vst [vmem:[#allocation30_spill] sm:$0xff] %v23713_v42  ;;  %v11009_v41 = vmax.f32 %v10993_v62, 0.0  ;;  %v10994_v53 = vadd.f32 %v23633_v25, %v10953_v27  ;;  %17628 = vmatprep.subr.bf16.mxu0 %v23713_v42  ;;  %v13605_v27 = vpack.c.bf16 %v13590_v19, %v13589_v49  ;;  %v20472_v19 = vld [vmem:[#allocation8 + $0x78] ss:$28 sps:$4 sm:$0xff]  }
 0x58c   : > { %11027 = vst.msk [vmem:[#allocation3 + $0x270] sm:$0xff] %vm5152_vm15, %v11011_v50  ;;  %v11012_v60 = vmax.f32 %v10996_v58, 0.0  ;;  %19257 = vmatmul.mubr.msk.bf16.gmra.mrb[68].mxu1 %vm3415_vm0, %v23578_v51  ;;  %17629 = vmatpush3.bf16.msra.mxu0 %v23130_v45 }
 0x58d   : > { %11025 = vst.msk [vmem:[#allocation3 + $0x260] sm:$0xff] %vm5152_vm15, %v11009_v41  ;;  %v11010_v28 = vmax.f32 %v10994_v53, 0.0  ;;  %19260 = vmatprep.mubr.msk.bf16.mxu1 %vm3415_vm0, %v13450_v15  ;;  %19304 = vmatprep.subr.bf16.mxu0 %v24350_v9  ;;  %v20469_v41 = vld [vmem:[#allocation8 + $0x40] ss:$28 sps:$4 sm:$0xff]  }
 0x58e   : > { %11028 = vst.msk [vmem:[#allocation3 + $0x278] sm:$0xff] %vm5152_vm15, %v11012_v60  ;;  %v20470_v15 = vld [vmem:[#allocation8 + $0x7c] ss:$28 sps:$4 sm:$0xff]   ;;  %v14032_v44 = vld [vmem:[#allocation3 + $0x248] sm:$0xff] }
 0x58f   : > { %11026 = vst.msk [vmem:[#allocation3 + $0x268] sm:$0xff] %vm5152_vm15, %v11010_v28  ;;  %14893 = vmatmul.mubr.bf16.vlgmr.msra.gmra.mrb[176].mxu0 %v20464_v10  ;;  %v13592_v28 = vld [vmem:[#allocation2 + $0x378] sm:$0xff]  ;;  %v14139_v33 = vld [vmem:[#allocation3 + $0x241] sm:$0xff] }
 0x590   : > { %v19110_v21 = vpop.f32.mrb[132].mxu0  ;;  %14900 = vmatprep.mubr.bf16.mxu0 %v20467_v6  ;;  %v13591_v6 = vld [vmem:[#allocation2 + $0x370] sm:$0xff] }
 0x591   : > { %v12448_v51 = vadd.f32 %v23633_v25, %v19110_v21  ;;  %v12367_v35 = vpop.f32.mrb[133].mxu0  ;;  %v13593_v21 = vld [vmem:[#allocation2 + $0x380] sm:$0xff] }
 0x592   : > { %v12446_v61 = vadd.f32 %v23633_v25, %v12367_v35  ;;  %v19111_v11 = vpop.f32.mrb[134].mxu0 }
 0x593   : > { %v12464_v40 = vmax.f32 %v12448_v51, 0.0  ;;  %v12449_v62 = vadd.f32 %v23633_v25, %v19111_v11  ;;  %v12370_v29 = vpop.f32.mrb[135].mxu0  ;;  %v13594_v51 = vld [vmem:[#allocation2 + $0x388] sm:$0xff] }
 0x594   : > { %v12462_v50 = vmax.f32 %v12446_v61, 0.0  ;;  %v12447_v58 = vadd.f32 %v23633_v25, %v12370_v29  ;;  %19261 = vmatmul.mubr.msk.bf16.gmra.mrb[72].mxu1 %vm3415_vm0, %v13451_v46  ;;  %v14033_v29 = vld [vmem:[#allocation3 + $0x250] sm:$0xff] }
 0x595   : > { %12480 = vst.msk [vmem:[#allocation3 + $0x290] sm:$0xff] %vm5152_vm15, %v12464_v40  ;;  %v12465_v53 = vmax.f32 %v12449_v62, 0.0  ;;  %19268 = vmatprep.mubr.msk.bf16.mxu1 %vm3415_vm0, %v13605_v27  ;;  %v14145_v35 = vld [vmem:[#allocation3 + $0x271] sm:$0xff]  ;;  %v13606_v62 = vpack.c.bf16 %v13592_v28, %v13591_v6 }
 0x596   : > { %12478 = vst.msk [vmem:[#allocation3 + $0x280] sm:$0xff] %vm5152_vm15, %v12462_v50  ;;  %v12463_v10 = vmax.f32 %v12447_v58, 0.0  ;;  %v14141_v50 = vld [vmem:[#allocation3 + $0x251] sm:$0xff]  ;;  %v14142_v58 = vld [vmem:[#allocation3 + $0x259] sm:$0xff]  ;;  %v14143_v45 = vld [vmem:[#allocation3 + $0x261] sm:$0xff] }
 0x597   : > { %12481 = vst.msk [vmem:[#allocation3 + $0x298] sm:$0xff] %vm5152_vm15, %v12465_v53  ;;  %14901 = vmatmul.mubr.bf16.gmra.mrb[180].mxu0 %v20469_v41  ;;  %v20473_v27 = vld [vmem:[#allocation8 + $0xb4] ss:$28 sps:$4 sm:$0xff]   ;;  %v14144_v42 = vld [vmem:[#allocation3 + $0x269] sm:$0xff] }
 0x598   : > { %12479 = vst.msk [vmem:[#allocation3 + $0x288] sm:$0xff] %vm5152_vm15, %v12463_v10  ;;  %v19114_v60 = vpop.f32.mrb[136].mxu0  ;;  %14908 = vmatprep.mubr.bf16.mxu0 %v20470_v15  ;;  %v14037_v41 = vld [vmem:[#allocation3 + $0x270] sm:$0xff]  ;;  %v14036_v15 = vld [vmem:[#allocation3 + $0x268] sm:$0xff]  ;;  %v14034_v6 = vld [vmem:[#allocation3 + $0x258] sm:$0xff] }
 0x599   : > { %v12452_v48 = vadd.f32 %v23633_v25, %v19114_v60  ;;  %v12383_v34 = vpop.f32.mrb[137].mxu0  ;;  %v13607_v60 = vpack.c.bf16 %v13594_v51, %v13593_v21  ;;  %v14038_v28 = vld [vmem:[#allocation3 + $0x278] sm:$0xff]  ;;  %v23748_v51 = vmax.f32 %v14033_v29, %v14141_v50  ;;  %v13595_v50 = vld [vmem:[#allocation2 + $0x390] sm:$0xff] }
 0x59a   : > { %v12450_v46 = vadd.f32 %v23633_v25, %v12383_v34  ;;  %v19115_v49 = vpop.f32.mrb[138].mxu0  ;;  %v23741_v34 = vmax.f32 %v14037_v41, %v14145_v35  ;;  %v23750_v35 = vmax.f32 %v14034_v6, %v14142_v58  ;;  %v13596_v58 = vld [vmem:[#allocation2 + $0x398] sm:$0xff] }
 0x59b   : > { %v12468_v61 = vmax.f32 %v12452_v48, 0.0  ;;  %v12453_v11 = vadd.f32 %v23633_v25, %v19115_v49  ;;  %v12386_v40 = vpop.f32.mrb[139].mxu0 }
 0x59c   : > { %v12466_v53 = vmax.f32 %v12450_v46, 0.0  ;;  %v12451_v10 = vadd.f32 %v23633_v25, %v12386_v40  ;;  %19269 = vmatmul.mubr.msk.bf16.vlgmr.msra.gmra.mrb[60].mxu1 %vm3415_vm0, %v13606_v62  ;;  %v14035_v46 = vld [vmem:[#allocation3 + $0x260] sm:$0xff]  ;;  %v14041_v57 = vld [vmem:[#allocation3 + $0x290] sm:$0xff] }
 0x59d   : > { %12484 = vst.msk [vmem:[#allocation3 + $0x2b0] sm:$0xff] %vm5152_vm15, %v12468_v61  ;;  %v12469_v48 = vmax.f32 %v12453_v11, 0.0  ;;  %v14146_v49 = vld [vmem:[#allocation3 + $0x279] sm:$0xff]  ;;  %19272 = vmatprep.mubr.msk.bf16.mxu1 %vm3415_vm0, %v13607_v60  ;;  %19285 = vmatpush3.bf16.msra.mxu1 %v23686_v26  ;;  %v20633_v11 = vld [vmem:[%s24251_s3 + $0x88] sm:$0xff]   ;;  %v23760_v26 = vmax.f32 %v14036_v15, %v14144_v42 }
 0x59e   : > { %12482 = vst.msk [vmem:[#allocation3 + $0x2a0] sm:$0xff] %vm5152_vm15, %v12466_v53  ;;  %v12467_v36 = vmax.f32 %v12451_v10, 0.0  ;;  %v14039_v21 = vld [vmem:[#allocation3 + $0x280] sm:$0xff]  ;;  %v23752_v61 = vmax.f32 %v14038_v28, %v14146_v49  ;;  %19286 = vmatprep.subr.bf16.mxu1 %v20633_v11  ;;  %v23758_v53 = vmax.f32 %v14035_v46, %v14143_v45  ;;  %v14149_v49 = vld [vmem:[#allocation3 + $0x291] sm:$0xff] }
 0x59f   : > { %12485 = vst.msk [vmem:[#allocation3 + $0x2b8] sm:$0xff] %vm5152_vm15, %v12469_v48  ;;  %v14040_v40 = vld [vmem:[#allocation3 + $0x288] sm:$0xff]  ;;  %14909 = vmatmul.mubr.bf16.gmra.mrb[184].mxu0 %v20472_v19  ;;  %v14372_v48 = vmax.f32 %v23748_v51, %v23741_v34 }
 0x5a0   : > { %v14147_v62 = vld [vmem:[#allocation3 + $0x281] sm:$0xff]  ;;  %v14148_v41 = vld [vmem:[#allocation3 + $0x289] sm:$0xff]  ;;  %12483 = vst.msk [vmem:[#allocation3 + $0x2a8] sm:$0xff] %vm5152_vm15, %v12467_v36  ;;  %v19118_v29 = vpop.f32.mrb[140].mxu0  ;;  %v14373_v6 = vmax.f32 %v23750_v35, %v23752_v61  ;;  %14916 = vmatprep.mubr.bf16.mxu0 %v20473_v27  ;;  %v23775_v27 = vmax.f32 %v14041_v57, %v14149_v49 }
 0x5a1   : > { %v14255_v10 = vmax.f32 %v14039_v21, %v14147_v62  ;;  %v14256_v60 = vmax.f32 %v14040_v40, %v14148_v41  ;;  %v12456_v28 = vadd.f32 %v23633_v25, %v19118_v29  ;;  %v12399_v45 = vpop.f32.mrb[141].mxu0  ;;  %19287 = vmatpush3.bf16.msra.mxu1 %v20633_v11  ;;  %v13608_v41 = vpack.c.bf16 %v13596_v58, %v13595_v50  ;;  %v13601_v58 = vld [vmem:[#allocation2 + $0x3c0] sm:$0xff]  ;;  %v13602_v57 = vld [vmem:[#allocation2 + $0x3c8] sm:$0xff] }
 0x5a2   : > { %v12454_v42 = vadd.f32 %v23633_v25, %v12399_v45  ;;  %v19119_v36 = vpop.f32.mrb[142].mxu0  ;;  %v23769_v15 = vpack.c.bf16 %v14373_v6, %v14372_v48  ;;  %v20475_v45 = vld [vmem:[#allocation8 + $0xb0] ss:$28 sps:$4 sm:$0xff]   ;;  %v14042_v48 = vld [vmem:[#allocation3 + $0x298] sm:$0xff] }
 0x5a3   : > { %v14374_v21 = vmax.f32 %v23758_v53, %v14255_v10  ;;  %v14375_v19 = vmax.f32 %v23760_v26, %v14256_v60  ;;  %v12472_v46 = vmax.f32 %v12456_v28, 0.0  ;;  %v12457_v40 = vadd.f32 %v23633_v25, %v19119_v36  ;;  %v12402_v62 = vpop.f32.mrb[143].mxu0 }
 0x5a4   : > { %v12470_v29 = vmax.f32 %v12454_v42, 0.0  ;;  %v12455_v43 = vadd.f32 %v23633_v25, %v12402_v62  ;;  %19273 = vmatmul.mubr.msk.bf16.gmra.mrb[64].mxu1 %vm3415_vm0, %v13608_v41 }
 0x5a5   : > { %v23777_v14 = vpack.c.bf16 %v14375_v19, %v14374_v21  ;;  %12488 = vst.msk [vmem:[#allocation3 + $0x2d0] sm:$0xff] %vm5152_vm15, %v12472_v46  ;;  %v12473_v11 = vmax.f32 %v12457_v40, 0.0  ;;  %v14150_v6 = vld [vmem:[#allocation3 + $0x299] sm:$0xff]  ;;  %19276 = vmatprep.mubr.msk.bf16.mxu1 %vm3415_vm0, %v23598_v18 }
 0x5a6   : > { %12486 = vst.msk [vmem:[#allocation3 + $0x2c0] sm:$0xff] %vm5152_vm15, %v12470_v29  ;;  %v12471_v28 = vmax.f32 %v12455_v43, 0.0  ;;  %v14043_v50 = vld [vmem:[#allocation3 + $0x2a0] sm:$0xff]  ;;  %v23784_v49 = vmax.f32 %v14042_v48, %v14150_v6  ;;  %v14376_v43 = vmax.f32 %v23741_v34, %v23775_v27  ;;  %v13611_v29 = vpack.c.bf16 %v13602_v57, %v13601_v58  ;;  %v13604_v57 = vld [vmem:[#allocation2 + $0x3d8] sm:$0xff] }
 0x5a7   : > { %12489 = vst.msk [vmem:[#allocation3 + $0x2d8] sm:$0xff] %vm5152_vm15, %v12473_v11  ;;  %v14044_v42 = vld [vmem:[#allocation3 + $0x2a8] sm:$0xff]  ;;  %14917 = vmatmul.mubr.bf16.gmra.mrb[188].mxu0 %v20475_v45 }
 0x5a8   : > { %v14151_v36 = vld [vmem:[#allocation3 + $0x2a1] sm:$0xff]  ;;  %v14152_v21 = vld [vmem:[#allocation3 + $0x2a9] sm:$0xff]  ;;  %12487 = vst.msk [vmem:[#allocation3 + $0x2c8] sm:$0xff] %vm5152_vm15, %v12471_v28  ;;  %v19122_v19 = vpop.f32.mrb[144].mxu0  ;;  %v14377_v18 = vmax.f32 %v23752_v61, %v23784_v49 }
 0x5a9   : > { %v23788_v46 = vmax.f32 %v14043_v50, %v14151_v36  ;;  %v23790_v40 = vmax.f32 %v14044_v42, %v14152_v21  ;;  %v12460_v62 = vadd.f32 %v23633_v25, %v19122_v19  ;;  %v12415_v41 = vpop.f32.mrb[145].mxu0 }
 0x5aa   : > { %v12458_v11 = vadd.f32 %v23633_v25, %v12415_v41  ;;  %v19123_v48 = vpop.f32.mrb[146].mxu0  ;;  %v23800_v50 = vpack.c.bf16 %v14377_v18, %v14376_v43  ;;  %v14028_v43 = vld [vmem:[#allocation3 + $0x228] sm:$0xff] }
 0x5ab   : > { %v14378_v6 = vmax.f32 %v14255_v10, %v23788_v46  ;;  %v14379_v28 = vmax.f32 %v14256_v60, %v23790_v40  ;;  %v12476_v45 = vmax.f32 %v12460_v62, 0.0  ;;  %v12461_v42 = vadd.f32 %v23633_v25, %v19123_v48  ;;  %v12418_v34 = vpop.f32.mrb[147].mxu0  ;;  %v13603_v60 = vld [vmem:[#allocation2 + $0x3d0] sm:$0xff]  ;;  %v14135_v18 = vld [vmem:[#allocation3 + $0x221] sm:$0xff] }
 0x5ac   : > { %24351 = vst [vmem:[#allocation31_spill] sm:$0xff] %v23800_v50  ;;  %v12474_v36 = vmax.f32 %v12458_v11, 0.0  ;;  %v12459_v61 = vadd.f32 %v23633_v25, %v12418_v34  ;;  %19277 = vmatmul.mubr.msk.bf16.gmra.mrb[68].mxu1 %vm3415_vm0, %v23604_v22  ;;  %v13612_v19 = vpack.c.bf16 %v13604_v57, %v13603_v60  ;;  %v14136_v62 = vld [vmem:[#allocation3 + $0x229] sm:$0xff]  ;;  %v14027_v11 = vld [vmem:[#allocation3 + $0x220] sm:$0xff]  ;;  %v14137_v60 = vld [vmem:[#allocation3 + $0x231] sm:$0xff] }
 0x5ad   : > { %v23804_v21 = vpack.c.bf16 %v14379_v28, %v14378_v6  ;;  %12492 = vst.msk [vmem:[#allocation3 + $0x2f0] sm:$0xff] %vm5152_vm15, %v12476_v45  ;;  %v12477_v58 = vmax.f32 %v12461_v42, 0.0  ;;  %19280 = vmatprep.mubr.msk.bf16.mxu1 %vm3415_vm0, %v13611_v29  ;;  %v14154_v41 = vld [vmem:[#allocation3 + $0x2b9] sm:$0xff]  ;;  %v14243_v22 = vmax.f32 %v14027_v11, %v14135_v18  ;;  %v14244_v48 = vmax.f32 %v14028_v43, %v14136_v62  ;;  %v14153_v28 = vld [vmem:[#allocation3 + $0x2b1] sm:$0xff] }
 0x5ae   : > { %12490 = vst.msk [vmem:[#allocation3 + $0x2e0] sm:$0xff] %vm5152_vm15, %v12474_v36  ;;  %v12475_v10 = vmax.f32 %v12459_v61, 0.0  ;;  %v14046_v6 = vld [vmem:[#allocation3 + $0x2b8] sm:$0xff]  ;;  %v14045_v45 = vld [vmem:[#allocation3 + $0x2b0] sm:$0xff]  ;;  %v14047_v11 = vld [vmem:[#allocation3 + $0x2c0] sm:$0xff] }
 0x5af   : > { %24352 = vst [vmem:[#allocation32_spill] sm:$0xff] %v23804_v21  ;;  %17672 = vmatprep.subr.bf16.mxu1 %v23804_v21  ;;  %12493 = vst.msk [vmem:[#allocation3 + $0x2f8] sm:$0xff] %vm5152_vm15, %v12477_v58  ;;  %v14262_v29 = vmax.f32 %v14046_v6, %v14154_v41  ;;  %v14138_v42 = vld [vmem:[#allocation3 + $0x239] sm:$0xff]  ;;  %v14048_v34 = vld [vmem:[#allocation3 + $0x2c8] sm:$0xff]  ;;  %v14261_v58 = vmax.f32 %v14045_v45, %v14153_v28  ;;  %v14362_v57 = vmax.f32 %v23670_v12, %v14243_v22 }
 0x5b0   : > { %12491 = vst.msk [vmem:[#allocation3 + $0x2e8] sm:$0xff] %vm5152_vm15, %v12475_v10  ;;  %v14155_v36 = vld [vmem:[#allocation3 + $0x2c1] sm:$0xff]  ;;  %v14156_v61 = vld [vmem:[#allocation3 + $0x2c9] sm:$0xff]  ;;  %v14030_v10 = vld [vmem:[#allocation3 + $0x238] sm:$0xff]  ;;  %v14363_v43 = vmax.f32 %v23672_v38, %v14244_v48 }
 0x5b1   : > { %v14029_v18 = vld [vmem:[#allocation3 + $0x230] sm:$0xff]  ;;  %v14246_v62 = vmax.f32 %v14030_v10, %v14138_v42  ;;  %v14263_v41 = vmax.f32 %v14047_v11, %v14155_v36  ;;  %v14264_v6 = vmax.f32 %v14048_v34, %v14156_v61  ;;  %v14380_v28 = vmax.f32 %v23775_v27, %v14261_v58  ;;  %v14031_v45 = vld [vmem:[#allocation3 + $0x240] sm:$0xff]  ;;  %v14050_v42 = vld [vmem:[#allocation3 + $0x2d8] sm:$0xff] }
 0x5b2   : > { %v14245_v3 = vmax.f32 %v14029_v18, %v14137_v60  ;;  %v23821_v1 = vpack.c.bf16 %v14363_v43, %v14362_v57  ;;  %v14247_v38 = vmax.f32 %v14031_v45, %v14139_v33  ;;  %v14157_v10 = vld [vmem:[#allocation3 + $0x2d1] sm:$0xff] }
 0x5b3   : > { %v14365_v12 = vmax.f32 %v23703_v5, %v14246_v62  ;;  %v14382_v34 = vmax.f32 %v23788_v46, %v14263_v41  ;;  %v14383_v36 = vmax.f32 %v23790_v40, %v14264_v6  ;;  %v14049_v61 = vld [vmem:[#allocation3 + $0x2d0] sm:$0xff] }
 0x5b4   : > { %19281 = vmatmul.mubr.msk.bf16.gmra.mrb[72].mxu1 %vm3415_vm0, %v13612_v19  ;;  %v14381_v19 = vmax.f32 %v23784_v49, %v14262_v29  ;;  %v14364_v33 = vmax.f32 %v23693_v55, %v14245_v3  ;;  %v14366_v40 = vmax.f32 %v14243_v22, %v14247_v38  ;;  %v14369_v22 = vmax.f32 %v14246_v62, %v23750_v35  ;;  %v13763_v35 = vld [vmem:[#allocation2 + $0x3c9] sm:$0xff] }
 0x5b5   : > { %19288 = vmatprep.mubr.msk.bf16.mxu1 %vm3415_vm0, %v23540_v16  ;;  %v14140_v16 = vld [vmem:[#allocation3 + $0x249] sm:$0xff]  ;;  %v14158_v54 = vld [vmem:[#allocation3 + $0x2d9] sm:$0xff]  ;;  %v23841_v43 = vpack.c.bf16 %v14383_v36, %v14382_v34 }
 0x5b6   : > { %v14248_v21 = vmax.f32 %v14032_v44, %v14140_v16  ;;  %v23826_v49 = vpack.c.bf16 %v14381_v19, %v14380_v28  ;;  %v23830_v27 = vmax.f32 %v14050_v42, %v14158_v54  ;;  %v23839_v46 = vpack.c.bf16 %v14365_v12, %v14364_v33  ;;  %v14051_v54 = vld [vmem:[#allocation3 + $0x2e0] sm:$0xff]  ;;  %v20476_v12 = vld [vmem:[#allocation8 + $0xec] ss:$28 sps:$4 sm:$0xff]  }
 0x5b7   : > { %v14052_v44 = vld [vmem:[#allocation3 + $0x2e8] sm:$0xff]  ;;  %14924 = vmatprep.mubr.bf16.mxu0 %v20476_v12  ;;  %v14053_v12 = vld [vmem:[#allocation3 + $0x2f0] sm:$0xff] }
 0x5b8   : > { %v14159_v5 = vld [vmem:[#allocation3 + $0x2e1] sm:$0xff]  ;;  %v14160_v60 = vld [vmem:[#allocation3 + $0x2e9] sm:$0xff]  ;;  %v14367_v57 = vmax.f32 %v14244_v48, %v14248_v21  ;;  %v14385_v18 = vmax.f32 %v14262_v29, %v23830_v27  ;;  %v14371_v45 = vmax.f32 %v14248_v21, %v23760_v26 }
 0x5b9   : > { %v23844_v11 = vmax.f32 %v14051_v54, %v14159_v5  ;;  %v13762_v28 = vld [vmem:[#allocation2 + $0x3c1] sm:$0xff]  ;;  %v14493_v26 = vld [vmem:[#allocation8 + $0xe8] sm:$0xff] }
 0x5ba   : > { %v23851_v19 = vpack.c.bf16 %v14367_v57, %v14366_v40  ;;  %v14497_v21 = vld [vmem:[#allocation8 + $0x104] sm:$0xff] }
 0x5bb   : > { %v14386_v29 = vmax.f32 %v14263_v41, %v23844_v11  ;;  %v14501_v42 = vld [vmem:[#allocation8 + $0x120] sm:$0xff] }
 0x5bc   : > { %19289 = vmatmul.mubr.msk.bf16.vlgmr.msra.gmra.mrb[60].mxu1 %vm3415_vm0, %v23546_v7  ;;  %v23837_v7 = vmax.f32 %v14049_v61, %v14157_v10  ;;  %v14505_v10 = vld [vmem:[#allocation8 + $0x13c] sm:$0xff] }
 0x5bd   : > { %17673 = vmatpush3.bf16.msra.mxu1 %v23821_v1  ;;  %19292 = vmatprep.mubr.msk.bf16.mxu1 %vm3415_vm0, %v23548_v13  ;;  %v23846_v13 = vmax.f32 %v14052_v44, %v14160_v60  ;;  %v20478_v34 = vld [vmem:[#allocation8 + $0x124] ss:$28 sps:$4 sm:$0xff]   ;;  %v16731_v36 = vcombine.low %v14501_v42, %v14505_v10  ;;  %v20484_v44 = vld [vmem:[#allocation8 + $0x14] ss:$28 sps:$4 sm:$0xff]  }
 0x5be   : > { %17674 = vmatprep.subr.bf16.mxu1 %v23826_v49  ;;  %v14384_v55 = vmax.f32 %v14261_v58, %v23837_v7  ;;  %v14368_v58 = vmax.f32 %v14245_v3, %v23748_v51  ;;  %v13764_v3 = vld [vmem:[#allocation2 + $0x3d1] sm:$0xff]  ;;  %v13765_v51 = vld [vmem:[#allocation2 + $0x3d9] sm:$0xff] }
 0x5bf   : > { %v14387_v16 = vmax.f32 %v14264_v6, %v23846_v13  ;;  %v13772_v6 = vpack.c.bf16 %v13763_v35, %v13762_v28 }
 0x5c0   : > { %v23856_v48 = vpack.c.bf16 %v14385_v18, %v14384_v55  ;;  %v23865_v62 = vpack.c.bf16 %v14369_v22, %v14368_v58 }
 0x5c1   : > { %17675 = vmatpush3.bf16.msra.mxu1 %v23839_v46  ;;  %v23869_v41 = vpack.c.bf16 %v14387_v16, %v14386_v29 }
 0x5c2   : > { %17676 = vmatprep.subr.bf16.mxu1 %v23841_v43 }
 0x5c4   : > { %19293 = vmatmul.mubr.msk.bf16.gmra.mrb[64].mxu1 %vm3415_vm0, %v23554_v56  ;;  %v14370_v56 = vmax.f32 %v14247_v38, %v23758_v53  ;;  %v13773_v53 = vpack.c.bf16 %v13765_v51, %v13764_v3  ;;  %v16724_v38 = vcombine.low %v14493_v26, %v14497_v21 }
 0x5c5   : > { %17677 = vmatpush3.bf16.msra.mxu1 %v23851_v19  ;;  %19296 = vmatprep.mubr.msk.bf16.mxu1 %vm3415_vm0, %v23627_v32 }
 0x5c6   : > { %17678 = vmatprep.subr.bf16.mxu1 %v23856_v48  ;;  %v23873_v32 = vpack.c.bf16 %v14371_v45, %v14370_v56  ;;  %14925 = vmatmul.mubr.bf16.gmra.mrb[192].mxu0 %v16724_v38 }
 0x5c7   : > { %14932 = vmatprep.mubr.bf16.mxu0 %v20478_v34 }
 0x5c9   : > { %17679 = vmatpush3.bf16.msra.mxu1 %v23865_v62 }
 0x5ca   : > { %17680 = vmatprep.subr.bf16.mxu1 %v23869_v41 }
 0x5cc   : > { %19297 = vmatmul.mubr.msk.bf16.gmra.mrb[68].mxu1 %vm3415_vm0, %v23638_v37  ;;  %v14509_v37 = vld [vmem:[#allocation8 + $0x158] sm:$0x11] }
 0x5cd   : > { %17681 = vmatpush3.bf16.msra.mxu1 %v23873_v32  ;;  %19300 = vmatprep.mubr.msk.bf16.mxu1 %vm3415_vm0, %v13772_v6  ;;  %v16739_v61 = vcombine.high %v14509_v37, %v14509_v37  ;;  %v16738_v33 = vcombine.low %v14509_v37, %v14509_v37  ;;  %v14161_v6 = vld [vmem:[#allocation3 + $0x2f1] sm:$0xff] }
 0x5ce   : > { %14933 = vmatmul.mubr.bf16.gmra.mrb[196].mxu0 %v16731_v36  ;;  %v23894_v10 = vmax.f32 %v14053_v12, %v14161_v6  ;;  %v14054_v36 = vld [vmem:[#allocation3 + $0x2f8] sm:$0xff] }
 0x5cf   : > { %14940 = vmatprep.mubr.bf16.mxu0 %v16739_v61 }
 0x5d4   : > { %19301 = vmatmul.mubr.msk.bf16.gmra.mrb[72].mxu1 %vm3415_vm0, %v13773_v53  ;;  %vm20774_vm0 = vmmov 0  }
 0x5d5   : > { %14980 = vmatprep.mubr.bf16.mxu1 %v20484_v44 }
 0x5d6   : > { %14941 = vmatmul.mubr.bf16.gmra.mrb[200].mxu0 %v16738_v33 }
 0x5d7   : > { %19316 = vmatprep.mubr.msk.bf16.mxu0 %vm20774_vm0, %v24350_v9 }
 0x68f   : > { %v19290_v5 = vpop.f32.mrb[60].mxu1 }
 0x690   : > { %v13913_v60 = vadd.f32 %v23633_v25, %v19290_v5  ;;  %v13832_v40 = vpop.f32.mrb[61].mxu1 }
 0x691   : > { %v13911_v57 = vadd.f32 %v23633_v25, %v13832_v40  ;;  %v19291_v54 = vpop.f32.mrb[62].mxu1 }
 0x692   : > { %v13929_v18 = vmax.f32 %v13913_v60, 0.0  ;;  %v13914_v55 = vadd.f32 %v23633_v25, %v19291_v54  ;;  %v13835_v22 = vpop.f32.mrb[63].mxu1  ;;  %v14388_v54 = vmax.f32 %v23837_v7, %v23894_v10 }
 0x693   : > { %v13927_v29 = vmax.f32 %v13911_v57, 0.0  ;;  %v13912_v16 = vadd.f32 %v23633_v25, %v13835_v22 }
 0x694   : > { %13945 = vst.msk [vmem:[#allocation3 + $0x310] sm:$0xff] %vm5152_vm15, %v13929_v18  ;;  %v13930_v58 = vmax.f32 %v13914_v55, 0.0 }
 0x695   : > { %13943 = vst.msk [vmem:[#allocation3 + $0x300] sm:$0xff] %vm5152_vm15, %v13927_v29  ;;  %v13928_v28 = vmax.f32 %v13912_v16, 0.0 }
 0x696   : > { %13946 = vst.msk [vmem:[#allocation3 + $0x318] sm:$0xff] %vm5152_vm15, %v13930_v58 }
 0x697   : > { %13944 = vst.msk [vmem:[#allocation3 + $0x308] sm:$0xff] %vm5152_vm15, %v13928_v28  ;;  %v19294_v35 = vpop.f32.mrb[64].mxu1 }
 0x698   : > { %v13917_v56 = vadd.f32 %v23633_v25, %v19294_v35  ;;  %v13848_v45 = vpop.f32.mrb[65].mxu1 }
 0x699   : > { %v13915_v3 = vadd.f32 %v23633_v25, %v13848_v45  ;;  %v19295_v51 = vpop.f32.mrb[66].mxu1 }
 0x69a   : > { %v13933_v53 = vmax.f32 %v13917_v56, 0.0  ;;  %v13918_v26 = vadd.f32 %v23633_v25, %v19295_v51  ;;  %v13851_v21 = vpop.f32.mrb[67].mxu1 }
 0x69b   : > { %v13931_v38 = vmax.f32 %v13915_v3, 0.0  ;;  %v13916_v42 = vadd.f32 %v23633_v25, %v13851_v21 }
 0x69c   : > { %13949 = vst.msk [vmem:[#allocation3 + $0x330] sm:$0xff] %vm5152_vm15, %v13933_v53  ;;  %v13934_v34 = vmax.f32 %v13918_v26, 0.0  ;;  %v14162_v37 = vld [vmem:[#allocation3 + $0x2f9] sm:$0xff] }
 0x69d   : > { %13947 = vst.msk [vmem:[#allocation3 + $0x320] sm:$0xff] %vm5152_vm15, %v13931_v38  ;;  %v13932_v61 = vmax.f32 %v13916_v42, 0.0  ;;  %v14270_v33 = vmax.f32 %v14054_v36, %v14162_v37  ;;  %v14055_v44 = vld [vmem:[#allocation3 + $0x300] sm:$0xff]  ;;  %v14165_v58 = vld [vmem:[#allocation3 + $0x311] sm:$0xff] }
 0x69e   : > { %13950 = vst.msk [vmem:[#allocation3 + $0x338] sm:$0xff] %vm5152_vm15, %v13934_v34  ;;  %v14056_v5 = vld [vmem:[#allocation3 + $0x308] sm:$0xff] }
 0x69f   : > { %v14163_v60 = vld [vmem:[#allocation3 + $0x301] sm:$0xff]  ;;  %v14164_v40 = vld [vmem:[#allocation3 + $0x309] sm:$0xff]  ;;  %13948 = vst.msk [vmem:[#allocation3 + $0x328] sm:$0xff] %vm5152_vm15, %v13932_v61  ;;  %v19298_v57 = vpop.f32.mrb[68].mxu1  ;;  %v14389_v18 = vmax.f32 %v23830_v27, %v14270_v33 }
 0x6a0   : > { %v14271_v55 = vmax.f32 %v14055_v44, %v14163_v60  ;;  %v14272_v22 = vmax.f32 %v14056_v5, %v14164_v40  ;;  %v13921_v29 = vadd.f32 %v23633_v25, %v19298_v57  ;;  %v13864_v16 = vpop.f32.mrb[69].mxu1  ;;  %v14057_v27 = vld [vmem:[#allocation3 + $0x310] sm:$0xff] }
 0x6a1   : > { %v13919_v28 = vadd.f32 %v23633_v25, %v13864_v16  ;;  %v19299_v35 = vpop.f32.mrb[70].mxu1  ;;  %v23905_v56 = vpack.c.bf16 %v14389_v18, %v14388_v54  ;;  %v23914_v12 = vmax.f32 %v14057_v27, %v14165_v58 }
 0x6a2   : > { %v14390_v45 = vmax.f32 %v23844_v11, %v14271_v55  ;;  %v14391_v6 = vmax.f32 %v23846_v13, %v14272_v22  ;;  %v13937_v3 = vmax.f32 %v13921_v29, 0.0  ;;  %v13922_v7 = vadd.f32 %v23633_v25, %v19299_v35  ;;  %v13867_v51 = vpop.f32.mrb[71].mxu1  ;;  %v14058_v11 = vld [vmem:[#allocation3 + $0x318] sm:$0xff]  ;;  %v17572_v29 = vpop.f32.mrb[148].mxu0 }
 0x6a3   : > { %v13935_v53 = vmax.f32 %v13919_v28, 0.0  ;;  %v13920_v26 = vadd.f32 %v23633_v25, %v13867_v51  ;;  %17682 = vmatprep.subr.bf16.mxu1 %v23905_v56  ;;  %v14392_v60 = vmax.f32 %v23894_v10, %v23914_v12  ;;  %v17573_v28 = vpop.f32.mrb[149].mxu0 }
 0x6a4   : > { %v23912_v21 = vpack.c.bf16 %v14391_v6, %v14390_v45  ;;  %13953 = vst.msk [vmem:[#allocation3 + $0x350] sm:$0xff] %vm5152_vm15, %v13937_v3  ;;  %v13938_v38 = vmax.f32 %v13922_v7, 0.0  ;;  %17683 = vmatpush3.bf16.msra.mxu1 %v23769_v15  ;;  %v14166_v13 = vld [vmem:[#allocation3 + $0x319] sm:$0xff]  ;;  %v14061_v3 = vld [vmem:[#allocation3 + $0x330] sm:$0xff]  ;;  %v17575_v7 = vpop.f32.mrb[150].mxu0 }
 0x6a5   : > { %13951 = vst.msk [vmem:[#allocation3 + $0x340] sm:$0xff] %vm5152_vm15, %v13935_v53  ;;  %v13936_v42 = vmax.f32 %v13920_v26, 0.0  ;;  %v23920_v34 = vmax.f32 %v14058_v11, %v14166_v13  ;;  %v14059_v36 = vld [vmem:[#allocation3 + $0x320] sm:$0xff]  ;;  %v14169_v18 = vld [vmem:[#allocation3 + $0x331] sm:$0xff]  ;;  %v17576_v11 = vpop.f32.mrb[151].mxu0 }
 0x6a6   : > { %17684 = vmatprep.subr.bf16.mxu1 %v23912_v21  ;;  %13954 = vst.msk [vmem:[#allocation3 + $0x358] sm:$0xff] %vm5152_vm15, %v13938_v38  ;;  %v14060_v37 = vld [vmem:[#allocation3 + $0x328] sm:$0xff]  ;;  %v23939_v26 = vmax.f32 %v14061_v3, %v14169_v18  ;;  %v23941_v38 = vadd.f32 %v17573_v28, %v17572_v29 }
 0x6a7   : > { %v14167_v61 = vld [vmem:[#allocation3 + $0x321] sm:$0xff]  ;;  %v14168_v44 = vld [vmem:[#allocation3 + $0x329] sm:$0xff]  ;;  %13952 = vst.msk [vmem:[#allocation3 + $0x348] sm:$0xff] %vm5152_vm15, %v13936_v42  ;;  %v19302_v5 = vpop.f32.mrb[72].mxu1  ;;  %v14393_v40 = vmax.f32 %v14270_v33, %v23920_v34 }
 0x6a8   : > { %v23927_v57 = vmax.f32 %v14059_v36, %v14167_v61  ;;  %v23929_v54 = vmax.f32 %v14060_v37, %v14168_v44  ;;  %v13925_v16 = vadd.f32 %v23633_v25, %v19302_v5  ;;  %v13880_v58 = vpop.f32.mrb[73].mxu1  ;;  %17685 = vmatpush3.bf16.msra.mxu1 %v23777_v14  ;;  %v17578_v37 = vpop.f32.mrb[152].mxu0  ;;  %v14062_v44 = vld [vmem:[#allocation3 + $0x338] sm:$0xff] }
 0x6a9   : > { %v13923_v35 = vadd.f32 %v23633_v25, %v13880_v58  ;;  %v19303_v45 = vpop.f32.mrb[74].mxu1  ;;  %v23934_v6 = vpack.c.bf16 %v14393_v40, %v14392_v60  ;;  %v20485_v60 = vld [vmem:[#allocation8 + $0x4c] ss:$28 sps:$4 sm:$0xff]   ;;  %v17579_v40 = vpop.f32.mrb[153].mxu0 }
 0x6aa   : > { %v14394_v10 = vmax.f32 %v14271_v55, %v23927_v57  ;;  %v14395_v33 = vmax.f32 %v14272_v22, %v23929_v54  ;;  %v13941_v51 = vmax.f32 %v13925_v16, 0.0  ;;  %v13926_v27 = vadd.f32 %v23633_v25, %v19303_v45  ;;  %v13883_v53 = vpop.f32.mrb[75].mxu1  ;;  %v20482_v55 = vld [vmem:[#allocation8 + $0x10] ss:$28 sps:$4 sm:$0xff]   ;;  %v17581_v45 = vpop.f32.mrb[154].mxu0 }
 0x6ab   : > { %v13939_v13 = vmax.f32 %v13923_v35, 0.0  ;;  %v13924_v42 = vadd.f32 %v23633_v25, %v13883_v53  ;;  %17686 = vmatprep.subr.bf16.mxu1 %v23934_v6  ;;  %v23947_v22 = vadd.f32 %v17576_v11, %v17575_v7  ;;  %v23954_v16 = vadd.f32 %v17579_v40, %v17578_v37 }
 0x6ac   : > { %v23945_v36 = vpack.c.bf16 %v14395_v33, %v14394_v10  ;;  %13957 = vst.msk [vmem:[#allocation3 + $0x370] sm:$0xff] %vm5152_vm15, %v13941_v51  ;;  %v13942_v61 = vmax.f32 %v13926_v27, 0.0  ;;  %17687 = vmatpush3.bf16.msra.mxu1 %v23800_v50  ;;  %v14170_v5 = vld [vmem:[#allocation3 + $0x339] sm:$0xff]  ;;  %v14396_v10 = vmax.f32 %v23914_v12, %v23939_v26  ;;  %v17582_v51 = vpop.f32.mrb[155].mxu0 }
 0x6ad   : > { %13955 = vst.msk [vmem:[#allocation3 + $0x360] sm:$0xff] %vm5152_vm15, %v13939_v13  ;;  %v13940_v25 = vmax.f32 %v13924_v42, 0.0  ;;  %17743 = vmatprep.subr.bf16.mxu1 %v23174_v63  ;;  %v14278_v18 = vmax.f32 %v14062_v44, %v14170_v5  ;;  %v14063_v29 = vld [vmem:[#allocation3 + $0x340] sm:$0xff]  ;;  %v14173_v7 = vld [vmem:[#allocation3 + $0x351] sm:$0xff]  ;;  %v23968_v42 = vadd.f32 %v17582_v51, %v17581_v45  ;;  %v17584_v12 = vpop.f32.mrb[156].mxu0 }
 0x6ae   : > { %19305 = vmatpush3.bf16.msra.mxu0 %v23945_v36  ;;  %13958 = vst.msk [vmem:[#allocation3 + $0x378] sm:$0xff] %vm5152_vm15, %v13942_v61  ;;  %v14064_v58 = vld [vmem:[#allocation3 + $0x348] sm:$0xff]  ;;  %v14065_v13 = vld [vmem:[#allocation3 + $0x350] sm:$0xff]  ;;  %v17585_v37 = vpop.f32.mrb[157].mxu0  ;;  %v14066_v44 = vld [vmem:[#allocation3 + $0x358] sm:$0xf] }
 0x6af   : > { %19306 = vmatprep.subr.bf16.mxu0 %v24350_v9  ;;  %v14171_v28 = vld [vmem:[#allocation3 + $0x341] sm:$0xff]  ;;  %v14172_v35 = vld [vmem:[#allocation3 + $0x349] sm:$0xff]  ;;  %13956 = vst.msk [vmem:[#allocation3 + $0x368] sm:$0xff] %vm5152_vm15, %v13940_v25  ;;  %14981 = vmatmul.mubr.bf16.vlgmr.msra.gmra.mrb[76].mxu1 %v20482_v55  ;;  %v14397_v63 = vmax.f32 %v23920_v34, %v14278_v18  ;;  %v14281_v55 = vmax.f32 %v14065_v13, %v14173_v7  ;;  %v14174_v5 = vld [vmem:[#allocation3 + $0x359] sm:$0xf] }
 0x6b0   : > { %v14279_v33 = vmax.f32 %v14063_v29, %v14171_v28  ;;  %v14280_v3 = vmax.f32 %v14064_v58, %v14172_v35  ;;  %17744 = vmatpush3.bf16.msra.mxu1 %v23233_v2  ;;  %14988 = vmatprep.mubr.bf16.mxu1 %v20485_v60  ;;  %v20487_v34 = vld [vmem:[#allocation8 + $0x48] ss:$28 sps:$4 sm:$0xff]   ;;  %v14283_v2 = vld [vmem:[#allocation3 + $0x358] sm:$0xff]  ;;  %v17587_v60 = vpop.f32.mrb[158].mxu0 }
 0x6b1   : > { %17745 = vmatprep.subr.bf16.mxu1 %v23235_v20  ;;  %v23964_v27 = vpack.c.bf16 %v14397_v63, %v14396_v10  ;;  %v20488_v61 = vld [vmem:[#allocation8 + $0x84] ss:$28 sps:$4 sm:$0xff]   ;;  %v23971_v20 = vadd.f32 %v17585_v37, %v17584_v12  ;;  %v17588_v25 = vpop.f32.mrb[159].mxu0  ;;  %v14400_v7 = vmax.f32 %v23939_v26, %v14281_v55 }
 0x6b2   : > { %v14398_v53 = vmax.f32 %v23927_v57, %v14279_v33  ;;  %v14399_v11 = vmax.f32 %v23929_v54, %v14280_v3  ;;  %v23978_v10 = vadd.f32 %v17588_v25, %v17587_v60  ;;  %v17590_v63 = vpop.f32.mrb[160].mxu0  ;;  %v14282_v60 = vmax.f32 %v14066_v44, %v14174_v5  ;;  %v24353_v5 = vld [vmem:[#allocation17_spill] sm:$0xff] }
 0x6b3   : > { %19307 = vmatpush3.bf16.msra.mxu0 %v23964_v27  ;;  %v14286_v40 = vld [vmem:[#allocation3 + $0x370] sm:$0xff]  ;;  %v17591_v50 = vpop.f32.mrb[161].mxu0 }
 0x6b4   : > { %17746 = vmatpush3.bf16.msra.mxu1 %v23263_v17  ;;  %19308 = vmatprep.subr.bf16.mxu0 %v24350_v9  ;;  %v14288_v57 = vld [vmem:[#allocation3 + $0x359] sm:$0xff]  ;;  %v23976_v29 = vpack.c.bf16 %v14399_v11, %v14398_v53 }
 0x6b5   : > { %v14284_v54 = vld [vmem:[#allocation3 + $0x360] sm:$0xff]  ;;  %17747 = vmatprep.subr.bf16.mxu1 %v23270_v30  ;;  %v14293_v58 = vmax.f32 %v14283_v2, %v14288_v57  ;;  %v14287_v28 = vld [vmem:[#allocation3 + $0x378] sm:$0xf]  ;;  %v17593_v2 = vpop.f32.mrb[162].mxu0  ;;  %v23984_v57 = vadd.f32 %v17591_v50, %v17590_v63 }
 0x6b6   : > { %v14291_v35 = vld [vmem:[#allocation3 + $0x371] sm:$0xff]  ;;  %v14292_v45 = vld [vmem:[#allocation3 + $0x379] sm:$0xf]  ;;  %v14285_v17 = vld [vmem:[#allocation3 + $0x368] sm:$0xff]  ;;  %v17594_v26 = vpop.f32.mrb[163].mxu0 }
 0x6b7   : > { %v14289_v51 = vld [vmem:[#allocation3 + $0x361] sm:$0xff]  ;;  %v14290_v13 = vld [vmem:[#allocation3 + $0x369] sm:$0xff]  ;;  %v14296_v12 = vmax.f32 %v14286_v40, %v14291_v35  ;;  %v14297_v37 = vmax.f32 %v14287_v28, %v14292_v45  ;;  %14989 = vmatmul.mubr.bf16.gmra.mrb[80].mxu1 %v20487_v34  ;;  %19309 = vmatpush3.bf16.msra.mxu0 %v23976_v29  ;;  %v14401_v30 = vmax.f32 %v14278_v18, %v14293_v58  ;;  %v17596_v28 = vpop.f32.mrb[164].mxu0 }
 0x6b8   : > { %v14294_v53 = vmax.f32 %v14284_v54, %v14289_v51  ;;  %v14295_v11 = vmax.f32 %v14285_v17, %v14290_v13  ;;  %17748 = vmatpush3.bf16.msra.mxu1 %v23291_v59  ;;  %19310 = vmatprep.subr.bf16.mxu0 %v24350_v9  ;;  %v23989_v58 = vadd.f32 %v17594_v26, %v17593_v2  ;;  %v17597_v35 = vpop.f32.mrb[165].mxu0  ;;  %v20490_v59 = vld [vmem:[#allocation8 + $0x80] ss:$28 sps:$4 sm:$0xff]   ;;  %v20493_v2 = vld [vmem:[#allocation8 + $0x18] ss:$28 sps:$4 sm:$0xff]  }
 0x6b9   : > { %17749 = vmatprep.subr.bf16.mxu1 %v23302_v23  ;;  %v23987_v40 = vpack.c.bf16 %v14401_v30, %v14400_v7  ;;  %14996 = vmatprep.mubr.bf16.mxu1 %v20488_v61  ;;  %v14404_v18 = vmax.f32 %v14281_v55, %v14296_v12  ;;  %v14405_v54 = vmax.f32 %v14282_v60, %v14297_v37  ;;  %v17599_v50 = vpop.f32.mrb[166].mxu0  ;;  %v24354_v61 = vld [vmem:[#allocation18_spill] sm:$0xff]  ;;  %v24355_v13 = vld [vmem:[#allocation19_spill] sm:$0xff]  ;;  %v24356_v37 = vld [vmem:[#allocation20_spill] sm:$0xff] }
 0x6ba   : > { %v14402_v34 = vmax.f32 %v14279_v33, %v14294_v53  ;;  %v14403_v25 = vmax.f32 %v14280_v3, %v14295_v11  ;;  %v23992_v44 = vadd.f32 %v17597_v35, %v17596_v28  ;;  %v17600_v23 = vpop.f32.mrb[167].mxu0  ;;  %v20491_v3 = vld [vmem:[#allocation8 + $0xbc] ss:$28 sps:$4 sm:$0xff]  }
 0x6bb   : > { %19311 = vmatpush3.bf16.msra.mxu0 %v23987_v40  ;;  %v23999_v55 = vadd.f32 %v17600_v23, %v17599_v50  ;;  %v17602_v45 = vpop.f32.mrb[168].mxu0  ;;  %v14459_v63 = vpack.c.bf16 %v14405_v54, %v14404_v18  ;;  %v20494_v26 = vld [vmem:[#allocation8 + $0xb8] ss:$28 sps:$4 sm:$0xff]  }
 0x6bc   : > { %17750 = vmatpush3.bf16.msra.mxu1 %v24353_v5  ;;  %19312 = vmatprep.subr.bf16.mxu0 %v24350_v9  ;;  %v23997_v33 = vpack.c.bf16 %v14403_v25, %v14402_v34  ;;  %v17603_v7 = vpop.f32.mrb[169].mxu0  ;;  %v20495_v54 = vld [vmem:[#allocation8 + $0xf4] ss:$28 sps:$4 sm:$0xff]  }
 0x6bd   : > { %17751 = vmatprep.subr.bf16.mxu1 %v24354_v61  ;;  %v24002_v17 = vadd.f32 %v17603_v7, %v17602_v45  ;;  %v17605_v51 = vpop.f32.mrb[170].mxu0  ;;  %v24009_v11 = vsel %vm14768_vm1, %v14459_v63, 0  ;;  %v24357_v5 = vld [vmem:[#allocation21_spill] sm:$0xff]  ;;  %v24358_v45 = vld [vmem:[#allocation22_spill] sm:$0xff]  ;;  %v24359_v63 = vld [vmem:[#allocation32_spill] sm:$0xff] }
 0x6be   : > { %v17606_v12 = vpop.f32.mrb[171].mxu0  ;;  %v20497_v61 = vld [vmem:[#allocation8 + $0x50] ss:$28 sps:$4 sm:$0xff]  }
 0x6bf   : > { %14997 = vmatmul.mubr.bf16.gmra.mrb[84].mxu1 %v20490_v59  ;;  %19313 = vmatpush3.bf16.msra.mxu0 %v23997_v33  ;;  %v24007_v30 = vadd.f32 %v17606_v12, %v17605_v51  ;;  %v17608_v53 = vpop.f32.mrb[172].mxu0 }
 0x6c0   : > { %17752 = vmatpush3.bf16.msra.mxu1 %v24355_v13  ;;  %19314 = vmatprep.subr.bf16.mxu0 %v24350_v9  ;;  %v17609_v60 = vpop.f32.mrb[173].mxu0 }
 0x6c1   : > { %17753 = vmatprep.subr.bf16.mxu1 %v24356_v37  ;;  %15004 = vmatprep.mubr.bf16.mxu1 %v20491_v3  ;;  %v24012_v34 = vadd.f32 %v17609_v60, %v17608_v53  ;;  %v17611_v25 = vpop.f32.mrb[174].mxu0  ;;  %v20498_v3 = vld [vmem:[#allocation8 + $0xf0] ss:$28 sps:$4 sm:$0xff]   ;;  %v20501_v53 = vld [vmem:[#allocation8 + $0x88] ss:$28 sps:$4 sm:$0xff]  }
 0x6c2   : > { %v17612_v28 = vpop.f32.mrb[175].mxu0  ;;  %v20502_v25 = vld [vmem:[#allocation8 + $0x128] ss:$28 sps:$4 sm:$0xff]  }
 0x6c3   : > { %19315 = vmatpush3.bf16.msra.mxu0 %v24009_v11  ;;  %v17630_v18 = vpop.f32.mrb[176].mxu0  ;;  %v24363_v28 = vld [vmem:[#allocation26_spill] sm:$0xff] }
 0x6c4   : > { %17754 = vmatpush3.bf16.msra.mxu1 %v23376_v4  ;;  %17801 = vmatprep.subr.bf16.mxu0 %v23435_v0  ;;  %v17631_v35 = vpop.f32.mrb[177].mxu0 }
 0x6c5   : > { %17755 = vmatprep.subr.bf16.mxu1 %v23382_v52  ;;  %v17632_v59 = vadd.f32 %v17631_v35, %v17630_v18  ;;  %v17633_v50 = vpop.f32.mrb[178].mxu0 }
 0x6c6   : > { %19317 = vmatmul.mubr.msk.bf16.vlgmr.msra.gmra.mrb[204].mxu0 %vm14746_vm2, %v20493_v2  ;;  %v17634_v4 = vpop.f32.mrb[179].mxu0  ;;  %v14510_v2 = vld [vmem:[#allocation8 + $0x160] sm:$0x11] }
 0x6c7   : > { %15005 = vmatmul.mubr.bf16.gmra.mrb[88].mxu1 %v20494_v26  ;;  %17802 = vmatpush3.bf16.msra.mxu0 %v23445_v39  ;;  %v24025_v52 = vadd.f32 %v17632_v59, %v23941_v38  ;;  %v17635_v0 = vadd.f32 %v17634_v4, %v17633_v50  ;;  %v17636_v23 = vpop.f32.mrb[180].mxu0  ;;  %v20499_v38 = vld [vmem:[#allocation8 + $0x12c] ss:$28 sps:$4 sm:$0xff]   ;;  %v24362_v26 = vld [vmem:[#allocation25_spill] sm:$0xff]  ;;  %v24364_v59 = vld [vmem:[#allocation27_spill] sm:$0xff] }
 0x6c8   : > { %17756 = vmatpush3.bf16.msra.mxu1 %v23402_v31  ;;  %17803 = vmatprep.subr.bf16.mxu0 %v23447_v24  ;;  %v17637_v39 = vpop.f32.mrb[181].mxu0  ;;  %v24365_v4 = vld [vmem:[#allocation28_spill] sm:$0xff] }
 0x6c9   : > { %17757 = vmatprep.subr.bf16.mxu1 %v24357_v5  ;;  %19320 = vmatprep.mubr.msk.bf16.mxu0 %vm20774_vm0, %v24350_v9  ;;  %v24029_v31 = vadd.f32 %v17635_v0, %v23947_v22  ;;  %v17638_v24 = vadd.f32 %v17637_v39, %v17636_v23  ;;  %v17639_v51 = vpop.f32.mrb[182].mxu0  ;;  %v24361_v22 = vld [vmem:[#allocation24_spill] sm:$0xff]  ;;  %v20504_v23 = vld [vmem:[#allocation8 + $0xc0] ss:$28 sps:$4 sm:$0xff]  }
 0x6ca   : > { %15012 = vmatprep.mubr.bf16.mxu1 %v20495_v54  ;;  %v17640_v13 = vpop.f32.mrb[183].mxu0  ;;  %v16741_v54 = vcombine.high %v14510_v2, %v14510_v2  ;;  %v24366_v39 = vld [vmem:[#allocation14_spill] sm:$0xff] }
 0x6cb   : > { %17804 = vmatpush3.bf16.msra.mxu0 %v23466_v47  ;;  %v24035_v7 = vadd.f32 %v17638_v24, %v23954_v16  ;;  %v24360_v47 = vld [vmem:[#allocation23_spill] sm:$0xff]  ;;  %v17641_v12 = vadd.f32 %v17640_v13, %v17639_v51  ;;  %v24367_v24 = vld [vmem:[#allocation29_spill] sm:$0xff]  ;;  %v24369_v13 = vld [vmem:[#allocation30_spill] sm:$0xff] }
 0x6cc   : > { %17758 = vmatpush3.bf16.msra.mxu1 %v24358_v45  ;;  %17805 = vmatprep.subr.bf16.mxu0 %v23473_v8  ;;  %v17642_v8 = vpop.f32.mrb[184].mxu0  ;;  %v24368_v51 = vld [vmem:[#allocation15_spill] sm:$0xff] }
 0x6cd   : > { %17859 = vmatprep.subr.bf16.mxu1 %v24359_v63  ;;  %v17643_v37 = vpop.f32.mrb[185].mxu0  ;;  %v24043_v16 = vadd.f32 %v17641_v12, %v23968_v42  ;;  %v20509_v63 = vld [vmem:[#allocation9 + $0x4] ss:$28 sps:$4 sm:$0xff]  }
 0x6ce   : > { %19321 = vmatmul.mubr.msk.bf16.gmra.mrb[208].mxu0 %vm14746_vm2, %v20497_v61  ;;  %v17644_v60 = vadd.f32 %v17643_v37, %v17642_v8  ;;  %v17645_v35 = vpop.f32.mrb[186].mxu0  ;;  %v20507_v8 = vld [vmem:[#allocation9] ss:$28 sps:$4 sm:$0xff]  }
 0x6cf   : > { %15013 = vmatmul.mubr.bf16.gmra.mrb[92].mxu1 %v20498_v3  ;;  %17806 = vmatpush3.bf16.msra.mxu0 %v24360_v47  ;;  %v17646_v50 = vpop.f32.mrb[187].mxu0  ;;  %v16740_v3 = vcombine.low %v14510_v2, %v14510_v2  ;;  %v20511_v37 = vld [vmem:[#allocation9 + $0x3c] ss:$28 sps:$4 sm:$0xff]   ;;  %v20515_v2 = vld [vmem:[#allocation9 + $0x74] ss:$28 sps:$4 sm:$0xff]  }
 0x6d0   : > { %17807 = vmatprep.subr.bf16.mxu0 %v24361_v22  ;;  %19324 = vmatprep.mubr.msk.bf16.mxu0 %vm20774_vm0, %v24350_v9  ;;  %v24048_v18 = vadd.f32 %v17644_v60, %v23971_v20  ;;  %v17647_v42 = vadd.f32 %v17646_v50, %v17645_v35  ;;  %v17648_v5 = vpop.f32.mrb[188].mxu0  ;;  %v20506_v22 = vld [vmem:[#allocation8 + $0xf8] ss:$28 sps:$4 sm:$0xff]  }
 0x6d1   : > { %15020 = vmatprep.mubr.bf16.mxu1 %v20499_v38  ;;  %v17649_v0 = vpop.f32.mrb[189].mxu0  ;;  %v20517_v35 = vld [vmem:[#allocation9 + $0x70] ss:$28 sps:$4 sm:$0xff]  }
 0x6d2   : > { %v24056_v20 = vadd.f32 %v17647_v42, %v23978_v10  ;;  %v17650_v61 = vadd.f32 %v17649_v0, %v17648_v5  ;;  %v17651_v38 = vpop.f32.mrb[190].mxu0  ;;  %v20521_v50 = vld [vmem:[#allocation9 + $0xac] ss:$28 sps:$4 sm:$0xff]  }
 0x6d3   : > { %17808 = vmatpush3.bf16.msra.mxu0 %v24362_v26  ;;  %v17652_v47 = vpop.f32.mrb[191].mxu0  ;;  %v20523_v0 = vld [vmem:[#allocation9 + $0xa8] ss:$28 sps:$4 sm:$0xff]  }
 0x6d4   : > { %17809 = vmatprep.subr.bf16.mxu0 %v24363_v28  ;;  %v24061_v45 = vadd.f32 %v17650_v61, %v23984_v57  ;;  %v17653_v10 = vadd.f32 %v17652_v47, %v17651_v38  ;;  %v24370_v57 = vld [vmem:[#allocation16_spill] sm:$0xff]  ;;  %v17654_v60 = vpop.f32.mrb[192].mxu0  ;;  %v20541_v47 = vld [vmem:[#allocation9 + $0xec] ss:$28 sps:$4 sm:$0xff]  }
 0x6d5   : > { %v17655_v26 = vpop.f32.mrb[193].mxu0  ;;  %v20526_v61 = vld [vmem:[#allocation9 + $0xe4] ss:$28 sps:$4 sm:$0xff]  }
 0x6d6   : > { %19325 = vmatmul.mubr.msk.bf16.gmra.mrb[212].mxu0 %vm14746_vm2, %v20501_v53  ;;  %v24069_v12 = vadd.f32 %v17653_v10, %v23989_v58  ;;  %v20510_v53 = vld [vmem:[#allocation8 + $0x130] ss:$28 sps:$4 sm:$0xff]   ;;  %v20513_v58 = vld [vmem:[#allocation9 + $0x38] ss:$28 sps:$4 sm:$0xff]   ;;  %v17657_v28 = vpop.f32.mrb[194].mxu0 }
 0x6d7   : > { %15021 = vmatmul.mubr.bf16.gmra.mrb[96].mxu1 %v20502_v25  ;;  %17810 = vmatpush3.bf16.msra.mxu0 %v24364_v59  ;;  %v17656_v25 = vadd.f32 %v17655_v26, %v17654_v60  ;;  %v20520_v59 = vld [vmem:[#allocation9 + $0xc] ss:$28 sps:$4 sm:$0xff]   ;;  %v20558_v60 = vld [vmem:[#allocation9 + $0xbc] ss:$28 sps:$4 sm:$0xff]  }
 0x6d8   : > { %17811 = vmatprep.subr.bf16.mxu0 %v24365_v4  ;;  %19328 = vmatprep.mubr.msk.bf16.mxu0 %vm20774_vm0, %v24350_v9  ;;  %v20544_v10 = vld [vmem:[#allocation9 + $0x10] ss:$28 sps:$4 sm:$0xff]   ;;  %v20560_v26 = vld [vmem:[#allocation9 + $0x18] ss:$28 sps:$4 sm:$0xff]  }
 0x6d9   : > { %15028 = vmatprep.mubr.bf16.mxu1 %v16741_v54 }
 0x6db   : > { %17812 = vmatpush3.bf16.msra.mxu0 %v24366_v39 }
 0x6dc   : > { %17813 = vmatprep.subr.bf16.mxu0 %v24367_v24  ;;  %v20532_v24 = vld [vmem:[#allocation9 + $0x11c] ss:$28 sps:$4 sm:$0xff]  }
 0x6de   : > { %19329 = vmatmul.mubr.msk.bf16.gmra.mrb[216].mxu0 %vm14746_vm2, %v20504_v23  ;;  %v20524_v23 = vld [vmem:[#allocation9 + $0x44] ss:$28 sps:$4 sm:$0xff]  }
 0x6df   : > { %15029 = vmatmul.mubr.bf16.gmra.mrb[100].mxu1 %v16740_v3  ;;  %17814 = vmatpush3.bf16.msra.mxu0 %v24368_v51  ;;  %v24371_v3 = vld [vmem:[#allocation31_spill] sm:$0xff] }
 0x6e0   : > { %17815 = vmatprep.subr.bf16.mxu0 %v24369_v13  ;;  %19332 = vmatprep.mubr.msk.bf16.mxu0 %vm20774_vm0, %v24350_v9  ;;  %v20546_v13 = vld [vmem:[#allocation9 + $0x14] ss:$28 sps:$4 sm:$0xff]  }
 0x6e1   : > { %15463 = vmatprep.mubr.bf16.mxu1 %v20509_v63  ;;  %v20536_v63 = vld [vmem:[#allocation9 + $0xb4] ss:$28 sps:$4 sm:$0xff]  }
 0x6e3   : > { %17816 = vmatpush3.bf16.msra.mxu0 %v24370_v57  ;;  %v20550_v57 = vld [vmem:[#allocation9 + $0x4c] ss:$28 sps:$4 sm:$0xff]  }
 0x6e4   : > { %19344 = vmatprep.subr.bf16.mxu0 %v24350_v9 }
 0x6e6   : > { %19333 = vmatmul.mubr.msk.bf16.gmra.mrb[220].mxu0 %vm14746_vm2, %v20506_v22  ;;  %v20547_v22 = vld [vmem:[#allocation9 + $0x124] ss:$28 sps:$4 sm:$0xff]  }
 0x6e7   : > { %15464 = vmatmul.mubr.bf16.vlgmr.msra.gmra.mrb[104].mxu1 %v20507_v8  ;;  %19336 = vmatprep.mubr.msk.bf16.mxu0 %vm20774_vm0, %v24350_v9  ;;  %v20549_v8 = vld [vmem:[#allocation9 + $0x120] ss:$28 sps:$4 sm:$0xff]  }
 0x6e8   : > { %17860 = vmatpush3.bf16.msra.mxu1 %v23821_v1  ;;  %15471 = vmatprep.mubr.bf16.mxu1 %v20511_v37  ;;  %v17658_v1 = vpop.f32.mrb[195].mxu0  ;;  %v20552_v37 = vld [vmem:[#allocation9 + $0x48] ss:$28 sps:$4 sm:$0xff]  }
 0x6e9   : > { %17861 = vmatprep.subr.bf16.mxu1 %v23826_v49  ;;  %v24085_v49 = vadd.f32 %v17656_v25, %v23992_v44  ;;  %v17660_v4 = vpop.f32.mrb[196].mxu0  ;;  %v20561_v25 = vld [vmem:[#allocation9 + $0xb8] ss:$28 sps:$4 sm:$0xff]  }
 0x6ec   : > { %17862 = vmatpush3.bf16.msra.mxu1 %v23839_v46  ;;  %v17659_v46 = vadd.f32 %v17658_v1, %v17657_v28  ;;  %v20562_v28 = vld [vmem:[#allocation9 + $0xf4] ss:$28 sps:$4 sm:$0xff]  }
 0x6ed   : > { %17863 = vmatprep.subr.bf16.mxu1 %v23841_v43  ;;  %v20514_v43 = vld [vmem:[#allocation8 + $0x168] ss:$0 sps:$4 sm:$0x11]   ;;  %v20564_v1 = vld [vmem:[#allocation9 + $0x50] ss:$28 sps:$4 sm:$0xff]  }
 0x6ee   : > { %19337 = vmatmul.mubr.msk.bf16.gmra.mrb[224].mxu0 %vm14746_vm2, %v20510_v53  ;;  %v24089_v54 = vadd.f32 %v17659_v46, %v23999_v55  ;;  %v20565_v46 = vld [vmem:[#allocation9 + $0xf0] ss:$28 sps:$4 sm:$0xff]  }
 0x6ef   : > { %15472 = vmatmul.mubr.bf16.gmra.mrb[108].mxu1 %v20513_v58  ;;  %19340 = vmatprep.mubr.msk.bf16.mxu0 %vm20774_vm0, %v24350_v9 }
 0x6f0   : > { %17864 = vmatpush3.bf16.msra.mxu1 %v23851_v19  ;;  %15479 = vmatprep.mubr.bf16.mxu1 %v20515_v2  ;;  %v17661_v19 = vpop.f32.mrb[197].mxu0  ;;  %v20557_v2 = vld [vmem:[#allocation9 + $0x80] ss:$28 sps:$4 sm:$0xff]  }
 0x6f1   : > { %17865 = vmatprep.subr.bf16.mxu1 %v23856_v48  ;;  %v17662_v44 = vadd.f32 %v17661_v19, %v17660_v4  ;;  %v17663_v42 = vpop.f32.mrb[198].mxu0  ;;  %v20571_v19 = vld [vmem:[#allocation9 + $0xc0] ss:$28 sps:$4 sm:$0xff]  }
 0x6f2   : > { %v17664_v48 = vpop.f32.mrb[199].mxu0 }
 0x6f3   : > { %v24096_v55 = vadd.f32 %v17662_v44, %v24002_v17  ;;  %v17665_v5 = vadd.f32 %v17664_v48, %v17663_v42  ;;  %v20573_v42 = vld [vmem:[#allocation9 + $0xf8] ss:$28 sps:$4 sm:$0xff]   ;;  %v20574_v48 = vld [vmem:[#allocation9 + $0x130] ss:$28 sps:$4 sm:$0xff]  }
 0x6f4   : > { %17866 = vmatpush3.bf16.msra.mxu1 %v23865_v62  ;;  %v20518_v62 = vld [vmem:[#allocation9 + $0x8] ss:$28 sps:$4 sm:$0xff]  }
 0x6f5   : > { %17867 = vmatprep.subr.bf16.mxu1 %v23869_v41  ;;  %v24100_v41 = vadd.f32 %v17665_v5, %v24007_v30  ;;  %v20575_v5 = vld [vmem:[#allocation9 + $0x168] ss:$0 sps:$4 sm:$0x11]  }
 0x6f6   : > { %19341 = vmatmul.mubr.msk.bf16.gmra.mrb[228].mxu0 %vm14746_vm2, %v20514_v43  ;;  %v20566_v43 = vld [vmem:[#allocation9 + $0x12c] ss:$28 sps:$4 sm:$0xff]  }
 0x6f7   : > { %15480 = vmatmul.mubr.bf16.gmra.mrb[112].mxu1 %v20517_v35  ;;  %15551 = vmatprep.mubr.bf16.mxu0 %v20520_v59  ;;  %v15174_v35 = vld [vmem:[#allocation9 + $0x160] sm:$0x11] }
 0x6f8   : > { %17868 = vmatpush3.bf16.msra.mxu1 %v23873_v32  ;;  %15487 = vmatprep.mubr.bf16.mxu1 %v20521_v50  ;;  %v17666_v32 = vpop.f32.mrb[200].mxu0  ;;  %v20568_v59 = vld [vmem:[#allocation9 + $0x88] ss:$28 sps:$4 sm:$0xff]   ;;  %v16797_v4 = vcombine.high %v15174_v35, %v15174_v35  ;;  %v16796_v44 = vcombine.low %v15174_v35, %v15174_v35 }
 0x6f9   : > { %17869 = vmatprep.subr.bf16.mxu1 %v23905_v56  ;;  %v17667_v17 = vpop.f32.mrb[201].mxu0  ;;  %v20569_v50 = vld [vmem:[#allocation9 + $0x128] ss:$28 sps:$4 sm:$0xff]  }
 0x6fa   : > { %v17668_v56 = vadd.f32 %v17667_v17, %v17666_v32  ;;  %v17669_v30 = vpop.f32.mrb[202].mxu0 }
 0x6fc   : > { %17870 = vmatpush3.bf16.msra.mxu1 %v23769_v15  ;;  %v17670_v15 = vpop.f32.mrb[203].mxu0  ;;  %v24109_v39 = vadd.f32 %v17668_v56, %v24012_v34  ;;  %v15172_v34 = vld [vmem:[#allocation9 + $0x150] sm:$0x11] }
 0x6fd   : > { %17871 = vmatprep.subr.bf16.mxu1 %v23912_v21  ;;  %v20528_v21 = vld [vmem:[#allocation9 + $0x40] ss:$28 sps:$4 sm:$0xff]   ;;  %v16793_v38 = vcombine.high %v15172_v34, %v15172_v34  ;;  %v16792_v51 = vcombine.low %v15172_v34, %v15172_v34 }
 0x6fe   : > { %15552 = vmatmul.mubr.bf16.vlgmr.msra.gmra.mrb[232].mxu0 %v20518_v62 }
 0x6ff   : > { %19345 = vmatpush3.bf16.msra.mxu0 %v23945_v36  ;;  %15488 = vmatmul.mubr.bf16.gmra.mrb[116].mxu1 %v20523_v0  ;;  %v20529_v36 = vld [vmem:[#allocation9 + $0xe0] ss:$28 sps:$4 sm:$0xff]  }
 0x700   : > { %17872 = vmatpush3.bf16.msra.mxu1 %v23777_v14  ;;  %19346 = vmatprep.subr.bf16.mxu0 %v24350_v9  ;;  %v20530_v14 = vld [vmem:[#allocation9 + $0x7c] ss:$28 sps:$4 sm:$0xff]  }
 0x701   : > { %17873 = vmatprep.subr.bf16.mxu1 %v23934_v6  ;;  %15559 = vmatprep.mubr.bf16.mxu0 %v20524_v23  ;;  %v20534_v6 = vld [vmem:[#allocation9 + $0x78] ss:$28 sps:$4 sm:$0xff]  }
 0x702   : > { %15495 = vmatprep.mubr.bf16.mxu1 %v20526_v61 }
 0x703   : > { %19347 = vmatpush3.bf16.msra.mxu0 %v23964_v27  ;;  %v20535_v27 = vld [vmem:[#allocation9 + $0x118] ss:$28 sps:$4 sm:$0xff]  }
 0x704   : > { %17874 = vmatpush3.bf16.msra.mxu1 %v24371_v3  ;;  %19348 = vmatprep.subr.bf16.mxu0 %v24350_v9 }
 0x706   : > { %15560 = vmatmul.mubr.bf16.gmra.mrb[236].mxu0 %v20528_v21 }
 0x707   : > { %19349 = vmatpush3.bf16.msra.mxu0 %v23976_v29  ;;  %15496 = vmatmul.mubr.bf16.gmra.mrb[120].mxu1 %v20529_v36  ;;  %v20539_v29 = vld [vmem:[#allocation9 + $0xb0] ss:$28 sps:$4 sm:$0xff]  }
 0x708   : > { %19350 = vmatprep.subr.bf16.mxu0 %v24350_v9  ;;  %15567 = vmatprep.mubr.bf16.mxu0 %v20530_v14 }
 0x709   : > { %15503 = vmatprep.mubr.bf16.mxu1 %v20532_v24 }
 0x70b   : > { %19351 = vmatpush3.bf16.msra.mxu0 %v23987_v40  ;;  %v20543_v40 = vld [vmem:[#allocation9 + $0xe8] ss:$28 sps:$4 sm:$0xff]  }
 0x70c   : > { %19352 = vmatprep.subr.bf16.mxu0 %v24350_v9 }
 0x70e   : > { %15568 = vmatmul.mubr.bf16.gmra.mrb[240].mxu0 %v20534_v6 }
 0x70f   : > { %19353 = vmatpush3.bf16.msra.mxu0 %v23997_v33  ;;  %15504 = vmatmul.mubr.bf16.gmra.mrb[124].mxu1 %v20535_v27  ;;  %v15173_v33 = vld [vmem:[#allocation9 + $0x158] sm:$0x11] }
 0x710   : > { %19354 = vmatprep.subr.bf16.mxu0 %v24350_v9  ;;  %15575 = vmatprep.mubr.bf16.mxu0 %v20536_v63  ;;  %v16795_v53 = vcombine.high %v15173_v33, %v15173_v33  ;;  %v16794_v58 = vcombine.low %v15173_v33, %v15173_v33 }
 0x711   : > { %15511 = vmatprep.mubr.bf16.mxu1 %v16793_v38 }
 0x713   : > { %19355 = vmatpush3.bf16.msra.mxu0 %v24009_v11  ;;  %v20555_v11 = vld [vmem:[#allocation9 + $0x84] ss:$28 sps:$4 sm:$0xff]  }
 0x716   : > { %15576 = vmatmul.mubr.bf16.gmra.mrb[244].mxu0 %v20539_v29 }
 0x717   : > { %15512 = vmatmul.mubr.bf16.gmra.mrb[128].mxu1 %v16792_v51  ;;  %15583 = vmatprep.mubr.bf16.mxu0 %v20541_v47 }
 0x718   : > { %15639 = vmatprep.mubr.bf16.mxu1 %v20546_v13 }
 0x71e   : > { %15584 = vmatmul.mubr.bf16.gmra.mrb[248].mxu0 %v20543_v40 }
 0x71f   : > { %15640 = vmatmul.mubr.bf16.vlgmr.msra.gmra.mrb[132].mxu1 %v20544_v10  ;;  %15591 = vmatprep.mubr.bf16.mxu0 %v20547_v22 }
 0x720   : > { %15647 = vmatprep.mubr.bf16.mxu1 %v20550_v57 }
 0x726   : > { %15592 = vmatmul.mubr.bf16.gmra.mrb[252].mxu0 %v20549_v8 }
 0x727   : > { %15648 = vmatmul.mubr.bf16.gmra.mrb[136].mxu1 %v20552_v37  ;;  %15599 = vmatprep.mubr.bf16.mxu0 %v16795_v53 }
 0x728   : > { %15655 = vmatprep.mubr.bf16.mxu1 %v20555_v11 }
 0x72e   : > { %15600 = vmatmul.mubr.bf16.gmra.mrb[0].mxu0 %v16794_v58 }
 0x72f   : > { %15656 = vmatmul.mubr.bf16.gmra.mrb[140].mxu1 %v20557_v2  ;;  %19356 = vmatprep.mubr.msk.bf16.mxu0 %vm20774_vm0, %v24350_v9 }
 0x730   : > { %15663 = vmatprep.mubr.bf16.mxu1 %v20558_v60 }
 0x736   : > { %19357 = vmatmul.mubr.msk.bf16.vlgmr.msra.gmra.mrb[4].mxu0 %vm14746_vm2, %v20560_v26 }
 0x737   : > { %15664 = vmatmul.mubr.bf16.gmra.mrb[144].mxu1 %v20561_v25  ;;  %19360 = vmatprep.mubr.msk.bf16.mxu0 %vm20774_vm0, %v24350_v9 }
 0x738   : > { %15671 = vmatprep.mubr.bf16.mxu1 %v20562_v28 }
 0x73e   : > { %19361 = vmatmul.mubr.msk.bf16.gmra.mrb[8].mxu0 %vm14746_vm2, %v20564_v1 }
 0x73f   : > { %15672 = vmatmul.mubr.bf16.gmra.mrb[148].mxu1 %v20565_v46  ;;  %19364 = vmatprep.mubr.msk.bf16.mxu0 %vm20774_vm0, %v24350_v9 }
 0x740   : > { %15679 = vmatprep.mubr.bf16.mxu1 %v20566_v43 }
 0x746   : > { %19365 = vmatmul.mubr.msk.bf16.gmra.mrb[12].mxu0 %vm14746_vm2, %v20568_v59 }
 0x747   : > { %15680 = vmatmul.mubr.bf16.gmra.mrb[152].mxu1 %v20569_v50  ;;  %19368 = vmatprep.mubr.msk.bf16.mxu0 %vm20774_vm0, %v24350_v9 }
 0x748   : > { %15687 = vmatprep.mubr.bf16.mxu1 %v16797_v4 }
 0x74e   : > { %19369 = vmatmul.mubr.msk.bf16.gmra.mrb[16].mxu0 %vm14746_vm2, %v20571_v19 }
 0x74f   : > { %15688 = vmatmul.mubr.bf16.gmra.mrb[156].mxu1 %v16796_v44  ;;  %19372 = vmatprep.mubr.msk.bf16.mxu0 %vm20774_vm0, %v24350_v9 }
 0x756   : > { %19373 = vmatmul.mubr.msk.bf16.gmra.mrb[20].mxu0 %vm14746_vm2, %v20573_v42 }
 0x757   : > { %19376 = vmatprep.mubr.msk.bf16.mxu0 %vm20774_vm0, %v24350_v9 }
 0x75e   : > { %19377 = vmatmul.mubr.msk.bf16.gmra.mrb[24].mxu0 %vm14746_vm2, %v20574_v48 }
 0x75f   : > { %19380 = vmatprep.mubr.msk.bf16.mxu0 %vm20774_vm0, %v24350_v9 }
 0x766   : > { %19381 = vmatmul.mubr.msk.bf16.gmra.mrb[28].mxu0 %vm14746_vm2, %v20575_v5 }
 0x782   : > { %v17688_v62 = vpop.f32.mrb[76].mxu1 }
 0x783   : > { %v17689_v0 = vpop.f32.mrb[77].mxu1 }
 0x784   : > { %v17690_v23 = vadd.f32 %v17689_v0, %v17688_v62  ;;  %v17691_v61 = vpop.f32.mrb[78].mxu1 }
 0x785   : > { %v17692_v32 = vpop.f32.mrb[79].mxu1 }
 0x786   : > { %v17693_v17 = vadd.f32 %v17692_v32, %v17691_v61  ;;  %v14983_v56 = vadd.f32 %v17690_v23, %v24025_v52 }
 0x788   : > { %v14986_v30 = vadd.f32 %v17693_v17, %v24029_v31 }
 0x78a   : > { %v17694_v15 = vpop.f32.mrb[80].mxu1 }
 0x78b   : > { %v17695_v21 = vpop.f32.mrb[81].mxu1 }
 0x78c   : > { %v17696_v36 = vadd.f32 %v17695_v21, %v17694_v15  ;;  %v17697_v3 = vpop.f32.mrb[82].mxu1 }
 0x78d   : > { %v17698_v14 = vpop.f32.mrb[83].mxu1 }
 0x78e   : > { %v17699_v24 = vadd.f32 %v17698_v14, %v17697_v3  ;;  %v14991_v9 = vadd.f32 %v17696_v36, %v24035_v7 }
 0x790   : > { %v14994_v6 = vadd.f32 %v17699_v24, %v24043_v16 }
 0x792   : > { %v17700_v34 = vpop.f32.mrb[84].mxu1 }
 0x793   : > { %v17701_v27 = vpop.f32.mrb[85].mxu1 }
 0x794   : > { %v17702_v63 = vadd.f32 %v17701_v27, %v17700_v34  ;;  %v17703_v38 = vpop.f32.mrb[86].mxu1 }
 0x795   : > { %v17704_v29 = vpop.f32.mrb[87].mxu1 }
 0x796   : > { %v17705_v51 = vadd.f32 %v17704_v29, %v17703_v38  ;;  %v14999_v52 = vadd.f32 %v17702_v63, %v24048_v18 }
 0x798   : > { %v15002_v31 = vadd.f32 %v17705_v51, %v24056_v20 }
 0x799   : > { %v15070_v47 = vpop.f32.mrb[204].mxu0 }
 0x79a   : > { %v24148_v13 = vadd.f32 %v15070_v47, %v14983_v56  ;;  %v17706_v40 = vpop.f32.mrb[88].mxu1  ;;  %v19318_v10 = vpop.f32.mrb[205].mxu0 }
 0x79b   : > { %v17707_v22 = vpop.f32.mrb[89].mxu1  ;;  %v15073_v57 = vpop.f32.mrb[206].mxu0 }
 0x79c   : > { %v17708_v7 = vadd.f32 %v17707_v22, %v17706_v40  ;;  %v24150_v33 = vadd.f32 %v15073_v57, %v14986_v30  ;;  %v17709_v16 = vpop.f32.mrb[90].mxu1  ;;  %v19319_v8 = vpop.f32.mrb[207].mxu0 }
 0x79d   : > { %v17710_v37 = vpop.f32.mrb[91].mxu1 }
 0x79e   : > { %v17711_v53 = vadd.f32 %v17710_v37, %v17709_v16  ;;  %v15007_v11 = vadd.f32 %v17708_v7, %v24061_v45 }
 0x7a0   : > { %v15010_v18 = vadd.f32 %v17711_v53, %v24069_v12 }
 0x7a1   : > { %v15078_v58 = vpop.f32.mrb[208].mxu0 }
 0x7a2   : > { %v24154_v20 = vadd.f32 %v15078_v58, %v14991_v9  ;;  %v17712_v2 = vpop.f32.mrb[92].mxu1  ;;  %v19322_v60 = vpop.f32.mrb[209].mxu0 }
 0x7a3   : > { %v17713_v26 = vpop.f32.mrb[93].mxu1  ;;  %v15081_v25 = vpop.f32.mrb[210].mxu0 }
 0x7a4   : > { %v17714_v28 = vadd.f32 %v17713_v26, %v17712_v2  ;;  %v24156_v1 = vadd.f32 %v15081_v25, %v14994_v6  ;;  %v17715_v46 = vpop.f32.mrb[94].mxu1  ;;  %v19323_v43 = vpop.f32.mrb[211].mxu0 }
 0x7a5   : > { %v17716_v35 = vpop.f32.mrb[95].mxu1 }
 0x7a6   : > { %v17717_v59 = vadd.f32 %v17716_v35, %v17715_v46  ;;  %v15015_v50 = vadd.f32 %v17714_v28, %v24085_v49 }
 0x7a8   : > { %v15018_v45 = vadd.f32 %v17717_v59, %v24089_v54 }
 0x7a9   : > { %v15086_v4 = vpop.f32.mrb[212].mxu0 }
 0x7aa   : > { %v24160_v12 = vadd.f32 %v15086_v4, %v14999_v52  ;;  %v17718_v19 = vpop.f32.mrb[96].mxu1  ;;  %v19326_v44 = vpop.f32.mrb[213].mxu0 }
 0x7ab   : > { %v17719_v42 = vpop.f32.mrb[97].mxu1  ;;  %v15089_v48 = vpop.f32.mrb[214].mxu0 }
 0x7ac   : > { %v17720_v5 = vadd.f32 %v17719_v42, %v17718_v19  ;;  %v24162_v62 = vadd.f32 %v15089_v48, %v15002_v31  ;;  %v17721_v0 = vpop.f32.mrb[98].mxu1  ;;  %v19327_v23 = vpop.f32.mrb[215].mxu0 }
 0x7ad   : > { %v17722_v61 = vpop.f32.mrb[99].mxu1 }
 0x7ae   : > { %v17723_v32 = vadd.f32 %v17722_v61, %v17721_v0  ;;  %v15023_v17 = vadd.f32 %v17720_v5, %v24096_v55 }
 0x7b0   : > { %v15026_v49 = vadd.f32 %v17723_v32, %v24100_v41 }
 0x7b1   : > { %v15094_v56 = vpop.f32.mrb[216].mxu0 }
 0x7b2   : > { %v24166_v54 = vadd.f32 %v15094_v56, %v15007_v11  ;;  %v17724_v30 = vpop.f32.mrb[100].mxu1  ;;  %v19330_v15 = vpop.f32.mrb[217].mxu0 }
 0x7b3   : > { %v17725_v21 = vpop.f32.mrb[101].mxu1  ;;  %v15097_v36 = vpop.f32.mrb[218].mxu0 }
 0x7b4   : > { %v17726_v3 = vadd.f32 %v17725_v21, %v17724_v30  ;;  %v24168_v14 = vadd.f32 %v15097_v36, %v15010_v18  ;;  %v19331_v24 = vpop.f32.mrb[219].mxu0  ;;  %v17727_v9 = vpop.f32.mrb[102].mxu1 }
 0x7b5   : > { %v17728_v6 = vpop.f32.mrb[103].mxu1 }
 0x7b6   : > { %v15031_v34 = vadd.f32 %v17726_v3, %v24109_v39 }
 0x7b9   : > { %v15102_v27 = vpop.f32.mrb[220].mxu0 }
 0x7ba   : > { %v24171_v63 = vadd.f32 %v15102_v27, %v15015_v50  ;;  %v19334_v55 = vpop.f32.mrb[221].mxu0  ;;  %v17759_v41 = vpop.f32.mrb[104].mxu1 }
 0x7bb   : > { %v15105_v38 = vpop.f32.mrb[222].mxu0  ;;  %v17760_v29 = vpop.f32.mrb[105].mxu1 }
 0x7bc   : > { %v24173_v51 = vadd.f32 %v15105_v38, %v15018_v45  ;;  %v19335_v52 = vpop.f32.mrb[223].mxu0  ;;  %v17761_v31 = vadd.f32 %v17760_v29, %v17759_v41  ;;  %v17762_v47 = vpop.f32.mrb[106].mxu1 }
 0x7bd   : > { %v17763_v40 = vpop.f32.mrb[107].mxu1 }
 0x7be   : > { %v17764_v10 = vadd.f32 %v17763_v40, %v17762_v47 }
 0x7c1   : > { %v15110_v22 = vpop.f32.mrb[224].mxu0 }
 0x7c2   : > { %v24175_v57 = vadd.f32 %v15110_v22, %v15023_v17  ;;  %v19338_v7 = vpop.f32.mrb[225].mxu0  ;;  %v17765_v16 = vpop.f32.mrb[108].mxu1 }
 0x7c3   : > { %v15113_v39 = vpop.f32.mrb[226].mxu0  ;;  %v17766_v8 = vpop.f32.mrb[109].mxu1 }
 0x7c4   : > { %v24177_v37 = vadd.f32 %v15113_v39, %v15026_v49  ;;  %v19339_v53 = vpop.f32.mrb[227].mxu0  ;;  %v17767_v11 = vadd.f32 %v17766_v8, %v17765_v16  ;;  %v17768_v18 = vpop.f32.mrb[110].mxu1 }
 0x7c5   : > { %v17769_v58 = vpop.f32.mrb[111].mxu1 }
 0x7c6   : > { %v17770_v2 = vadd.f32 %v17769_v58, %v17768_v18 }
 0x7c9   : > { %v15118_v60 = vpop.f32.mrb[228].mxu0 }
 0x7ca   : > { %v24179_v26 = vadd.f32 %v15118_v60, %v15031_v34  ;;  %v17771_v25 = vpop.f32.mrb[112].mxu1  ;;  %v19342_v28 = vpop.f32.mrb[229].mxu0 }
 0x7cb   : > { %v17772_v46 = vpop.f32.mrb[113].mxu1  ;;  %v15121_v43 = vpop.f32.mrb[230].mxu0 }
 0x7cc   : > { %v17773_v35 = vadd.f32 %v17772_v46, %v17771_v25  ;;  %v17774_v59 = vpop.f32.mrb[114].mxu1  ;;  %v19343_v50 = vpop.f32.mrb[231].mxu0 }
 0x7cd   : > { %v17775_v45 = vpop.f32.mrb[115].mxu1 }
 0x7ce   : > { %v17776_v4 = vadd.f32 %v17775_v45, %v17774_v59 }
 0x7d1   : > { %v17817_v19 = vpop.f32.mrb[232].mxu0 }
 0x7d2   : > { %v17777_v44 = vpop.f32.mrb[116].mxu1  ;;  %v17818_v42 = vpop.f32.mrb[233].mxu0 }
 0x7d3   : > { %v17778_v48 = vpop.f32.mrb[117].mxu1  ;;  %v17819_v5 = vadd.f32 %v17818_v42, %v17817_v19  ;;  %v17820_v0 = vpop.f32.mrb[234].mxu0 }
 0x7d4   : > { %v17779_v23 = vadd.f32 %v17778_v48, %v17777_v44  ;;  %v17780_v61 = vpop.f32.mrb[118].mxu1  ;;  %v17821_v32 = vpop.f32.mrb[235].mxu0 }
 0x7d5   : > { %v17781_v17 = vpop.f32.mrb[119].mxu1  ;;  %v15554_v49 = vadd.f32 %v17819_v5, %v17761_v31  ;;  %v17822_v56 = vadd.f32 %v17821_v32, %v17820_v0 }
 0x7d6   : > { %v17782_v30 = vadd.f32 %v17781_v17, %v17780_v61 }
 0x7d7   : > { %v15557_v15 = vadd.f32 %v17822_v56, %v17764_v10 }
 0x7d9   : > { %v17823_v21 = vpop.f32.mrb[236].mxu0 }
 0x7da   : > { %v17783_v36 = vpop.f32.mrb[120].mxu1  ;;  %v17824_v3 = vpop.f32.mrb[237].mxu0 }
 0x7db   : > { %v17784_v24 = vpop.f32.mrb[121].mxu1  ;;  %v17825_v9 = vadd.f32 %v17824_v3, %v17823_v21  ;;  %v17826_v6 = vpop.f32.mrb[238].mxu0 }
 0x7dc   : > { %v17785_v34 = vadd.f32 %v17784_v24, %v17783_v36  ;;  %v17786_v27 = vpop.f32.mrb[122].mxu1  ;;  %v17827_v55 = vpop.f32.mrb[239].mxu0 }
 0x7dd   : > { %v17787_v41 = vpop.f32.mrb[123].mxu1  ;;  %v15562_v38 = vadd.f32 %v17825_v9, %v17767_v11  ;;  %v17828_v29 = vadd.f32 %v17827_v55, %v17826_v6 }
 0x7de   : > { %v17788_v52 = vadd.f32 %v17787_v41, %v17786_v27 }
 0x7df   : > { %v15565_v47 = vadd.f32 %v17828_v29, %v17770_v2 }
 0x7e1   : > { %v17829_v40 = vpop.f32.mrb[240].mxu0 }
 0x7e2   : > { %v17789_v22 = vpop.f32.mrb[124].mxu1  ;;  %v17830_v31 = vpop.f32.mrb[241].mxu0 }
 0x7e3   : > { %v17790_v7 = vpop.f32.mrb[125].mxu1  ;;  %v17831_v16 = vadd.f32 %v17830_v31, %v17829_v40  ;;  %v17832_v10 = vpop.f32.mrb[242].mxu0 }
 0x7e4   : > { %v17791_v39 = vadd.f32 %v17790_v7, %v17789_v22  ;;  %v17792_v8 = vpop.f32.mrb[126].mxu1  ;;  %v17833_v53 = vpop.f32.mrb[243].mxu0 }
 0x7e5   : > { %v17793_v18 = vpop.f32.mrb[127].mxu1  ;;  %v15570_v58 = vadd.f32 %v17831_v16, %v17773_v35  ;;  %v17834_v60 = vadd.f32 %v17833_v53, %v17832_v10 }
 0x7e6   : > { %v17794_v25 = vadd.f32 %v17793_v18, %v17792_v8 }
 0x7e7   : > { %v15573_v28 = vadd.f32 %v17834_v60, %v17776_v4 }
 0x7e9   : > { %v17835_v46 = vpop.f32.mrb[244].mxu0 }
 0x7ea   : > { %v17795_v43 = vpop.f32.mrb[128].mxu1  ;;  %v17836_v11 = vpop.f32.mrb[245].mxu0 }
 0x7eb   : > { %v17796_v59 = vpop.f32.mrb[129].mxu1  ;;  %v17837_v50 = vadd.f32 %v17836_v11, %v17835_v46  ;;  %v17838_v2 = vpop.f32.mrb[246].mxu0 }
 0x7ec   : > { %v17797_v45 = vadd.f32 %v17796_v59, %v17795_v43  ;;  %v17798_v19 = vpop.f32.mrb[130].mxu1  ;;  %v17839_v44 = vpop.f32.mrb[247].mxu0 }
 0x7ed   : > { %v17799_v42 = vpop.f32.mrb[131].mxu1  ;;  %v15578_v48 = vadd.f32 %v17837_v50, %v17779_v23  ;;  %v17840_v5 = vadd.f32 %v17839_v44, %v17838_v2 }
 0x7ef   : > { %v24181_v0 = vadd.f32 %v17840_v5, %v17782_v30 }
 0x7f1   : > { %v17841_v61 = vpop.f32.mrb[248].mxu0 }
 0x7f2   : > { %v17875_v32 = vpop.f32.mrb[132].mxu1  ;;  %v17842_v35 = vpop.f32.mrb[249].mxu0 }
 0x7f3   : > { %v17876_v17 = vpop.f32.mrb[133].mxu1  ;;  %v17843_v56 = vadd.f32 %v17842_v35, %v17841_v61  ;;  %v17844_v4 = vpop.f32.mrb[250].mxu0 }
 0x7f4   : > { %v17877_v21 = vadd.f32 %v17876_v17, %v17875_v32  ;;  %v17878_v36 = vpop.f32.mrb[134].mxu1  ;;  %v17845_v3 = vpop.f32.mrb[251].mxu0 }
 0x7f5   : > { %v17879_v24 = vpop.f32.mrb[135].mxu1  ;;  %v24183_v9 = vadd.f32 %v17843_v56, %v17785_v34  ;;  %v17846_v6 = vadd.f32 %v17845_v3, %v17844_v4 }
 0x7f6   : > { %v17880_v27 = vadd.f32 %v17879_v24, %v17878_v36  ;;  %v15642_v55 = vadd.f32 %v17877_v21, %v15554_v49 }
 0x7f7   : > { %v24185_v41 = vadd.f32 %v17846_v6, %v17788_v52 }
 0x7f8   : > { %v15645_v23 = vadd.f32 %v17880_v27, %v15557_v15 }
 0x7f9   : > { %v17847_v30 = vpop.f32.mrb[252].mxu0 }
 0x7fa   : > { %v17881_v29 = vpop.f32.mrb[136].mxu1  ;;  %v17848_v40 = vpop.f32.mrb[253].mxu0 }
 0x7fb   : > { %v17882_v22 = vpop.f32.mrb[137].mxu1  ;;  %v17849_v31 = vadd.f32 %v17848_v40, %v17847_v30  ;;  %v17850_v7 = vpop.f32.mrb[254].mxu0 }
 0x7fc   : > { %v17883_v16 = vadd.f32 %v17882_v22, %v17881_v29  ;;  %v17884_v10 = vpop.f32.mrb[138].mxu1  ;;  %v17851_v8 = vpop.f32.mrb[255].mxu0 }
 0x7fd   : > { %v17885_v53 = vpop.f32.mrb[139].mxu1  ;;  %v24187_v18 = vadd.f32 %v17849_v31, %v17791_v39  ;;  %v17852_v34 = vadd.f32 %v17851_v8, %v17850_v7 }
 0x7fe   : > { %v17886_v60 = vadd.f32 %v17885_v53, %v17884_v10  ;;  %v15650_v46 = vadd.f32 %v17883_v16, %v15562_v38 }
 0x7ff   : > { %v24189_v43 = vadd.f32 %v17852_v34, %v17794_v25 }
 0x800   : > { %v15653_v49 = vadd.f32 %v17886_v60, %v15565_v47 }
 0x801   : > { %v17853_v52 = vpop.f32.mrb[0].mxu0 }
 0x802   : > { %v17887_v15 = vpop.f32.mrb[140].mxu1  ;;  %v17854_v11 = vpop.f32.mrb[1].mxu0 }
 0x803   : > { %v17888_v59 = vpop.f32.mrb[141].mxu1  ;;  %v17855_v50 = vadd.f32 %v17854_v11, %v17853_v52  ;;  %v17856_v2 = vpop.f32.mrb[2].mxu0 }
 0x804   : > { %v17889_v19 = vadd.f32 %v17888_v59, %v17887_v15  ;;  %v17890_v44 = vpop.f32.mrb[142].mxu1  ;;  %v17857_v42 = vpop.f32.mrb[3].mxu0 }
 0x805   : > { %v17891_v5 = vpop.f32.mrb[143].mxu1  ;;  %v24191_v61 = vadd.f32 %v17855_v50, %v17797_v45 }
 0x806   : > { %v17892_v39 = vadd.f32 %v17891_v5, %v17890_v44  ;;  %v15658_v32 = vadd.f32 %v17889_v19, %v15570_v58 }
 0x808   : > { %v15661_v35 = vadd.f32 %v17892_v39, %v15573_v28 }
 0x809   : > { %v15729_v17 = vpop.f32.mrb[4].mxu0 }
 0x80a   : > { %v15730_v38 = vadd.f32 %v15729_v17, %v15642_v55  ;;  %v17893_v25 = vpop.f32.mrb[144].mxu1  ;;  %v19358_v56 = vpop.f32.mrb[5].mxu0 }
 0x80b   : > { %v17894_v47 = vpop.f32.mrb[145].mxu1  ;;  %v15732_v4 = vpop.f32.mrb[6].mxu0 }
 0x80c   : > { %v17895_v21 = vadd.f32 %v17894_v47, %v17893_v25  ;;  %v15733_v36 = vadd.f32 %v15732_v4, %v15645_v23  ;;  %v17896_v3 = vpop.f32.mrb[146].mxu1  ;;  %v19359_v24 = vpop.f32.mrb[7].mxu0 }
 0x80d   : > { %v17897_v6 = vpop.f32.mrb[147].mxu1 }
 0x80e   : > { %v17898_v27 = vadd.f32 %v17897_v6, %v17896_v3  ;;  %v20339_v30 = vpack.i.bf16 %v15733_v36, %v15730_v38  ;;  %v15666_v29 = vadd.f32 %v17895_v21, %v15578_v48 }
 0x810   : > { %20340 = vrot.lane.b32.xlu0 %v20339_v30, %s20775_s18  ;;  %v15669_v58 = vadd.f32 %v17898_v27, %v24181_v0 }
 0x811   : > { %v15737_v28 = vpop.f32.mrb[8].mxu0 }
 0x812   : > { %v15738_v45 = vadd.f32 %v15737_v28, %v15650_v46  ;;  %v17899_v55 = vpop.f32.mrb[148].mxu1  ;;  %v19362_v40 = vpop.f32.mrb[9].mxu0 }
 0x813   : > { %v17900_v22 = vpop.f32.mrb[149].mxu1  ;;  %v15740_v31 = vpop.f32.mrb[10].mxu0 }
 0x814   : > { %v17901_v7 = vadd.f32 %v17900_v22, %v17899_v55  ;;  %v15741_v16 = vadd.f32 %v15740_v31, %v15653_v49  ;;  %v17902_v23 = vpop.f32.mrb[150].mxu1  ;;  %v19363_v10 = vpop.f32.mrb[11].mxu0 }
 0x815   : > { %v17903_v8 = vpop.f32.mrb[151].mxu1 }
 0x816   : > { %v20344_v53 = vpack.i.bf16 %v15741_v16, %v15738_v45  ;;  %v17904_v34 = vadd.f32 %v17903_v8, %v17902_v23  ;;  %v15674_v48 = vadd.f32 %v17901_v7, %v24183_v9 }
 0x818   : > { %20345 = vrot.lane.b32.xlu0 %v20344_v53, %s20775_s18  ;;  %v15677_v60 = vadd.f32 %v17904_v34, %v24185_v41 }
 0x819   : > { %v15745_v0 = vpop.f32.mrb[12].mxu0 }
 0x81a   : > { %v15746_v52 = vadd.f32 %v15745_v0, %v15658_v32  ;;  %v17905_v46 = vpop.f32.mrb[152].mxu1  ;;  %v19366_v15 = vpop.f32.mrb[13].mxu0 }
 0x81b   : > { %v17906_v11 = vpop.f32.mrb[153].mxu1  ;;  %v15748_v59 = vpop.f32.mrb[14].mxu0 }
 0x81c   : > { %v17907_v50 = vadd.f32 %v17906_v11, %v17905_v46  ;;  %v15749_v2 = vadd.f32 %v15748_v59, %v15661_v35  ;;  %v17908_v49 = vpop.f32.mrb[154].mxu1  ;;  %v19367_v19 = vpop.f32.mrb[15].mxu0 }
 0x81d   : > { %v17909_v44 = vpop.f32.mrb[155].mxu1 }
 0x81e   : > { %v17910_v42 = vadd.f32 %v17909_v44, %v17908_v49  ;;  %v20349_v5 = vpack.i.bf16 %v15749_v2, %v15746_v52  ;;  %v15682_v39 = vadd.f32 %v17907_v50, %v24187_v18 }
 0x820   : > { %20350 = vrot.lane.b32.xlu1 %v20349_v5, %s20775_s18  ;;  %v15685_v9 = vadd.f32 %v17910_v42, %v24189_v43 }
 0x821   : > { %v15753_v41 = vpop.f32.mrb[16].mxu0 }
 0x822   : > { %v15754_v17 = vadd.f32 %v15753_v41, %v15666_v29  ;;  %v17911_v32 = vpop.f32.mrb[156].mxu1  ;;  %v19370_v38 = vpop.f32.mrb[17].mxu0 }
 0x823   : > { %v17912_v25 = vpop.f32.mrb[157].mxu1  ;;  %v15756_v56 = vpop.f32.mrb[18].mxu0 }
 0x824   : > { %v17913_v47 = vadd.f32 %v17912_v25, %v17911_v32  ;;  %v15757_v4 = vadd.f32 %v15756_v56, %v15669_v58  ;;  %v19371_v35 = vpop.f32.mrb[19].mxu0  ;;  %v17914_v21 = vpop.f32.mrb[158].mxu1 }
 0x825   : > { %v17915_v36 = vpop.f32.mrb[159].mxu1 }
 0x826   : > { %v20354_v3 = vpack.i.bf16 %v15757_v4, %v15754_v17  ;;  %v15690_v24 = vadd.f32 %v17913_v47, %v24191_v61 }
 0x828   : > { %20355 = vrot.lane.b32.xlu1 %v20354_v3, %s20775_s18 }
 0x829   : > { %v15761_v18 = vpop.f32.mrb[20].mxu0 }
 0x82a   : > { %v15762_v6 = vadd.f32 %v15761_v18, %v15674_v48  ;;  %v19374_v27 = vpop.f32.mrb[21].mxu0 }
 0x82b   : > { %v15764_v43 = vpop.f32.mrb[22].mxu0 }
 0x82c   : > { %v15765_v30 = vadd.f32 %v15764_v43, %v15677_v60  ;;  %v19375_v29 = vpop.f32.mrb[23].mxu0 }
 0x82e   : > { %v20359_v28 = vpack.i.bf16 %v15765_v30, %v15762_v6 }
 0x830   : > { %20360 = vrot.lane.b32.xlu0 %v20359_v28, %s20775_s18 }
 0x831   : > { %v15769_v45 = vpop.f32.mrb[24].mxu0 }
 0x832   : > { %v15770_v58 = vadd.f32 %v15769_v45, %v15682_v39  ;;  %v19378_v55 = vpop.f32.mrb[25].mxu0 }
 0x833   : > { %v15772_v40 = vpop.f32.mrb[26].mxu0 }
 0x834   : > { %v15773_v22 = vadd.f32 %v15772_v40, %v15685_v9  ;;  %v19379_v31 = vpop.f32.mrb[27].mxu0 }
 0x836   : > { %v20364_v7 = vpack.i.bf16 %v15773_v22, %v15770_v58 }
 0x838   : > { %20365 = vrot.lane.b32.xlu1 %v20364_v7, %s20775_s18 }
 0x839   : > { %v15777_v61 = vpop.f32.mrb[28].mxu0 }
 0x83a   : > { %v15778_v16 = vadd.f32 %v15777_v61, %v15690_v24  ;;  %v19382_v23 = vpop.f32.mrb[29].mxu0 }
 0x83b   : > { %v15780_v10 = vpop.f32.mrb[30].mxu0 }
 0x83c   : > { %15820 = vrot.lane.b32.xlu0 %v15778_v16, %s20775_s18  ;;  %v19383_v8 = vpop.f32.mrb[31].mxu0 }
 0x882   : > { %v20341_v53 = vpop.permute.xlu0 %20340 }
 0x883   : > { %v20343_v34 = vunpack.i.h.bf16 %v20341_v53  ;;  %v20342_v48 = vunpack.i.l.bf16 %v20341_v53 }
 0x885   : > { %v15835_v60 = vsel %vm5152_vm15, %v24148_v13, %v20342_v48  ;;  %v15836_v0 = vsel %vm5152_vm15, %v24150_v33, %v20343_v34 }
 0x886   : > { %v16837_v52 = vpack.c.bf16 %v15836_v0, %v15835_v60 }
 0x888   : > { %16838 = vst [vmem:[%s24210_s13] sm:$0xff] %v16837_v52  }
 0x88a   : > { %v20346_v46 = vpop.permute.xlu0 %20345 }
 0x88b   : > { %v20348_v15 = vunpack.i.h.bf16 %v20346_v46  ;;  %v20347_v11 = vunpack.i.l.bf16 %v20346_v46 }
 0x88d   : > { %v15837_v59 = vsel %vm5152_vm15, %v24154_v20, %v20347_v11  ;;  %v15838_v50 = vsel %vm5152_vm15, %v24156_v1, %v20348_v15 }
 0x88e   : > { %v16842_v2 = vpack.c.bf16 %v15838_v50, %v15837_v59 }
 0x890   : > { %16864 = vst [vmem:[%s24210_s13 + $0x8] sm:$0xff] %v16842_v2  }
 0x892   : > { %v20351_v49 = vpop.permute.xlu1 %20350 }
 0x893   : > { %v20353_v13 = vunpack.i.h.bf16 %v20351_v49  ;;  %v20352_v19 = vunpack.i.l.bf16 %v20351_v49 }
 0x895   : > { %v15839_v33 = vsel %vm5152_vm15, %v24160_v12, %v20352_v19  ;;  %v15840_v44 = vsel %vm5152_vm15, %v24162_v62, %v20353_v13 }
 0x896   : > { %v16847_v42 = vpack.c.bf16 %v15840_v44, %v15839_v33 }
 0x898   : > { %16865 = vst [vmem:[%s24210_s13 + $0x10] sm:$0xff] %v16847_v42  }
 0x89a   : > { %v20356_v5 = vpop.permute.xlu1 %20355 }
 0x89b   : > { %v20358_v20 = vunpack.i.h.bf16 %v20356_v5  ;;  %v20357_v39 = vunpack.i.l.bf16 %v20356_v5 }
 0x89d   : > { %v15841_v1 = vsel %vm5152_vm15, %v24166_v54, %v20357_v39  ;;  %v15842_v9 = vsel %vm5152_vm15, %v24168_v14, %v20358_v20 }
 0x89e   : > { %v16852_v41 = vpack.c.bf16 %v15842_v9, %v15841_v1 }
 0x8a0   : > { %16866 = vst [vmem:[%s24210_s13 + $0x18] sm:$0xff] %v16852_v41  }
 0x8a2   : > { %v20361_v17 = vpop.permute.xlu0 %20360 }
 0x8a3   : > { %v20363_v12 = vunpack.i.h.bf16 %v20361_v17  ;;  %v20362_v32 = vunpack.i.l.bf16 %v20361_v17 }
 0x8a5   : > { %v15843_v62 = vsel %vm5152_vm15, %v24171_v63, %v20362_v32  ;;  %v15844_v38 = vsel %vm5152_vm15, %v24173_v51, %v20363_v12 }
 0x8a6   : > { %v16857_v25 = vpack.c.bf16 %v15844_v38, %v15843_v62 }
 0x8a8   : > { %16867 = vst [vmem:[%s24210_s13 + $0x20] sm:$0xff] %v16857_v25  }
 0x8aa   : > { %v20366_v56 = vpop.permute.xlu1 %20365 }
 0x8ab   : > { %v20368_v54 = vunpack.i.h.bf16 %v20366_v56  ;;  %v20367_v47 = vunpack.i.l.bf16 %v20366_v56 }
 0x8ad   : > { %v15845_v14 = vsel %vm5152_vm15, %v24175_v57, %v20367_v47  ;;  %v15846_v4 = vsel %vm5152_vm15, %v24177_v37, %v20368_v54 }
 0x8ae   : > { %v16862_v35 = vpack.c.bf16 %v15846_v4, %v15845_v14  ;;  %v15821_v21 = vpop.permute.xlu0 %15820 }
 0x8af   : > { %v15847_v36 = vsel %vm5152_vm15, %v24179_v26, %v15821_v21 }
 0x8b0   : > { %16868 = vst [vmem:[%s24210_s13 + $0x28] sm:$0xff] %v16862_v35   ;;  %v16833_v63 = vpack.c.bf16 %v15847_v36, %v15847_v36 }
 0x8b2   : > { %15913 = vst [vmem:[%s24210_s13 + $0x30] sm:$0x1] %v16833_v63 }
 0x8b3 PF: > { %s20_s24 = sadd.s32 1, %s20764_s24  }
 0x8b4   : > { %p17_p6 = scmp.ge.s32.totalorder %s20_s24, 4  }
 0x8b6   :  { %19 = sbr.rel (!%p17_p6) target bundleno = 3 (0x3), region = 103 }
 0x8bd   :  { %15935 = vsyncpa [#allocation5], 1 }
 0x8be   :  { %15937 = vsyncpa [#allocation5 + $0x1], 1 }
 0x8bf   :  { %15938 = vsyncpa [#allocation7], 1 }
 0x8c0   :  { %15939 = vsyncpa [#allocation10], 1 }

// kernel: cnn_forward.3
= control target key start
LH: loop header
LB: loop body
LE: loop exit
PB: predicated region body
PF: predicated region fallthrough
CT: control target
= control target key end

     0   :  { %s6296_s18 = smov 0   ;;  %s6785_s0 = inlined_call_operand.vmem [shape: bf16[8,12544], index: 0, kind: input, shape index: {}]   ;;  %s6786_s1 = inlined_call_operand.vmem [shape: bf16[12544,128], index: 1, kind: input, shape index: {}]   ;;  %s6787_s2 = inlined_call_operand.vmem [shape: f32[1,128], index: 2, kind: input, shape index: {}]   ;;  %s6788_s3 = inlined_call_operand.vmem [shape: bf16[128,10], index: 3, kind: input, shape index: {}]   ;;  %s6789_s4 = inlined_call_operand.vmem [shape: f32[1,10], index: 4, kind: input, shape index: {}]   ;;  %s6790_s5 = inlined_call_operand.vmem [shape: f32[8,10], index: 5, kind: output, shape index: {}]  }
   0x1 LB: > { %s6302_s19 = sadd.s32 4294967295, %s6259_s18   ;;  %p4747_p0 = scmp.ge.s32.totalorder %s6259_s18, 1  ;;  %s6259_s18 = sphi %s6296_s18, %s15_s18  }
   0x2   : > { %p194_p1 = scmp.lt.s32.totalorder %s6259_s18, 3 }
   0x4   : > { %p195_p2 = pnand %p4747_p0, %p194_p1 }
   0x5   : > { %s222_s20 = smul.u32 (!%p195_p2), 49, %s6302_s19  ;;  %p4750_p5 = scmp.ne.s32.totalorder (!%p195_p2), %s6302_s19, 0 }
   0x6   : > { %198 = sbr.rel (%p195_p2) target bundleno = 886 (0x376), region = 40 }
   0x7   : > { %s228_s21 = smul.u32 (!%p195_p2), 784, %s6302_s19  ;;  %p223_p3 = scmp.lt.s32.totalorder (!%p195_p2), %s222_s20, 97 }
   0x9   : > { %p229_p4 = scmp.lt.s32.totalorder (!%p195_p2), %s228_s21, 1567 }
   0xd   : > { %s6792_s20 = smov (!%p223_p3, %s222_s20), 97  ;;  %s6794_s21 = smov (!%p229_p4, %s228_s21), 1567 }
   0xe   : > { %s4748_s22 = sshll.u32 %s6792_s20, 2  ;;  %s4749_s26 = sshll.u32 %s6794_s21, 2  ;;  %v6261_v0 = vmov (!%p4750_p5), 0.0  }
   0xf   : > { %s6311_s25 = scalar_lea.vmem %s6785_s0, %s4748_s22  ;;  %s6316_s29 = scalar_lea.vmem %s6786_s1, %s4749_s26  ;;  %239 = vst [vmem:[#allocation2] sm:$0xff] (!%p4750_p5), %v6261_v0 }
  0x10   : > { %238 = sbr.rel (%p4750_p5) target bundleno = 23 (0x17), region = 44 }
  0x17 PF: > { %v5804_v1 = vld [vmem:[%s6316_s29 + $0x40] sm:$0xff]   ;;  %v5808_v5 = vld [vmem:[%s6316_s29 + $0x48] sm:$0xff]   ;;  %v5812_v9 = vld [vmem:[%s6316_s29 + $0x50] sm:$0xff]   ;;  %vm6263_vm0 = vmmov 0   ;;  %p5192_p6 = scmp.ne.s32.totalorder %s6302_s19, 1 }
  0x18   : > { %v5805_v2 = vld [vmem:[%s6316_s29 + $0xc0] sm:$0xff]   ;;  %5205 = vmatprep.subr.bf16.mxu0 %v5804_v1  ;;  %v5809_v6 = vld [vmem:[%s6316_s29 + $0xc8] sm:$0xff]   ;;  %v5813_v10 = vld [vmem:[%s6316_s29 + $0xd0] sm:$0xff]   ;;  %vm6265_vm1 = vmmov (!%p5192_p6), 0   ;;  %vm4702_vm2 = vcmask (!%p5192_p6), 80896  }
  0x19   : > { %v5806_v3 = vld [vmem:[%s6316_s29] sm:$0xff]   ;;  %5227 = vmatprep.subr.bf16.mxu1 %v5805_v2  ;;  %v5810_v7 = vld [vmem:[%s6316_s29 + $0x8] sm:$0xff]   ;;  %v5814_v11 = vld [vmem:[%s6316_s29 + $0x10] sm:$0xff]  }
  0x1a   : > { %v5807_v4 = vld [vmem:[%s6316_s29 + $0x80] sm:$0xff]   ;;  %5206 = vmatpush3.bf16.msra.mxu0 %v5806_v3  ;;  %v5811_v8 = vld [vmem:[%s6316_s29 + $0x88] sm:$0xff]   ;;  %v5815_v12 = vld [vmem:[%s6316_s29 + $0x90] sm:$0xff]  }
  0x1b   : > { %5228 = vmatpush3.bf16.msra.mxu1 %v5807_v4  ;;  %5207 = vmatprep.subr.bf16.mxu0 %v5808_v5  ;;  %v5816_v13 = vld [vmem:[%s6316_s29 + $0x58] sm:$0xff]   ;;  %v5820_v17 = vld [vmem:[%s6316_s29 + $0x60] sm:$0xff]   ;;  %v5824_v21 = vld [vmem:[%s6316_s29 + $0x68] sm:$0xff]  }
  0x1c   : > { %5229 = vmatprep.subr.bf16.mxu1 %v5809_v6  ;;  %v5817_v14 = vld [vmem:[%s6316_s29 + $0xd8] sm:$0xff]   ;;  %v5821_v18 = vld [vmem:[%s6316_s29 + $0xe0] sm:$0xff]   ;;  %v5825_v22 = vld [vmem:[%s6316_s29 + $0xe8] sm:$0xff]  }
  0x1d   : > { %v5818_v15 = vld [vmem:[%s6316_s29 + $0x18] sm:$0xff]   ;;  %v5822_v19 = vld [vmem:[%s6316_s29 + $0x20] sm:$0xff]   ;;  %v5826_v23 = vld [vmem:[%s6316_s29 + $0x28] sm:$0xff]  }
  0x1e   : > { %5208 = vmatpush3.bf16.msra.mxu0 %v5810_v7  ;;  %v5819_v16 = vld [vmem:[%s6316_s29 + $0x98] sm:$0xff]   ;;  %v5823_v20 = vld [vmem:[%s6316_s29 + $0xa0] sm:$0xff]   ;;  %v5827_v24 = vld [vmem:[%s6316_s29 + $0xa8] sm:$0xff]  }
  0x1f   : > { %5230 = vmatpush3.bf16.msra.mxu1 %v5811_v8  ;;  %5209 = vmatprep.subr.bf16.mxu0 %v5812_v9  ;;  %v5828_v25 = vld [vmem:[%s6316_s29 + $0x70] sm:$0xff]   ;;  %v5832_v29 = vld [vmem:[%s6316_s29 + $0x78] sm:$0xff]   ;;  %v241_v33 = vld [vmem:[%s6311_s25] sm:$0xff] }
  0x20   : > { %5231 = vmatprep.subr.bf16.mxu1 %v5813_v10  ;;  %v5829_v26 = vld [vmem:[%s6316_s29 + $0xf0] sm:$0xff]   ;;  %v5833_v30 = vld [vmem:[%s6316_s29 + $0xf8] sm:$0xff]   ;;  %v242_v34 = vld [vmem:[%s6311_s25 + $0x8] sm:$0xff]  ;;  %v4751_v35 = vcombine.low %v241_v33, %v241_v33  ;;  %v4752_v36 = vcombine.high %v241_v33, %v241_v33 }
  0x21   : > { %v5830_v27 = vld [vmem:[%s6316_s29 + $0x30] sm:$0xff]   ;;  %v5834_v31 = vld [vmem:[%s6316_s29 + $0x38] sm:$0xff]   ;;  %v4753_v37 = vcombine.low %v242_v34, %v242_v34  ;;  %v4754_v38 = vcombine.high %v242_v34, %v242_v34  ;;  %v5840_v39 = vld [vmem:[%s6316_s29 + $0x140] sm:$0xff]  }
  0x22   : > { %5210 = vmatpush3.bf16.msra.mxu0 %v5814_v11  ;;  %v5831_v28 = vld [vmem:[%s6316_s29 + $0xb0] sm:$0xff]   ;;  %v5835_v32 = vld [vmem:[%s6316_s29 + $0xb8] sm:$0xff]   ;;  %v5841_v40 = vld [vmem:[%s6316_s29 + $0x100] sm:$0xff]   ;;  %3606 = vmatprep.mubr.bf16.mxu0 %v4752_v36 }
  0x23   : > { %5232 = vmatpush3.bf16.msra.mxu1 %v5815_v12  ;;  %5211 = vmatprep.subr.bf16.mxu0 %v5816_v13  ;;  %v5842_v41 = vld [vmem:[%s6316_s29 + $0x1c0] sm:$0xff]   ;;  %v5844_v43 = vld [vmem:[%s6316_s29 + $0x148] sm:$0xff]   ;;  %v5848_v47 = vld [vmem:[%s6316_s29 + $0x150] sm:$0xff]  }
  0x24   : > { %5233 = vmatprep.subr.bf16.mxu1 %v5817_v14  ;;  %3646 = vmatprep.mubr.bf16.mxu1 %v4754_v38  ;;  %v5843_v42 = vld [vmem:[%s6316_s29 + $0x180] sm:$0xff]   ;;  %v5845_v44 = vld [vmem:[%s6316_s29 + $0x108] sm:$0xff]   ;;  %v5849_v48 = vld [vmem:[%s6316_s29 + $0x110] sm:$0xff]  }
  0x25   : > { %v5846_v45 = vld [vmem:[%s6316_s29 + $0x1c8] sm:$0xff]   ;;  %v5850_v49 = vld [vmem:[%s6316_s29 + $0x1d0] sm:$0xff]   ;;  %v5852_v51 = vld [vmem:[%s6316_s29 + $0x158] sm:$0xff]  }
  0x26   : > { %5212 = vmatpush3.bf16.msra.mxu0 %v5818_v15  ;;  %v5847_v46 = vld [vmem:[%s6316_s29 + $0x188] sm:$0xff]   ;;  %v5851_v50 = vld [vmem:[%s6316_s29 + $0x190] sm:$0xff]   ;;  %v5853_v52 = vld [vmem:[%s6316_s29 + $0x118] sm:$0xff]  }
  0x27   : > { %5234 = vmatpush3.bf16.msra.mxu1 %v5819_v16  ;;  %5213 = vmatprep.subr.bf16.mxu0 %v5820_v17  ;;  %v5854_v53 = vld [vmem:[%s6316_s29 + $0x1d8] sm:$0xff]   ;;  %v5856_v55 = vld [vmem:[%s6316_s29 + $0x160] sm:$0xff]   ;;  %v5860_v59 = vld [vmem:[%s6316_s29 + $0x168] sm:$0xff]  }
  0x28   : > { %5235 = vmatprep.subr.bf16.mxu1 %v5821_v18  ;;  %v5855_v54 = vld [vmem:[%s6316_s29 + $0x198] sm:$0xff]   ;;  %v5857_v56 = vld [vmem:[%s6316_s29 + $0x120] sm:$0xff]   ;;  %v5861_v60 = vld [vmem:[%s6316_s29 + $0x128] sm:$0xff]  }
  0x29   : > { %v5858_v57 = vld [vmem:[%s6316_s29 + $0x1e0] sm:$0xff]   ;;  %v5862_v61 = vld [vmem:[%s6316_s29 + $0x1e8] sm:$0xff]   ;;  %v5864_v63 = vld [vmem:[%s6316_s29 + $0x170] sm:$0xff]  }
  0x2a   : > { %5214 = vmatpush3.bf16.msra.mxu0 %v5822_v19  ;;  %v5859_v58 = vld [vmem:[%s6316_s29 + $0x1a0] sm:$0xff]   ;;  %v5863_v62 = vld [vmem:[%s6316_s29 + $0x1a8] sm:$0xff]   ;;  %v5865_v0 = vld [vmem:[%s6316_s29 + $0x130] sm:$0xff]  }
  0x2b   : > { %5236 = vmatpush3.bf16.msra.mxu1 %v5823_v20  ;;  %5215 = vmatprep.subr.bf16.mxu0 %v5824_v21  ;;  %v5866_v1 = vld [vmem:[%s6316_s29 + $0x1f0] sm:$0xff]   ;;  %v5868_v3 = vld [vmem:[%s6316_s29 + $0x178] sm:$0xff]   ;;  %v5874_v10 = vld [vmem:[%s6316_s29 + $0x240] sm:$0xff]  }
  0x2c   : > { %5237 = vmatprep.subr.bf16.mxu1 %v5825_v22  ;;  %v5867_v2 = vld [vmem:[%s6316_s29 + $0x1b0] sm:$0xff]   ;;  %v5869_v4 = vld [vmem:[%s6316_s29 + $0x138] sm:$0xff]   ;;  %v5877_v14 = vld [vmem:[%s6316_s29 + $0x200] sm:$0xff]  }
  0x2d   : > { %v5870_v5 = vld [vmem:[%s6316_s29 + $0x1f8] sm:$0xff]   ;;  %v243_v6 = vld [vmem:[%s6311_s25 + $0x10] sm:$0xff]  ;;  %v5878_v15 = vld [vmem:[%s6316_s29 + $0x2c0] sm:$0xff]  }
  0x2e   : > { %5216 = vmatpush3.bf16.msra.mxu0 %v5826_v23  ;;  %v4756_v7 = vcombine.high %v243_v6, %v243_v6  ;;  %v5873_v8 = vld [vmem:[%s6316_s29 + $0x1b8] sm:$0xff]   ;;  %v4755_v9 = vcombine.low %v243_v6, %v243_v6  ;;  %v5879_v16 = vld [vmem:[%s6316_s29 + $0x280] sm:$0xff]   ;;  %v5880_v17 = vld [vmem:[%s6316_s29 + $0x248] sm:$0xff]  }
  0x2f   : > { %5238 = vmatpush3.bf16.msra.mxu1 %v5827_v24  ;;  %5217 = vmatprep.subr.bf16.mxu0 %v5828_v25  ;;  %v244_v11 = vld [vmem:[%s6311_s25 + $0x18] sm:$0xff]  ;;  %v5881_v18 = vld [vmem:[%s6316_s29 + $0x208] sm:$0xff]   ;;  %v5884_v21 = vld [vmem:[%s6316_s29 + $0x250] sm:$0xff]  }
  0x30   : > { %5239 = vmatprep.subr.bf16.mxu1 %v5829_v26  ;;  %v4757_v12 = vcombine.low %v244_v11, %v244_v11  ;;  %v4758_v13 = vcombine.high %v244_v11, %v244_v11  ;;  %v5882_v19 = vld [vmem:[%s6316_s29 + $0x2c8] sm:$0xff]   ;;  %v5885_v22 = vld [vmem:[%s6316_s29 + $0x210] sm:$0xff]   ;;  %v5888_v25 = vld [vmem:[%s6316_s29 + $0x258] sm:$0xff]  }
  0x31   : > { %v5883_v20 = vld [vmem:[%s6316_s29 + $0x288] sm:$0xff]   ;;  %v5886_v23 = vld [vmem:[%s6316_s29 + $0x2d0] sm:$0xff]   ;;  %v5889_v26 = vld [vmem:[%s6316_s29 + $0x218] sm:$0xff]  }
  0x32   : > { %5218 = vmatpush3.bf16.msra.mxu0 %v5830_v27  ;;  %v5887_v24 = vld [vmem:[%s6316_s29 + $0x290] sm:$0xff]   ;;  %v5890_v27 = vld [vmem:[%s6316_s29 + $0x2d8] sm:$0xff]   ;;  %v5896_v33 = vld [vmem:[%s6316_s29 + $0x268] sm:$0xff]  }
  0x33   : > { %5240 = vmatpush3.bf16.msra.mxu1 %v5831_v28  ;;  %5219 = vmatprep.subr.bf16.mxu0 %v5832_v29  ;;  %v5891_v28 = vld [vmem:[%s6316_s29 + $0x298] sm:$0xff]   ;;  %v5892_v29 = vld [vmem:[%s6316_s29 + $0x260] sm:$0xff]   ;;  %v5897_v34 = vld [vmem:[%s6316_s29 + $0x228] sm:$0xff]  }
  0x34   : > { %5241 = vmatprep.subr.bf16.mxu1 %v5833_v30  ;;  %v5893_v30 = vld [vmem:[%s6316_s29 + $0x220] sm:$0xff]   ;;  %v5899_v36 = vld [vmem:[%s6316_s29 + $0x2a8] sm:$0xff]   ;;  %v5901_v38 = vld [vmem:[%s6316_s29 + $0x230] sm:$0xff]  }
  0x35   : > { %v5931_v6 = vld [vmem:[%s6316_s29 + $0x3a0] sm:$0xff]   ;;  %v5936_v11 = vld [vmem:[%s6316_s29 + $0x370] sm:$0xff]  }
  0x36   : > { %5220 = vmatpush3.bf16.msra.mxu0 %v5834_v31  ;;  %v5894_v31 = vld [vmem:[%s6316_s29 + $0x2e0] sm:$0xff]  }
  0x37   : > { %5242 = vmatpush3.bf16.msra.mxu1 %v5835_v32  ;;  %5249 = vmatprep.subr.bf16.mxu0 %v5840_v39  ;;  %v5895_v32 = vld [vmem:[%s6316_s29 + $0x2a0] sm:$0xff]   ;;  %v5902_v39 = vld [vmem:[%s6316_s29 + $0x2f0] sm:$0xff]  }
  0x38   : > { %5271 = vmatprep.subr.bf16.mxu1 %v5842_v41  ;;  %v5904_v41 = vld [vmem:[%s6316_s29 + $0x278] sm:$0xff]  }
  0x39   : > { %3607 = vmatmul.mubr.bf16.vlgmr.msra.gmra.mrb[0].mxu0 %v4751_v35  ;;  %v5898_v35 = vld [vmem:[%s6316_s29 + $0x2e8] sm:$0xff]  }
  0x3a   : > { %3647 = vmatmul.mubr.bf16.vlgmr.msra.gmra.mrb[0].mxu1 %v4753_v37  ;;  %5250 = vmatpush3.bf16.msra.mxu0 %v5841_v40  ;;  %v5900_v37 = vld [vmem:[%s6316_s29 + $0x270] sm:$0xff]  }
  0x3b   : > { %5272 = vmatpush3.bf16.msra.mxu1 %v5843_v42  ;;  %5251 = vmatprep.subr.bf16.mxu0 %v5844_v43  ;;  %v5903_v40 = vld [vmem:[%s6316_s29 + $0x2b0] sm:$0xff]   ;;  %v5905_v42 = vld [vmem:[%s6316_s29 + $0x238] sm:$0xff]  }
  0x3c   : > { %5273 = vmatprep.subr.bf16.mxu1 %v5846_v45  ;;  %3686 = vmatprep.mubr.bf16.mxu0 %v4756_v7  ;;  %v5906_v43 = vld [vmem:[%s6316_s29 + $0x2f8] sm:$0xff]   ;;  %v5932_v7 = vld [vmem:[%s6316_s29 + $0x368] sm:$0xff]  }
  0x3d   : > { %3726 = vmatprep.mubr.bf16.mxu1 %v4758_v13  ;;  %v5938_v13 = vld [vmem:[%s6316_s29 + $0x3f0] sm:$0xff]  }
  0x3e   : > { %5252 = vmatpush3.bf16.msra.mxu0 %v5845_v44  ;;  %v245_v44 = vld [vmem:[%s6311_s25 + $0x20] sm:$0xff] }
  0x3f   : > { %5274 = vmatpush3.bf16.msra.mxu1 %v5847_v46  ;;  %5253 = vmatprep.subr.bf16.mxu0 %v5848_v47  ;;  %v4759_v45 = vcombine.low %v245_v44, %v245_v44  ;;  %v4760_v46 = vcombine.high %v245_v44, %v245_v44  ;;  %v5909_v47 = vld [vmem:[%s6316_s29 + $0x2b8] sm:$0xff]   ;;  %v5967_v44 = vld [vmem:[%s6316_s29 + $0x4a0] sm:$0xff]  }
  0x40   : > { %5275 = vmatprep.subr.bf16.mxu1 %v5850_v49  ;;  %v246_v49 = vld [vmem:[%s6311_s25 + $0x28] sm:$0xff] }
  0x42   : > { %5254 = vmatpush3.bf16.msra.mxu0 %v5849_v48  ;;  %v5910_v48 = vld [vmem:[%s6316_s29 + $0x340] sm:$0xff]  }
  0x43   : > { %5276 = vmatpush3.bf16.msra.mxu1 %v5851_v50  ;;  %5255 = vmatprep.subr.bf16.mxu0 %v5852_v51  ;;  %v4761_v50 = vcombine.low %v246_v49, %v246_v49  ;;  %v4762_v51 = vcombine.high %v246_v49, %v246_v49  ;;  %v5972_v49 = vld [vmem:[%s6316_s29 + $0x470] sm:$0xff]  }
  0x44   : > { %5277 = vmatprep.subr.bf16.mxu1 %v5854_v53  ;;  %v5914_v53 = vld [vmem:[%s6316_s29 + $0x3c0] sm:$0xff]  }
  0x46   : > { %5256 = vmatpush3.bf16.msra.mxu0 %v5853_v52  ;;  %v5913_v52 = vld [vmem:[%s6316_s29 + $0x300] sm:$0xff]  }
  0x47   : > { %5278 = vmatpush3.bf16.msra.mxu1 %v5855_v54  ;;  %5257 = vmatprep.subr.bf16.mxu0 %v5856_v55  ;;  %v5915_v54 = vld [vmem:[%s6316_s29 + $0x380] sm:$0xff]   ;;  %v5916_v55 = vld [vmem:[%s6316_s29 + $0x348] sm:$0xff]  }
  0x48   : > { %5279 = vmatprep.subr.bf16.mxu1 %v5858_v57  ;;  %v5918_v57 = vld [vmem:[%s6316_s29 + $0x3c8] sm:$0xff]  }
  0x4a   : > { %5258 = vmatpush3.bf16.msra.mxu0 %v5857_v56  ;;  %v5917_v56 = vld [vmem:[%s6316_s29 + $0x308] sm:$0xff]  }
  0x4b   : > { %5280 = vmatpush3.bf16.msra.mxu1 %v5859_v58  ;;  %5259 = vmatprep.subr.bf16.mxu0 %v5860_v59  ;;  %v5919_v58 = vld [vmem:[%s6316_s29 + $0x388] sm:$0xff]   ;;  %v5920_v59 = vld [vmem:[%s6316_s29 + $0x350] sm:$0xff]  }
  0x4c   : > { %5281 = vmatprep.subr.bf16.mxu1 %v5862_v61  ;;  %v5922_v61 = vld [vmem:[%s6316_s29 + $0x3d0] sm:$0xff]  }
  0x4e   : > { %5260 = vmatpush3.bf16.msra.mxu0 %v5861_v60  ;;  %v5921_v60 = vld [vmem:[%s6316_s29 + $0x310] sm:$0xff]  }
  0x4f   : > { %5282 = vmatpush3.bf16.msra.mxu1 %v5863_v62  ;;  %5261 = vmatprep.subr.bf16.mxu0 %v5864_v63  ;;  %v5923_v62 = vld [vmem:[%s6316_s29 + $0x390] sm:$0xff]   ;;  %v5924_v63 = vld [vmem:[%s6316_s29 + $0x358] sm:$0xff]  }
  0x50   : > { %5283 = vmatprep.subr.bf16.mxu1 %v5866_v1  ;;  %v5926_v1 = vld [vmem:[%s6316_s29 + $0x3d8] sm:$0xff]  }
  0x52   : > { %5262 = vmatpush3.bf16.msra.mxu0 %v5865_v0  ;;  %v5925_v0 = vld [vmem:[%s6316_s29 + $0x318] sm:$0xff]  }
  0x53   : > { %5284 = vmatpush3.bf16.msra.mxu1 %v5867_v2  ;;  %5263 = vmatprep.subr.bf16.mxu0 %v5868_v3  ;;  %v5927_v2 = vld [vmem:[%s6316_s29 + $0x398] sm:$0xff]   ;;  %v5928_v3 = vld [vmem:[%s6316_s29 + $0x360] sm:$0xff]  }
  0x54   : > { %5285 = vmatprep.subr.bf16.mxu1 %v5870_v5  ;;  %v5930_v5 = vld [vmem:[%s6316_s29 + $0x3e0] sm:$0xff]  }
  0x56   : > { %5264 = vmatpush3.bf16.msra.mxu0 %v5869_v4  ;;  %v5929_v4 = vld [vmem:[%s6316_s29 + $0x320] sm:$0xff]  }
  0x57   : > { %5286 = vmatpush3.bf16.msra.mxu1 %v5873_v8  ;;  %5293 = vmatprep.subr.bf16.mxu0 %v5874_v10  ;;  %v5933_v8 = vld [vmem:[%s6316_s29 + $0x328] sm:$0xff]  }
  0x58   : > { %5315 = vmatprep.subr.bf16.mxu1 %v5878_v15  ;;  %v5935_v10 = vld [vmem:[%s6316_s29 + $0x3a8] sm:$0xff]   ;;  %v5940_v15 = vld [vmem:[%s6316_s29 + $0x378] sm:$0xff]  }
  0x59   : > { %3687 = vmatmul.mubr.bf16.vlgmr.msra.gmra.mrb[4].mxu0 %v4755_v9  ;;  %v5934_v9 = vld [vmem:[%s6316_s29 + $0x3e8] sm:$0xff]  }
  0x5a   : > { %5294 = vmatpush3.bf16.msra.mxu0 %v5877_v14  ;;  %3727 = vmatmul.mubr.bf16.vlgmr.msra.gmra.mrb[4].mxu1 %v4757_v12  ;;  %v5937_v12 = vld [vmem:[%s6316_s29 + $0x330] sm:$0xff]  }
  0x5b   : > { %5316 = vmatpush3.bf16.msra.mxu1 %v5879_v16  ;;  %5295 = vmatprep.subr.bf16.mxu0 %v5880_v17  ;;  %v5939_v14 = vld [vmem:[%s6316_s29 + $0x3b0] sm:$0xff]   ;;  %v5941_v16 = vld [vmem:[%s6316_s29 + $0x338] sm:$0xff]  }
  0x5c   : > { %5317 = vmatprep.subr.bf16.mxu1 %v5882_v19  ;;  %3766 = vmatprep.mubr.bf16.mxu0 %v4760_v46  ;;  %v5942_v17 = vld [vmem:[%s6316_s29 + $0x3f8] sm:$0xff]   ;;  %v5969_v46 = vld [vmem:[%s6316_s29 + $0x428] sm:$0xff]  }
  0x5d   : > { %3806 = vmatprep.mubr.bf16.mxu1 %v4762_v51  ;;  %v5974_v51 = vld [vmem:[%s6316_s29 + $0x4f0] sm:$0xff]  }
  0x5e   : > { %5296 = vmatpush3.bf16.msra.mxu0 %v5881_v18  ;;  %v247_v18 = vld [vmem:[%s6311_s25 + $0x30] sm:$0xff] }
  0x5f   : > { %5318 = vmatpush3.bf16.msra.mxu1 %v5883_v20  ;;  %5297 = vmatprep.subr.bf16.mxu0 %v5884_v21  ;;  %v4763_v19 = vcombine.low %v247_v18, %v247_v18  ;;  %v4764_v20 = vcombine.high %v247_v18, %v247_v18  ;;  %v5945_v21 = vld [vmem:[%s6316_s29 + $0x3b8] sm:$0xff]   ;;  %v6003_v18 = vld [vmem:[%s6316_s29 + $0x5a0] sm:$0xff]  }
  0x60   : > { %5319 = vmatprep.subr.bf16.mxu1 %v5886_v23  ;;  %v248_v23 = vld [vmem:[%s6311_s25 + $0x38] sm:$0xff] }
  0x62   : > { %5298 = vmatpush3.bf16.msra.mxu0 %v5885_v22  ;;  %v5946_v22 = vld [vmem:[%s6316_s29 + $0x440] sm:$0xff]  }
  0x63   : > { %5320 = vmatpush3.bf16.msra.mxu1 %v5887_v24  ;;  %5299 = vmatprep.subr.bf16.mxu0 %v5888_v25  ;;  %v4765_v24 = vcombine.low %v248_v23, %v248_v23  ;;  %v4766_v25 = vcombine.high %v248_v23, %v248_v23  ;;  %v6008_v23 = vld [vmem:[%s6316_s29 + $0x570] sm:$0xff]  }
  0x64   : > { %5321 = vmatprep.subr.bf16.mxu1 %v5890_v27  ;;  %v5950_v27 = vld [vmem:[%s6316_s29 + $0x4c0] sm:$0xff]  }
  0x66   : > { %5300 = vmatpush3.bf16.msra.mxu0 %v5889_v26  ;;  %v5949_v26 = vld [vmem:[%s6316_s29 + $0x400] sm:$0xff]  }
  0x67   : > { %5322 = vmatpush3.bf16.msra.mxu1 %v5891_v28  ;;  %5301 = vmatprep.subr.bf16.mxu0 %v5892_v29  ;;  %v5951_v28 = vld [vmem:[%s6316_s29 + $0x480] sm:$0xff]   ;;  %v5952_v29 = vld [vmem:[%s6316_s29 + $0x448] sm:$0xff]  }
  0x68   : > { %5323 = vmatprep.subr.bf16.mxu1 %v5894_v31  ;;  %v5954_v31 = vld [vmem:[%s6316_s29 + $0x4c8] sm:$0xff]  }
  0x6a   : > { %5302 = vmatpush3.bf16.msra.mxu0 %v5893_v30  ;;  %v5953_v30 = vld [vmem:[%s6316_s29 + $0x408] sm:$0xff]  }
  0x6b   : > { %5324 = vmatpush3.bf16.msra.mxu1 %v5895_v32  ;;  %5303 = vmatprep.subr.bf16.mxu0 %v5896_v33  ;;  %v5955_v32 = vld [vmem:[%s6316_s29 + $0x488] sm:$0xff]   ;;  %v5956_v33 = vld [vmem:[%s6316_s29 + $0x450] sm:$0xff]  }
  0x6c   : > { %5325 = vmatprep.subr.bf16.mxu1 %v5898_v35  ;;  %v5958_v35 = vld [vmem:[%s6316_s29 + $0x4d0] sm:$0xff]  }
  0x6e   : > { %5304 = vmatpush3.bf16.msra.mxu0 %v5897_v34  ;;  %v5957_v34 = vld [vmem:[%s6316_s29 + $0x410] sm:$0xff]  }
  0x6f   : > { %5326 = vmatpush3.bf16.msra.mxu1 %v5899_v36  ;;  %5305 = vmatprep.subr.bf16.mxu0 %v5900_v37  ;;  %v5959_v36 = vld [vmem:[%s6316_s29 + $0x490] sm:$0xff]   ;;  %v5960_v37 = vld [vmem:[%s6316_s29 + $0x458] sm:$0xff]  }
  0x70   : > { %5327 = vmatprep.subr.bf16.mxu1 %v5902_v39  ;;  %v5962_v39 = vld [vmem:[%s6316_s29 + $0x4d8] sm:$0xff]  }
  0x72   : > { %5306 = vmatpush3.bf16.msra.mxu0 %v5901_v38  ;;  %v5961_v38 = vld [vmem:[%s6316_s29 + $0x418] sm:$0xff]  }
  0x73   : > { %5328 = vmatpush3.bf16.msra.mxu1 %v5903_v40  ;;  %5307 = vmatprep.subr.bf16.mxu0 %v5904_v41  ;;  %v5963_v40 = vld [vmem:[%s6316_s29 + $0x498] sm:$0xff]   ;;  %v5964_v41 = vld [vmem:[%s6316_s29 + $0x460] sm:$0xff]  }
  0x74   : > { %5329 = vmatprep.subr.bf16.mxu1 %v5906_v43  ;;  %v5966_v43 = vld [vmem:[%s6316_s29 + $0x4e0] sm:$0xff]  }
  0x76   : > { %5308 = vmatpush3.bf16.msra.mxu0 %v5905_v42  ;;  %v5965_v42 = vld [vmem:[%s6316_s29 + $0x420] sm:$0xff]  }
  0x77   : > { %5330 = vmatpush3.bf16.msra.mxu1 %v5909_v47  ;;  %5337 = vmatprep.subr.bf16.mxu0 %v5910_v48  ;;  %v5970_v47 = vld [vmem:[%s6316_s29 + $0x4e8] sm:$0xff]  }
  0x78   : > { %5359 = vmatprep.subr.bf16.mxu1 %v5914_v53  ;;  %v5971_v48 = vld [vmem:[%s6316_s29 + $0x4a8] sm:$0xff]   ;;  %v5976_v53 = vld [vmem:[%s6316_s29 + $0x478] sm:$0xff]  }
  0x79   : > { %3767 = vmatmul.mubr.bf16.vlgmr.msra.gmra.mrb[8].mxu0 %v4759_v45  ;;  %v5968_v45 = vld [vmem:[%s6316_s29 + $0x468] sm:$0xff]  }
  0x7a   : > { %5338 = vmatpush3.bf16.msra.mxu0 %v5913_v52  ;;  %3807 = vmatmul.mubr.bf16.vlgmr.msra.gmra.mrb[8].mxu1 %v4761_v50  ;;  %v5973_v50 = vld [vmem:[%s6316_s29 + $0x430] sm:$0xff]  }
  0x7b   : > { %5360 = vmatpush3.bf16.msra.mxu1 %v5915_v54  ;;  %5339 = vmatprep.subr.bf16.mxu0 %v5916_v55  ;;  %v5975_v52 = vld [vmem:[%s6316_s29 + $0x4b0] sm:$0xff]   ;;  %v5977_v54 = vld [vmem:[%s6316_s29 + $0x438] sm:$0xff]  }
  0x7c   : > { %5361 = vmatprep.subr.bf16.mxu1 %v5918_v57  ;;  %3846 = vmatprep.mubr.bf16.mxu0 %v4764_v20  ;;  %v5978_v55 = vld [vmem:[%s6316_s29 + $0x4f8] sm:$0xff]   ;;  %v6005_v20 = vld [vmem:[%s6316_s29 + $0x528] sm:$0xff]  }
  0x7d   : > { %3886 = vmatprep.mubr.bf16.mxu1 %v4766_v25  ;;  %v6010_v25 = vld [vmem:[%s6316_s29 + $0x5f0] sm:$0xff]  }
  0x7e   : > { %5340 = vmatpush3.bf16.msra.mxu0 %v5917_v56  ;;  %v249_v56 = vld [vmem:[%s6311_s25 + $0x40] sm:$0xff] }
  0x7f   : > { %5362 = vmatpush3.bf16.msra.mxu1 %v5919_v58  ;;  %5341 = vmatprep.subr.bf16.mxu0 %v5920_v59  ;;  %v4767_v57 = vcombine.low %v249_v56, %v249_v56  ;;  %v4768_v58 = vcombine.high %v249_v56, %v249_v56  ;;  %v5981_v59 = vld [vmem:[%s6316_s29 + $0x4b8] sm:$0xff]   ;;  %v6039_v56 = vld [vmem:[%s6316_s29 + $0x6a0] sm:$0xff]  }
  0x80   : > { %5363 = vmatprep.subr.bf16.mxu1 %v5922_v61  ;;  %v250_v61 = vld [vmem:[%s6311_s25 + $0x48] sm:$0xff] }
  0x82   : > { %5342 = vmatpush3.bf16.msra.mxu0 %v5921_v60  ;;  %v5982_v60 = vld [vmem:[%s6316_s29 + $0x540] sm:$0xff]  }
  0x83   : > { %5364 = vmatpush3.bf16.msra.mxu1 %v5923_v62  ;;  %5343 = vmatprep.subr.bf16.mxu0 %v5924_v63  ;;  %v4769_v62 = vcombine.low %v250_v61, %v250_v61  ;;  %v4770_v63 = vcombine.high %v250_v61, %v250_v61  ;;  %v6044_v61 = vld [vmem:[%s6316_s29 + $0x670] sm:$0xff]  }
  0x84   : > { %5365 = vmatprep.subr.bf16.mxu1 %v5926_v1  ;;  %v5986_v1 = vld [vmem:[%s6316_s29 + $0x5c0] sm:$0xff]  }
  0x86   : > { %5344 = vmatpush3.bf16.msra.mxu0 %v5925_v0  ;;  %v5985_v0 = vld [vmem:[%s6316_s29 + $0x500] sm:$0xff]  }
  0x87   : > { %5366 = vmatpush3.bf16.msra.mxu1 %v5927_v2  ;;  %5345 = vmatprep.subr.bf16.mxu0 %v5928_v3  ;;  %v5987_v2 = vld [vmem:[%s6316_s29 + $0x580] sm:$0xff]   ;;  %v5988_v3 = vld [vmem:[%s6316_s29 + $0x548] sm:$0xff]  }
  0x88   : > { %5367 = vmatprep.subr.bf16.mxu1 %v5930_v5  ;;  %v5990_v5 = vld [vmem:[%s6316_s29 + $0x5c8] sm:$0xff]  }
  0x8a   : > { %5346 = vmatpush3.bf16.msra.mxu0 %v5929_v4  ;;  %v5989_v4 = vld [vmem:[%s6316_s29 + $0x508] sm:$0xff]  }
  0x8b   : > { %5368 = vmatpush3.bf16.msra.mxu1 %v5931_v6  ;;  %5347 = vmatprep.subr.bf16.mxu0 %v5932_v7  ;;  %v5991_v6 = vld [vmem:[%s6316_s29 + $0x588] sm:$0xff]   ;;  %v5992_v7 = vld [vmem:[%s6316_s29 + $0x550] sm:$0xff]  }
  0x8c   : > { %5369 = vmatprep.subr.bf16.mxu1 %v5934_v9  ;;  %v5994_v9 = vld [vmem:[%s6316_s29 + $0x5d0] sm:$0xff]  }
  0x8e   : > { %5348 = vmatpush3.bf16.msra.mxu0 %v5933_v8  ;;  %v5993_v8 = vld [vmem:[%s6316_s29 + $0x510] sm:$0xff]  }
  0x8f   : > { %5370 = vmatpush3.bf16.msra.mxu1 %v5935_v10  ;;  %5349 = vmatprep.subr.bf16.mxu0 %v5936_v11  ;;  %v5995_v10 = vld [vmem:[%s6316_s29 + $0x590] sm:$0xff]   ;;  %v5996_v11 = vld [vmem:[%s6316_s29 + $0x558] sm:$0xff]  }
  0x90   : > { %5371 = vmatprep.subr.bf16.mxu1 %v5938_v13  ;;  %v5998_v13 = vld [vmem:[%s6316_s29 + $0x5d8] sm:$0xff]  }
  0x92   : > { %5350 = vmatpush3.bf16.msra.mxu0 %v5937_v12  ;;  %v5997_v12 = vld [vmem:[%s6316_s29 + $0x518] sm:$0xff]  }
  0x93   : > { %5372 = vmatpush3.bf16.msra.mxu1 %v5939_v14  ;;  %5351 = vmatprep.subr.bf16.mxu0 %v5940_v15  ;;  %v5999_v14 = vld [vmem:[%s6316_s29 + $0x598] sm:$0xff]   ;;  %v6000_v15 = vld [vmem:[%s6316_s29 + $0x560] sm:$0xff]  }
  0x94   : > { %5373 = vmatprep.subr.bf16.mxu1 %v5942_v17  ;;  %v6002_v17 = vld [vmem:[%s6316_s29 + $0x5e0] sm:$0xff]  }
  0x96   : > { %5352 = vmatpush3.bf16.msra.mxu0 %v5941_v16  ;;  %v6001_v16 = vld [vmem:[%s6316_s29 + $0x520] sm:$0xff]  }
  0x97   : > { %5374 = vmatpush3.bf16.msra.mxu1 %v5945_v21  ;;  %5381 = vmatprep.subr.bf16.mxu0 %v5946_v22  ;;  %v6006_v21 = vld [vmem:[%s6316_s29 + $0x5e8] sm:$0xff]  }
  0x98   : > { %5403 = vmatprep.subr.bf16.mxu1 %v5950_v27  ;;  %v6007_v22 = vld [vmem:[%s6316_s29 + $0x5a8] sm:$0xff]   ;;  %v6012_v27 = vld [vmem:[%s6316_s29 + $0x578] sm:$0xff]  }
  0x99   : > { %3847 = vmatmul.mubr.bf16.vlgmr.msra.gmra.mrb[12].mxu0 %v4763_v19  ;;  %v6004_v19 = vld [vmem:[%s6316_s29 + $0x568] sm:$0xff]  }
  0x9a   : > { %5382 = vmatpush3.bf16.msra.mxu0 %v5949_v26  ;;  %3887 = vmatmul.mubr.bf16.vlgmr.msra.gmra.mrb[12].mxu1 %v4765_v24  ;;  %v6009_v24 = vld [vmem:[%s6316_s29 + $0x530] sm:$0xff]  }
  0x9b   : > { %5404 = vmatpush3.bf16.msra.mxu1 %v5951_v28  ;;  %5383 = vmatprep.subr.bf16.mxu0 %v5952_v29  ;;  %v6011_v26 = vld [vmem:[%s6316_s29 + $0x5b0] sm:$0xff]   ;;  %v6013_v28 = vld [vmem:[%s6316_s29 + $0x538] sm:$0xff]  }
  0x9c   : > { %5405 = vmatprep.subr.bf16.mxu1 %v5954_v31  ;;  %3926 = vmatprep.mubr.bf16.mxu0 %v4768_v58  ;;  %v6014_v29 = vld [vmem:[%s6316_s29 + $0x5f8] sm:$0xff]   ;;  %v6041_v58 = vld [vmem:[%s6316_s29 + $0x628] sm:$0xff]  }
  0x9d   : > { %3966 = vmatprep.mubr.bf16.mxu1 %v4770_v63  ;;  %v6046_v63 = vld [vmem:[%s6316_s29 + $0x6f0] sm:$0xff]  }
  0x9e   : > { %5384 = vmatpush3.bf16.msra.mxu0 %v5953_v30  ;;  %v251_v30 = vld [vmem:[%s6311_s25 + $0x50] sm:$0xff] }
  0x9f   : > { %5406 = vmatpush3.bf16.msra.mxu1 %v5955_v32  ;;  %5385 = vmatprep.subr.bf16.mxu0 %v5956_v33  ;;  %v4771_v31 = vcombine.low %v251_v30, %v251_v30  ;;  %v4772_v32 = vcombine.high %v251_v30, %v251_v30  ;;  %v6017_v33 = vld [vmem:[%s6316_s29 + $0x5b8] sm:$0xff]  }
  0xa0   : > { %5407 = vmatprep.subr.bf16.mxu1 %v5958_v35  ;;  %v252_v35 = vld [vmem:[%s6311_s25 + $0x58] sm:$0xff] }
  0xa2   : > { %5386 = vmatpush3.bf16.msra.mxu0 %v5957_v34  ;;  %v6018_v34 = vld [vmem:[%s6316_s29 + $0x640] sm:$0xff]  }
  0xa3   : > { %5408 = vmatpush3.bf16.msra.mxu1 %v5959_v36  ;;  %5387 = vmatprep.subr.bf16.mxu0 %v5960_v37  ;;  %v4773_v36 = vcombine.low %v252_v35, %v252_v35  ;;  %v4774_v37 = vcombine.high %v252_v35, %v252_v35 }
  0xa4   : > { %5409 = vmatprep.subr.bf16.mxu1 %v5962_v39  ;;  %v6022_v39 = vld [vmem:[%s6316_s29 + $0x6c0] sm:$0xff]  }
  0xa6   : > { %5388 = vmatpush3.bf16.msra.mxu0 %v5961_v38  ;;  %v6021_v38 = vld [vmem:[%s6316_s29 + $0x600] sm:$0xff]  }
  0xa7   : > { %5410 = vmatpush3.bf16.msra.mxu1 %v5963_v40  ;;  %5389 = vmatprep.subr.bf16.mxu0 %v5964_v41  ;;  %v6023_v40 = vld [vmem:[%s6316_s29 + $0x680] sm:$0xff]   ;;  %v6024_v41 = vld [vmem:[%s6316_s29 + $0x648] sm:$0xff]  }
  0xa8   : > { %5411 = vmatprep.subr.bf16.mxu1 %v5966_v43  ;;  %v6026_v43 = vld [vmem:[%s6316_s29 + $0x6c8] sm:$0xff]  }
  0xaa   : > { %5390 = vmatpush3.bf16.msra.mxu0 %v5965_v42  ;;  %v6025_v42 = vld [vmem:[%s6316_s29 + $0x608] sm:$0xff]  }
  0xab   : > { %5412 = vmatpush3.bf16.msra.mxu1 %v5967_v44  ;;  %5391 = vmatprep.subr.bf16.mxu0 %v5968_v45  ;;  %v6027_v44 = vld [vmem:[%s6316_s29 + $0x688] sm:$0xff]   ;;  %v6028_v45 = vld [vmem:[%s6316_s29 + $0x650] sm:$0xff]  }
  0xac   : > { %5413 = vmatprep.subr.bf16.mxu1 %v5970_v47  ;;  %v6030_v47 = vld [vmem:[%s6316_s29 + $0x6d0] sm:$0xff]  }
  0xae   : > { %5392 = vmatpush3.bf16.msra.mxu0 %v5969_v46  ;;  %v6029_v46 = vld [vmem:[%s6316_s29 + $0x610] sm:$0xff]  }
  0xaf   : > { %5414 = vmatpush3.bf16.msra.mxu1 %v5971_v48  ;;  %5393 = vmatprep.subr.bf16.mxu0 %v5972_v49  ;;  %v6031_v48 = vld [vmem:[%s6316_s29 + $0x690] sm:$0xff]   ;;  %v6032_v49 = vld [vmem:[%s6316_s29 + $0x658] sm:$0xff]  }
  0xb0   : > { %5415 = vmatprep.subr.bf16.mxu1 %v5974_v51  ;;  %v6034_v51 = vld [vmem:[%s6316_s29 + $0x6d8] sm:$0xff]  }
  0xb2   : > { %5394 = vmatpush3.bf16.msra.mxu0 %v5973_v50  ;;  %v6033_v50 = vld [vmem:[%s6316_s29 + $0x618] sm:$0xff]  }
  0xb3   : > { %5416 = vmatpush3.bf16.msra.mxu1 %v5975_v52  ;;  %5395 = vmatprep.subr.bf16.mxu0 %v5976_v53  ;;  %v6035_v52 = vld [vmem:[%s6316_s29 + $0x698] sm:$0xff]   ;;  %v6036_v53 = vld [vmem:[%s6316_s29 + $0x660] sm:$0xff]  }
  0xb4   : > { %5417 = vmatprep.subr.bf16.mxu1 %v5978_v55  ;;  %v6038_v55 = vld [vmem:[%s6316_s29 + $0x6e0] sm:$0xff]  }
  0xb6   : > { %5396 = vmatpush3.bf16.msra.mxu0 %v5977_v54  ;;  %v6037_v54 = vld [vmem:[%s6316_s29 + $0x620] sm:$0xff]  }
  0xb7   : > { %5418 = vmatpush3.bf16.msra.mxu1 %v5981_v59  ;;  %5425 = vmatprep.subr.bf16.mxu0 %v5982_v60  ;;  %v6042_v59 = vld [vmem:[%s6316_s29 + $0x6e8] sm:$0xff]  }
  0xb8   : > { %5447 = vmatprep.subr.bf16.mxu1 %v5986_v1  ;;  %v6043_v60 = vld [vmem:[%s6316_s29 + $0x6a8] sm:$0xff]   ;;  %v6048_v1 = vld [vmem:[%s6316_s29 + $0x678] sm:$0xff]  }
  0xb9   : > { %3927 = vmatmul.mubr.bf16.vlgmr.msra.gmra.mrb[16].mxu0 %v4767_v57  ;;  %v6040_v57 = vld [vmem:[%s6316_s29 + $0x668] sm:$0xff]  }
  0xba   : > { %5426 = vmatpush3.bf16.msra.mxu0 %v5985_v0  ;;  %3967 = vmatmul.mubr.bf16.vlgmr.msra.gmra.mrb[16].mxu1 %v4769_v62  ;;  %v6045_v62 = vld [vmem:[%s6316_s29 + $0x630] sm:$0xff]  }
  0xbb   : > { %5448 = vmatpush3.bf16.msra.mxu1 %v5987_v2  ;;  %5427 = vmatprep.subr.bf16.mxu0 %v5988_v3  ;;  %v6047_v0 = vld [vmem:[%s6316_s29 + $0x6b0] sm:$0xff]   ;;  %v6049_v2 = vld [vmem:[%s6316_s29 + $0x638] sm:$0xff]  }
  0xbc   : > { %5449 = vmatprep.subr.bf16.mxu1 %v5990_v5  ;;  %4006 = vmatprep.mubr.bf16.mxu0 %v4772_v32  ;;  %v6050_v3 = vld [vmem:[%s6316_s29 + $0x6f8] sm:$0xff]   ;;  %v6075_v32 = vld [vmem:[%s6316_s29 + $0x7a0] sm:$0xff]  }
  0xbd   : > { %4046 = vmatprep.mubr.bf16.mxu1 %v4774_v37  ;;  %v6076_v37 = vld [vmem:[%s6316_s29 + $0x768] sm:$0xff]  }
  0xbe   : > { %5428 = vmatpush3.bf16.msra.mxu0 %v5989_v4  ;;  %v253_v4 = vld [vmem:[%s6311_s25 + $0x60] sm:$0xff] }
  0xbf   : > { %5450 = vmatpush3.bf16.msra.mxu1 %v5991_v6  ;;  %5429 = vmatprep.subr.bf16.mxu0 %v5992_v7  ;;  %v4775_v5 = vcombine.low %v253_v4, %v253_v4  ;;  %v4776_v6 = vcombine.high %v253_v4, %v253_v4  ;;  %v6053_v7 = vld [vmem:[%s6316_s29 + $0x6b8] sm:$0xff]   ;;  %v6100_v4 = vld [vmem:[%s6316_s29 + $0x850] sm:$0xff]  }
  0xc0   : > { %5451 = vmatprep.subr.bf16.mxu1 %v5994_v9  ;;  %v254_v9 = vld [vmem:[%s6311_s25 + $0x68] sm:$0xff] }
  0xc2   : > { %5430 = vmatpush3.bf16.msra.mxu0 %v5993_v8  ;;  %v6054_v8 = vld [vmem:[%s6316_s29 + $0x740] sm:$0xff]  }
  0xc3   : > { %5452 = vmatpush3.bf16.msra.mxu1 %v5995_v10  ;;  %5431 = vmatprep.subr.bf16.mxu0 %v5996_v11  ;;  %v4777_v10 = vcombine.low %v254_v9, %v254_v9  ;;  %v4778_v11 = vcombine.high %v254_v9, %v254_v9  ;;  %v6105_v9 = vld [vmem:[%s6316_s29 + $0x818] sm:$0xff]  }
  0xc4   : > { %5453 = vmatprep.subr.bf16.mxu1 %v5998_v13  ;;  %v6058_v13 = vld [vmem:[%s6316_s29 + $0x7c0] sm:$0xff]  }
  0xc6   : > { %5432 = vmatpush3.bf16.msra.mxu0 %v5997_v12  ;;  %v6057_v12 = vld [vmem:[%s6316_s29 + $0x700] sm:$0xff]  }
  0xc7   : > { %5454 = vmatpush3.bf16.msra.mxu1 %v5999_v14  ;;  %5433 = vmatprep.subr.bf16.mxu0 %v6000_v15  ;;  %v6059_v14 = vld [vmem:[%s6316_s29 + $0x780] sm:$0xff]   ;;  %v6060_v15 = vld [vmem:[%s6316_s29 + $0x748] sm:$0xff]  }
  0xc8   : > { %5455 = vmatprep.subr.bf16.mxu1 %v6002_v17  ;;  %v6062_v17 = vld [vmem:[%s6316_s29 + $0x7c8] sm:$0xff]  }
  0xca   : > { %5434 = vmatpush3.bf16.msra.mxu0 %v6001_v16  ;;  %v6061_v16 = vld [vmem:[%s6316_s29 + $0x708] sm:$0xff]  }
  0xcb   : > { %5456 = vmatpush3.bf16.msra.mxu1 %v6003_v18  ;;  %5435 = vmatprep.subr.bf16.mxu0 %v6004_v19  ;;  %v6063_v18 = vld [vmem:[%s6316_s29 + $0x788] sm:$0xff]   ;;  %v6064_v19 = vld [vmem:[%s6316_s29 + $0x750] sm:$0xff]  }
  0xcc   : > { %5457 = vmatprep.subr.bf16.mxu1 %v6006_v21  ;;  %v6066_v21 = vld [vmem:[%s6316_s29 + $0x7d0] sm:$0xff]  }
  0xce   : > { %5436 = vmatpush3.bf16.msra.mxu0 %v6005_v20  ;;  %v6065_v20 = vld [vmem:[%s6316_s29 + $0x710] sm:$0xff]  }
  0xcf   : > { %5458 = vmatpush3.bf16.msra.mxu1 %v6007_v22  ;;  %5437 = vmatprep.subr.bf16.mxu0 %v6008_v23  ;;  %v6067_v22 = vld [vmem:[%s6316_s29 + $0x790] sm:$0xff]   ;;  %v6068_v23 = vld [vmem:[%s6316_s29 + $0x758] sm:$0xff]  }
  0xd0   : > { %5459 = vmatprep.subr.bf16.mxu1 %v6010_v25  ;;  %v6070_v25 = vld [vmem:[%s6316_s29 + $0x7d8] sm:$0xff]  }
  0xd2   : > { %5438 = vmatpush3.bf16.msra.mxu0 %v6009_v24  ;;  %v6069_v24 = vld [vmem:[%s6316_s29 + $0x718] sm:$0xff]  }
  0xd3   : > { %5460 = vmatpush3.bf16.msra.mxu1 %v6011_v26  ;;  %5439 = vmatprep.subr.bf16.mxu0 %v6012_v27  ;;  %v6071_v26 = vld [vmem:[%s6316_s29 + $0x798] sm:$0xff]   ;;  %v6072_v27 = vld [vmem:[%s6316_s29 + $0x760] sm:$0xff]  }
  0xd4   : > { %5461 = vmatprep.subr.bf16.mxu1 %v6014_v29  ;;  %v6074_v29 = vld [vmem:[%s6316_s29 + $0x7e0] sm:$0xff]  }
  0xd6   : > { %5440 = vmatpush3.bf16.msra.mxu0 %v6013_v28  ;;  %v6073_v28 = vld [vmem:[%s6316_s29 + $0x720] sm:$0xff]  }
  0xd7   : > { %5462 = vmatpush3.bf16.msra.mxu1 %v6017_v33  ;;  %5469 = vmatprep.subr.bf16.mxu0 %v6018_v34 }
  0xd8   : > { %5491 = vmatprep.subr.bf16.mxu1 %v6022_v39  ;;  %v6077_v39 = vld [vmem:[%s6316_s29 + $0x728] sm:$0xff]  }
  0xd9   : > { %4007 = vmatmul.mubr.bf16.vlgmr.msra.gmra.mrb[20].mxu0 %v4771_v31 }
  0xda   : > { %5470 = vmatpush3.bf16.msra.mxu0 %v6021_v38  ;;  %4047 = vmatmul.mubr.bf16.vlgmr.msra.gmra.mrb[20].mxu1 %v4773_v36 }
  0xdb   : > { %5492 = vmatpush3.bf16.msra.mxu1 %v6023_v40  ;;  %5471 = vmatprep.subr.bf16.mxu0 %v6024_v41 }
  0xdc   : > { %5493 = vmatprep.subr.bf16.mxu1 %v6026_v43  ;;  %4086 = vmatprep.mubr.bf16.mxu0 %v4776_v6  ;;  %v6102_v6 = vld [vmem:[%s6316_s29 + $0x8d0] sm:$0xff]  }
  0xdd   : > { %4126 = vmatprep.mubr.bf16.mxu1 %v4778_v11  ;;  %v6107_v11 = vld [vmem:[%s6316_s29 + $0x898] sm:$0xff]  }
  0xde   : > { %5472 = vmatpush3.bf16.msra.mxu0 %v6025_v42  ;;  %v6078_v42 = vld [vmem:[%s6316_s29 + $0x7e8] sm:$0xff]  }
  0xdf   : > { %5494 = vmatpush3.bf16.msra.mxu1 %v6027_v44  ;;  %5473 = vmatprep.subr.bf16.mxu0 %v6028_v45  ;;  %v6079_v44 = vld [vmem:[%s6316_s29 + $0x7a8] sm:$0xff]  }
  0xe0   : > { %5495 = vmatprep.subr.bf16.mxu1 %v6030_v47  ;;  %v6081_v47 = vld [vmem:[%s6316_s29 + $0x730] sm:$0xff]  }
  0xe2   : > { %5474 = vmatpush3.bf16.msra.mxu0 %v6029_v46  ;;  %v6080_v46 = vld [vmem:[%s6316_s29 + $0x770] sm:$0xff]  }
  0xe3   : > { %5496 = vmatpush3.bf16.msra.mxu1 %v6031_v48  ;;  %5475 = vmatprep.subr.bf16.mxu0 %v6032_v49  ;;  %v6082_v48 = vld [vmem:[%s6316_s29 + $0x7f0] sm:$0xff]  }
  0xe4   : > { %5497 = vmatprep.subr.bf16.mxu1 %v6034_v51  ;;  %v6083_v49 = vld [vmem:[%s6316_s29 + $0x7b0] sm:$0xff]   ;;  %v6085_v51 = vld [vmem:[%s6316_s29 + $0x738] sm:$0xff]  }
  0xe6   : > { %5476 = vmatpush3.bf16.msra.mxu0 %v6033_v50  ;;  %v6084_v50 = vld [vmem:[%s6316_s29 + $0x778] sm:$0xff]  }
  0xe7   : > { %5498 = vmatpush3.bf16.msra.mxu1 %v6035_v52  ;;  %5477 = vmatprep.subr.bf16.mxu0 %v6036_v53  ;;  %v6086_v52 = vld [vmem:[%s6316_s29 + $0x7f8] sm:$0xff]   ;;  %v255_v53 = vld [vmem:[%s6311_s25 + $0x70] sm:$0xff] }
  0xe8   : > { %5499 = vmatprep.subr.bf16.mxu1 %v6038_v55  ;;  %v4780_v55 = vcombine.high %v255_v53, %v255_v53 }
  0xea   : > { %5478 = vmatpush3.bf16.msra.mxu0 %v6037_v54  ;;  %v4779_v54 = vcombine.low %v255_v53, %v255_v53  ;;  %v6135_v53 = vld [vmem:[%s6316_s29 + $0x988] sm:$0xff]  }
  0xeb   : > { %5500 = vmatpush3.bf16.msra.mxu1 %v6039_v56  ;;  %5479 = vmatprep.subr.bf16.mxu0 %v6040_v57  ;;  %v6089_v56 = vld [vmem:[%s6316_s29 + $0x7b8] sm:$0xff]   ;;  %v6090_v57 = vld [vmem:[%s6316_s29 + $0x840] sm:$0xff]  }
  0xec   : > { %5501 = vmatprep.subr.bf16.mxu1 %v6042_v59 }
  0xee   : > { %5480 = vmatpush3.bf16.msra.mxu0 %v6041_v58  ;;  %v256_v58 = vld [vmem:[%s6311_s25 + $0x78] sm:$0xff] }
  0xef   : > { %5502 = vmatpush3.bf16.msra.mxu1 %v6043_v60  ;;  %5481 = vmatprep.subr.bf16.mxu0 %v6044_v61  ;;  %v4781_v59 = vcombine.low %v256_v58, %v256_v58  ;;  %v4782_v60 = vcombine.high %v256_v58, %v256_v58  ;;  %v6093_v61 = vld [vmem:[%s6316_s29 + $0x800] sm:$0xff]   ;;  %v6140_v58 = vld [vmem:[%s6316_s29 + $0x958] sm:$0xff]  }
  0xf0   : > { %5503 = vmatprep.subr.bf16.mxu1 %v6046_v63  ;;  %v6095_v63 = vld [vmem:[%s6316_s29 + $0x880] sm:$0xff]  }
  0xf2   : > { %5482 = vmatpush3.bf16.msra.mxu0 %v6045_v62  ;;  %v6094_v62 = vld [vmem:[%s6316_s29 + $0x8c0] sm:$0xff]  }
  0xf3   : > { %5504 = vmatpush3.bf16.msra.mxu1 %v6047_v0  ;;  %5483 = vmatprep.subr.bf16.mxu0 %v6048_v1  ;;  %v6096_v0 = vld [vmem:[%s6316_s29 + $0x848] sm:$0xff]  }
  0xf4   : > { %5505 = vmatprep.subr.bf16.mxu1 %v6050_v3  ;;  %v6097_v1 = vld [vmem:[%s6316_s29 + $0x808] sm:$0xff]  }
  0xf5   : > { %v6099_v3 = vld [vmem:[%s6316_s29 + $0x888] sm:$0xff]  }
  0xf6   : > { %5484 = vmatpush3.bf16.msra.mxu0 %v6049_v2  ;;  %v6098_v2 = vld [vmem:[%s6316_s29 + $0x8c8] sm:$0xff]  }
  0xf7   : > { %5506 = vmatpush3.bf16.msra.mxu1 %v6053_v7  ;;  %5513 = vmatprep.subr.bf16.mxu0 %v6054_v8  ;;  %v6103_v7 = vld [vmem:[%s6316_s29 + $0x890] sm:$0xff]   ;;  %v6104_v8 = vld [vmem:[%s6316_s29 + $0x858] sm:$0xff]  }
  0xf8   : > { %5535 = vmatprep.subr.bf16.mxu1 %v6058_v13  ;;  %v6109_v13 = vld [vmem:[%s6316_s29 + $0x820] sm:$0xff]  }
  0xf9   : > { %4087 = vmatmul.mubr.bf16.vlgmr.msra.gmra.mrb[24].mxu0 %v4775_v5  ;;  %v6101_v5 = vld [vmem:[%s6316_s29 + $0x810] sm:$0xff]  }
  0xfa   : > { %5514 = vmatpush3.bf16.msra.mxu0 %v6057_v12  ;;  %4127 = vmatmul.mubr.bf16.vlgmr.msra.gmra.mrb[24].mxu1 %v4777_v10  ;;  %v6106_v10 = vld [vmem:[%s6316_s29 + $0x8d8] sm:$0xff]   ;;  %v6108_v12 = vld [vmem:[%s6316_s29 + $0x860] sm:$0xff]  }
  0xfb   : > { %5536 = vmatpush3.bf16.msra.mxu1 %v6059_v14  ;;  %5515 = vmatprep.subr.bf16.mxu0 %v6060_v15  ;;  %v6110_v14 = vld [vmem:[%s6316_s29 + $0x8e0] sm:$0xff]  }
  0xfc   : > { %5537 = vmatprep.subr.bf16.mxu1 %v6062_v17  ;;  %4166 = vmatprep.mubr.bf16.mxu0 %v4780_v55  ;;  %v6137_v55 = vld [vmem:[%s6316_s29 + $0x910] sm:$0xff]  }
  0xfd   : > { %4206 = vmatprep.mubr.bf16.mxu1 %v4782_v60  ;;  %v6142_v60 = vld [vmem:[%s6316_s29 + $0x9d8] sm:$0xff]  }
  0xfe   : > { %5516 = vmatpush3.bf16.msra.mxu0 %v6061_v16  ;;  %v6111_v16 = vld [vmem:[%s6316_s29 + $0x8a0] sm:$0xff]  }
  0xff   : > { %5538 = vmatpush3.bf16.msra.mxu1 %v6063_v18  ;;  %5517 = vmatprep.subr.bf16.mxu0 %v6064_v19  ;;  %v6112_v19 = vld [vmem:[%s6316_s29 + $0x868] sm:$0xff]  }
 0x100   : > { %5539 = vmatprep.subr.bf16.mxu1 %v6066_v21 }
 0x102   : > { %5518 = vmatpush3.bf16.msra.mxu0 %v6065_v20 }
 0x103   : > { %5540 = vmatpush3.bf16.msra.mxu1 %v6067_v22  ;;  %5519 = vmatprep.subr.bf16.mxu0 %v6068_v23  ;;  %v6113_v22 = vld [vmem:[%s6316_s29 + $0x828] sm:$0xff]  }
 0x104   : > { %5541 = vmatprep.subr.bf16.mxu1 %v6070_v25 }
 0x106   : > { %5520 = vmatpush3.bf16.msra.mxu0 %v6069_v24 }
 0x107   : > { %5542 = vmatpush3.bf16.msra.mxu1 %v6071_v26  ;;  %5521 = vmatprep.subr.bf16.mxu0 %v6072_v27  ;;  %v6114_v27 = vld [vmem:[%s6316_s29 + $0x8e8] sm:$0xff]  }
 0x108   : > { %5543 = vmatprep.subr.bf16.mxu1 %v6074_v29  ;;  %v6115_v29 = vld [vmem:[%s6316_s29 + $0x8a8] sm:$0xff]  }
 0x10a   : > { %5522 = vmatpush3.bf16.msra.mxu0 %v6073_v28 }
 0x10b   : > { %5544 = vmatpush3.bf16.msra.mxu1 %v6075_v32  ;;  %5523 = vmatprep.subr.bf16.mxu0 %v6076_v37  ;;  %v6116_v32 = vld [vmem:[%s6316_s29 + $0x870] sm:$0xff]   ;;  %v6121_v37 = vld [vmem:[%s6316_s29 + $0x838] sm:$0xff]  }
 0x10c   : > { %v5221_v30 = vpop.f32.mrb[0].mxu0  ;;  %5545 = vmatprep.subr.bf16.mxu1 %v6078_v42  ;;  %v6125_v42 = vld [vmem:[%s6316_s29 + $0x8b8] sm:$0xff]  }
 0x10d   : > { %v5243_v31 = vpop.f32.mrb[0].mxu1  ;;  %v5222_v33 = vpop.f32.mrb[1].mxu0 }
 0x10e   : > { %v5244_v34 = vpop.f32.mrb[1].mxu1  ;;  %v5223_v35 = vadd.f32 %v5222_v33, %v5221_v30  ;;  %v5224_v38 = vpop.f32.mrb[2].mxu0  ;;  %5524 = vmatpush3.bf16.msra.mxu0 %v6077_v39  ;;  %v6117_v33 = vld [vmem:[%s6316_s29 + $0x830] sm:$0xff]   ;;  %v257_v39 = vld [vmem:[%s6311_s25 + $0x80] sm:$0xff] }
 0x10f   : > { %v5245_v36 = vadd.f32 %v5244_v34, %v5243_v31  ;;  %v5225_v40 = vpop.f32.mrb[3].mxu0  ;;  %v5246_v43 = vpop.f32.mrb[2].mxu1  ;;  %5546 = vmatpush3.bf16.msra.mxu1 %v6079_v44  ;;  %5525 = vmatprep.subr.bf16.mxu0 %v6080_v46  ;;  %v6118_v34 = vld [vmem:[%s6316_s29 + $0x8f0] sm:$0xff]   ;;  %v6122_v38 = vld [vmem:[%s6316_s29 + $0x8f8] sm:$0xff]   ;;  %v258_v44 = vld [vmem:[%s6311_s25 + $0x88] sm:$0xff] }
 0x110   : > { %v5247_v45 = vpop.f32.mrb[3].mxu1  ;;  %5547 = vmatprep.subr.bf16.mxu1 %v6082_v48  ;;  %v4783_v40 = vcombine.low %v257_v39, %v257_v39  ;;  %v6126_v43 = vld [vmem:[%s6316_s29 + $0x940] sm:$0xff]   ;;  %v4786_v46 = vcombine.high %v258_v44, %v258_v44 }
 0x111   : > { %v6579_v41 = vadd.f32 %v5245_v36, %v5223_v35  ;;  %v6119_v35 = vld [vmem:[%s6316_s29 + $0x8b0] sm:$0xff]   ;;  %v6120_v36 = vld [vmem:[%s6316_s29 + $0x878] sm:$0xff]   ;;  %v4785_v45 = vcombine.low %v258_v44, %v258_v44  ;;  %v6130_v48 = vld [vmem:[%s6316_s29 + $0x9c0] sm:$0xff]  }
 0x112   : > { %5526 = vmatpush3.bf16.msra.mxu0 %v6081_v47  ;;  %v6129_v47 = vld [vmem:[%s6316_s29 + $0x900] sm:$0xff]   ;;  %v6176_v44 = vld [vmem:[%s6316_s29 + $0xa58] sm:$0xff]  }
 0x113   : > { %5548 = vmatpush3.bf16.msra.mxu1 %v6083_v49  ;;  %5527 = vmatprep.subr.bf16.mxu0 %v6084_v50  ;;  %v6131_v49 = vld [vmem:[%s6316_s29 + $0x980] sm:$0xff]   ;;  %v6132_v50 = vld [vmem:[%s6316_s29 + $0x948] sm:$0xff]  }
 0x114   : > { %5549 = vmatprep.subr.bf16.mxu1 %v6086_v52  ;;  %v6134_v52 = vld [vmem:[%s6316_s29 + $0x9c8] sm:$0xff]  }
 0x116   : > { %5528 = vmatpush3.bf16.msra.mxu0 %v6085_v51  ;;  %v6133_v51 = vld [vmem:[%s6316_s29 + $0x908] sm:$0xff]  }
 0x117   : > { %5550 = vmatpush3.bf16.msra.mxu1 %v6089_v56  ;;  %5557 = vmatprep.subr.bf16.mxu0 %v6090_v57  ;;  %v6138_v56 = vld [vmem:[%s6316_s29 + $0x9d0] sm:$0xff]  }
 0x118   : > { %5579 = vmatprep.subr.bf16.mxu1 %v6094_v62  ;;  %v6139_v57 = vld [vmem:[%s6316_s29 + $0x990] sm:$0xff]   ;;  %v6144_v62 = vld [vmem:[%s6316_s29 + $0x960] sm:$0xff]  }
 0x119   : > { %4167 = vmatmul.mubr.bf16.vlgmr.msra.gmra.mrb[28].mxu0 %v4779_v54  ;;  %v6136_v54 = vld [vmem:[%s6316_s29 + $0x950] sm:$0xff]  }
 0x11a   : > { %5558 = vmatpush3.bf16.msra.mxu0 %v6093_v61  ;;  %4207 = vmatmul.mubr.bf16.vlgmr.msra.gmra.mrb[28].mxu1 %v4781_v59  ;;  %v6141_v59 = vld [vmem:[%s6316_s29 + $0x918] sm:$0xff]  }
 0x11b   : > { %5580 = vmatpush3.bf16.msra.mxu1 %v6095_v63  ;;  %5559 = vmatprep.subr.bf16.mxu0 %v6096_v0  ;;  %v6143_v61 = vld [vmem:[%s6316_s29 + $0x998] sm:$0xff]   ;;  %v6145_v63 = vld [vmem:[%s6316_s29 + $0x920] sm:$0xff]  }
 0x11c   : > { %5581 = vmatprep.subr.bf16.mxu1 %v6098_v2  ;;  %4286 = vmatprep.mubr.bf16.mxu1 %v4786_v46  ;;  %v6178_v46 = vld [vmem:[%s6316_s29 + $0xad8] sm:$0xff]  }
 0x11e   : > { %5560 = vmatpush3.bf16.msra.mxu0 %v6097_v1  ;;  %v6146_v1 = vld [vmem:[%s6316_s29 + $0x9e0] sm:$0xff]  }
 0x11f   : > { %5582 = vmatpush3.bf16.msra.mxu1 %v6099_v3  ;;  %5561 = vmatprep.subr.bf16.mxu0 %v6100_v4  ;;  %v6147_v3 = vld [vmem:[%s6316_s29 + $0x9a0] sm:$0xff]  }
 0x120   : > { %5583 = vmatprep.subr.bf16.mxu1 %v6102_v6  ;;  %v6148_v6 = vld [vmem:[%s6316_s29 + $0x968] sm:$0xff]  }
 0x122   : > { %5562 = vmatpush3.bf16.msra.mxu0 %v6101_v5 }
 0x123   : > { %5584 = vmatpush3.bf16.msra.mxu1 %v6103_v7  ;;  %5563 = vmatprep.subr.bf16.mxu0 %v6104_v8 }
 0x124   : > { %5585 = vmatprep.subr.bf16.mxu1 %v6106_v10 }
 0x126   : > { %5564 = vmatpush3.bf16.msra.mxu0 %v6105_v9  ;;  %v6149_v9 = vld [vmem:[%s6316_s29 + $0x928] sm:$0xff]  }
 0x127   : > { %5586 = vmatpush3.bf16.msra.mxu1 %v6107_v11  ;;  %5565 = vmatprep.subr.bf16.mxu0 %v6108_v12  ;;  %v6150_v12 = vld [vmem:[%s6316_s29 + $0x9e8] sm:$0xff]  }
 0x128   : > { %5587 = vmatprep.subr.bf16.mxu1 %v6110_v14  ;;  %v6151_v14 = vld [vmem:[%s6316_s29 + $0x9a8] sm:$0xff]  }
 0x12a   : > { %5566 = vmatpush3.bf16.msra.mxu0 %v6109_v13 }
 0x12b   : > { %5588 = vmatpush3.bf16.msra.mxu1 %v6111_v16  ;;  %5567 = vmatprep.subr.bf16.mxu0 %v6112_v19  ;;  %v6153_v19 = vld [vmem:[%s6316_s29 + $0x930] sm:$0xff]  }
 0x12c   : > { %v5265_v15 = vpop.f32.mrb[4].mxu0  ;;  %5589 = vmatprep.subr.bf16.mxu1 %v6114_v27 }
 0x12d   : > { %v5266_v17 = vpop.f32.mrb[5].mxu0  ;;  %v5287_v21 = vpop.f32.mrb[4].mxu1 }
 0x12e   : > { %v5267_v18 = vadd.f32 %v5266_v17, %v5265_v15  ;;  %v5268_v20 = vpop.f32.mrb[6].mxu0  ;;  %v5288_v24 = vpop.f32.mrb[5].mxu1  ;;  %5568 = vmatpush3.bf16.msra.mxu0 %v6113_v22  ;;  %v6152_v17 = vld [vmem:[%s6316_s29 + $0x970] sm:$0xff]   ;;  %v6156_v22 = vld [vmem:[%s6316_s29 + $0x978] sm:$0xff]  }
 0x12f   : > { %v5269_v23 = vpop.f32.mrb[7].mxu0  ;;  %v5289_v26 = vadd.f32 %v5288_v24, %v5287_v21  ;;  %v5290_v28 = vpop.f32.mrb[6].mxu1  ;;  %5590 = vmatpush3.bf16.msra.mxu1 %v6115_v29  ;;  %5569 = vmatprep.subr.bf16.mxu0 %v6116_v32  ;;  %v6154_v20 = vld [vmem:[%s6316_s29 + $0x9f0] sm:$0xff]   ;;  %v6158_v24 = vld [vmem:[%s6316_s29 + $0x9f8] sm:$0xff]   ;;  %v6162_v29 = vld [vmem:[%s6316_s29 + $0xa40] sm:$0xff]  }
 0x130   : > { %v3689_v25 = vadd.f32 %v5267_v18, %v6579_v41  ;;  %v5291_v30 = vpop.f32.mrb[7].mxu1  ;;  %5591 = vmatprep.subr.bf16.mxu1 %v6118_v34  ;;  %v4784_v41 = vcombine.high %v257_v39, %v257_v39  ;;  %v6155_v21 = vld [vmem:[%s6316_s29 + $0x9b0] sm:$0xff]   ;;  %v6157_v23 = vld [vmem:[%s6316_s29 + $0x938] sm:$0xff]   ;;  %v6166_v34 = vld [vmem:[%s6316_s29 + $0xac0] sm:$0xff]  }
 0x131   : > { %v6161_v28 = vld [vmem:[%s6316_s29 + $0x9b8] sm:$0xff]   ;;  %v6171_v39 = vld [vmem:[%s6316_s29 + $0xa88] sm:$0xff]  }
 0x132   : > { %v6618_v31 = vadd.f32 %v5289_v26, %v3689_v25  ;;  %5570 = vmatpush3.bf16.msra.mxu0 %v6117_v33  ;;  %4246 = vmatprep.mubr.bf16.mxu0 %v4784_v41  ;;  %v259_v25 = vld [vmem:[%s6311_s25 + $0x90] sm:$0xff]  ;;  %v260_v30 = vld [vmem:[%s6311_s25 + $0x98] sm:$0xff]  ;;  %v6165_v33 = vld [vmem:[%s6316_s29 + $0xa00] sm:$0xff]  }
 0x133   : > { %5592 = vmatpush3.bf16.msra.mxu1 %v6119_v35  ;;  %5571 = vmatprep.subr.bf16.mxu0 %v6120_v36  ;;  %v4787_v26 = vcombine.low %v259_v25, %v259_v25  ;;  %v4788_v27 = vcombine.high %v259_v25, %v259_v25  ;;  %v4790_v32 = vcombine.high %v260_v30, %v260_v30  ;;  %v6167_v35 = vld [vmem:[%s6316_s29 + $0xa80] sm:$0xff]   ;;  %v6168_v36 = vld [vmem:[%s6316_s29 + $0xa48] sm:$0xff]   ;;  %v6173_v41 = vld [vmem:[%s6316_s29 + $0xa10] sm:$0xff]  }
 0x134   : > { %5593 = vmatprep.subr.bf16.mxu1 %v6122_v38  ;;  %v6170_v38 = vld [vmem:[%s6316_s29 + $0xac8] sm:$0xff]  }
 0x135   : > { %v6207_v25 = vld [vmem:[%s6316_s29 + $0xb88] sm:$0xff]  }
 0x136   : > { %5572 = vmatpush3.bf16.msra.mxu0 %v6121_v37  ;;  %v6169_v37 = vld [vmem:[%s6316_s29 + $0xa08] sm:$0xff]  }
 0x137   : > { %5594 = vmatpush3.bf16.msra.mxu1 %v6125_v42  ;;  %5601 = vmatprep.subr.bf16.mxu0 %v6126_v43  ;;  %v6174_v42 = vld [vmem:[%s6316_s29 + $0xad0] sm:$0xff]  }
 0x138   : > { %5623 = vmatprep.subr.bf16.mxu1 %v6130_v48  ;;  %v6175_v43 = vld [vmem:[%s6316_s29 + $0xa90] sm:$0xff]   ;;  %v6180_v48 = vld [vmem:[%s6316_s29 + $0xa60] sm:$0xff]  }
 0x139   : > { %4247 = vmatmul.mubr.bf16.vlgmr.msra.gmra.mrb[32].mxu0 %v4783_v40  ;;  %v6172_v40 = vld [vmem:[%s6316_s29 + $0xa50] sm:$0xff]  }
 0x13a   : > { %5602 = vmatpush3.bf16.msra.mxu0 %v6129_v47  ;;  %4287 = vmatmul.mubr.bf16.vlgmr.msra.gmra.mrb[32].mxu1 %v4785_v45  ;;  %v6177_v45 = vld [vmem:[%s6316_s29 + $0xa18] sm:$0xff]  }
 0x13b   : > { %5624 = vmatpush3.bf16.msra.mxu1 %v6131_v49  ;;  %5603 = vmatprep.subr.bf16.mxu0 %v6132_v50  ;;  %v6179_v47 = vld [vmem:[%s6316_s29 + $0xa98] sm:$0xff]   ;;  %v6181_v50 = vld [vmem:[%s6316_s29 + $0xa20] sm:$0xff]  }
 0x13c   : > { %5625 = vmatprep.subr.bf16.mxu1 %v6134_v52  ;;  %4326 = vmatprep.mubr.bf16.mxu0 %v4788_v27  ;;  %v6182_v52 = vld [vmem:[%s6316_s29 + $0xae0] sm:$0xff]   ;;  %v6209_v27 = vld [vmem:[%s6316_s29 + $0xb10] sm:$0xff]  }
 0x13d   : > { %4366 = vmatprep.mubr.bf16.mxu1 %v4790_v32  ;;  %v6214_v32 = vld [vmem:[%s6316_s29 + $0xbd8] sm:$0xff]  }
 0x13e   : > { %5604 = vmatpush3.bf16.msra.mxu0 %v6133_v51 }
 0x13f   : > { %5626 = vmatpush3.bf16.msra.mxu1 %v6135_v53  ;;  %5605 = vmatprep.subr.bf16.mxu0 %v6136_v54 }
 0x140   : > { %5627 = vmatprep.subr.bf16.mxu1 %v6138_v56 }
 0x142   : > { %5606 = vmatpush3.bf16.msra.mxu0 %v6137_v55  ;;  %v6183_v55 = vld [vmem:[%s6316_s29 + $0xaa0] sm:$0xff]  }
 0x143   : > { %5628 = vmatpush3.bf16.msra.mxu1 %v6139_v57  ;;  %5607 = vmatprep.subr.bf16.mxu0 %v6140_v58  ;;  %v6184_v58 = vld [vmem:[%s6316_s29 + $0xa68] sm:$0xff]  }
 0x144   : > { %5629 = vmatprep.subr.bf16.mxu1 %v6142_v60  ;;  %v6185_v60 = vld [vmem:[%s6316_s29 + $0xa28] sm:$0xff]  }
 0x146   : > { %5608 = vmatpush3.bf16.msra.mxu0 %v6141_v59 }
 0x147   : > { %5630 = vmatpush3.bf16.msra.mxu1 %v6143_v61  ;;  %5609 = vmatprep.subr.bf16.mxu0 %v6144_v62 }
 0x148   : > { %5631 = vmatprep.subr.bf16.mxu1 %v6146_v1  ;;  %v6187_v1 = vld [vmem:[%s6316_s29 + $0xaa8] sm:$0xff]  }
 0x14a   : > { %5610 = vmatpush3.bf16.msra.mxu0 %v6145_v63  ;;  %v6186_v63 = vld [vmem:[%s6316_s29 + $0xae8] sm:$0xff]  }
 0x14b   : > { %5632 = vmatpush3.bf16.msra.mxu1 %v6147_v3  ;;  %5611 = vmatprep.subr.bf16.mxu0 %v6148_v6  ;;  %v6190_v6 = vld [vmem:[%s6316_s29 + $0xaf0] sm:$0xff]  }
 0x14c   : > { %v5309_v0 = vpop.f32.mrb[8].mxu0  ;;  %5633 = vmatprep.subr.bf16.mxu1 %v6150_v12 }
 0x14d   : > { %v5310_v2 = vpop.f32.mrb[9].mxu0  ;;  %v5331_v7 = vpop.f32.mrb[8].mxu1 }
 0x14e   : > { %v5311_v4 = vadd.f32 %v5310_v2, %v5309_v0  ;;  %v5312_v5 = vpop.f32.mrb[10].mxu0  ;;  %v5332_v11 = vpop.f32.mrb[9].mxu1  ;;  %5612 = vmatpush3.bf16.msra.mxu0 %v6149_v9  ;;  %v6193_v9 = vld [vmem:[%s6316_s29 + $0xa38] sm:$0xff]  }
 0x14f   : > { %v5313_v10 = vpop.f32.mrb[11].mxu0  ;;  %v5333_v13 = vadd.f32 %v5332_v11, %v5331_v7  ;;  %v5334_v15 = vpop.f32.mrb[10].mxu1  ;;  %5634 = vmatpush3.bf16.msra.mxu1 %v6151_v14  ;;  %5613 = vmatprep.subr.bf16.mxu0 %v6152_v17  ;;  %v6189_v5 = vld [vmem:[%s6316_s29 + $0xa30] sm:$0xff]   ;;  %v261_v11 = vld [vmem:[%s6311_s25 + $0xa0] sm:$0xff]  ;;  %v6197_v14 = vld [vmem:[%s6316_s29 + $0xab8] sm:$0xff]  }
 0x150   : > { %v3769_v8 = vadd.f32 %v5311_v4, %v6618_v31  ;;  %v5335_v18 = vpop.f32.mrb[11].mxu1  ;;  %5635 = vmatprep.subr.bf16.mxu1 %v6154_v20  ;;  %v4789_v31 = vcombine.low %v260_v30, %v260_v30  ;;  %v6188_v4 = vld [vmem:[%s6316_s29 + $0xa70] sm:$0xff]   ;;  %v6194_v10 = vld [vmem:[%s6316_s29 + $0xaf8] sm:$0xff]   ;;  %v4791_v12 = vcombine.low %v261_v11, %v261_v11  ;;  %v6198_v15 = vld [vmem:[%s6316_s29 + $0xb40] sm:$0xff]  }
 0x151   : > { %v6191_v7 = vld [vmem:[%s6316_s29 + $0xab0] sm:$0xff]   ;;  %v6202_v20 = vld [vmem:[%s6316_s29 + $0xbc0] sm:$0xff]   ;;  %v6212_v30 = vld [vmem:[%s6316_s29 + $0xb58] sm:$0xff]  }
 0x152   : > { %v6655_v16 = vadd.f32 %v5333_v13, %v3769_v8  ;;  %5614 = vmatpush3.bf16.msra.mxu0 %v6153_v19  ;;  %v6192_v8 = vld [vmem:[%s6316_s29 + $0xa78] sm:$0xff]   ;;  %v4792_v13 = vcombine.high %v261_v11, %v261_v11  ;;  %v6201_v19 = vld [vmem:[%s6316_s29 + $0xb00] sm:$0xff]  }
 0x153   : > { %5636 = vmatpush3.bf16.msra.mxu1 %v6155_v21  ;;  %5615 = vmatprep.subr.bf16.mxu0 %v6156_v22  ;;  %v6203_v21 = vld [vmem:[%s6316_s29 + $0xb80] sm:$0xff]   ;;  %v6204_v22 = vld [vmem:[%s6316_s29 + $0xb48] sm:$0xff]  }
 0x154   : > { %5637 = vmatprep.subr.bf16.mxu1 %v6158_v24  ;;  %v6206_v24 = vld [vmem:[%s6316_s29 + $0xbc8] sm:$0xff]  }
 0x156   : > { %5616 = vmatpush3.bf16.msra.mxu0 %v6157_v23  ;;  %v6205_v23 = vld [vmem:[%s6316_s29 + $0xb08] sm:$0xff]  }
 0x157   : > { %5638 = vmatpush3.bf16.msra.mxu1 %v6161_v28  ;;  %5645 = vmatprep.subr.bf16.mxu0 %v6162_v29  ;;  %v6210_v28 = vld [vmem:[%s6316_s29 + $0xbd0] sm:$0xff]  }
 0x158   : > { %5667 = vmatprep.subr.bf16.mxu1 %v6166_v34  ;;  %v6211_v29 = vld [vmem:[%s6316_s29 + $0xb90] sm:$0xff]   ;;  %v6216_v34 = vld [vmem:[%s6316_s29 + $0xb60] sm:$0xff]  }
 0x159   : > { %4327 = vmatmul.mubr.bf16.vlgmr.msra.gmra.mrb[36].mxu0 %v4787_v26  ;;  %v6208_v26 = vld [vmem:[%s6316_s29 + $0xb50] sm:$0xff]  }
 0x15a   : > { %5646 = vmatpush3.bf16.msra.mxu0 %v6165_v33  ;;  %4367 = vmatmul.mubr.bf16.vlgmr.msra.gmra.mrb[36].mxu1 %v4789_v31  ;;  %v6213_v31 = vld [vmem:[%s6316_s29 + $0xb18] sm:$0xff]  }
 0x15b   : > { %5668 = vmatpush3.bf16.msra.mxu1 %v6167_v35  ;;  %5647 = vmatprep.subr.bf16.mxu0 %v6168_v36  ;;  %v6215_v33 = vld [vmem:[%s6316_s29 + $0xb98] sm:$0xff]   ;;  %v6217_v36 = vld [vmem:[%s6316_s29 + $0xb20] sm:$0xff]  }
 0x15c   : > { %5669 = vmatprep.subr.bf16.mxu1 %v6170_v38  ;;  %4406 = vmatprep.mubr.bf16.mxu0 %v4792_v13  ;;  %v6218_v38 = vld [vmem:[%s6316_s29 + $0xbe0] sm:$0xff]  }
 0x15e   : > { %5648 = vmatpush3.bf16.msra.mxu0 %v6169_v37 }
 0x15f   : > { %5670 = vmatpush3.bf16.msra.mxu1 %v6171_v39  ;;  %5649 = vmatprep.subr.bf16.mxu0 %v6172_v40 }
 0x160   : > { %5671 = vmatprep.subr.bf16.mxu1 %v6174_v42 }
 0x162   : > { %5650 = vmatpush3.bf16.msra.mxu0 %v6173_v41  ;;  %v6219_v41 = vld [vmem:[%s6316_s29 + $0xba0] sm:$0xff]  }
 0x163   : > { %5672 = vmatpush3.bf16.msra.mxu1 %v6175_v43  ;;  %5651 = vmatprep.subr.bf16.mxu0 %v6176_v44  ;;  %v6220_v44 = vld [vmem:[%s6316_s29 + $0xb68] sm:$0xff]  }
 0x164   : > { %5673 = vmatprep.subr.bf16.mxu1 %v6178_v46  ;;  %v6221_v46 = vld [vmem:[%s6316_s29 + $0xb28] sm:$0xff]  }
 0x166   : > { %5652 = vmatpush3.bf16.msra.mxu0 %v6177_v45 }
 0x167   : > { %5674 = vmatpush3.bf16.msra.mxu1 %v6179_v47  ;;  %5653 = vmatprep.subr.bf16.mxu0 %v6180_v48 }
 0x168   : > { %5675 = vmatprep.subr.bf16.mxu1 %v6182_v52 }
 0x16a   : > { %5654 = vmatpush3.bf16.msra.mxu0 %v6181_v50 }
 0x16b   : > { %5676 = vmatpush3.bf16.msra.mxu1 %v6183_v55  ;;  %5655 = vmatprep.subr.bf16.mxu0 %v6184_v58  ;;  %v6225_v55 = vld [vmem:[%s6316_s29 + $0xb30] sm:$0xff]   ;;  %v6228_v58 = vld [vmem:[%s6316_s29 + $0xb78] sm:$0xff]  }
 0x16c   : > { %v5353_v49 = vpop.f32.mrb[12].mxu0  ;;  %5677 = vmatprep.subr.bf16.mxu1 %v6186_v63 }
 0x16d   : > { %v5354_v51 = vpop.f32.mrb[13].mxu0  ;;  %v5375_v56 = vpop.f32.mrb[12].mxu1 }
 0x16e   : > { %v5355_v53 = vadd.f32 %v5354_v51, %v5353_v49  ;;  %v5356_v54 = vpop.f32.mrb[14].mxu0  ;;  %v5376_v61 = vpop.f32.mrb[13].mxu1  ;;  %5656 = vmatpush3.bf16.msra.mxu0 %v6185_v60  ;;  %v6222_v49 = vld [vmem:[%s6316_s29 + $0xbe8] sm:$0xff]   ;;  %v6230_v60 = vld [vmem:[%s6316_s29 + $0xbf8] sm:$0xff]  }
 0x16f   : > { %v5357_v59 = vpop.f32.mrb[15].mxu0  ;;  %v5377_v62 = vadd.f32 %v5376_v61, %v5375_v56  ;;  %v5378_v0 = vpop.f32.mrb[14].mxu1  ;;  %5678 = vmatpush3.bf16.msra.mxu1 %v6187_v1  ;;  %5657 = vmatprep.subr.bf16.mxu0 %v6188_v4  ;;  %v6223_v51 = vld [vmem:[%s6316_s29 + $0xba8] sm:$0xff]   ;;  %v6224_v54 = vld [vmem:[%s6316_s29 + $0xb70] sm:$0xff]   ;;  %v6262_v1 = vmov 0.0  }
 0x170   : > { %v3849_v57 = vadd.f32 %v5355_v53, %v6655_v16  ;;  %v5379_v2 = vpop.f32.mrb[15].mxu1  ;;  %5679 = vmatprep.subr.bf16.mxu1 %v6190_v6  ;;  %v262_v16 = vld [vmem:[%s6311_s25 + $0xa8] sm:$0xff]  ;;  %v6226_v56 = vld [vmem:[%s6316_s29 + $0xbf0] sm:$0xff]   ;;  %v6229_v59 = vld [vmem:[%s6316_s29 + $0xb38] sm:$0xff]  }
 0x171   : > { %v4793_v17 = vcombine.low %v262_v16, %v262_v16  ;;  %v4794_v18 = vcombine.high %v262_v16, %v262_v16  ;;  %v263_v61 = vld [vmem:[%s6311_s25 + $0xb0] sm:$0xff]  ;;  %v6233_v0 = vld [vmem:[%s6316_s29 + $0xbb8] sm:$0xff]   ;;  %v6237_v6 = vld [vmem:[%s6316_s29 + $0xc08] sm:$0xff]  }
 0x172   : > { %v6692_v3 = vadd.f32 %v5377_v62, %v3849_v57  ;;  %5658 = vmatpush3.bf16.msra.mxu0 %v6189_v5  ;;  %v6227_v57 = vld [vmem:[%s6316_s29 + $0xbb0] sm:$0xff]   ;;  %v4795_v62 = vcombine.low %v263_v61, %v263_v61  ;;  %v4796_v63 = vcombine.high %v263_v61, %v263_v61  ;;  %v264_v2 = vld [vmem:[%s6311_s25 + $0xb8] sm:$0xff]  ;;  %v6236_v5 = vld [vmem:[%s6316_s29 + $0xc00] sm:$0xff]  }
 0x173   : > { %5680 = vmatpush3.bf16.msra.mxu1 %v6191_v7  ;;  %5659 = vmatprep.subr.bf16.mxu0 %v6192_v8  ;;  %v4798_v4 = vcombine.high %v264_v2, %v264_v2  ;;  %v6238_v7 = vld [vmem:[%s6316_s29 + $0xc10] sm:$0xff]   ;;  %v6239_v8 = vld [vmem:[%s6316_s29 + $0xc18] sm:$0xff]  }
 0x174   : > { %5681 = vmatprep.subr.bf16.mxu1 %v6194_v10  ;;  %4446 = vmatprep.mubr.bf16.mxu1 %v4794_v18 }
 0x176   : > { %5660 = vmatpush3.bf16.msra.mxu0 %v6193_v9  ;;  %v6240_v9 = vld [vmem:[%s6316_s29 + $0xc20] sm:$0xff]  }
 0x177   : > { %5682 = vmatpush3.bf16.msra.mxu1 %v6197_v14  ;;  %5689 = vmatprep.subr.bf16.mxu0 %v6198_v15  ;;  %v6241_v15 = vld [vmem:[%s6316_s29 + $0xc28] sm:$0xff]  }
 0x178   : > { %5711 = vmatprep.subr.bf16.mxu1 %v6202_v20 }
 0x179   : > { %4407 = vmatmul.mubr.bf16.vlgmr.msra.gmra.mrb[40].mxu0 %v4791_v12 }
 0x17a   : > { %5690 = vmatpush3.bf16.msra.mxu0 %v6201_v19  ;;  %4447 = vmatmul.mubr.bf16.vlgmr.msra.gmra.mrb[40].mxu1 %v4793_v17 }
 0x17b   : > { %5712 = vmatpush3.bf16.msra.mxu1 %v6203_v21  ;;  %5691 = vmatprep.subr.bf16.mxu0 %v6204_v22 }
 0x17c   : > { %5713 = vmatprep.subr.bf16.mxu1 %v6206_v24  ;;  %4486 = vmatprep.mubr.bf16.mxu0 %v4796_v63  ;;  %v6243_v24 = vld [vmem:[%s6316_s29 + $0xc38] sm:$0xff]  }
 0x17d   : > { %4526 = vmatprep.mubr.bf16.mxu1 %v4798_v4 }
 0x17e   : > { %5692 = vmatpush3.bf16.msra.mxu0 %v6205_v23  ;;  %v6242_v23 = vld [vmem:[%s6316_s29 + $0xc30] sm:$0xff]  }
 0x17f   : > { %5714 = vmatpush3.bf16.msra.mxu1 %v6207_v25  ;;  %5693 = vmatprep.subr.bf16.mxu0 %v6208_v26  ;;  %v6244_v25 = vld [vmem:[%s6311_s25 + $0xc0] ss:$0 sps:$4 sm:$0xff]  }
 0x180   : > { %5715 = vmatprep.subr.bf16.mxu1 %v6210_v28 }
 0x182   : > { %5694 = vmatpush3.bf16.msra.mxu0 %v6209_v27 }
 0x183   : > { %5716 = vmatpush3.bf16.msra.mxu1 %v6211_v29  ;;  %5695 = vmatprep.subr.bf16.mxu0 %v6212_v30 }
 0x184   : > { %5717 = vmatprep.subr.bf16.mxu1 %v6214_v32 }
 0x186   : > { %5696 = vmatpush3.bf16.msra.mxu0 %v6213_v31 }
 0x187   : > { %5718 = vmatpush3.bf16.msra.mxu1 %v6215_v33  ;;  %5697 = vmatprep.subr.bf16.mxu0 %v6216_v34 }
 0x188   : > { %5719 = vmatprep.subr.bf16.mxu1 %v6218_v38 }
 0x18a   : > { %5698 = vmatpush3.bf16.msra.mxu0 %v6217_v36 }
 0x18b   : > { %5720 = vmatpush3.bf16.msra.mxu1 %v6219_v41  ;;  %5699 = vmatprep.subr.bf16.mxu0 %v6220_v44 }
 0x18c   : > { %v5397_v35 = vpop.f32.mrb[16].mxu0  ;;  %5721 = vmatprep.subr.bf16.mxu1 %v6222_v49 }
 0x18d   : > { %v5398_v37 = vpop.f32.mrb[17].mxu0  ;;  %v5419_v42 = vpop.f32.mrb[16].mxu1 }
 0x18e   : > { %v5399_v39 = vadd.f32 %v5398_v37, %v5397_v35  ;;  %v5400_v40 = vpop.f32.mrb[18].mxu0  ;;  %v5420_v47 = vpop.f32.mrb[17].mxu1  ;;  %5700 = vmatpush3.bf16.msra.mxu0 %v6221_v46 }
 0x18f   : > { %v5401_v45 = vpop.f32.mrb[19].mxu0  ;;  %v5421_v48 = vadd.f32 %v5420_v47, %v5419_v42  ;;  %v5422_v50 = vpop.f32.mrb[18].mxu1  ;;  %5722 = vmatpush3.bf16.msra.mxu1 %v6223_v51  ;;  %5701 = vmatprep.subr.bf16.mxu0 %v6224_v54 }
 0x190   : > { %v3929_v43 = vadd.f32 %v5399_v39, %v6692_v3  ;;  %v5423_v52 = vpop.f32.mrb[19].mxu1  ;;  %5723 = vmatprep.subr.bf16.mxu1 %v6226_v56  ;;  %v4797_v3 = vcombine.low %v264_v2, %v264_v2 }
 0x192   : > { %v3969_v53 = vadd.f32 %v5421_v48, %v3929_v43  ;;  %5702 = vmatpush3.bf16.msra.mxu0 %v6225_v55 }
 0x193   : > { %5724 = vmatpush3.bf16.msra.mxu1 %v6227_v57  ;;  %5703 = vmatprep.subr.bf16.mxu0 %v6228_v58 }
 0x194   : > { %5725 = vmatprep.subr.bf16.mxu1 %v6230_v60 }
 0x196   : > { %5704 = vmatpush3.bf16.msra.mxu0 %v6229_v59 }
 0x197   : > { %5751 = vmatprep.subr.bf16.mxu0 %v6262_v1  ;;  %5726 = vmatpush3.bf16.msra.mxu1 %v6233_v0 }
 0x199   : > { %4487 = vmatmul.mubr.bf16.vlgmr.msra.gmra.mrb[44].mxu0 %v4795_v62 }
 0x19a   : > { %5752 = vmatpush3.bf16.msra.mxu0 %v6236_v5  ;;  %5767 = vmatprep.mubr.msk.bf16.mxu0 %vm6263_vm0, %v6262_v1 }
 0x19b   : > { %4527 = vmatmul.mubr.bf16.vlgmr.msra.gmra.mrb[44].mxu1 %v4797_v3  ;;  %5753 = vmatprep.subr.bf16.mxu0 %v6262_v1 }
 0x19e   : > { %5754 = vmatpush3.bf16.msra.mxu0 %v6237_v6 }
 0x19f   : > { %5755 = vmatprep.subr.bf16.mxu0 %v6262_v1 }
 0x1a2   : > { %5756 = vmatpush3.bf16.msra.mxu0 %v6238_v7 }
 0x1a3   : > { %5757 = vmatprep.subr.bf16.mxu0 %v6262_v1 }
 0x1a6   : > { %5758 = vmatpush3.bf16.msra.mxu0 %v6239_v8 }
 0x1a7   : > { %5759 = vmatprep.subr.bf16.mxu0 %v6262_v1 }
 0x1aa   : > { %5760 = vmatpush3.bf16.msra.mxu0 %v6240_v9 }
 0x1ab   : > { %5761 = vmatprep.subr.bf16.mxu0 %v6262_v1 }
 0x1ac   : > { %v5441_v10 = vpop.f32.mrb[20].mxu0 }
 0x1ad   : > { %v5442_v11 = vpop.f32.mrb[21].mxu0  ;;  %v5463_v14 = vpop.f32.mrb[20].mxu1 }
 0x1ae   : > { %v5443_v12 = vadd.f32 %v5442_v11, %v5441_v10  ;;  %v5444_v13 = vpop.f32.mrb[22].mxu0  ;;  %v5464_v17 = vpop.f32.mrb[21].mxu1  ;;  %5762 = vmatpush3.bf16.msra.mxu0 %v6241_v15 }
 0x1af   : > { %v5445_v16 = vpop.f32.mrb[23].mxu0  ;;  %v5465_v19 = vadd.f32 %v5464_v17, %v5463_v14  ;;  %v5466_v20 = vpop.f32.mrb[22].mxu1  ;;  %5763 = vmatprep.subr.bf16.mxu0 %v6262_v1 }
 0x1b0   : > { %v4009_v18 = vadd.f32 %v5443_v12, %v3969_v53  ;;  %v5467_v21 = vpop.f32.mrb[23].mxu1 }
 0x1b2   : > { %v4049_v22 = vadd.f32 %v5465_v19, %v4009_v18  ;;  %5764 = vmatpush3.bf16.msra.mxu0 %v6242_v23 }
 0x1b3   : > { %5765 = vmatprep.subr.bf16.mxu0 %v6262_v1 }
 0x1b6   : > { %5766 = vmatpush3.bf16.msra.mxu0 %v6243_v24 }
 0x1b9   : > { %5768 = vmatmul.mubr.bf16.vlgmr.msra.gmra.mrb[48].mxu0 %v6244_v25 }
 0x1cc   : > { %v5485_v26 = vpop.f32.mrb[24].mxu0 }
 0x1cd   : > { %v5486_v27 = vpop.f32.mrb[25].mxu0  ;;  %v5507_v30 = vpop.f32.mrb[24].mxu1 }
 0x1ce   : > { %v5487_v28 = vadd.f32 %v5486_v27, %v5485_v26  ;;  %v5488_v29 = vpop.f32.mrb[26].mxu0  ;;  %v5508_v32 = vpop.f32.mrb[25].mxu1 }
 0x1cf   : > { %v5489_v31 = vpop.f32.mrb[27].mxu0  ;;  %v5509_v34 = vadd.f32 %v5508_v32, %v5507_v30  ;;  %v5510_v35 = vpop.f32.mrb[26].mxu1 }
 0x1d0   : > { %v4089_v33 = vadd.f32 %v5487_v28, %v4049_v22  ;;  %v5511_v36 = vpop.f32.mrb[27].mxu1 }
 0x1d2   : > { %v4129_v37 = vadd.f32 %v5509_v34, %v4089_v33  ;;  %v240_v34 = vld [vmem:[#allocation2] sm:$0xff] }
 0x1ec   : > { %v5529_v38 = vpop.f32.mrb[28].mxu0 }
 0x1ed   : > { %v5530_v39 = vpop.f32.mrb[29].mxu0  ;;  %v5551_v42 = vpop.f32.mrb[28].mxu1 }
 0x1ee   : > { %v5531_v40 = vadd.f32 %v5530_v39, %v5529_v38  ;;  %v5532_v41 = vpop.f32.mrb[30].mxu0  ;;  %v5552_v44 = vpop.f32.mrb[29].mxu1 }
 0x1ef   : > { %v5533_v43 = vpop.f32.mrb[31].mxu0  ;;  %v5553_v46 = vadd.f32 %v5552_v44, %v5551_v42  ;;  %v5554_v47 = vpop.f32.mrb[30].mxu1  ;;  %v6245_v41 = vld [vmem:[%s6788_s3] sm:$0xff] (!%p5192_p6)   ;;  %v6264_v42 = vmov (!%p5192_p6), 0.0   ;;  %v6247_v44 = vld [vmem:[%s6788_s3 + $0x10] sm:$0xff] (!%p5192_p6)  }
 0x1f0   : > { %v4169_v45 = vadd.f32 %v5531_v40, %v4129_v37  ;;  %v5555_v48 = vpop.f32.mrb[31].mxu1  ;;  %5771 = vmatprep.subr.bf16.mxu0 (!%p5192_p6), %v6264_v42  ;;  %v6246_v43 = vld [vmem:[%s6788_s3 + $0x8] sm:$0xff] (!%p5192_p6)   ;;  %5787 = vmatprep.mubr.msk.bf16.mxu0 (!%p5192_p6), %vm6265_vm1, %v6264_v42 }
 0x1f1   : > { %5772 = vmatpush3.bf16.msra.mxu0 (!%p5192_p6), %v6245_v41  ;;  %v6250_v47 = vld [vmem:[%s6788_s3 + $0x28] sm:$0xff] (!%p5192_p6)  }
 0x1f2   : > { %v4209_v49 = vadd.f32 %v5553_v46, %v4169_v45  ;;  %5773 = vmatprep.subr.bf16.mxu0 (!%p5192_p6), %v6264_v42  ;;  %v6248_v45 = vld [vmem:[%s6788_s3 + $0x18] sm:$0xff] (!%p5192_p6)   ;;  %v6249_v46 = vld [vmem:[%s6788_s3 + $0x20] sm:$0xff] (!%p5192_p6)  }
 0x1f5   : > { %5774 = vmatpush3.bf16.msra.mxu0 (!%p5192_p6), %v6246_v43 }
 0x1f6   : > { %5775 = vmatprep.subr.bf16.mxu0 (!%p5192_p6), %v6264_v42 }
 0x1f9   : > { %5776 = vmatpush3.bf16.msra.mxu0 (!%p5192_p6), %v6247_v44 }
 0x1fa   : > { %5777 = vmatprep.subr.bf16.mxu0 (!%p5192_p6), %v6264_v42 }
 0x1fd   : > { %5778 = vmatpush3.bf16.msra.mxu0 (!%p5192_p6), %v6248_v45 }
 0x1fe   : > { %5779 = vmatprep.subr.bf16.mxu0 (!%p5192_p6), %v6264_v42 }
 0x201   : > { %5780 = vmatpush3.bf16.msra.mxu0 (!%p5192_p6), %v6249_v46 }
 0x202   : > { %5781 = vmatprep.subr.bf16.mxu0 (!%p5192_p6), %v6264_v42 }
 0x205   : > { %5782 = vmatpush3.bf16.msra.mxu0 (!%p5192_p6), %v6250_v47 }
 0x206   : > { %5783 = vmatprep.subr.bf16.mxu0 (!%p5192_p6), %v6264_v42 }
 0x20c   : > { %v5573_v50 = vpop.f32.mrb[32].mxu0 }
 0x20d   : > { %v5574_v51 = vpop.f32.mrb[33].mxu0  ;;  %v5595_v54 = vpop.f32.mrb[32].mxu1 }
 0x20e   : > { %v5575_v52 = vadd.f32 %v5574_v51, %v5573_v50  ;;  %v5576_v53 = vpop.f32.mrb[34].mxu0  ;;  %v5596_v56 = vpop.f32.mrb[33].mxu1  ;;  %v6251_v51 = vld [vmem:[%s6788_s3 + $0x30] sm:$0xff] (!%p5192_p6)  }
 0x20f   : > { %v5577_v55 = vpop.f32.mrb[35].mxu0  ;;  %v5597_v58 = vadd.f32 %v5596_v56, %v5595_v54  ;;  %v5598_v59 = vpop.f32.mrb[34].mxu1  ;;  %5784 = vmatpush3.bf16.msra.mxu0 (!%p5192_p6), %v6251_v51  ;;  %v6252_v53 = vld [vmem:[%s6788_s3 + $0x38] sm:$0xff] (!%p5192_p6)  }
 0x210   : > { %v4249_v57 = vadd.f32 %v5575_v52, %v4209_v49  ;;  %v5599_v60 = vpop.f32.mrb[35].mxu1  ;;  %v5193_v49 = vld [vmem:[%s6787_s2] ss:$0 sm:$0xff] (!%p5192_p6)  ;;  %5785 = vmatprep.subr.bf16.mxu0 (!%p5192_p6), %v6264_v42 }
 0x211   : > { %v5194_v55 = vld [vmem:[%s6789_s4] ss:$0 sm:$0xff] (!%p5192_p6) }
 0x212   : > { %v4289_v61 = vadd.f32 %v5597_v58, %v4249_v57 }
 0x213   : > { %5786 = vmatpush3.bf16.msra.mxu0 (!%p5192_p6), %v6252_v53 }
 0x22c   : > { %v5617_v62 = vpop.f32.mrb[36].mxu0 }
 0x22d   : > { %v5618_v63 = vpop.f32.mrb[37].mxu0  ;;  %v5639_v2 = vpop.f32.mrb[36].mxu1 }
 0x22e   : > { %v5619_v0 = vadd.f32 %v5618_v63, %v5617_v62  ;;  %v5620_v1 = vpop.f32.mrb[38].mxu0  ;;  %v5640_v5 = vpop.f32.mrb[37].mxu1 }
 0x22f   : > { %v5621_v3 = vpop.f32.mrb[39].mxu0  ;;  %v5641_v6 = vadd.f32 %v5640_v5, %v5639_v2  ;;  %v5642_v7 = vpop.f32.mrb[38].mxu1 }
 0x230   : > { %v4329_v4 = vadd.f32 %v5619_v0, %v4289_v61  ;;  %v5643_v8 = vpop.f32.mrb[39].mxu1 }
 0x232   : > { %v4369_v9 = vadd.f32 %v5641_v6, %v4329_v4 }
 0x24c   : > { %v5661_v10 = vpop.f32.mrb[40].mxu0 }
 0x24d   : > { %v5662_v11 = vpop.f32.mrb[41].mxu0  ;;  %v5683_v14 = vpop.f32.mrb[40].mxu1 }
 0x24e   : > { %v5663_v12 = vadd.f32 %v5662_v11, %v5661_v10  ;;  %v5664_v13 = vpop.f32.mrb[42].mxu0  ;;  %v5684_v16 = vpop.f32.mrb[41].mxu1 }
 0x24f   : > { %v5665_v15 = vpop.f32.mrb[43].mxu0  ;;  %v5685_v18 = vadd.f32 %v5684_v16, %v5683_v14  ;;  %v5686_v19 = vpop.f32.mrb[42].mxu1 }
 0x250   : > { %v4409_v17 = vadd.f32 %v5663_v12, %v4369_v9  ;;  %v5687_v20 = vpop.f32.mrb[43].mxu1 }
 0x252   : > { %v4449_v21 = vadd.f32 %v5685_v18, %v4409_v17 }
 0x26c   : > { %v5705_v22 = vpop.f32.mrb[44].mxu0 }
 0x26d   : > { %v5706_v23 = vpop.f32.mrb[45].mxu0 }
 0x26e   : > { %v5707_v24 = vadd.f32 %v5706_v23, %v5705_v22  ;;  %v5708_v25 = vpop.f32.mrb[46].mxu0  ;;  %v5727_v26 = vpop.f32.mrb[44].mxu1 }
 0x26f   : > { %v5709_v27 = vpop.f32.mrb[47].mxu0  ;;  %v5728_v28 = vpop.f32.mrb[45].mxu1 }
 0x270   : > { %v4489_v29 = vadd.f32 %v5707_v24, %v4449_v21  ;;  %v5729_v30 = vadd.f32 %v5728_v28, %v5727_v26  ;;  %v5730_v31 = vpop.f32.mrb[46].mxu1 }
 0x271   : > { %v5731_v32 = vpop.f32.mrb[47].mxu1 }
 0x272   : > { %v4529_v33 = vadd.f32 %v5729_v30, %v4489_v29 }
 0x28b   : > { %4579 = sbr.rel (%p5192_p6) target bundleno = 886 (0x376), region = 48 }
 0x28c   : > { %v4568_v35 = vpop.f32.mrb[48].mxu0 }
 0x28d   : > { %v4569_v36 = vadd.f32 %v4568_v35, %v4529_v33  ;;  %v5769_v37 = vpop.f32.mrb[49].mxu0 }
 0x28e   : > { %v4571_v38 = vpop.f32.mrb[50].mxu0 }
 0x28f   : > { %v4574_v39 = vadd.f32 %v4569_v36, %v240_v34  ;;  %v5770_v40 = vpop.f32.mrb[51].mxu0 }
 0x291   : > { %4575 = vst [vmem:[#allocation2] sm:$0xff] %v4574_v39 }
 0x298   : > { %v4580_v48 = vld [vmem:[#allocation2] sm:$0xff] }
 0x299   : > { %v4588_v50 = vadd.f32 %v5193_v49, %v4580_v48 }
 0x29b   : > { %v4589_v52 = vmax.f32 %v4588_v50, 0.0 }
 0x29d   : > { %v4590_v54 = vpack.c.bf16 %v4589_v52, %v4589_v52 }
 0x29f   : > { %5788 = vmatmul.mubr.bf16.vlgmr.msra.gmra.mrb[0].mxu0 %v4590_v54 }
 0x372   : > { %v4696_v56 = vpop.f32.mrb[0].mxu0 }
 0x373   : > { %v4697_v57 = vadd.f32 %v5194_v55, %v4696_v56  ;;  %v5789_v58 = vpop.f32.mrb[1].mxu0 }
 0x374   : > { %v4699_v59 = vpop.f32.mrb[2].mxu0 }
 0x375   : > { %4703 = vst.msk [vmem:[%s6790_s5] sm:$0xff] %vm4702_vm2, %v4697_v57  ;;  %v5790_v60 = vpop.f32.mrb[3].mxu0 }
 0x376 PF: > { %s15_s18 = sadd.s32 1, %s6259_s18  }
 0x377   : > { %p12_p7 = scmp.ge.s32.totalorder %s15_s18, 4  }
 0x379   :  { %14 = sbr.rel (!%p12_p7) target bundleno = 1 (0x1), region = 77 }

</bundles_post_ra>
